<compile_context>
chip_gen: v5e
topology: v5e:2x2
jax: 0.10.0
libtpu: 0.0.40
codegen_flags: <defaults>
</compile_context>

<pallas_src>
import functools

import jax
import jax.numpy as jnp
from jax.experimental import pallas as pl
from jax.experimental.pallas import tpu as pltpu

INPUT_DIM = 35
NUM_HIDDEN_LAYERS_RED = 5
RED_FIRST_UNITS = 512
RED_HIDDEN_UNITS = 512
RED_OUTPUT_DIM = 35

# Lane-padded widths so every matmul / store is lane-dense (no masked vst).
_IN_PAD = 128    # first-layer K: 35 -> 128
_OUT_PAD = 128   # last-layer  N: 35 -> 128

# Logical (unpadded) layer dims: Linear(35,512), Linear(512,512),
# 4 x Linear(512,512), Linear(512,35).
_LAYER_DIMS = (
    [(INPUT_DIM, RED_FIRST_UNITS), (RED_FIRST_UNITS, RED_HIDDEN_UNITS)]
    + [(RED_HIDDEN_UNITS, RED_HIDDEN_UNITS)] * (NUM_HIDDEN_LAYERS_RED - 1)
    + [(RED_HIDDEN_UNITS, RED_OUTPUT_DIM)]
)
_NUM_LAYERS = len(_LAYER_DIMS)  # 7

# Padded dims as seen by the kernel.
_PADDED_LAYER_DIMS = (
    [(_IN_PAD, RED_FIRST_UNITS), (RED_FIRST_UNITS, RED_HIDDEN_UNITS)]
    + [(RED_HIDDEN_UNITS, RED_HIDDEN_UNITS)] * (NUM_HIDDEN_LAYERS_RED - 1)
    + [(RED_HIDDEN_UNITS, _OUT_PAD)]
)


def _round_up(n, m):
    return ((n + m - 1) // m) * m


# ---------------------------------------------------------------------------
# Kernel
# ---------------------------------------------------------------------------
def _red_mlp_kernel(x_ref, *refs):
    # refs = (w0, b0, w1, b1, ..., w6, b6, out_ref)
    out_ref = refs[-1]
    param_refs = refs[:-1]

    h = x_ref[...]                                    # (tile, 128) bf16, zero-padded
    for layer in range(_NUM_LAYERS):
        w_ref = param_refs[2 * layer]                 # bf16 (din, dout)
        b_ref = param_refs[2 * layer + 1]             # f32  (1, dout)
        z = jnp.dot(h, w_ref[...],
                    preferred_element_type=jnp.float32) + b_ref[...]
        if layer < _NUM_LAYERS - 1:
            # ReLU on the VPU; keep inter-layer activations in bf16.
            h = jnp.maximum(z, 0.0).astype(jnp.bfloat16)
        else:
            # Stable sigmoid: clamp avoids exp overflow; exp + approx
            # reciprocal run on the EUP (VALU slot stays free).
            zc = jnp.clip(z, -30.0, 30.0)
            h = pl.reciprocal(1.0 + jnp.exp(-zc), approx=True)
    out_ref[...] = h.astype(out_ref.dtype)


# ---------------------------------------------------------------------------
# One-time capability probe: single-buffered (pipeline_mode=pl.Buffered(1))
# grid-invariant weight blocks.  AOT lower+compile of a tiny kernel; no broad
# try/except around the real call, so genuine errors are never masked.
# ---------------------------------------------------------------------------
def _probe_single_buffer_support():
    if not hasattr(pl, "Buffered"):
        return False
    try:
        def _copy(a_ref, o_ref):
            o_ref[...] = a_ref[...]

        f = pl.pallas_call(
            _copy,
            out_shape=jax.ShapeDtypeStruct((8, 128), jnp.float32),
            grid_spec=pltpu.PrefetchScalarGridSpec(
                num_scalar_prefetch=0,
                grid=(1,),
                in_specs=[pl.BlockSpec((8, 128), lambda i: (0, 0),
                                       pipeline_mode=pl.Buffered(1))],
                out_specs=pl.BlockSpec((8, 128), lambda i: (0, 0)),
            ),
        )
        jax.jit(f).lower(jax.ShapeDtypeStruct((8, 128), jnp.float32)).compile()
        return True
    except Exception:
        return False


_SINGLE_BUFFER_WEIGHTS = _probe_single_buffer_support()


# ---------------------------------------------------------------------------
# pallas_call builder (cached per (n_tiles, batch_tile))
# ---------------------------------------------------------------------------
@functools.lru_cache(maxsize=None)
def _build_call(n_tiles, batch_tile):
    in_specs = [pl.BlockSpec((batch_tile, _IN_PAD), lambda i: (i, 0))]
    weight_kwargs = {}
    if _SINGLE_BUFFER_WEIGHTS:
        # Grid-invariant blocks: fetched once, no point double-buffering them.
        weight_kwargs = dict(pipeline_mode=pl.Buffered(1))
    for (din, dout) in _PADDED_LAYER_DIMS:
        in_specs.append(pl.BlockSpec((din, dout), lambda i: (0, 0), **weight_kwargs))
        in_specs.append(pl.BlockSpec((1, dout), lambda i: (0, 0), **weight_kwargs))

    return pl.pallas_call(
        _red_mlp_kernel,
        out_shape=jax.ShapeDtypeStruct((n_tiles * batch_tile, _OUT_PAD),
                                       jnp.float32),
        grid_spec=pltpu.PrefetchScalarGridSpec(
            num_scalar_prefetch=0,
            grid=(n_tiles,),
            in_specs=in_specs,
            out_specs=pl.BlockSpec((batch_tile, _OUT_PAD), lambda i: (i, 0)),
        ),
        compiler_params=pltpu.CompilerParams(
            dimension_semantics=("parallel",),   # batch tiles shard across TCs
            vmem_limit_bytes=32 << 20,           # ~5-8 MiB footprint; v7x-safe
        ),
    )


# ---------------------------------------------------------------------------
# Parameters
# ---------------------------------------------------------------------------
def init_params(key):
    """PyTorch-nn.Linear-style init; weights stored transposed as (in, out), f32."""
    params = []
    for (din, dout) in _LAYER_DIMS:
        kw, kb, key = jax.random.split(key, 3)
        bound = 1.0 / (din ** 0.5)   # U(-1/sqrt(fan_in), 1/sqrt(fan_in))
        w = jax.random.uniform(kw, (din, dout), jnp.float32, -bound, bound)
        b = jax.random.uniform(kb, (1, dout), jnp.float32, -bound, bound)
        params += [w, b]
    return params


def prepare_params(params):
    """One-time packing for the kernel: bf16 weights, f32 biases, lane padding
    of first-layer K (35->128) and last-layer N (35->128).
    Call once at init / after each parameter update, NOT per forward."""
    packed = []
    for layer, (din, dout) in enumerate(_LAYER_DIMS):
        w = jnp.asarray(params[2 * layer], jnp.float32)
        b = jnp.asarray(params[2 * layer + 1], jnp.float32).reshape(1, dout)
        pdin, pdout = _PADDED_LAYER_DIMS[layer]
        if (pdin, pdout) != (din, dout):
            w = jnp.zeros((pdin, pdout), jnp.float32).at[:din, :dout].set(w)
            b = jnp.zeros((1, pdout), jnp.float32).at[:, :dout].set(b)
        packed += [w.astype(jnp.bfloat16), b]
    return packed


# ---------------------------------------------------------------------------
# Forward wrapper
# ---------------------------------------------------------------------------
def _select_batch_tile(batch):
    """Pick a tile in {128,256,512}: minimize padded rows, prefer >=2 grid
    tiles (keeps both v7x TensorCores busy), then prefer the larger tile
    (fewer ~0.35us grid-step overheads)."""
    batch = max(int(batch), 1)
    best_tile, best_score = None, None
    for t in (128, 256, 512):
        pad = _round_up(batch, t)
        n_tiles = pad // t
        score = (pad, 0 if n_tiles >= 2 else 1, -t)
        if best_score is None or score < best_score:
            best_score, best_tile = score, t
    return best_tile


def red_model_forward(x, padded_params, *, batch_tile=None):
    """x: (B, 35) float; padded_params: output of prepare_params()."""
    B, D = x.shape
    assert D == INPUT_DIM
    if batch_tile is None:
        batch_tile = _select_batch_tile(B)

    B_pad = _round_up(max(B, 1), batch_tile)
    n_tiles = B_pad // batch_tile
    # bf16 input tile, zero-padded in batch rows and lanes (35 -> 128).
    x_pad = jnp.zeros((B_pad, _IN_PAD), jnp.bfloat16).at[:B, :INPUT_DIM].set(
        x.astype(jnp.bfloat16))

    out = _build_call(n_tiles, batch_tile)(x_pad, *padded_params)
    return out[:B, :RED_OUTPUT_DIM]


# ---------------------------------------------------------------------------
# Pure-JAX reference mirroring the kernel numerics (bf16 weights/activations,
# f32 accumulation) — takes the UNpadded init_params output.
# ---------------------------------------------------------------------------
def red_model_reference(x, params):
    h = x.astype(jnp.bfloat16)
    for layer in range(_NUM_LAYERS):
        w = jnp.asarray(params[2 * layer], jnp.float32).astype(jnp.bfloat16)
        b = jnp.asarray(params[2 * layer + 1], jnp.float32)
        z = jnp.dot(h, w, preferred_element_type=jnp.float32) + b
        if layer < _NUM_LAYERS - 1:
            h = jnp.maximum(z, 0.0).astype(jnp.bfloat16)
        else:
            h = jax.nn.sigmoid(z)
    return h


if __name__ == "__main__":
    key = jax.random.PRNGKey(0)
    kx, kp = jax.random.split(key)

    B = 300  # not a tile multiple -> exercises batch padding + multi-tile grid
    x = jax.random.normal(kx, (B, INPUT_DIM), jnp.float32)

    params = init_params(kp)
    padded_params = prepare_params(params)   # one-time packing (hoisted)

    forward = jax.jit(red_model_forward)
    out = jax.block_until_ready(forward(x, padded_params))
    ref = red_model_reference(x, params)

    assert out.shape == (B, RED_OUTPUT_DIM)
    # bf16 weights/activations + clamped approx-reciprocal sigmoid:
    # deviation vs exact path is ~1e-3; tolerance kept at 1e-2.
    assert jnp.allclose(out, ref, atol=1e-2, rtol=1e-2), "mismatch vs reference"

    print("KERNEL_OK")
</pallas_src>

<mosaic_0001>
module attributes {stable_mosaic.version = 11 : i64} {
  func.func @_red_mlp_kernel(%arg0: i32, %arg1: memref<128x128xbf16, #tpu.memory_space<vmem>>, %arg2: memref<128x512xbf16, #tpu.memory_space<vmem>>, %arg3: memref<1x512xf32, #tpu.memory_space<vmem>>, %arg4: memref<512x512xbf16, #tpu.memory_space<vmem>>, %arg5: memref<1x512xf32, #tpu.memory_space<vmem>>, %arg6: memref<512x512xbf16, #tpu.memory_space<vmem>>, %arg7: memref<1x512xf32, #tpu.memory_space<vmem>>, %arg8: memref<512x512xbf16, #tpu.memory_space<vmem>>, %arg9: memref<1x512xf32, #tpu.memory_space<vmem>>, %arg10: memref<512x512xbf16, #tpu.memory_space<vmem>>, %arg11: memref<1x512xf32, #tpu.memory_space<vmem>>, %arg12: memref<512x512xbf16, #tpu.memory_space<vmem>>, %arg13: memref<1x512xf32, #tpu.memory_space<vmem>>, %arg14: memref<512x128xbf16, #tpu.memory_space<vmem>>, %arg15: memref<1x128xf32, #tpu.memory_space<vmem>>, %arg16: memref<128x128xf32, #tpu.memory_space<vmem>>) attributes {dimension_semantics = [#tpu.dimension_semantics<parallel>], iteration_bounds = array<i64: 3>, scalar_prefetch = 0 : i64, scratch_operands = 0 : i64, tpu.core_type = #tpu.core_type<tc>, window_params = [{transform_indices = @transform_0, window_bounds = array<i64: 128, 128>}, {pipeline_mode = #tpu.pipeline_mode<synchronous>, transform_indices = @transform_1, window_bounds = array<i64: 128, 512>}, {pipeline_mode = #tpu.pipeline_mode<synchronous>, transform_indices = @transform_2, window_bounds = array<i64: 1, 512>}, {pipeline_mode = #tpu.pipeline_mode<synchronous>, transform_indices = @transform_3, window_bounds = array<i64: 512, 512>}, {pipeline_mode = #tpu.pipeline_mode<synchronous>, transform_indices = @transform_4, window_bounds = array<i64: 1, 512>}, {pipeline_mode = #tpu.pipeline_mode<synchronous>, transform_indices = @transform_5, window_bounds = array<i64: 512, 512>}, {pipeline_mode = #tpu.pipeline_mode<synchronous>, transform_indices = @transform_6, window_bounds = array<i64: 1, 512>}, {pipeline_mode = #tpu.pipeline_mode<synchronous>, transform_indices = @transform_7, window_bounds = array<i64: 512, 512>}, {pipeline_mode = #tpu.pipeline_mode<synchronous>, transform_indices = @transform_8, window_bounds = array<i64: 1, 512>}, {pipeline_mode = #tpu.pipeline_mode<synchronous>, transform_indices = @transform_9, window_bounds = array<i64: 512, 512>}, {pipeline_mode = #tpu.pipeline_mode<synchronous>, transform_indices = @transform_10, window_bounds = array<i64: 1, 512>}, {pipeline_mode = #tpu.pipeline_mode<synchronous>, transform_indices = @transform_11, window_bounds = array<i64: 512, 512>}, {pipeline_mode = #tpu.pipeline_mode<synchronous>, transform_indices = @transform_12, window_bounds = array<i64: 1, 512>}, {pipeline_mode = #tpu.pipeline_mode<synchronous>, transform_indices = @transform_13, window_bounds = array<i64: 512, 128>}, {pipeline_mode = #tpu.pipeline_mode<synchronous>, transform_indices = @transform_14, window_bounds = array<i64: 1, 128>}, {transform_indices = @transform_15, window_bounds = array<i64: 128, 128>}]} {
    %c0 = arith.constant 0 : index
    %c0_0 = arith.constant 0 : index
    %0 = vector.load %arg1[%c0, %c0_0] : memref<128x128xbf16, #tpu.memory_space<vmem>>, vector<128x128xbf16>
    %c0_1 = arith.constant 0 : index
    %c0_2 = arith.constant 0 : index
    %1 = vector.load %arg2[%c0_1, %c0_2] : memref<128x512xbf16, #tpu.memory_space<vmem>>, vector<128x512xbf16>
    %cst = arith.constant dense<0.000000e+00> : vector<128x512xf32>
    %2 = tpu.matmul %0, %1, %cst {dimension_numbers = #tpu.dot_dimension_numbers<[1], [0], [0], [1], [0, 0, 1, 1], [], []>} : vector<128x128xbf16>, vector<128x512xbf16>, vector<128x512xf32> -> vector<128x512xf32>
    %c0_3 = arith.constant 0 : index
    %c0_4 = arith.constant 0 : index
    %3 = vector.load %arg3[%c0_3, %c0_4] : memref<1x512xf32, #tpu.memory_space<vmem>>, vector<1x512xf32>
    %4 = vector.broadcast %3 : vector<1x512xf32> to vector<128x512xf32>
    %5 = arith.addf %2, %4 : vector<128x512xf32>
    %cst_5 = arith.constant 0.000000e+00 : f32
    %6 = vector.broadcast %cst_5 : f32 to vector<128x512xf32>
    %7 = arith.maximumf %5, %6 : vector<128x512xf32>
    %8 = arith.truncf %7 : vector<128x512xf32> to vector<128x512xbf16>
    %c0_6 = arith.constant 0 : index
    %c0_7 = arith.constant 0 : index
    %9 = vector.load %arg4[%c0_6, %c0_7] : memref<512x512xbf16, #tpu.memory_space<vmem>>, vector<512x512xbf16>
    %cst_8 = arith.constant dense<0.000000e+00> : vector<128x512xf32>
    %10 = tpu.matmul %8, %9, %cst_8 {dimension_numbers = #tpu.dot_dimension_numbers<[1], [0], [0], [1], [0, 0, 1, 1], [], []>} : vector<128x512xbf16>, vector<512x512xbf16>, vector<128x512xf32> -> vector<128x512xf32>
    %c0_9 = arith.constant 0 : index
    %c0_10 = arith.constant 0 : index
    %11 = vector.load %arg5[%c0_9, %c0_10] : memref<1x512xf32, #tpu.memory_space<vmem>>, vector<1x512xf32>
    %12 = vector.broadcast %11 : vector<1x512xf32> to vector<128x512xf32>
    %13 = arith.addf %10, %12 : vector<128x512xf32>
    %cst_11 = arith.constant 0.000000e+00 : f32
    %14 = vector.broadcast %cst_11 : f32 to vector<128x512xf32>
    %15 = arith.maximumf %13, %14 : vector<128x512xf32>
    %16 = arith.truncf %15 : vector<128x512xf32> to vector<128x512xbf16>
    %c0_12 = arith.constant 0 : index
    %c0_13 = arith.constant 0 : index
    %17 = vector.load %arg6[%c0_12, %c0_13] : memref<512x512xbf16, #tpu.memory_space<vmem>>, vector<512x512xbf16>
    %cst_14 = arith.constant dense<0.000000e+00> : vector<128x512xf32>
    %18 = tpu.matmul %16, %17, %cst_14 {dimension_numbers = #tpu.dot_dimension_numbers<[1], [0], [0], [1], [0, 0, 1, 1], [], []>} : vector<128x512xbf16>, vector<512x512xbf16>, vector<128x512xf32> -> vector<128x512xf32>
    %c0_15 = arith.constant 0 : index
    %c0_16 = arith.constant 0 : index
    %19 = vector.load %arg7[%c0_15, %c0_16] : memref<1x512xf32, #tpu.memory_space<vmem>>, vector<1x512xf32>
    %20 = vector.broadcast %19 : vector<1x512xf32> to vector<128x512xf32>
    %21 = arith.addf %18, %20 : vector<128x512xf32>
    %cst_17 = arith.constant 0.000000e+00 : f32
    %22 = vector.broadcast %cst_17 : f32 to vector<128x512xf32>
    %23 = arith.maximumf %21, %22 : vector<128x512xf32>
    %24 = arith.truncf %23 : vector<128x512xf32> to vector<128x512xbf16>
    %c0_18 = arith.constant 0 : index
    %c0_19 = arith.constant 0 : index
    %25 = vector.load %arg8[%c0_18, %c0_19] : memref<512x512xbf16, #tpu.memory_space<vmem>>, vector<512x512xbf16>
    %cst_20 = arith.constant dense<0.000000e+00> : vector<128x512xf32>
    %26 = tpu.matmul %24, %25, %cst_20 {dimension_numbers = #tpu.dot_dimension_numbers<[1], [0], [0], [1], [0, 0, 1, 1], [], []>} : vector<128x512xbf16>, vector<512x512xbf16>, vector<128x512xf32> -> vector<128x512xf32>
    %c0_21 = arith.constant 0 : index
    %c0_22 = arith.constant 0 : index
    %27 = vector.load %arg9[%c0_21, %c0_22] : memref<1x512xf32, #tpu.memory_space<vmem>>, vector<1x512xf32>
    %28 = vector.broadcast %27 : vector<1x512xf32> to vector<128x512xf32>
    %29 = arith.addf %26, %28 : vector<128x512xf32>
    %cst_23 = arith.constant 0.000000e+00 : f32
    %30 = vector.broadcast %cst_23 : f32 to vector<128x512xf32>
    %31 = arith.maximumf %29, %30 : vector<128x512xf32>
    %32 = arith.truncf %31 : vector<128x512xf32> to vector<128x512xbf16>
    %c0_24 = arith.constant 0 : index
    %c0_25 = arith.constant 0 : index
    %33 = vector.load %arg10[%c0_24, %c0_25] : memref<512x512xbf16, #tpu.memory_space<vmem>>, vector<512x512xbf16>
    %cst_26 = arith.constant dense<0.000000e+00> : vector<128x512xf32>
    %34 = tpu.matmul %32, %33, %cst_26 {dimension_numbers = #tpu.dot_dimension_numbers<[1], [0], [0], [1], [0, 0, 1, 1], [], []>} : vector<128x512xbf16>, vector<512x512xbf16>, vector<128x512xf32> -> vector<128x512xf32>
    %c0_27 = arith.constant 0 : index
    %c0_28 = arith.constant 0 : index
    %35 = vector.load %arg11[%c0_27, %c0_28] : memref<1x512xf32, #tpu.memory_space<vmem>>, vector<1x512xf32>
    %36 = vector.broadcast %35 : vector<1x512xf32> to vector<128x512xf32>
    %37 = arith.addf %34, %36 : vector<128x512xf32>
    %cst_29 = arith.constant 0.000000e+00 : f32
    %38 = vector.broadcast %cst_29 : f32 to vector<128x512xf32>
    %39 = arith.maximumf %37, %38 : vector<128x512xf32>
    %40 = arith.truncf %39 : vector<128x512xf32> to vector<128x512xbf16>
    %c0_30 = arith.constant 0 : index
    %c0_31 = arith.constant 0 : index
    %41 = vector.load %arg12[%c0_30, %c0_31] : memref<512x512xbf16, #tpu.memory_space<vmem>>, vector<512x512xbf16>
    %cst_32 = arith.constant dense<0.000000e+00> : vector<128x512xf32>
    %42 = tpu.matmul %40, %41, %cst_32 {dimension_numbers = #tpu.dot_dimension_numbers<[1], [0], [0], [1], [0, 0, 1, 1], [], []>} : vector<128x512xbf16>, vector<512x512xbf16>, vector<128x512xf32> -> vector<128x512xf32>
    %c0_33 = arith.constant 0 : index
    %c0_34 = arith.constant 0 : index
    %43 = vector.load %arg13[%c0_33, %c0_34] : memref<1x512xf32, #tpu.memory_space<vmem>>, vector<1x512xf32>
    %44 = vector.broadcast %43 : vector<1x512xf32> to vector<128x512xf32>
    %45 = arith.addf %42, %44 : vector<128x512xf32>
    %cst_35 = arith.constant 0.000000e+00 : f32
    %46 = vector.broadcast %cst_35 : f32 to vector<128x512xf32>
    %47 = arith.maximumf %45, %46 : vector<128x512xf32>
    %48 = arith.truncf %47 : vector<128x512xf32> to vector<128x512xbf16>
    %c0_36 = arith.constant 0 : index
    %c0_37 = arith.constant 0 : index
    %49 = vector.load %arg14[%c0_36, %c0_37] : memref<512x128xbf16, #tpu.memory_space<vmem>>, vector<512x128xbf16>
    %cst_38 = arith.constant dense<0.000000e+00> : vector<128x128xf32>
    %50 = tpu.matmul %48, %49, %cst_38 {dimension_numbers = #tpu.dot_dimension_numbers<[1], [0], [0], [1], [0, 0, 1, 1], [], []>} : vector<128x512xbf16>, vector<512x128xbf16>, vector<128x128xf32> -> vector<128x128xf32>
    %c0_39 = arith.constant 0 : index
    %c0_40 = arith.constant 0 : index
    %51 = vector.load %arg15[%c0_39, %c0_40] : memref<1x128xf32, #tpu.memory_space<vmem>>, vector<1x128xf32>
    %52 = vector.broadcast %51 : vector<1x128xf32> to vector<128x128xf32>
    %53 = arith.addf %50, %52 : vector<128x128xf32>
    %cst_41 = arith.constant -3.000000e+01 : f32
    %cst_42 = arith.constant 3.000000e+01 : f32
    %54 = vector.broadcast %cst_41 : f32 to vector<128x128xf32>
    %55 = arith.maximumf %54, %53 : vector<128x128xf32>
    %56 = vector.broadcast %cst_42 : f32 to vector<128x128xf32>
    %57 = arith.minimumf %56, %55 : vector<128x128xf32>
    %cst_43 = arith.constant 0.000000e+00 : f32
    %58 = vector.broadcast %cst_43 : f32 to vector<128x128xf32>
    %59 = arith.subf %58, %57 : vector<128x128xf32>
    %60 = math.exp %59 : vector<128x128xf32>
    %cst_44 = arith.constant 1.000000e+00 : f32
    %61 = vector.broadcast %cst_44 : f32 to vector<128x128xf32>
    %62 = arith.addf %61, %60 : vector<128x128xf32>
    %63 = tpu.reciprocal %62 {approx = true} : vector<128x128xf32> -> vector<128x128xf32>
    %c0_45 = arith.constant 0 : index
    %c0_46 = arith.constant 0 : index
    %64 = vector.load %arg16[%c0_45, %c0_46] : memref<128x128xf32, #tpu.memory_space<vmem>>, vector<128x128xf32>
    tpu.vector_store %arg16[%c0_45, %c0_46], %63 {strides = array<i32>} : memref<128x128xf32, #tpu.memory_space<vmem>>, vector<128x128xf32>,
    return
  }
  func.func @transform_0(%arg0: i32) -> (i32, i32) {
    %c0_i32 = arith.constant 0 : i32
    %c0_i32_0 = arith.constant 0 : i32
    return %arg0, %c0_i32 : i32, i32
  }
  func.func @transform_1(%arg0: i32) -> (i32, i32) {
    %c0_i32 = arith.constant 0 : i32
    %c0_i32_0 = arith.constant 0 : i32
    %c0_i32_1 = arith.constant 0 : i32
    return %c0_i32, %c0_i32_0 : i32, i32
  }
  func.func @transform_2(%arg0: i32) -> (i32, i32) {
    %c0_i32 = arith.constant 0 : i32
    %c0_i32_0 = arith.constant 0 : i32
    %c0_i32_1 = arith.constant 0 : i32
    return %c0_i32, %c0_i32_0 : i32, i32
  }
  func.func @transform_3(%arg0: i32) -> (i32, i32) {
    %c0_i32 = arith.constant 0 : i32
    %c0_i32_0 = arith.constant 0 : i32
    %c0_i32_1 = arith.constant 0 : i32
    return %c0_i32, %c0_i32_0 : i32, i32
  }
  func.func @transform_4(%arg0: i32) -> (i32, i32) {
    %c0_i32 = arith.constant 0 : i32
    %c0_i32_0 = arith.constant 0 : i32
    %c0_i32_1 = arith.constant 0 : i32
    return %c0_i32, %c0_i32_0 : i32, i32
  }
  func.func @transform_5(%arg0: i32) -> (i32, i32) {
    %c0_i32 = arith.constant 0 : i32
    %c0_i32_0 = arith.constant 0 : i32
    %c0_i32_1 = arith.constant 0 : i32
    return %c0_i32, %c0_i32_0 : i32, i32
  }
  func.func @transform_6(%arg0: i32) -> (i32, i32) {
    %c0_i32 = arith.constant 0 : i32
    %c0_i32_0 = arith.constant 0 : i32
    %c0_i32_1 = arith.constant 0 : i32
    return %c0_i32, %c0_i32_0 : i32, i32
  }
  func.func @transform_7(%arg0: i32) -> (i32, i32) {
    %c0_i32 = arith.constant 0 : i32
    %c0_i32_0 = arith.constant 0 : i32
    %c0_i32_1 = arith.constant 0 : i32
    return %c0_i32, %c0_i32_0 : i32, i32
  }
  func.func @transform_8(%arg0: i32) -> (i32, i32) {
    %c0_i32 = arith.constant 0 : i32
    %c0_i32_0 = arith.constant 0 : i32
    %c0_i32_1 = arith.constant 0 : i32
    return %c0_i32, %c0_i32_0 : i32, i32
  }
  func.func @transform_9(%arg0: i32) -> (i32, i32) {
    %c0_i32 = arith.constant 0 : i32
    %c0_i32_0 = arith.constant 0 : i32
    %c0_i32_1 = arith.constant 0 : i32
    return %c0_i32, %c0_i32_0 : i32, i32
  }
  func.func @transform_10(%arg0: i32) -> (i32, i32) {
    %c0_i32 = arith.constant 0 : i32
    %c0_i32_0 = arith.constant 0 : i32
    %c0_i32_1 = arith.constant 0 : i32
    return %c0_i32, %c0_i32_0 : i32, i32
  }
  func.func @transform_11(%arg0: i32) -> (i32, i32) {
    %c0_i32 = arith.constant 0 : i32
    %c0_i32_0 = arith.constant 0 : i32
    %c0_i32_1 = arith.constant 0 : i32
    return %c0_i32, %c0_i32_0 : i32, i32
  }
  func.func @transform_12(%arg0: i32) -> (i32, i32) {
    %c0_i32 = arith.constant 0 : i32
    %c0_i32_0 = arith.constant 0 : i32
    %c0_i32_1 = arith.constant 0 : i32
    return %c0_i32, %c0_i32_0 : i32, i32
  }
  func.func @transform_13(%arg0: i32) -> (i32, i32) {
    %c0_i32 = arith.constant 0 : i32
    %c0_i32_0 = arith.constant 0 : i32
    %c0_i32_1 = arith.constant 0 : i32
    return %c0_i32, %c0_i32_0 : i32, i32
  }
  func.func @transform_14(%arg0: i32) -> (i32, i32) {
    %c0_i32 = arith.constant 0 : i32
    %c0_i32_0 = arith.constant 0 : i32
    %c0_i32_1 = arith.constant 0 : i32
    return %c0_i32, %c0_i32_0 : i32, i32
  }
  func.func @transform_15(%arg0: i32) -> (i32, i32) {
    %c0_i32 = arith.constant 0 : i32
    %c0_i32_0 = arith.constant 0 : i32
    return %arg0, %c0_i32 : i32, i32
  }
}

</mosaic_0001>

<bundles_post_ra>
// kernel: red_model_forward.1
= control target key start
LH: loop header
LB: loop body
LE: loop exit
PB: predicated region body
PF: predicated region fallthrough
CT: control target
= control target key end

     0   :  { %s17099_s0 = inlined_call_operand.vmem [shape: bf16[384,128], index: 0, kind: input, shape index: {}]   ;;  %s17100_s1 = inlined_call_operand.vmem [shape: bf16[128,512], index: 1, kind: input, shape index: {}]   ;;  %s17101_s2 = inlined_call_operand.vmem [shape: f32[1,512], index: 2, kind: input, shape index: {}]   ;;  %s17102_s3 = inlined_call_operand.hbm [shape: bf16[512,512], index: 3, kind: input, shape index: {}]   ;;  %s17103_s4 = inlined_call_operand.vmem [shape: f32[1,512], index: 4, kind: input, shape index: {}]   ;;  %s17104_s5 = inlined_call_operand.hbm [shape: bf16[512,512], index: 5, kind: input, shape index: {}]   ;;  %s17105_s6 = inlined_call_operand.vmem [shape: f32[1,512], index: 6, kind: input, shape index: {}]   ;;  %s17106_s7 = inlined_call_operand.hbm [shape: bf16[512,512], index: 7, kind: input, shape index: {}]   ;;  %s17107_s8 = inlined_call_operand.vmem [shape: f32[1,512], index: 8, kind: input, shape index: {}]   ;;  %s17108_s9 = inlined_call_operand.hbm [shape: bf16[512,512], index: 9, kind: input, shape index: {}]   ;;  %s17109_s10 = inlined_call_operand.vmem [shape: f32[1,512], index: 10, kind: input, shape index: {}]   ;;  %s17110_s11 = inlined_call_operand.hbm [shape: bf16[512,512], index: 11, kind: input, shape index: {}]   ;;  %s17111_s12 = inlined_call_operand.vmem [shape: f32[1,512], index: 12, kind: input, shape index: {}]   ;;  %s17112_s13 = inlined_call_operand.vmem [shape: bf16[512,128], index: 13, kind: input, shape index: {}]   ;;  %s17113_s14 = inlined_call_operand.vmem [shape: f32[1,128], index: 14, kind: input, shape index: {}]   ;;  %s17114_s15 = inlined_call_operand.vmem [shape: f32[384,128], index: 15, kind: output, shape index: {}]  }
   0x1   :  { %17166 = sst [smem:[#allocation37_spill]] %s17102_s3 }
   0x2   :  { %17167 = sst [smem:[#allocation38_spill]] %s17104_s5 }
   0x3   :  { %17168 = sst [smem:[#allocation39_spill]] %s17108_s9 }
   0x4   :  { %17169 = sst [smem:[#allocation40_spill]] %s17113_s14 }
   0x5   :  { %17170 = sst [smem:[#allocation41_spill]] %s17114_s15 }
   0x6   :  { %20 = vsyncpa [#allocation3], 0 }
   0x7   :  { %21 = vsyncpa [#allocation5], 0 }
   0x8   :  { %22 = vsyncpa [#allocation8], 0  ;;  %s14104_s18 = smov 0  }
   0x9 LB: > { %s17115_s19 = sadd.s32 4294967295, %s14015_s18   ;;  %p10121_p0 = scmp.ge.s32.totalorder %s14015_s18, 1  ;;  %s14015_s18 = sphi %s14104_s18, %s28_s18  }
   0xa   : > { %p379_p1 = scmp.lt.s32.totalorder %s14015_s18, 4  ;;  %p14114_p2 = scmp.eq.s32.totalorder %s17115_s19, 0 }
   0xb   : > { %s17172_s5 = sld [smem:[#allocation38_spill]]  ;;  %s14017_s28 = smov [#allocation4]  }
   0xc   : > { %p14121_p3 = pnand %p10121_p0, %p379_p1  ;;  %s17174_s9 = sld [smem:[#allocation39_spill]] }
   0xd   : > { %s415_s29 = sshll.u32 %s14017_s28, 4  ;;  %s14018_s16 = smov [#allocation7]   ;;  %s416_s29 = int_to_ptr.vmem [resolvable:$true] %s415_s29 }
   0xe   : > { %p13736_p4 = pneg %p14121_p3  ;;  %s449_s17 = sshll.u32 %s14018_s16, 4  ;;  %s450_s17 = int_to_ptr.vmem [resolvable:$true] %s449_s17 }
   0xf   : > { %s17176_s3 = sld [smem:[#allocation37_spill]]  ;;  %s14019_s26 = smov 256  }
  0x10   : > { %p14132_p5 = pnand %p14114_p2, %p13736_p4  ;;  %s14020_s28 = smov 16  }
  0x11   : > { %s413_s23 = sshll.u32 %s17172_s5, 4  ;;  %s14021_s19 = smov [#allocation2]   ;;  %s414_s23 = int_to_ptr.hbm [resolvable:$true] %s413_s23 }
  0x12   : > { %s447_s27 = sshll.u32 %s17174_s9, 4  ;;  %s398_s5 = sshll.u32 %s14021_s19, 4  ;;  %s448_s27 = int_to_ptr.hbm [resolvable:$true] %s447_s27  ;;  %s399_s5 = int_to_ptr.vmem [resolvable:$true] %s398_s5 }
  0x13   : > { %13742 = dma.hbm_to_vmem [thread:$0]  (!%p14132_p5), %s414_s23, 16384, %s416_s29, [#allocation5], %s14019_s26, %s14019_s26, %s14020_s28  }
  0x14   : > { %13748 = dma.hbm_to_vmem [thread:$0]  (!%p14132_p5), %s448_s27, 16384, %s450_s17, [#allocation8], %s14019_s26, %s14019_s26, %s14020_s28  }
  0x15   : > { %s396_s25 = sshll.u32 %s17176_s3, 4  ;;  %s430_s16 = sshll.u32 %s17106_s7, 4  ;;  %s397_s25 = int_to_ptr.hbm [resolvable:$true] %s396_s25  ;;  %s431_s16 = int_to_ptr.hbm [resolvable:$true] %s430_s16 }
  0x16   : > { %13739 = dma.hbm_to_vmem [thread:$0]  (!%p14132_p5), %s397_s25, 16384, %s399_s5, [#allocation3], %s14019_s26, %s14019_s26, %s14020_s28  }
  0x17   : > { %s464_s3 = sshll.u32 %s17110_s11, 4  ;;  %s14022_s14 = smov [#allocation6]   ;;  %s465_s3 = int_to_ptr.hbm [resolvable:$true] %s464_s3 }
  0x18   : > { %s432_s23 = sshll.u32 %s14022_s14, 4  ;;  %s14023_s27 = smov [#allocation9]   ;;  %s433_s23 = int_to_ptr.vmem [resolvable:$true] %s432_s23 }
  0x19   : > { %13745 = dma.hbm_to_vmem [thread:$0]  (!%p14132_p5), %s431_s16, 16384, %s433_s23, [#allocation5], %s14019_s26, %s14019_s26, %s14020_s28  }
  0x1a   : > { %s466_s19 = sshll.u32 %s14023_s27, 4  ;;  %500 = sbr.rel (%p14121_p3) target bundleno = 3147 (0xc4b), region = 80  ;;  %s467_s19 = int_to_ptr.vmem [resolvable:$true] %s466_s19 }
  0x1b   : > { %13751 = dma.hbm_to_vmem [thread:$0]  (!%p14132_p5), %s465_s3, 16384, %s467_s19, [#allocation8], %s14019_s26, %s14019_s26, %s14020_s28  }
  0x1f   : > { %14002 = dma.done.wait (%p14114_p2), [#allocation3], 16384  }
  0x20   : > { %14004 = vsyncadd (%p14114_p2), [#allocation3], 4294950912 }
  0x21   : > { %14006 = dma.done.wait (%p14114_p2), [#allocation5], 32768  }
  0x22   : > { %14008 = vsyncadd (%p14114_p2), [#allocation5], 4294934528 }
  0x23   : > { %14010 = dma.done.wait (%p14114_p2), [#allocation8], 32768  }
  0x24   : > { %14012 = vsyncadd (%p14114_p2), [#allocation8], 4294934528  ;;  %v10284_v0 = vld [vmem:[%s17100_s1 + $0xe0] sm:$0xf]  ;;  %v13042_v1 = vld [vmem:[%s17100_s1 + $0xec] sm:$0xf0] }
  0x25   : > { %v13040_v2 = vld [vmem:[%s17100_s1 + $0xe4] sm:$0xf]  ;;  %v10285_v3 = vor.u32 %v13042_v1, %v10284_v0  ;;  %v10286_v4 = vld [vmem:[%s17100_s1 + $0xf0] sm:$0xf0]  ;;  %v10292_v5 = vld [vmem:[%s17100_s1 + $0xe8] sm:$0xf] }
  0x26   : > { %v13043_v6 = vld [vmem:[%s17100_s1 + $0xf4] sm:$0xf0]  ;;  %v10289_v7 = vor.u32 %v13040_v2, %v10286_v4  ;;  %v13041_v9 = vld [vmem:[%s17100_s1 + $0xec] sm:$0xf]  ;;  %v10294_v10 = vld [vmem:[%s17100_s1 + $0xf8] sm:$0xf0] }
  0x27   : > { %v10293_v8 = vor.u32 %v13043_v6, %v10292_v5  ;;  %v10268_v11 = vld [vmem:[%s17100_s1 + $0xc0] sm:$0xf]  ;;  %847 = vmatpush.bf16.msra.mxu0 %v10285_v3  ;;  %v10297_v12 = vor.u32 %v13041_v9, %v10294_v10  ;;  %v13038_v13 = vld [vmem:[%s17100_s1 + $0xcc] sm:$0xf0]  ;;  %v13036_v14 = vld [vmem:[%s17100_s1 + $0xc4] sm:$0xf] }
  0x28   : > { %v10270_v15 = vld [vmem:[%s17100_s1 + $0xd0] sm:$0xf0]  ;;  %896 = vmatpush.bf16.msra.mxu1 %v10289_v7  ;;  %v10269_v16 = vor.u32 %v13038_v13, %v10268_v11  ;;  %v10276_v18 = vld [vmem:[%s17100_s1 + $0xc8] sm:$0xf]  ;;  %v13039_v19 = vld [vmem:[%s17100_s1 + $0xd4] sm:$0xf0] }
  0x29   : > { %945 = vmatpush.bf16.msra.mxu2 %v10293_v8  ;;  %v10273_v17 = vor.u32 %v13036_v14, %v10270_v15  ;;  %v13037_v20 = vld [vmem:[%s17100_s1 + $0xcc] sm:$0xf]  ;;  %994 = vmatpush.bf16.msra.mxu3 %v10297_v12  ;;  %v10277_v21 = vor.u32 %v13039_v19, %v10276_v18  ;;  %v10278_v22 = vld [vmem:[%s17100_s1 + $0xd8] sm:$0xf0]  ;;  %v10252_v23 = vld [vmem:[%s17100_s1 + $0xa0] sm:$0xf] }
  0x2a   : > { %v13034_v24 = vld [vmem:[%s17100_s1 + $0xac] sm:$0xf0]  ;;  %v10281_v25 = vor.u32 %v13037_v20, %v10278_v22  ;;  %v13032_v26 = vld [vmem:[%s17100_s1 + $0xa4] sm:$0xf]  ;;  %v10254_v27 = vld [vmem:[%s17100_s1 + $0xb0] sm:$0xf0] }
  0x2b   : > { %v10260_v28 = vld [vmem:[%s17100_s1 + $0xa8] sm:$0xf]  ;;  %848 = vmatpush.bf16.msra.mxu0 %v10269_v16  ;;  %v10253_v29 = vor.u32 %v13034_v24, %v10252_v23  ;;  %v13035_v30 = vld [vmem:[%s17100_s1 + $0xb4] sm:$0xf0]  ;;  %v13033_v31 = vld [vmem:[%s17100_s1 + $0xac] sm:$0xf]  ;;  %v10257_v33 = vor.u32 %v13032_v26, %v10254_v27 }
  0x2c   : > { %v10262_v32 = vld [vmem:[%s17100_s1 + $0xb8] sm:$0xf0]  ;;  %897 = vmatpush.bf16.msra.mxu1 %v10273_v17  ;;  %v10261_v34 = vor.u32 %v13035_v30, %v10260_v28  ;;  %v10236_v35 = vld [vmem:[%s17100_s1 + $0x80] sm:$0xf]  ;;  %v13030_v36 = vld [vmem:[%s17100_s1 + $0x8c] sm:$0xf0] }
  0x2d   : > { %946 = vmatpush.bf16.msra.mxu2 %v10277_v21  ;;  %v13028_v37 = vld [vmem:[%s17100_s1 + $0x84] sm:$0xf]  ;;  %995 = vmatpush.bf16.msra.mxu3 %v10281_v25  ;;  %v10265_v38 = vor.u32 %v13033_v31, %v10262_v32  ;;  %v10238_v39 = vld [vmem:[%s17100_s1 + $0x90] sm:$0xf0]  ;;  %v10244_v40 = vld [vmem:[%s17100_s1 + $0x88] sm:$0xf]  ;;  %v10237_v44 = vor.u32 %v13030_v36, %v10236_v35 }
  0x2e   : > { %v13031_v41 = vld [vmem:[%s17100_s1 + $0x94] sm:$0xf0]  ;;  %v13029_v42 = vld [vmem:[%s17100_s1 + $0x8c] sm:$0xf]  ;;  %v10246_v43 = vld [vmem:[%s17100_s1 + $0x98] sm:$0xf0]  ;;  %v10241_v45 = vor.u32 %v13028_v37, %v10238_v39 }
  0x2f   : > { %849 = vmatpush.bf16.msra.mxu0 %v10253_v29  ;;  %s17177_s30 = sadd.s32 4294967295, %s14015_s18   ;;  %v10245_v46 = vor.u32 %v13031_v41, %v10244_v40  ;;  %v10220_v47 = vld [vmem:[%s17100_s1 + $0x60] sm:$0xf]  ;;  %v13026_v48 = vld [vmem:[%s17100_s1 + $0x6c] sm:$0xf0]  ;;  %v10249_v50 = vor.u32 %v13029_v42, %v10246_v43  ;;  %s17296_s9 = sld [smem:[#allocation40_spill]] }
  0x30   : > { %s14267_s17 = sshll.u32 %s17177_s30, 4  ;;  %898 = vmatpush.bf16.msra.mxu1 %v10257_v33  ;;  %v13024_v49 = vld [vmem:[%s17100_s1 + $0x64] sm:$0xf]  ;;  %v10222_v51 = vld [vmem:[%s17100_s1 + $0x70] sm:$0xf0]  ;;  %v10221_v56 = vor.u32 %v13026_v48, %v10220_v47 }
  0x31   : > { %947 = vmatpush.bf16.msra.mxu2 %v10261_v34  ;;  %996 = vmatpush.bf16.msra.mxu3 %v10265_v38  ;;  %v10228_v52 = vld [vmem:[%s17100_s1 + $0x68] sm:$0xf]  ;;  %v13027_v53 = vld [vmem:[%s17100_s1 + $0x74] sm:$0xf0]  ;;  %v13025_v54 = vld [vmem:[%s17100_s1 + $0x6c] sm:$0xf]  ;;  %v10225_v57 = vor.u32 %v13024_v49, %v10222_v51 }
  0x32   : > { %v10230_v55 = vld [vmem:[%s17100_s1 + $0x78] sm:$0xf0]  ;;  %p570_p6 = scmp.lt.s32.totalorder %s14267_s17, 47  ;;  %v10229_v58 = vor.u32 %v13027_v53, %v10228_v52  ;;  %v10204_v59 = vld [vmem:[%s17100_s1 + $0x40] sm:$0xf] }
  0x33   : > { %850 = vmatpush.bf16.msra.mxu0 %v10237_v44  ;;  %v13022_v60 = vld [vmem:[%s17100_s1 + $0x4c] sm:$0xf0]  ;;  %v13020_v61 = vld [vmem:[%s17100_s1 + $0x44] sm:$0xf]  ;;  %v10233_v62 = vor.u32 %v13025_v54, %v10230_v55  ;;  %v10206_v63 = vld [vmem:[%s17100_s1 + $0x50] sm:$0xf0] }
  0x34   : > { %899 = vmatpush.bf16.msra.mxu1 %v10241_v45  ;;  %v10212_v0 = vld [vmem:[%s17100_s1 + $0x48] sm:$0xf]  ;;  %v13023_v1 = vld [vmem:[%s17100_s1 + $0x54] sm:$0xf0]  ;;  %v13021_v2 = vld [vmem:[%s17100_s1 + $0x4c] sm:$0xf]  ;;  %v10205_v4 = vor.u32 %v13022_v60, %v10204_v59  ;;  %v10209_v5 = vor.u32 %v13020_v61, %v10206_v63 }
  0x35   : > { %948 = vmatpush.bf16.msra.mxu2 %v10245_v46  ;;  %997 = vmatpush.bf16.msra.mxu3 %v10249_v50  ;;  %v10214_v3 = vld [vmem:[%s17100_s1 + $0x58] sm:$0xf0]  ;;  %s17299_s17 = smov (!%p570_p6, %s14267_s17), 47  ;;  %v10213_v6 = vor.u32 %v13023_v1, %v10212_v0  ;;  %v10188_v7 = vld [vmem:[%s17100_s1 + $0x20] sm:$0xf] }
  0x36   : > { %v13018_v8 = vld [vmem:[%s17100_s1 + $0x2c] sm:$0xf0]  ;;  %v13016_v9 = vld [vmem:[%s17100_s1 + $0x24] sm:$0xf]  ;;  %v10217_v10 = vor.u32 %v13021_v2, %v10214_v3  ;;  %v10190_v11 = vld [vmem:[%s17100_s1 + $0x30] sm:$0xf0] }
  0x37   : > { %851 = vmatpush.bf16.msra.mxu0 %v10221_v56  ;;  %v10196_v12 = vld [vmem:[%s17100_s1 + $0x28] sm:$0xf]  ;;  %v13019_v13 = vld [vmem:[%s17100_s1 + $0x34] sm:$0xf0]  ;;  %v13017_v14 = vld [vmem:[%s17100_s1 + $0x2c] sm:$0xf]  ;;  %v10189_v16 = vor.u32 %v13018_v8, %v10188_v7  ;;  %v10193_v19 = vor.u32 %v13016_v9, %v10190_v11 }
  0x38   : > { %900 = vmatpush.bf16.msra.mxu1 %v10225_v57  ;;  %v10198_v15 = vld [vmem:[%s17100_s1 + $0x38] sm:$0xf0]  ;;  %v10172_v17 = vld [vmem:[%s17100_s1] sm:$0xf]  ;;  %v13014_v18 = vld [vmem:[%s17100_s1 + $0xc] sm:$0xf0]  ;;  %v10197_v20 = vor.u32 %v13019_v13, %v10196_v12 }
  0x39   : > { %949 = vmatpush.bf16.msra.mxu2 %v10229_v58  ;;  %998 = vmatpush.bf16.msra.mxu3 %v10233_v62  ;;  %s10135_s29 = sshll.u32 %s17299_s17, 2  ;;  %v13012_v21 = vld [vmem:[%s17100_s1 + $0x4] sm:$0xf]  ;;  %v10174_v22 = vld [vmem:[%s17100_s1 + $0x10] sm:$0xf0]  ;;  %v10201_v24 = vor.u32 %v13017_v14, %v10198_v15  ;;  %v10173_v30 = vor.u32 %v13014_v18, %v10172_v17 }
  0x3a   : > { %v10180_v23 = vld [vmem:[%s17100_s1 + $0x8] sm:$0xf]  ;;  %v13015_v25 = vld [vmem:[%s17100_s1 + $0x14] sm:$0xf0]  ;;  %v13013_v26 = vld [vmem:[%s17100_s1 + $0xc] sm:$0xf]  ;;  %s14375_s14 = scalar_lea.vmem %s17099_s0, %s10135_s29  ;;  %v10177_v33 = vor.u32 %v13012_v21, %v10174_v22 }
  0x3b   : > { %852 = vmatpush.bf16.msra.mxu0 %v10205_v4  ;;  %v10182_v27 = vld [vmem:[%s17100_s1 + $0x18] sm:$0xf0]  ;;  %v10668_v28 = vld [vmem:[#allocation2 + $0x2e0] sm:$0xf]  ;;  %v13138_v29 = vld [vmem:[#allocation2 + $0x2ec] sm:$0xf0]  ;;  %v10181_v34 = vor.u32 %v13015_v25, %v10180_v23 }
  0x3c   : > { %901 = vmatpush.bf16.msra.mxu1 %v10209_v5  ;;  %v10796_v31 = vld [vmem:[#allocation2 + $0x3e0] sm:$0xf]  ;;  %v13170_v32 = vld [vmem:[#allocation2 + $0x3ec] sm:$0xf0]  ;;  %v10185_v35 = vor.u32 %v13013_v26, %v10182_v27  ;;  %v10669_v36 = vor.u32 %v13138_v29, %v10668_v28  ;;  %v13005_v57 = vld [vmem:[%s14375_s14 + $0x8] sm:$0xff]  ;;  %s17297_s29 = sld [smem:[#allocation41_spill]] }
  0x3d   : > { %950 = vmatpush.bf16.msra.mxu2 %v10213_v6  ;;  %999 = vmatpush.bf16.msra.mxu3 %v10217_v10  ;;  %v10412_v37 = vld [vmem:[#allocation2 + $0xe0] sm:$0xf]  ;;  %v13074_v38 = vld [vmem:[#allocation2 + $0xec] sm:$0xf0]  ;;  %v10797_v40 = vor.u32 %v13170_v32, %v10796_v31 }
  0x3e   : > { %v13004_v39 = vld [vmem:[%s14375_s14] sm:$0xff]  ;;  %v13106_v42 = vld [vmem:[#allocation2 + $0x1ec] sm:$0xf0]  ;;  %v10413_v43 = vor.u32 %v13074_v38, %v10412_v37 }
  0x3f   : > { %853 = vmatpush.bf16.msra.mxu0 %v10189_v16  ;;  %v10540_v41 = vld [vmem:[#allocation2 + $0x1e0] sm:$0xf]  ;;  %v13134_v46 = vld [vmem:[#allocation2 + $0x2cc] sm:$0xf0] }
  0x40   : > { %902 = vmatpush.bf16.msra.mxu1 %v10193_v19  ;;  %v10541_v44 = vor.u32 %v13106_v42, %v10540_v41  ;;  %v10652_v45 = vld [vmem:[#allocation2 + $0x2c0] sm:$0xf]  ;;  %v13070_v49 = vld [vmem:[#allocation2 + $0xcc] sm:$0xf0]  ;;  %v13007_v19 = vld [vmem:[%s14375_s14 + $0x18] sm:$0xff] }
  0x41   : > { %951 = vmatpush.bf16.msra.mxu2 %v10197_v20  ;;  %1000 = vmatpush.bf16.msra.mxu3 %v10201_v24  ;;  %v10396_v47 = vld [vmem:[#allocation2 + $0xc0] sm:$0xf]  ;;  %v10653_v48 = vor.u32 %v13134_v46, %v10652_v45  ;;  %v13166_v51 = vld [vmem:[#allocation2 + $0x3cc] sm:$0xf0]  ;;  %v13009_v45 = vld [vmem:[%s14375_s14 + $0x28] sm:$0xff] }
  0x42   : > { %v10780_v50 = vld [vmem:[#allocation2 + $0x3c0] sm:$0xf]  ;;  %v10397_v52 = vor.u32 %v13070_v49, %v10396_v47  ;;  %v13102_v55 = vld [vmem:[#allocation2 + $0x1cc] sm:$0xf0] }
  0x43   : > { %854 = vmatpush.bf16.msra.mxu0 %v10173_v30  ;;  %v10781_v53 = vor.u32 %v13166_v51, %v10780_v50  ;;  %v10524_v54 = vld [vmem:[#allocation2 + $0x1c0] sm:$0xf]  ;;  %v13130_v59 = vld [vmem:[#allocation2 + $0x2ac] sm:$0xf0] }
  0x44   : > { %903 = vmatpush.bf16.msra.mxu1 %v10177_v33  ;;  %v10525_v56 = vor.u32 %v13102_v55, %v10524_v54  ;;  %v10636_v58 = vld [vmem:[#allocation2 + $0x2a0] sm:$0xf]  ;;  %v13066_v62 = vld [vmem:[#allocation2 + $0xac] sm:$0xf0] }
  0x45   : > { %952 = vmatpush.bf16.msra.mxu2 %v10181_v34  ;;  %1001 = vmatpush.bf16.msra.mxu3 %v10185_v35  ;;  %v10380_v60 = vld [vmem:[#allocation2 + $0xa0] sm:$0xf]  ;;  %v10637_v61 = vor.u32 %v13130_v59, %v10636_v58  ;;  %v13162_v0 = vld [vmem:[#allocation2 + $0x3ac] sm:$0xf0] }
  0x46   : > { %855 = vmatmul.bf16.vlgmr.msra.gmra.mxu0 %v13004_v39  ;;  %v10764_v63 = vld [vmem:[#allocation2 + $0x3a0] sm:$0xf]  ;;  %v10381_v1 = vor.u32 %v13066_v62, %v10380_v60  ;;  %v13098_v4 = vld [vmem:[#allocation2 + $0x1ac] sm:$0xf0] }
  0x47   : > { %904 = vmatmul.bf16.vlgmr.msra.gmra.mxu1 %v13004_v39  ;;  %1917 = vmatpush.bf16.msrb.mxu0 %v10413_v43  ;;  %v10765_v2 = vor.u32 %v13162_v0, %v10764_v63  ;;  %v10508_v3 = vld [vmem:[#allocation2 + $0x1a0] sm:$0xf]  ;;  %v13006_v6 = vld [vmem:[%s14375_s14 + $0x10] sm:$0xff] }
  0x48   : > { %953 = vmatmul.bf16.vlgmr.msra.gmra.mxu2 %v13004_v39  ;;  %1002 = vmatmul.bf16.vlgmr.msra.gmra.mxu3 %v13004_v39  ;;  %v10509_v5 = vor.u32 %v13098_v4, %v10508_v3  ;;  %v10620_v7 = vld [vmem:[#allocation2 + $0x280] sm:$0xf]  ;;  %v13126_v8 = vld [vmem:[#allocation2 + $0x28c] sm:$0xf0] }
  0x49   : > { %2015 = vmatpush.bf16.msrb.mxu2 %v10669_v36  ;;  %2064 = vmatpush.bf16.msrb.mxu3 %v10797_v40  ;;  %v10364_v9 = vld [vmem:[#allocation2 + $0x80] sm:$0xf]  ;;  %v10621_v10 = vor.u32 %v13126_v8, %v10620_v7  ;;  %v13062_v11 = vld [vmem:[#allocation2 + $0x8c] sm:$0xf0]  ;;  %v13011_v7 = vld [vmem:[%s14375_s14 + $0x38] sm:$0xff] }
  0x4a   : > { %1966 = vmatpush.bf16.msrb.mxu1 %v10541_v44  ;;  %v10748_v12 = vld [vmem:[#allocation2 + $0x380] sm:$0xf]  ;;  %v13158_v13 = vld [vmem:[#allocation2 + $0x38c] sm:$0xf0]  ;;  %v10365_v14 = vor.u32 %v13062_v11, %v10364_v9  ;;  %v13136_v8 = vld [vmem:[#allocation2 + $0x2e4] sm:$0xf] }
  0x4b   : > { %1918 = vmatpush.bf16.msrb.mxu0 %v10397_v52  ;;  %v10749_v15 = vor.u32 %v13158_v13, %v10748_v12  ;;  %v10492_v16 = vld [vmem:[#allocation2 + $0x180] sm:$0xf]  ;;  %v13094_v17 = vld [vmem:[#allocation2 + $0x18c] sm:$0xf0]  ;;  %v10670_v9 = vld [vmem:[#allocation2 + $0x2f0] sm:$0xf0] }
  0x4c   : > { %v10493_v18 = vor.u32 %v13094_v17, %v10492_v16  ;;  %v10604_v20 = vld [vmem:[#allocation2 + $0x260] sm:$0xf]  ;;  %v13122_v21 = vld [vmem:[#allocation2 + $0x26c] sm:$0xf0]  ;;  %v13072_v11 = vld [vmem:[#allocation2 + $0xe4] sm:$0xf] }
  0x4d   : > { %2016 = vmatpush.bf16.msrb.mxu2 %v10653_v48  ;;  %2065 = vmatpush.bf16.msrb.mxu3 %v10781_v53  ;;  %v10348_v22 = vld [vmem:[#allocation2 + $0x60] sm:$0xf]  ;;  %v10605_v23 = vor.u32 %v13122_v21, %v10604_v20  ;;  %v13058_v24 = vld [vmem:[#allocation2 + $0x6c] sm:$0xf0]  ;;  %v10414_v12 = vld [vmem:[#allocation2 + $0xf0] sm:$0xf0] }
  0x4e   : > { %1967 = vmatpush.bf16.msrb.mxu1 %v10525_v56  ;;  %v10732_v25 = vld [vmem:[#allocation2 + $0x360] sm:$0xf]  ;;  %v13154_v26 = vld [vmem:[#allocation2 + $0x36c] sm:$0xf0]  ;;  %v10349_v27 = vor.u32 %v13058_v24, %v10348_v22  ;;  %v13168_v13 = vld [vmem:[#allocation2 + $0x3e4] sm:$0xf] }
  0x4f   : > { %1919 = vmatpush.bf16.msrb.mxu0 %v10381_v1  ;;  %v10733_v28 = vor.u32 %v13154_v26, %v10732_v25  ;;  %v10476_v29 = vld [vmem:[#allocation2 + $0x160] sm:$0xf]  ;;  %v13090_v30 = vld [vmem:[#allocation2 + $0x16c] sm:$0xf0]  ;;  %v13104_v17 = vld [vmem:[#allocation2 + $0x1e4] sm:$0xf] }
  0x50   : > { %v10477_v31 = vor.u32 %v13090_v30, %v10476_v29  ;;  %v13008_v32 = vld [vmem:[%s14375_s14 + $0x20] sm:$0xff]  ;;  %v13118_v34 = vld [vmem:[#allocation2 + $0x24c] sm:$0xf0]  ;;  %v10654_v29 = vld [vmem:[#allocation2 + $0x2d0] sm:$0xf0] }
  0x51   : > { %2017 = vmatpush.bf16.msrb.mxu2 %v10637_v61  ;;  %2066 = vmatpush.bf16.msrb.mxu3 %v10765_v2  ;;  %v10588_v33 = vld [vmem:[#allocation2 + $0x240] sm:$0xf]  ;;  %v13054_v37 = vld [vmem:[#allocation2 + $0x4c] sm:$0xf0] }
  0x52   : > { %1968 = vmatpush.bf16.msrb.mxu1 %v10509_v5  ;;  %v10332_v35 = vld [vmem:[#allocation2 + $0x40] sm:$0xf]  ;;  %v10589_v36 = vor.u32 %v13118_v34, %v10588_v33  ;;  %v13150_v39 = vld [vmem:[#allocation2 + $0x34c] sm:$0xf0] }
  0x53   : > { %1920 = vmatpush.bf16.msrb.mxu0 %v10365_v14  ;;  %v10716_v38 = vld [vmem:[#allocation2 + $0x340] sm:$0xf]  ;;  %v10333_v40 = vor.u32 %v13054_v37, %v10332_v35  ;;  %v13086_v43 = vld [vmem:[#allocation2 + $0x14c] sm:$0xf0]  ;;  %v10417_v14 = vor.u32 %v13072_v11, %v10414_v12 }
  0x54   : > { %v10717_v41 = vor.u32 %v13150_v39, %v10716_v38  ;;  %v10460_v42 = vld [vmem:[#allocation2 + $0x140] sm:$0xf]  ;;  %v13114_v47 = vld [vmem:[#allocation2 + $0x22c] sm:$0xf0] }
  0x55   : > { %2018 = vmatpush.bf16.msrb.mxu2 %v10621_v10  ;;  %2067 = vmatpush.bf16.msrb.mxu3 %v10749_v15  ;;  %v10461_v44 = vor.u32 %v13086_v43, %v10460_v42  ;;  %v10572_v46 = vld [vmem:[#allocation2 + $0x220] sm:$0xf]  ;;  %v13050_v50 = vld [vmem:[#allocation2 + $0x2c] sm:$0xf0]  ;;  %v10673_v10 = vor.u32 %v13136_v8, %v10670_v9  ;;  %v10798_v15 = vld [vmem:[#allocation2 + $0x3f0] sm:$0xf0] }
  0x56   : > { %860 = vmatmul.bf16.gmra.mxu0 %v13005_v57  ;;  %1969 = vmatpush.bf16.msrb.mxu1 %v10493_v18  ;;  %v10316_v48 = vld [vmem:[#allocation2 + $0x20] sm:$0xf]  ;;  %v10573_v49 = vor.u32 %v13114_v47, %v10572_v46  ;;  %v13146_v52 = vld [vmem:[#allocation2 + $0x32c] sm:$0xf0]  ;;  %v10801_v16 = vor.u32 %v13168_v13, %v10798_v15  ;;  %v10542_v18 = vld [vmem:[#allocation2 + $0x1f0] sm:$0xf0] }
  0x57   : > { %909 = vmatmul.bf16.gmra.mxu1 %v13005_v57  ;;  %1921 = vmatpush.bf16.msrb.mxu0 %v10349_v27  ;;  %v10700_v51 = vld [vmem:[#allocation2 + $0x320] sm:$0xf]  ;;  %v10317_v53 = vor.u32 %v13050_v50, %v10316_v48  ;;  %v13082_v56 = vld [vmem:[#allocation2 + $0x12c] sm:$0xf0]  ;;  %v10398_v42 = vld [vmem:[#allocation2 + $0xd0] sm:$0xf0] }
  0x58   : > { %958 = vmatmul.bf16.gmra.mxu2 %v13005_v57  ;;  %1007 = vmatmul.bf16.gmra.mxu3 %v13005_v57  ;;  %v10701_v54 = vor.u32 %v13146_v52, %v10700_v51  ;;  %v10444_v55 = vld [vmem:[#allocation2 + $0x120] sm:$0xf]  ;;  %v13010_v58 = vld [vmem:[%s14375_s14 + $0x30] sm:$0xff]  ;;  %v13100_v51 = vld [vmem:[#allocation2 + $0x1c4] sm:$0xf]  ;;  %s10137_s14 = sshll.u32 %s17299_s17, 3 }
  0x59   : > { %2019 = vmatpush.bf16.msrb.mxu2 %v10605_v23  ;;  %2068 = vmatpush.bf16.msrb.mxu3 %v10733_v28  ;;  %v10445_v57 = vor.u32 %v13082_v56, %v10444_v55  ;;  %v10556_v59 = vld [vmem:[#allocation2 + $0x200] sm:$0xf]  ;;  %v13110_v60 = vld [vmem:[#allocation2 + $0x20c] sm:$0xf0]  ;;  %v13132_v28 = vld [vmem:[#allocation2 + $0x2c4] sm:$0xf]  ;;  %s17066_s30 = scalar_lea.vmem %s17297_s29, %s10137_s14 }
  0x5a   : > { %1970 = vmatpush.bf16.msrb.mxu1 %v10477_v31  ;;  %v10557_v61 = vor.u32 %v13110_v60, %v10556_v59  ;;  %v10300_v62 = vld [vmem:[#allocation2] sm:$0xf]  ;;  %v13046_v63 = vld [vmem:[#allocation2 + $0xc] sm:$0xf0]  ;;  %v10782_v46 = vld [vmem:[#allocation2 + $0x3d0] sm:$0xf0] }
  0x5b   : > { %1922 = vmatpush.bf16.msrb.mxu0 %v10333_v40  ;;  %v10684_v0 = vld [vmem:[#allocation2 + $0x300] sm:$0xf]  ;;  %v10301_v1 = vor.u32 %v13046_v63, %v10300_v62  ;;  %v13142_v2 = vld [vmem:[#allocation2 + $0x30c] sm:$0xf0]  ;;  %v10526_v52 = vld [vmem:[#allocation2 + $0x1d0] sm:$0xf0] }
  0x5c   : > { %v10428_v3 = vld [vmem:[#allocation2 + $0x100] sm:$0xf]  ;;  %v13078_v4 = vld [vmem:[#allocation2 + $0x10c] sm:$0xf0]  ;;  %v10685_v5 = vor.u32 %v13142_v2, %v10684_v0  ;;  %v10529_v55 = vor.u32 %v13100_v51, %v10526_v52  ;;  %v13124_v52 = vld [vmem:[#allocation2 + $0x284] sm:$0xf] }
  0x5d   : > { %2020 = vmatpush.bf16.msrb.mxu2 %v10589_v36  ;;  %2069 = vmatpush.bf16.msrb.mxu3 %v10717_v41  ;;  %v629_v20 = vld [vmem:[%s17101_s2] sm:$0xf]  ;;  %v13068_v41 = vld [vmem:[#allocation2 + $0xc4] sm:$0xf] }
  0x5e   : > { %1971 = vmatpush.bf16.msrb.mxu1 %v10461_v44  ;;  %v14388_v22 = vperm.slane %v629_v20, 0  ;;  %v14390_v24 = vperm.slane %v629_v20, 1  ;;  %v14395_v37 = vperm.slane %v629_v20, 2  ;;  %v14398_v39 = vperm.slane %v629_v20, 3 }
  0x5f   : > { %1923 = vmatpush.bf16.msrb.mxu0 %v10317_v53  ;;  %v10401_v44 = vor.u32 %v13068_v41, %v10398_v42 }
  0x61   : > { %2021 = vmatpush.bf16.msrb.mxu2 %v10573_v49  ;;  %2070 = vmatpush.bf16.msrb.mxu3 %v10701_v54 }
  0x62   : > { %1972 = vmatpush.bf16.msrb.mxu1 %v10445_v57 }
  0x63   : > { %1924 = vmatpush.bf16.msrb.mxu0 %v10301_v1 }
  0x65   : > { %2022 = vmatpush.bf16.msrb.mxu2 %v10557_v61  ;;  %2071 = vmatpush.bf16.msrb.mxu3 %v10685_v5 }
  0x66   : > { %865 = vmatmul.bf16.gmra.mxu0 %v13006_v6 }
  0x67   : > { %914 = vmatmul.bf16.gmra.mxu1 %v13006_v6  ;;  %2113 = vmatpush.bf16.msra.mxu0 %v10417_v14 }
  0x68   : > { %963 = vmatmul.bf16.gmra.mxu2 %v13006_v6  ;;  %1012 = vmatmul.bf16.gmra.mxu3 %v13006_v6  ;;  %v10429_v6 = vor.u32 %v13078_v4, %v10428_v3 }
  0x69   : > { %2211 = vmatpush.bf16.msra.mxu2 %v10673_v10  ;;  %2260 = vmatpush.bf16.msra.mxu3 %v10801_v16 }
  0x6a   : > { %1973 = vmatpush.bf16.msrb.mxu1 %v10429_v6  ;;  %v13128_v6 = vld [vmem:[#allocation2 + $0x2a4] sm:$0xf] }
  0x6b   : > { %2114 = vmatpush.bf16.msra.mxu0 %v10401_v44 }
  0x76   : > { %870 = vmatmul.bf16.gmra.mxu0 %v13007_v19 }
  0x77   : > { %919 = vmatmul.bf16.gmra.mxu1 %v13007_v19 }
  0x78   : > { %968 = vmatmul.bf16.gmra.mxu2 %v13007_v19  ;;  %1017 = vmatmul.bf16.gmra.mxu3 %v13007_v19  ;;  %v10545_v19 = vor.u32 %v13104_v17, %v10542_v18  ;;  %v13064_v17 = vld [vmem:[#allocation2 + $0xa4] sm:$0xf]  ;;  %v10382_v18 = vld [vmem:[#allocation2 + $0xb0] sm:$0xf0] }
  0x79   : > { %v10385_v20 = vor.u32 %v13064_v17, %v10382_v18 }
  0x7a   : > { %2162 = vmatpush.bf16.msra.mxu1 %v10545_v19 }
  0x7b   : > { %2115 = vmatpush.bf16.msra.mxu0 %v10385_v20 }
  0x7e   : > { %2163 = vmatpush.bf16.msra.mxu1 %v10529_v55 }
  0x86   : > { %875 = vmatmul.bf16.gmra.mxu0 %v13008_v32 }
  0x87   : > { %924 = vmatmul.bf16.gmra.mxu1 %v13008_v32 }
  0x88   : > { %973 = vmatmul.bf16.gmra.mxu2 %v13008_v32  ;;  %1022 = vmatmul.bf16.gmra.mxu3 %v13008_v32  ;;  %v10657_v32 = vor.u32 %v13132_v28, %v10654_v29  ;;  %v13096_v29 = vld [vmem:[#allocation2 + $0x1a4] sm:$0xf] }
  0x8a   : > { %2212 = vmatpush.bf16.msra.mxu2 %v10657_v32 }
  0x96   : > { %880 = vmatmul.bf16.gmra.mxu0 %v13009_v45 }
  0x97   : > { %929 = vmatmul.bf16.gmra.mxu1 %v13009_v45 }
  0x98   : > { %978 = vmatmul.bf16.gmra.mxu2 %v13009_v45  ;;  %1027 = vmatmul.bf16.gmra.mxu3 %v13009_v45  ;;  %v13164_v45 = vld [vmem:[#allocation2 + $0x3c4] sm:$0xf] }
  0x99   : > { %v10785_v48 = vor.u32 %v13164_v45, %v10782_v46 }
  0x9b   : > { %2261 = vmatpush.bf16.msra.mxu3 %v10785_v48 }
  0xa6   : > { %885 = vmatmul.bf16.gmra.mxu0 %v13010_v58 }
  0xa7   : > { %934 = vmatmul.bf16.gmra.mxu1 %v13010_v58 }
  0xa8   : > { %983 = vmatmul.bf16.gmra.mxu2 %v13010_v58  ;;  %1032 = vmatmul.bf16.gmra.mxu3 %v13010_v58 }
  0xb6   : > { %890 = vmatmul.bf16.gmra.mxu0 %v13011_v7 }
  0xb7   : > { %939 = vmatmul.bf16.gmra.mxu1 %v13011_v7 }
  0xb8   : > { %988 = vmatmul.bf16.gmra.mxu2 %v13011_v7  ;;  %1037 = vmatmul.bf16.gmra.mxu3 %v13011_v7  ;;  %v10638_v7 = vld [vmem:[#allocation2 + $0x2b0] sm:$0xf0] }
  0xb9   : > { %v10641_v10 = vor.u32 %v13128_v6, %v10638_v7  ;;  %v10750_v6 = vld [vmem:[#allocation2 + $0x390] sm:$0xf0] }
  0xbb   : > { %2213 = vmatpush.bf16.msra.mxu2 %v10641_v10 }
  0xc3   : > { %v856_v21 = vpop.f32.mrf.mxu0 }
  0xc4   : > { %v905_v23 = vpop.f32.mrf.mxu1  ;;  %v857_v25 = vadd.f32 %v856_v21, %v14388_v22  ;;  %v13160_v21 = vld [vmem:[#allocation2 + $0x3a4] sm:$0xf] }
  0xc5   : > { %v906_v26 = vadd.f32 %v905_v23, %v14390_v24  ;;  %v10766_v23 = vld [vmem:[#allocation2 + $0x3b0] sm:$0xf0] }
  0xc6   : > { %v1043_v33 = vmax.f32 %v857_v25, 0.0 }
  0xc7   : > { %v1044_v36 = vmax.f32 %v906_v26, 0.0  ;;  %v10769_v26 = vor.u32 %v13160_v21, %v10766_v23 }
  0xc9   : > { %2262 = vmatpush.bf16.msra.mxu3 %v10769_v26 }
  0xcb   : > { %v954_v27 = vpop.f32.mrf.mxu2  ;;  %v1003_v30 = vpop.f32.mrf.mxu3 }
  0xcc   : > { %v858_v31 = vpop.f32.mrf.mxu0  ;;  %v907_v35 = vpop.f32.mrf.mxu1  ;;  %v955_v49 = vadd.f32 %v954_v27, %v14395_v37  ;;  %v1004_v53 = vadd.f32 %v1003_v30, %v14398_v39  ;;  %v10510_v30 = vld [vmem:[#allocation2 + $0x1b0] sm:$0xf0] }
  0xcd   : > { %v859_v34 = vadd.f32 %v858_v31, %v14388_v22  ;;  %v908_v38 = vadd.f32 %v907_v35, %v14390_v24 }
  0xce   : > { %v1045_v61 = vmax.f32 %v955_v49, 0.0  ;;  %v1046_v63 = vmax.f32 %v1004_v53, 0.0  ;;  %v10622_v53 = vld [vmem:[#allocation2 + $0x290] sm:$0xf0] }
  0xcf   : > { %v1047_v40 = vmax.f32 %v859_v34, 0.0  ;;  %v1048_v43 = vmax.f32 %v908_v38, 0.0 }
  0xd1   : > { %v14400_v47 = vpack.c.bf16 %v1047_v40, %v1043_v33  ;;  %v14403_v50 = vpack.c.bf16 %v1048_v43, %v1044_v36  ;;  %v10513_v33 = vor.u32 %v13096_v29, %v10510_v30 }
  0xd3   : > { %v956_v54 = vpop.f32.mrf.mxu2  ;;  %1925 = vmatmul.bf16.vlgmr.msrb.gmra.mxu0 %v14400_v47  ;;  %v1005_v57 = vpop.f32.mrf.mxu3  ;;  %1974 = vmatmul.bf16.vlgmr.msrb.gmra.mxu1 %v14403_v50 }
  0xd4   : > { %v957_v56 = vadd.f32 %v956_v54, %v14395_v37  ;;  %v861_v58 = vpop.f32.mrf.mxu0  ;;  %v1006_v59 = vadd.f32 %v1005_v57, %v14398_v39  ;;  %v910_v60 = vpop.f32.mrf.mxu1  ;;  %2164 = vmatpush.bf16.msra.mxu1 %v10513_v33 }
  0xd5   : > { %v862_v3 = vadd.f32 %v861_v58, %v14388_v22  ;;  %v911_v4 = vadd.f32 %v910_v60, %v14390_v24 }
  0xd6   : > { %v1049_v62 = vmax.f32 %v957_v56, 0.0  ;;  %v1050_v0 = vmax.f32 %v1006_v59, 0.0  ;;  %v10625_v56 = vor.u32 %v13124_v52, %v10622_v53  ;;  %v10350_v52 = vld [vmem:[#allocation2 + $0x70] sm:$0xf0] }
  0xd7   : > { %v1051_v11 = vmax.f32 %v862_v3, 0.0  ;;  %v1052_v14 = vmax.f32 %v911_v4, 0.0 }
  0xd8   : > { %v14410_v1 = vpack.c.bf16 %v1049_v62, %v1045_v61  ;;  %v14412_v2 = vpack.c.bf16 %v1050_v0, %v1046_v63  ;;  %2214 = vmatpush.bf16.msra.mxu2 %v10625_v56  ;;  %v13060_v63 = vld [vmem:[#allocation2 + $0x84] sm:$0xf]  ;;  %v10366_v0 = vld [vmem:[#allocation2 + $0x90] sm:$0xf0] }
  0xd9   : > { %v10369_v4 = vor.u32 %v13060_v63, %v10366_v0  ;;  %v10734_v56 = vld [vmem:[#allocation2 + $0x370] sm:$0xf0] }
  0xda   : > { %2023 = vmatmul.bf16.vlgmr.msrb.gmra.mxu2 %v14410_v1  ;;  %2072 = vmatmul.bf16.vlgmr.msrb.gmra.mxu3 %v14412_v2 }
  0xdb   : > { %v959_v5 = vpop.f32.mrf.mxu2  ;;  %v1008_v8 = vpop.f32.mrf.mxu3  ;;  %2116 = vmatpush.bf16.msra.mxu0 %v10369_v4 }
  0xdc   : > { %v863_v9 = vpop.f32.mrf.mxu0  ;;  %v912_v13 = vpop.f32.mrf.mxu1  ;;  %v960_v27 = vadd.f32 %v959_v5, %v14395_v37  ;;  %v1009_v31 = vadd.f32 %v1008_v8, %v14398_v39  ;;  %v13156_v5 = vld [vmem:[#allocation2 + $0x384] sm:$0xf] }
  0xdd   : > { %v864_v12 = vadd.f32 %v863_v9, %v14388_v22  ;;  %v913_v15 = vadd.f32 %v912_v13, %v14390_v24  ;;  %v10753_v8 = vor.u32 %v13156_v5, %v10750_v6 }
  0xde   : > { %v1053_v41 = vmax.f32 %v960_v27, 0.0  ;;  %v1054_v43 = vmax.f32 %v1009_v31, 0.0 }
  0xdf   : > { %v1055_v16 = vmax.f32 %v864_v12, 0.0  ;;  %v1056_v19 = vmax.f32 %v913_v15, 0.0  ;;  %v10494_v12 = vld [vmem:[#allocation2 + $0x190] sm:$0xf0]  ;;  %2263 = vmatpush.bf16.msra.mxu3 %v10753_v8 }
  0xe1   : > { %v14420_v25 = vpack.c.bf16 %v1055_v16, %v1051_v11  ;;  %v14423_v28 = vpack.c.bf16 %v1056_v19, %v1052_v14  ;;  %v13092_v11 = vld [vmem:[#allocation2 + $0x184] sm:$0xf] }
  0xe2   : > { %v10497_v15 = vor.u32 %v13092_v11, %v10494_v12 }
  0xe3   : > { %v961_v32 = vpop.f32.mrf.mxu2  ;;  %1930 = vmatmul.bf16.gmra.mxu0 %v14420_v25  ;;  %v1010_v35 = vpop.f32.mrf.mxu3  ;;  %1979 = vmatmul.bf16.gmra.mxu1 %v14423_v28 }
  0xe4   : > { %v962_v34 = vadd.f32 %v961_v32, %v14395_v37  ;;  %v866_v36 = vpop.f32.mrf.mxu0  ;;  %v1011_v38 = vadd.f32 %v1010_v35, %v14398_v39  ;;  %v915_v40 = vpop.f32.mrf.mxu1  ;;  %2165 = vmatpush.bf16.msra.mxu1 %v10497_v15  ;;  %v10606_v35 = vld [vmem:[#allocation2 + $0x270] sm:$0xf0] }
  0xe5   : > { %v867_v48 = vadd.f32 %v866_v36, %v14388_v22  ;;  %v916_v49 = vadd.f32 %v915_v40, %v14390_v24 }
  0xe6   : > { %v1057_v42 = vmax.f32 %v962_v34, 0.0  ;;  %v1058_v44 = vmax.f32 %v1011_v38, 0.0  ;;  %v13120_v34 = vld [vmem:[#allocation2 + $0x264] sm:$0xf] }
  0xe7   : > { %v1059_v57 = vmax.f32 %v867_v48, 0.0  ;;  %v1060_v60 = vmax.f32 %v916_v49, 0.0  ;;  %v10609_v40 = vor.u32 %v13120_v34, %v10606_v35 }
  0xe8   : > { %v14430_v45 = vpack.c.bf16 %v1057_v42, %v1053_v41  ;;  %v14432_v46 = vpack.c.bf16 %v1058_v44, %v1054_v43 }
  0xe9   : > { %2215 = vmatpush.bf16.msra.mxu2 %v10609_v40  ;;  %v10334_v40 = vld [vmem:[#allocation2 + $0x50] sm:$0xf0] }
  0xea   : > { %2028 = vmatmul.bf16.gmra.mxu2 %v14430_v45  ;;  %2077 = vmatmul.bf16.gmra.mxu3 %v14432_v46 }
  0xeb   : > { %v964_v51 = vpop.f32.mrf.mxu2  ;;  %v1013_v54 = vpop.f32.mrf.mxu3 }
  0xec   : > { %v868_v55 = vpop.f32.mrf.mxu0  ;;  %v917_v59 = vpop.f32.mrf.mxu1  ;;  %v965_v9 = vadd.f32 %v964_v51, %v14395_v37  ;;  %v1014_v13 = vadd.f32 %v1013_v54, %v14398_v39  ;;  %v13056_v51 = vld [vmem:[#allocation2 + $0x64] sm:$0xf] }
  0xed   : > { %v869_v58 = vadd.f32 %v868_v55, %v14388_v22  ;;  %v918_v61 = vadd.f32 %v917_v59, %v14390_v24  ;;  %v10353_v54 = vor.u32 %v13056_v51, %v10350_v52  ;;  %v13152_v55 = vld [vmem:[#allocation2 + $0x364] sm:$0xf] }
  0xee   : > { %v1061_v21 = vmax.f32 %v965_v9, 0.0  ;;  %v1062_v26 = vmax.f32 %v1014_v13, 0.0 }
  0xef   : > { %v1063_v62 = vmax.f32 %v869_v58, 0.0  ;;  %v1064_v3 = vmax.f32 %v918_v61, 0.0  ;;  %v10737_v58 = vor.u32 %v13152_v55, %v10734_v56  ;;  %2117 = vmatpush.bf16.msra.mxu0 %v10353_v54  ;;  %v13088_v61 = vld [vmem:[#allocation2 + $0x164] sm:$0xf]  ;;  %v10462_v54 = vld [vmem:[#allocation2 + $0x150] sm:$0xf0] }
  0xf1   : > { %v14440_v7 = vpack.c.bf16 %v1063_v62, %v1059_v57  ;;  %v14443_v10 = vpack.c.bf16 %v1064_v3, %v1060_v60  ;;  %v10478_v62 = vld [vmem:[#allocation2 + $0x170] sm:$0xf0]  ;;  %2264 = vmatpush.bf16.msra.mxu3 %v10737_v58 }
  0xf2   : > { %v10481_v3 = vor.u32 %v13088_v61, %v10478_v62 }
  0xf3   : > { %v966_v14 = vpop.f32.mrf.mxu2  ;;  %1935 = vmatmul.bf16.gmra.mxu0 %v14440_v7  ;;  %v1015_v17 = vpop.f32.mrf.mxu3  ;;  %1984 = vmatmul.bf16.gmra.mxu1 %v14443_v10 }
  0xf4   : > { %v967_v16 = vadd.f32 %v966_v14, %v14395_v37  ;;  %v871_v18 = vpop.f32.mrf.mxu0  ;;  %v1016_v19 = vadd.f32 %v1015_v17, %v14398_v39  ;;  %v920_v20 = vpop.f32.mrf.mxu1  ;;  %2166 = vmatpush.bf16.msra.mxu1 %v10481_v3 }
  0xf5   : > { %v872_v31 = vadd.f32 %v871_v18, %v14388_v22  ;;  %v921_v32 = vadd.f32 %v920_v20, %v14390_v24  ;;  %v13116_v20 = vld [vmem:[#allocation2 + $0x244] sm:$0xf] }
  0xf6   : > { %v1065_v23 = vmax.f32 %v967_v16, 0.0  ;;  %v1066_v27 = vmax.f32 %v1016_v19, 0.0 }
  0xf7   : > { %v1067_v41 = vmax.f32 %v872_v31, 0.0  ;;  %v1068_v44 = vmax.f32 %v921_v32, 0.0 }
  0xf8   : > { %v14450_v29 = vpack.c.bf16 %v1065_v23, %v1061_v21  ;;  %v14452_v30 = vpack.c.bf16 %v1066_v27, %v1062_v26  ;;  %v10590_v21 = vld [vmem:[#allocation2 + $0x250] sm:$0xf0] }
  0xf9   : > { %v10593_v27 = vor.u32 %v13116_v20, %v10590_v21 }
  0xfa   : > { %2033 = vmatmul.bf16.gmra.mxu2 %v14450_v29  ;;  %2082 = vmatmul.bf16.gmra.mxu3 %v14452_v30 }
  0xfb   : > { %v969_v33 = vpop.f32.mrf.mxu2  ;;  %v1018_v36 = vpop.f32.mrf.mxu3  ;;  %2216 = vmatpush.bf16.msra.mxu2 %v10593_v27 }
  0xfc   : > { %v873_v38 = vpop.f32.mrf.mxu0  ;;  %v922_v43 = vpop.f32.mrf.mxu1  ;;  %v970_v59 = vadd.f32 %v969_v33, %v14395_v37  ;;  %v1019_v63 = vadd.f32 %v1018_v36, %v14398_v39 }
  0xfd   : > { %v874_v42 = vadd.f32 %v873_v38, %v14388_v22  ;;  %v923_v48 = vadd.f32 %v922_v43, %v14390_v24  ;;  %v13052_v38 = vld [vmem:[#allocation2 + $0x44] sm:$0xf] }
  0xfe   : > { %v1069_v11 = vmax.f32 %v970_v59, 0.0  ;;  %v1070_v13 = vmax.f32 %v1019_v63, 0.0  ;;  %v13148_v43 = vld [vmem:[#allocation2 + $0x344] sm:$0xf] }
  0xff   : > { %v1071_v49 = vmax.f32 %v874_v42, 0.0  ;;  %v1072_v53 = vmax.f32 %v923_v48, 0.0  ;;  %v10337_v42 = vor.u32 %v13052_v38, %v10334_v40  ;;  %v13144_v38 = vld [vmem:[#allocation2 + $0x324] sm:$0xf]  ;;  %v10702_v40 = vld [vmem:[#allocation2 + $0x330] sm:$0xf0] }
 0x101   : > { %v14460_v57 = vpack.c.bf16 %v1071_v49, %v1067_v41  ;;  %v14463_v60 = vpack.c.bf16 %v1072_v53, %v1068_v44  ;;  %v10718_v44 = vld [vmem:[#allocation2 + $0x350] sm:$0xf0]  ;;  %2118 = vmatpush.bf16.msra.mxu0 %v10337_v42  ;;  %v13084_v53 = vld [vmem:[#allocation2 + $0x144] sm:$0xf]  ;;  %v10705_v42 = vor.u32 %v13144_v38, %v10702_v40 }
 0x102   : > { %v10721_v49 = vor.u32 %v13148_v43, %v10718_v44  ;;  %v10465_v58 = vor.u32 %v13084_v53, %v10462_v54  ;;  %v10430_v38 = vld [vmem:[#allocation2 + $0x110] sm:$0xf0] }
 0x103   : > { %v971_v0 = vpop.f32.mrf.mxu2  ;;  %1940 = vmatmul.bf16.gmra.mxu0 %v14460_v57  ;;  %v1020_v5 = vpop.f32.mrf.mxu3  ;;  %1989 = vmatmul.bf16.gmra.mxu1 %v14463_v60 }
 0x104   : > { %v972_v4 = vadd.f32 %v971_v0, %v14395_v37  ;;  %v876_v6 = vpop.f32.mrf.mxu0  ;;  %v1021_v8 = vadd.f32 %v1020_v5, %v14398_v39  ;;  %v925_v9 = vpop.f32.mrf.mxu1  ;;  %2265 = vmatpush.bf16.msra.mxu3 %v10721_v49  ;;  %2167 = vmatpush.bf16.msra.mxu1 %v10465_v58  ;;  %v13080_v49 = vld [vmem:[#allocation2 + $0x124] sm:$0xf] }
 0x105   : > { %v877_v17 = vadd.f32 %v876_v6, %v14388_v22  ;;  %v926_v18 = vadd.f32 %v925_v9, %v14390_v24 }
 0x106   : > { %v1073_v12 = vmax.f32 %v972_v4, 0.0  ;;  %v1074_v14 = vmax.f32 %v1021_v8, 0.0 }
 0x107   : > { %v1075_v31 = vmax.f32 %v877_v17, 0.0  ;;  %v1076_v34 = vmax.f32 %v926_v18, 0.0  ;;  %v10574_v17 = vld [vmem:[#allocation2 + $0x230] sm:$0xf0] }
 0x108   : > { %v14470_v15 = vpack.c.bf16 %v1073_v12, %v1069_v11  ;;  %v14472_v16 = vpack.c.bf16 %v1074_v14, %v1070_v13  ;;  %v13112_v14 = vld [vmem:[#allocation2 + $0x224] sm:$0xf]  ;;  %2266 = vmatpush.bf16.msra.mxu3 %v10705_v42 }
 0x109   : > { %v10577_v20 = vor.u32 %v13112_v14, %v10574_v17  ;;  %v13108_v14 = vld [vmem:[#allocation2 + $0x204] sm:$0xf]  ;;  %v10558_v17 = vld [vmem:[#allocation2 + $0x210] sm:$0xf0] }
 0x10a   : > { %2038 = vmatmul.bf16.gmra.mxu2 %v14470_v15  ;;  %2087 = vmatmul.bf16.gmra.mxu3 %v14472_v16 }
 0x10b   : > { %v974_v19 = vpop.f32.mrf.mxu2  ;;  %v1023_v23 = vpop.f32.mrf.mxu3  ;;  %2217 = vmatpush.bf16.msra.mxu2 %v10577_v20 }
 0x10c   : > { %v878_v26 = vpop.f32.mrf.mxu0  ;;  %v927_v33 = vpop.f32.mrf.mxu1  ;;  %v975_v51 = vadd.f32 %v974_v19, %v14395_v37  ;;  %v1024_v55 = vadd.f32 %v1023_v23, %v14398_v39 }
 0x10d   : > { %v879_v32 = vadd.f32 %v878_v26, %v14388_v22  ;;  %v928_v35 = vadd.f32 %v927_v33, %v14390_v24  ;;  %v13048_v33 = vld [vmem:[#allocation2 + $0x24] sm:$0xf] }
 0x10e   : > { %v1077_v3 = vmax.f32 %v975_v51, 0.0  ;;  %v1078_v5 = vmax.f32 %v1024_v55, 0.0  ;;  %v10446_v51 = vld [vmem:[#allocation2 + $0x130] sm:$0xf0] }
 0x10f   : > { %v1079_v36 = vmax.f32 %v879_v32, 0.0  ;;  %v1080_v41 = vmax.f32 %v928_v35, 0.0  ;;  %v10449_v55 = vor.u32 %v13080_v49, %v10446_v51 }
 0x111   : > { %v14480_v48 = vpack.c.bf16 %v1079_v36, %v1075_v31  ;;  %v14483_v52 = vpack.c.bf16 %v1080_v41, %v1076_v34  ;;  %v10318_v34 = vld [vmem:[#allocation2 + $0x30] sm:$0xf0]  ;;  %2168 = vmatpush.bf16.msra.mxu1 %v10449_v55 }
 0x112   : > { %v10321_v36 = vor.u32 %v13048_v33, %v10318_v34 }
 0x113   : > { %v976_v56 = vpop.f32.mrf.mxu2  ;;  %1945 = vmatmul.bf16.gmra.mxu0 %v14480_v48  ;;  %v1025_v61 = vpop.f32.mrf.mxu3  ;;  %1994 = vmatmul.bf16.gmra.mxu1 %v14483_v52 }
 0x114   : > { %v977_v59 = vadd.f32 %v976_v56, %v14395_v37  ;;  %v881_v62 = vpop.f32.mrf.mxu0  ;;  %v1026_v63 = vadd.f32 %v1025_v61, %v14398_v39  ;;  %v930_v0 = vpop.f32.mrf.mxu1  ;;  %2119 = vmatpush.bf16.msra.mxu0 %v10321_v36  ;;  %v13076_v36 = vld [vmem:[#allocation2 + $0x104] sm:$0xf] }
 0x115   : > { %v882_v11 = vadd.f32 %v881_v62, %v14388_v22  ;;  %v931_v12 = vadd.f32 %v930_v0, %v14390_v24 }
 0x116   : > { %v1081_v4 = vmax.f32 %v977_v59, 0.0  ;;  %v1082_v6 = vmax.f32 %v1026_v63, 0.0 }
 0x117   : > { %v1083_v21 = vmax.f32 %v882_v11, 0.0  ;;  %v1084_v27 = vmax.f32 %v931_v12, 0.0 }
 0x118   : > { %v14490_v8 = vpack.c.bf16 %v1081_v4, %v1077_v3  ;;  %v14492_v9 = vpack.c.bf16 %v1082_v6, %v1078_v5 }
 0x11a   : > { %2043 = vmatmul.bf16.gmra.mxu2 %v14490_v8  ;;  %2092 = vmatmul.bf16.gmra.mxu3 %v14492_v9 }
 0x11b   : > { %v979_v13 = vpop.f32.mrf.mxu2  ;;  %v1028_v18 = vpop.f32.mrf.mxu3 }
 0x11c   : > { %v883_v19 = vpop.f32.mrf.mxu0  ;;  %v932_v26 = vpop.f32.mrf.mxu1  ;;  %v980_v43 = vadd.f32 %v979_v13, %v14395_v37  ;;  %v1029_v53 = vadd.f32 %v1028_v18, %v14398_v39  ;;  %v13044_v18 = vld [vmem:[#allocation2 + $0x4] sm:$0xf] }
 0x11d   : > { %v884_v23 = vadd.f32 %v883_v19, %v14388_v22  ;;  %v933_v31 = vadd.f32 %v932_v26, %v14390_v24  ;;  %v13140_v26 = vld [vmem:[#allocation2 + $0x304] sm:$0xf] }
 0x11e   : > { %v1085_v63 = vmax.f32 %v980_v43, 0.0  ;;  %v1086_v3 = vmax.f32 %v1029_v53, 0.0  ;;  %v10433_v43 = vor.u32 %v13076_v36, %v10430_v38 }
 0x11f   : > { %v1087_v32 = vmax.f32 %v884_v23, 0.0  ;;  %v1088_v35 = vmax.f32 %v933_v31, 0.0  ;;  %v10302_v23 = vld [vmem:[#allocation2 + $0x10] sm:$0xf0] }
 0x120   : > { %v10305_v34 = vor.u32 %v13044_v18, %v10302_v23  ;;  %2169 = vmatpush.bf16.msra.mxu1 %v10433_v43  ;;  %v10420_v23 = vld [vmem:[#allocation2 + $0xe8] sm:$0xf] }
 0x121   : > { %v14500_v41 = vpack.c.bf16 %v1087_v32, %v1083_v21  ;;  %v14503_v44 = vpack.c.bf16 %v1088_v35, %v1084_v27  ;;  %v10561_v21 = vor.u32 %v13108_v14, %v10558_v17  ;;  %v10686_v27 = vld [vmem:[#allocation2 + $0x310] sm:$0xf0] }
 0x122   : > { %v10689_v35 = vor.u32 %v13140_v26, %v10686_v27  ;;  %2120 = vmatpush.bf16.msra.mxu0 %v10305_v34  ;;  %v13171_v34 = vld [vmem:[#allocation2 + $0x3f4] sm:$0xf0] }
 0x123   : > { %v981_v54 = vpop.f32.mrf.mxu2  ;;  %1950 = vmatmul.bf16.gmra.mxu0 %v14500_v41  ;;  %v1030_v58 = vpop.f32.mrf.mxu3  ;;  %1999 = vmatmul.bf16.gmra.mxu1 %v14503_v44 }
 0x124   : > { %v982_v56 = vadd.f32 %v981_v54, %v14395_v37  ;;  %v886_v59 = vpop.f32.mrf.mxu0  ;;  %v1031_v61 = vadd.f32 %v1030_v58, %v14398_v39  ;;  %v935_v62 = vpop.f32.mrf.mxu1  ;;  %2218 = vmatpush.bf16.msra.mxu2 %v10561_v21  ;;  %2267 = vmatpush.bf16.msra.mxu3 %v10689_v35  ;;  %v13139_v21 = vld [vmem:[#allocation2 + $0x2f4] sm:$0xf0] }
 0x125   : > { %v887_v11 = vadd.f32 %v886_v59, %v14388_v22  ;;  %v936_v12 = vadd.f32 %v935_v62, %v14390_v24 }
 0x126   : > { %v1089_v0 = vmax.f32 %v982_v56, 0.0  ;;  %v1090_v4 = vmax.f32 %v1031_v61, 0.0 }
 0x127   : > { %v1091_v31 = vmax.f32 %v887_v11, 0.0  ;;  %v1092_v40 = vmax.f32 %v936_v12, 0.0 }
 0x128   : > { %v14510_v5 = vpack.c.bf16 %v1089_v0, %v1085_v63  ;;  %v14512_v6 = vpack.c.bf16 %v1090_v4, %v1086_v3 }
 0x12a   : > { %2048 = vmatmul.bf16.gmra.mxu2 %v14510_v5  ;;  %2097 = vmatmul.bf16.gmra.mxu3 %v14512_v6 }
 0x12b   : > { %v984_v13 = vpop.f32.mrf.mxu2  ;;  %v1033_v19 = vpop.f32.mrf.mxu3 }
 0x12c   : > { %v888_v20 = vpop.f32.mrf.mxu0  ;;  %v937_v33 = vpop.f32.mrf.mxu1  ;;  %v985_v54 = vadd.f32 %v984_v13, %v14395_v37  ;;  %v1034_v56 = vadd.f32 %v1033_v19, %v14398_v39 }
 0x12d   : > { %v889_v32 = vadd.f32 %v888_v20, %v14388_v22  ;;  %v938_v42 = vadd.f32 %v937_v33, %v14390_v24  ;;  %v10676_v20 = vld [vmem:[#allocation2 + $0x2e8] sm:$0xf] }
 0x12e   : > { %v1093_v3 = vmax.f32 %v985_v54, 0.0  ;;  %v1094_v11 = vmax.f32 %v1034_v56, 0.0  ;;  %v10804_v33 = vld [vmem:[#allocation2 + $0x3e8] sm:$0xf] }
 0x12f   : > { %v1095_v49 = vmax.f32 %v889_v32, 0.0  ;;  %v1096_v51 = vmax.f32 %v938_v42, 0.0  ;;  %v13075_v32 = vld [vmem:[#allocation2 + $0xf4] sm:$0xf0]  ;;  %v10805_v42 = vor.u32 %v13171_v34, %v10804_v33 }
 0x130   : > { %v13167_v33 = vld [vmem:[#allocation2 + $0x3d4] sm:$0xf0] }
 0x131   : > { %v14520_v53 = vpack.c.bf16 %v1095_v49, %v1091_v31  ;;  %v14523_v55 = vpack.c.bf16 %v1096_v51, %v1092_v40  ;;  %v10677_v31 = vor.u32 %v13139_v21, %v10676_v20  ;;  %v10421_v40 = vor.u32 %v13075_v32, %v10420_v23  ;;  %2456 = vmatpush.bf16.msrb.mxu3 %v10805_v42  ;;  %v14555_v20 = vld [vmem:[%s17103_s4] sm:$0xf]  ;;  %v13135_v23 = vld [vmem:[#allocation2 + $0x2d4] sm:$0xf0]  ;;  %v10788_v32 = vld [vmem:[#allocation2 + $0x3c8] sm:$0xf] }
 0x132   : > { %v10532_v42 = vld [vmem:[#allocation2 + $0x1c8] sm:$0xf] }
 0x133   : > { %v986_v58 = vpop.f32.mrf.mxu2  ;;  %1955 = vmatmul.bf16.gmra.mxu0 %v14520_v53  ;;  %v1035_v61 = vpop.f32.mrf.mxu3  ;;  %2004 = vmatmul.bf16.gmra.mxu1 %v14523_v55 }
 0x134   : > { %v987_v59 = vadd.f32 %v986_v58, %v14395_v37  ;;  %v891_v62 = vpop.f32.mrf.mxu0  ;;  %v1036_v63 = vadd.f32 %v1035_v61, %v14398_v39  ;;  %v940_v0 = vpop.f32.mrf.mxu1  ;;  %2407 = vmatpush.bf16.msrb.mxu2 %v10677_v31  ;;  %2309 = vmatpush.bf16.msrb.mxu0 %v10421_v40  ;;  %v10548_v61 = vld [vmem:[#allocation2 + $0x1e8] sm:$0xf]  ;;  %v13071_v31 = vld [vmem:[#allocation2 + $0xd4] sm:$0xf0] }
 0x135   : > { %v892_v17 = vadd.f32 %v891_v62, %v14388_v22  ;;  %v941_v18 = vadd.f32 %v940_v0, %v14390_v24  ;;  %v13107_v62 = vld [vmem:[#allocation2 + $0x1f4] sm:$0xf0] }
 0x136   : > { %v1097_v4 = vmax.f32 %v987_v59, 0.0  ;;  %v1098_v12 = vmax.f32 %v1036_v63, 0.0  ;;  %v10549_v0 = vor.u32 %v13107_v62, %v10548_v61 }
 0x137   : > { %v1099_v35 = vmax.f32 %v892_v17, 0.0  ;;  %v1100_v43 = vmax.f32 %v941_v18, 0.0 }
 0x138   : > { %v14530_v13 = vpack.c.bf16 %v1097_v4, %v1093_v3  ;;  %v14532_v14 = vpack.c.bf16 %v1098_v12, %v1094_v11  ;;  %2358 = vmatpush.bf16.msrb.mxu1 %v10549_v0  ;;  %v10388_v0 = vld [vmem:[#allocation2 + $0xa8] sm:$0xf] }
 0x13a   : > { %2053 = vmatmul.bf16.gmra.mxu2 %v14530_v13  ;;  %2102 = vmatmul.bf16.gmra.mxu3 %v14532_v14 }
 0x13b   : > { %v989_v19 = vpop.f32.mrf.mxu2  ;;  %v1038_v26 = vpop.f32.mrf.mxu3 }
 0x13c   : > { %v893_v27 = vpop.f32.mrf.mxu0  ;;  %v942_v38 = vpop.f32.mrf.mxu1  ;;  %v990_v58 = vadd.f32 %v989_v19, %v14395_v37 }
 0x13d   : > { %v894_v36 = vadd.f32 %v893_v27, %v14388_v22  ;;  %v943_v49 = vadd.f32 %v942_v38, %v14390_v24  ;;  %v1039_v22 = vadd.f32 %v1038_v26, %v14398_v39  ;;  %v10404_v26 = vld [vmem:[#allocation2 + $0xc8] sm:$0xf] }
 0x13e   : > { %v1101_v11 = vmax.f32 %v990_v58, 0.0  ;;  %v10405_v34 = vor.u32 %v13071_v31, %v10404_v26 }
 0x13f   : > { %v1103_v51 = vmax.f32 %v894_v36, 0.0  ;;  %v1104_v54 = vmax.f32 %v943_v49, 0.0  ;;  %v1102_v17 = vmax.f32 %v1039_v22, 0.0  ;;  %v10644_v22 = vld [vmem:[#allocation2 + $0x2a8] sm:$0xf] }
 0x140   : > { %2310 = vmatpush.bf16.msrb.mxu0 %v10405_v34  ;;  %v13099_v34 = vld [vmem:[#allocation2 + $0x1b4] sm:$0xf0] }
 0x141   : > { %v14540_v56 = vpack.c.bf16 %v1103_v51, %v1099_v35  ;;  %v14543_v59 = vpack.c.bf16 %v1104_v54, %v1100_v43  ;;  %v10789_v35 = vor.u32 %v13167_v33, %v10788_v32  ;;  %v13103_v43 = vld [vmem:[#allocation2 + $0x1d4] sm:$0xf0]  ;;  %v10516_v33 = vld [vmem:[#allocation2 + $0x1a8] sm:$0xf] }
 0x142   : > { %v10533_v51 = vor.u32 %v13103_v43, %v10532_v42 }
 0x143   : > { %v991_v63 = vpop.f32.mrf.mxu2  ;;  %1960 = vmatmul.bf16.gmra.mxu0 %v14540_v56  ;;  %v1040_v3 = vpop.f32.mrf.mxu3  ;;  %2009 = vmatmul.bf16.gmra.mxu1 %v14543_v59 }
 0x144   : > { %v992_v24 = vadd.f32 %v991_v63, %v14395_v37  ;;  %v1041_v4 = vadd.f32 %v1040_v3, %v14398_v39  ;;  %v14562_v37 = vperm.slane %v14555_v20, 0  ;;  %v10660_v39 = vld [vmem:[#allocation2 + $0x2c8] sm:$0xf]  ;;  %2457 = vmatpush.bf16.msrb.mxu3 %v10789_v35  ;;  %2359 = vmatpush.bf16.msrb.mxu1 %v10533_v51  ;;  %v13131_v63 = vld [vmem:[#allocation2 + $0x2b4] sm:$0xf0] }
 0x145   : > { %v10661_v27 = vor.u32 %v13135_v23, %v10660_v39  ;;  %v10645_v3 = vor.u32 %v13131_v63, %v10644_v22 }
 0x146   : > { %v1105_v12 = vmax.f32 %v992_v24, 0.0  ;;  %v1106_v18 = vmax.f32 %v1041_v4, 0.0  ;;  %v13067_v4 = vld [vmem:[#allocation2 + $0xb4] sm:$0xf0] }
 0x147   : > { %2408 = vmatpush.bf16.msrb.mxu2 %v10661_v27  ;;  %v10389_v39 = vor.u32 %v13067_v4, %v10388_v0  ;;  %v10628_v0 = vld [vmem:[#allocation2 + $0x288] sm:$0xf] }
 0x148   : > { %v14550_v19 = vpack.c.bf16 %v1105_v12, %v1101_v11  ;;  %v14557_v21 = vpack.c.bf16 %v1106_v18, %v1102_v17  ;;  %v10772_v11 = vld [vmem:[#allocation2 + $0x3a8] sm:$0xf]  ;;  %v13163_v12 = vld [vmem:[#allocation2 + $0x3b4] sm:$0xf0] }
 0x149   : > { %v10773_v23 = vor.u32 %v13163_v12, %v10772_v11  ;;  %2311 = vmatpush.bf16.msrb.mxu0 %v10389_v39  ;;  %v13063_v11 = vld [vmem:[#allocation2 + $0x94] sm:$0xf0]  ;;  %v10756_v12 = vld [vmem:[#allocation2 + $0x388] sm:$0xf] }
 0x14a   : > { %2058 = vmatmul.bf16.gmra.mxu2 %v14550_v19  ;;  %2107 = vmatmul.bf16.gmra.mxu3 %v14557_v21 }
 0x14b   : > { %2409 = vmatpush.bf16.msrb.mxu2 %v10645_v3  ;;  %2458 = vmatpush.bf16.msrb.mxu3 %v10773_v23  ;;  %v10372_v3 = vld [vmem:[#allocation2 + $0x88] sm:$0xf] }
 0x14c   : > { %v10373_v23 = vor.u32 %v13063_v11, %v10372_v3  ;;  %v10356_v11 = vld [vmem:[#allocation2 + $0x68] sm:$0xf] }
 0x14e   : > { %2312 = vmatpush.bf16.msrb.mxu0 %v10373_v23 }
 0x150   : > { %v1926_v36 = vpop.f32.mrf.mxu0  ;;  %v1975_v40 = vpop.f32.mrf.mxu1 }
 0x151   : > { %v1927_v38 = vadd.f32 %v1926_v36, %v14562_v37  ;;  %v10517_v36 = vor.u32 %v13099_v34, %v10516_v33  ;;  %v10500_v34 = vld [vmem:[#allocation2 + $0x188] sm:$0xf] }
 0x153   : > { %v1976_v49 = vadd.f32 %v1975_v40, %v1927_v38  ;;  %2121 = vmatmul.bf16.vlgmr.msra.gmra.mxu0 %v14400_v47  ;;  %2170 = vmatmul.bf16.vlgmr.msra.gmra.mxu1 %v14403_v50 }
 0x154   : > { %2360 = vmatpush.bf16.msrb.mxu1 %v10517_v36  ;;  %v13095_v36 = vld [vmem:[#allocation2 + $0x194] sm:$0xf0] }
 0x158   : > { %v1928_v54 = vpop.f32.mrf.mxu0  ;;  %v1977_v61 = vpop.f32.mrf.mxu1 }
 0x159   : > { %v1929_v58 = vadd.f32 %v1928_v54, %v14562_v37 }
 0x15a   : > { %2219 = vmatmul.bf16.vlgmr.msra.gmra.mxu2 %v14410_v1  ;;  %2268 = vmatmul.bf16.vlgmr.msra.gmra.mxu3 %v14412_v2 }
 0x15b   : > { %v1978_v62 = vadd.f32 %v1977_v61, %v1929_v58 }
 0x15d   : > { %v2024_v24 = vpop.f32.mrf.mxu2  ;;  %v2073_v18 = vpop.f32.mrf.mxu3 }
 0x15e   : > { %v2025_v17 = vadd.f32 %v2024_v24, %v1976_v49  ;;  %v13127_v24 = vld [vmem:[#allocation2 + $0x294] sm:$0xf0] }
 0x160   : > { %v2074_v26 = vadd.f32 %v2073_v18, %v2025_v17  ;;  %v1931_v27 = vpop.f32.mrf.mxu0  ;;  %v1980_v32 = vpop.f32.mrf.mxu1  ;;  %v13159_v17 = vld [vmem:[#allocation2 + $0x394] sm:$0xf0] }
 0x161   : > { %v1932_v31 = vadd.f32 %v1931_v27, %v14562_v37 }
 0x162   : > { %v2701_v58 = vmax.f32 %v2074_v26, 0.0  ;;  %v10757_v26 = vor.u32 %v13159_v17, %v10756_v12  ;;  %v13059_v17 = vld [vmem:[#allocation2 + $0x74] sm:$0xf0] }
 0x163   : > { %v1981_v35 = vadd.f32 %v1980_v32, %v1932_v31  ;;  %2126 = vmatmul.bf16.gmra.mxu0 %v14420_v25  ;;  %2175 = vmatmul.bf16.gmra.mxu1 %v14423_v28 }
 0x164   : > { %2459 = vmatpush.bf16.msrb.mxu3 %v10757_v26 }
 0x165   : > { %v2026_v38 = vpop.f32.mrf.mxu2  ;;  %v2075_v42 = vpop.f32.mrf.mxu3 }
 0x166   : > { %v2027_v40 = vadd.f32 %v2026_v38, %v1978_v62  ;;  %v10629_v62 = vor.u32 %v13127_v24, %v10628_v0 }
 0x168   : > { %v2076_v43 = vadd.f32 %v2075_v42, %v2027_v40  ;;  %v1933_v49 = vpop.f32.mrf.mxu0  ;;  %v1982_v54 = vpop.f32.mrf.mxu1  ;;  %2410 = vmatpush.bf16.msrb.mxu2 %v10629_v62  ;;  %v10501_v40 = vor.u32 %v13095_v36, %v10500_v34  ;;  %v13123_v62 = vld [vmem:[#allocation2 + $0x274] sm:$0xf0] }
 0x169   : > { %v1934_v51 = vadd.f32 %v1933_v49, %v14562_v37 }
 0x16a   : > { %v2705_v61 = vmax.f32 %v2076_v43, 0.0  ;;  %2224 = vmatmul.bf16.gmra.mxu2 %v14430_v45  ;;  %2273 = vmatmul.bf16.gmra.mxu3 %v14432_v46 }
 0x16b   : > { %v1983_v22 = vadd.f32 %v1982_v54, %v1934_v51  ;;  %2361 = vmatpush.bf16.msrb.mxu1 %v10501_v40  ;;  %v10484_v40 = vld [vmem:[#allocation2 + $0x168] sm:$0xf] }
 0x16c   : > { %v14576_v63 = vpack.c.bf16 %v2705_v61, %v2701_v58 }
 0x16d   : > { %v2029_v4 = vpop.f32.mrf.mxu2  ;;  %v2078_v39 = vpop.f32.mrf.mxu3 }
 0x16e   : > { %v2030_v18 = vadd.f32 %v2029_v4, %v1981_v35  ;;  %v10612_v4 = vld [vmem:[#allocation2 + $0x268] sm:$0xf] }
 0x170   : > { %v2079_v27 = vadd.f32 %v2078_v39, %v2030_v18  ;;  %v1936_v31 = vpop.f32.mrf.mxu0  ;;  %v1985_v33 = vpop.f32.mrf.mxu1  ;;  %v10740_v18 = vld [vmem:[#allocation2 + $0x368] sm:$0xf]  ;;  %v13155_v39 = vld [vmem:[#allocation2 + $0x374] sm:$0xf0] }
 0x171   : > { %v1937_v32 = vadd.f32 %v1936_v31, %v14562_v37  ;;  %v10357_v31 = vor.u32 %v13059_v17, %v10356_v11  ;;  %v13119_v17 = vld [vmem:[#allocation2 + $0x254] sm:$0xf0] }
 0x172   : > { %v2709_v61 = vmax.f32 %v2079_v27, 0.0  ;;  %v10741_v27 = vor.u32 %v13155_v39, %v10740_v18  ;;  %v10340_v18 = vld [vmem:[#allocation2 + $0x48] sm:$0xf] }
 0x173   : > { %v1986_v38 = vadd.f32 %v1985_v33, %v1937_v32  ;;  %2131 = vmatmul.bf16.gmra.mxu0 %v14440_v7  ;;  %2180 = vmatmul.bf16.gmra.mxu1 %v14443_v10 }
 0x174   : > { %2313 = vmatpush.bf16.msrb.mxu0 %v10357_v31  ;;  %2460 = vmatpush.bf16.msrb.mxu3 %v10741_v27  ;;  %v13151_v31 = vld [vmem:[#allocation2 + $0x354] sm:$0xf0] }
 0x175   : > { %v2031_v35 = vpop.f32.mrf.mxu2  ;;  %v2080_v43 = vpop.f32.mrf.mxu3 }
 0x176   : > { %v2032_v42 = vadd.f32 %v2031_v35, %v1983_v22  ;;  %v10613_v22 = vor.u32 %v13123_v62, %v10612_v4  ;;  %v13091_v35 = vld [vmem:[#allocation2 + $0x174] sm:$0xf0] }
 0x178   : > { %v2081_v49 = vadd.f32 %v2080_v43, %v2032_v42  ;;  %v1938_v51 = vpop.f32.mrf.mxu0  ;;  %v1987_v58 = vpop.f32.mrf.mxu1  ;;  %2411 = vmatpush.bf16.msrb.mxu2 %v10613_v22  ;;  %v10485_v43 = vor.u32 %v13091_v35, %v10484_v40  ;;  %v10596_v22 = vld [vmem:[#allocation2 + $0x248] sm:$0xf] }
 0x179   : > { %v1939_v54 = vadd.f32 %v1938_v51, %v14562_v37 }
 0x17a   : > { %v2713_v0 = vmax.f32 %v2081_v49, 0.0  ;;  %2229 = vmatmul.bf16.gmra.mxu2 %v14450_v29  ;;  %2278 = vmatmul.bf16.gmra.mxu3 %v14452_v30 }
 0x17b   : > { %v1988_v24 = vadd.f32 %v1987_v58, %v1939_v54  ;;  %2362 = vmatpush.bf16.msrb.mxu1 %v10485_v43 }
 0x17c   : > { %v14584_v3 = vpack.c.bf16 %v2713_v0, %v2709_v61 }
 0x17d   : > { %v2034_v12 = vpop.f32.mrf.mxu2  ;;  %v2083_v26 = vpop.f32.mrf.mxu3 }
 0x17e   : > { %v2035_v23 = vadd.f32 %v2034_v12, %v1986_v38 }
 0x180   : > { %v2084_v32 = vadd.f32 %v2083_v26, %v2035_v23  ;;  %v1941_v33 = vpop.f32.mrf.mxu0  ;;  %v1990_v36 = vpop.f32.mrf.mxu1  ;;  %v13055_v23 = vld [vmem:[#allocation2 + $0x54] sm:$0xf0]  ;;  %v10724_v26 = vld [vmem:[#allocation2 + $0x348] sm:$0xf] }
 0x181   : > { %v1942_v34 = vadd.f32 %v1941_v33, %v14562_v37 }
 0x182   : > { %v2717_v4 = vmax.f32 %v2084_v32, 0.0  ;;  %v10725_v32 = vor.u32 %v13151_v31, %v10724_v26  ;;  %v13115_v26 = vld [vmem:[#allocation2 + $0x234] sm:$0xf0]  ;;  %v10324_v31 = vld [vmem:[#allocation2 + $0x28] sm:$0xf] }
 0x183   : > { %v1991_v42 = vadd.f32 %v1990_v36, %v1942_v34  ;;  %2136 = vmatmul.bf16.gmra.mxu0 %v14460_v57  ;;  %2185 = vmatmul.bf16.gmra.mxu1 %v14463_v60  ;;  %v10341_v34 = vor.u32 %v13055_v23, %v10340_v18  ;;  %v10580_v23 = vld [vmem:[#allocation2 + $0x228] sm:$0xf] }
 0x184   : > { %2461 = vmatpush.bf16.msrb.mxu3 %v10725_v32  ;;  %v13147_v32 = vld [vmem:[#allocation2 + $0x334] sm:$0xf0] }
 0x185   : > { %v2036_v38 = vpop.f32.mrf.mxu2  ;;  %v2085_v51 = vpop.f32.mrf.mxu3  ;;  %2314 = vmatpush.bf16.msrb.mxu0 %v10341_v34  ;;  %v10708_v34 = vld [vmem:[#allocation2 + $0x328] sm:$0xf] }
 0x186   : > { %v2037_v49 = vadd.f32 %v2036_v38, %v1988_v24  ;;  %v10597_v24 = vor.u32 %v13119_v17, %v10596_v22  ;;  %v10468_v38 = vld [vmem:[#allocation2 + $0x148] sm:$0xf] }
 0x188   : > { %v2086_v54 = vadd.f32 %v2085_v51, %v2037_v49  ;;  %v1943_v58 = vpop.f32.mrf.mxu0  ;;  %v1992_v0 = vpop.f32.mrf.mxu1  ;;  %2412 = vmatpush.bf16.msrb.mxu2 %v10597_v24  ;;  %v13087_v49 = vld [vmem:[#allocation2 + $0x154] sm:$0xf0] }
 0x189   : > { %v1944_v61 = vadd.f32 %v1943_v58, %v14562_v37 }
 0x18a   : > { %v2721_v62 = vmax.f32 %v2086_v54, 0.0  ;;  %2234 = vmatmul.bf16.gmra.mxu2 %v14470_v15  ;;  %2283 = vmatmul.bf16.gmra.mxu3 %v14472_v16  ;;  %v10469_v54 = vor.u32 %v13087_v49, %v10468_v38 }
 0x18b   : > { %v1993_v11 = vadd.f32 %v1992_v0, %v1944_v61 }
 0x18c   : > { %v14592_v12 = vpack.c.bf16 %v2721_v62, %v2717_v4  ;;  %2363 = vmatpush.bf16.msrb.mxu1 %v10469_v54 }
 0x18d   : > { %v2039_v39 = vpop.f32.mrf.mxu2  ;;  %v2088_v33 = vpop.f32.mrf.mxu3 }
 0x18e   : > { %v2040_v27 = vadd.f32 %v2039_v39, %v1991_v42 }
 0x190   : > { %v2089_v36 = vadd.f32 %v2088_v33, %v2040_v27  ;;  %v1946_v40 = vpop.f32.mrf.mxu0  ;;  %v1995_v43 = vpop.f32.mrf.mxu1  ;;  %v13051_v33 = vld [vmem:[#allocation2 + $0x34] sm:$0xf0] }
 0x191   : > { %v1947_v35 = vadd.f32 %v1946_v40, %v14562_v37 }
 0x192   : > { %v2725_v17 = vmax.f32 %v2089_v36, 0.0  ;;  %v10709_v36 = vor.u32 %v13147_v32, %v10708_v34  ;;  %v10564_v34 = vld [vmem:[#allocation2 + $0x208] sm:$0xf]  ;;  %v13111_v32 = vld [vmem:[#allocation2 + $0x214] sm:$0xf0] }
 0x193   : > { %v1996_v51 = vadd.f32 %v1995_v43, %v1947_v35  ;;  %2141 = vmatmul.bf16.gmra.mxu0 %v14480_v48  ;;  %2190 = vmatmul.bf16.gmra.mxu1 %v14483_v52  ;;  %v10325_v43 = vor.u32 %v13051_v33, %v10324_v31 }
 0x194   : > { %2462 = vmatpush.bf16.msrb.mxu3 %v10709_v36  ;;  %v10692_v36 = vld [vmem:[#allocation2 + $0x308] sm:$0xf] }
 0x195   : > { %v2041_v42 = vpop.f32.mrf.mxu2  ;;  %v2090_v61 = vpop.f32.mrf.mxu3  ;;  %2315 = vmatpush.bf16.msrb.mxu0 %v10325_v43  ;;  %v13047_v43 = vld [vmem:[#allocation2 + $0x14] sm:$0xf0] }
 0x196   : > { %v2042_v58 = vadd.f32 %v2041_v42, %v1993_v11  ;;  %v10581_v11 = vor.u32 %v13115_v26, %v10580_v23 }
 0x198   : > { %v2091_v0 = vadd.f32 %v2090_v61, %v2042_v58  ;;  %v1948_v4 = vpop.f32.mrf.mxu0  ;;  %v1997_v22 = vpop.f32.mrf.mxu1  ;;  %2413 = vmatpush.bf16.msrb.mxu2 %v10581_v11  ;;  %v10452_v58 = vld [vmem:[#allocation2 + $0x128] sm:$0xf]  ;;  %v13083_v61 = vld [vmem:[#allocation2 + $0x134] sm:$0xf0] }
 0x199   : > { %v1949_v62 = vadd.f32 %v1948_v4, %v14562_v37  ;;  %v10453_v4 = vor.u32 %v13083_v61, %v10452_v58  ;;  %v10436_v61 = vld [vmem:[#allocation2 + $0x108] sm:$0xf] }
 0x19a   : > { %v2729_v18 = vmax.f32 %v2091_v0, 0.0  ;;  %2239 = vmatmul.bf16.gmra.mxu2 %v14490_v8  ;;  %2288 = vmatmul.bf16.gmra.mxu3 %v14492_v9 }
 0x19b   : > { %v1998_v39 = vadd.f32 %v1997_v22, %v1949_v62  ;;  %2364 = vmatpush.bf16.msrb.mxu1 %v10453_v4  ;;  %v13079_v4 = vld [vmem:[#allocation2 + $0x114] sm:$0xf0] }
 0x19c   : > { %v14600_v24 = vpack.c.bf16 %v2729_v18, %v2725_v17 }
 0x19d   : > { %v2044_v27 = vpop.f32.mrf.mxu2  ;;  %v2093_v35 = vpop.f32.mrf.mxu3 }
 0x19e   : > { %v2045_v40 = vadd.f32 %v2044_v27, %v1996_v51 }
 0x1a0   : > { %v2094_v38 = vadd.f32 %v2093_v35, %v2045_v40  ;;  %v1951_v49 = vpop.f32.mrf.mxu0  ;;  %v2000_v42 = vpop.f32.mrf.mxu1  ;;  %v10308_v40 = vld [vmem:[#allocation2 + $0x8] sm:$0xf] }
 0x1a1   : > { %v1952_v54 = vadd.f32 %v1951_v49, %v14562_v37  ;;  %v13143_v49 = vld [vmem:[#allocation2 + $0x314] sm:$0xf0]  ;;  %v10309_v58 = vor.u32 %v13047_v43, %v10308_v40 }
 0x1a2   : > { %v2733_v31 = vmax.f32 %v2094_v38, 0.0  ;;  %v10693_v38 = vor.u32 %v13143_v49, %v10692_v36  ;;  %v13137_v49 = vld [vmem:[#allocation2 + $0x2ec] sm:$0xf] }
 0x1a3   : > { %v2001_v0 = vadd.f32 %v2000_v42, %v1952_v54  ;;  %2146 = vmatmul.bf16.gmra.mxu0 %v14500_v41  ;;  %2195 = vmatmul.bf16.gmra.mxu1 %v14503_v44 }
 0x1a4   : > { %2316 = vmatpush.bf16.msrb.mxu0 %v10309_v58  ;;  %2463 = vmatpush.bf16.msrb.mxu3 %v10693_v38  ;;  %v10422_v38 = vld [vmem:[#allocation2 + $0xf8] sm:$0xf0] }
 0x1a5   : > { %v2046_v51 = vpop.f32.mrf.mxu2  ;;  %v2095_v22 = vpop.f32.mrf.mxu3 }
 0x1a6   : > { %v2047_v62 = vadd.f32 %v2046_v51, %v1998_v39  ;;  %v10565_v39 = vor.u32 %v13111_v32, %v10564_v34 }
 0x1a8   : > { %v2096_v17 = vadd.f32 %v2095_v22, %v2047_v62  ;;  %v1953_v18 = vpop.f32.mrf.mxu0  ;;  %v2002_v26 = vpop.f32.mrf.mxu1  ;;  %2414 = vmatpush.bf16.msrb.mxu2 %v10565_v39  ;;  %v10437_v22 = vor.u32 %v13079_v4, %v10436_v61  ;;  %v13169_v61 = vld [vmem:[#allocation2 + $0x3ec] sm:$0xf]  ;;  %v10806_v4 = vld [vmem:[#allocation2 + $0x3f8] sm:$0xf0] }
 0x1a9   : > { %v1954_v23 = vadd.f32 %v1953_v18, %v14562_v37 }
 0x1aa   : > { %v2737_v27 = vmax.f32 %v2096_v17, 0.0  ;;  %2244 = vmatmul.bf16.gmra.mxu2 %v14510_v5  ;;  %2293 = vmatmul.bf16.gmra.mxu3 %v14512_v6 }
 0x1ab   : > { %v2003_v11 = vadd.f32 %v2002_v26, %v1954_v23  ;;  %2365 = vmatpush.bf16.msrb.mxu1 %v10437_v22 }
 0x1ac   : > { %v14608_v33 = vpack.c.bf16 %v2737_v27, %v2733_v31 }
 0x1ad   : > { %v2049_v35 = vpop.f32.mrf.mxu2  ;;  %v2098_v42 = vpop.f32.mrf.mxu3 }
 0x1ae   : > { %v2050_v54 = vadd.f32 %v2049_v35, %v2001_v0 }
 0x1b0   : > { %v2099_v51 = vadd.f32 %v2098_v42, %v2050_v54  ;;  %v1956_v62 = vpop.f32.mrf.mxu0  ;;  %v2005_v18 = vpop.f32.mrf.mxu1  ;;  %v10678_v54 = vld [vmem:[#allocation2 + $0x2f8] sm:$0xf0]  ;;  %v13073_v42 = vld [vmem:[#allocation2 + $0xec] sm:$0xf] }
 0x1b1   : > { %v1957_v17 = vadd.f32 %v1956_v62, %v14562_v37 }
 0x1b2   : > { %v2741_v35 = vmax.f32 %v2099_v51, 0.0  ;;  %v10809_v51 = vor.u32 %v13169_v61, %v10806_v4  ;;  %v14625_v4 = vperm.slane %v14555_v20, 1 }
 0x1b3   : > { %v2006_v23 = vadd.f32 %v2005_v18, %v1957_v17  ;;  %2151 = vmatmul.bf16.gmra.mxu0 %v14520_v53  ;;  %2200 = vmatmul.bf16.gmra.mxu1 %v14523_v55  ;;  %v10425_v17 = vor.u32 %v13073_v42, %v10422_v38 }
 0x1b4   : > { %2652 = vmatpush.bf16.msra.mxu3 %v10809_v51 }
 0x1b5   : > { %v2051_v0 = vpop.f32.mrf.mxu2  ;;  %v2100_v31 = vpop.f32.mrf.mxu3  ;;  %2505 = vmatpush.bf16.msra.mxu0 %v10425_v17  ;;  %v13069_v17 = vld [vmem:[#allocation2 + $0xcc] sm:$0xf] }
 0x1b6   : > { %v2052_v26 = vadd.f32 %v2051_v0, %v2003_v11  ;;  %v10681_v11 = vor.u32 %v13137_v49, %v10678_v54 }
 0x1b8   : > { %v2101_v27 = vadd.f32 %v2100_v31, %v2052_v26  ;;  %v1958_v34 = vpop.f32.mrf.mxu0  ;;  %v2007_v40 = vpop.f32.mrf.mxu1  ;;  %2603 = vmatpush.bf16.msra.mxu2 %v10681_v11 }
 0x1b9   : > { %v1959_v32 = vadd.f32 %v1958_v34, %v14562_v37  ;;  %v10550_v34 = vld [vmem:[#allocation2 + $0x1f8] sm:$0xf0] }
 0x1ba   : > { %v2745_v39 = vmax.f32 %v2101_v27, 0.0  ;;  %2249 = vmatmul.bf16.gmra.mxu2 %v14530_v13  ;;  %2298 = vmatmul.bf16.gmra.mxu3 %v14532_v14  ;;  %v13105_v27 = vld [vmem:[#allocation2 + $0x1ec] sm:$0xf] }
 0x1bb   : > { %v2008_v43 = vadd.f32 %v2007_v40, %v1959_v32  ;;  %v10553_v40 = vor.u32 %v13105_v27, %v10550_v34 }
 0x1bc   : > { %v14616_v36 = vpack.c.bf16 %v2745_v39, %v2741_v35 }
 0x1bd   : > { %v2054_v58 = vpop.f32.mrf.mxu2  ;;  %v2103_v22 = vpop.f32.mrf.mxu3  ;;  %2554 = vmatpush.bf16.msra.mxu1 %v10553_v40 }
 0x1be   : > { %17178 = vst [vmem:[#allocation13_spill] sm:$0xff] %v14616_v36  ;;  %v2055_v62 = vadd.f32 %v2054_v58, %v2006_v23 }
 0x1c0   : > { %v2104_v18 = vadd.f32 %v2103_v22, %v2055_v62  ;;  %v1961_v0 = vpop.f32.mrf.mxu0  ;;  %v2010_v31 = vpop.f32.mrf.mxu1  ;;  %v13133_v22 = vld [vmem:[#allocation2 + $0x2cc] sm:$0xf] }
 0x1c1   : > { %v1962_v26 = vadd.f32 %v1961_v0, %v14562_v37 }
 0x1c2   : > { %v2749_v11 = vmax.f32 %v2104_v18, 0.0 }
 0x1c3   : > { %v2011_v32 = vadd.f32 %v2010_v31, %v1962_v26  ;;  %2156 = vmatmul.bf16.gmra.mxu0 %v14540_v56  ;;  %2205 = vmatmul.bf16.gmra.mxu1 %v14543_v59  ;;  %v10406_v26 = vld [vmem:[#allocation2 + $0xd8] sm:$0xf0] }
 0x1c4   : > { %v10790_v31 = vld [vmem:[#allocation2 + $0x3d8] sm:$0xf0]  ;;  %v10409_v34 = vor.u32 %v13069_v17, %v10406_v26 }
 0x1c5   : > { %v2056_v23 = vpop.f32.mrf.mxu2  ;;  %v2105_v39 = vpop.f32.mrf.mxu3 }
 0x1c6   : > { %v2057_v35 = vadd.f32 %v2056_v23, %v2008_v43  ;;  %v10662_v43 = vld [vmem:[#allocation2 + $0x2d8] sm:$0xf0]  ;;  %2506 = vmatpush.bf16.msra.mxu0 %v10409_v34  ;;  %v13065_v34 = vld [vmem:[#allocation2 + $0xac] sm:$0xf] }
 0x1c7   : > { %v10665_v0 = vor.u32 %v13133_v22, %v10662_v43 }
 0x1c8   : > { %v2106_v49 = vadd.f32 %v2105_v39, %v2057_v35  ;;  %v1963_v54 = vpop.f32.mrf.mxu0  ;;  %v2012_v58 = vpop.f32.mrf.mxu1 }
 0x1c9   : > { %v1964_v42 = vadd.f32 %v1963_v54, %v14562_v37  ;;  %v13165_v37 = vld [vmem:[#allocation2 + $0x3cc] sm:$0xf]  ;;  %2604 = vmatpush.bf16.msra.mxu2 %v10665_v0  ;;  %v10534_v54 = vld [vmem:[#allocation2 + $0x1d8] sm:$0xf0] }
 0x1ca   : > { %v2753_v38 = vmax.f32 %v2106_v49, 0.0  ;;  %2254 = vmatmul.bf16.gmra.mxu2 %v14550_v19  ;;  %2303 = vmatmul.bf16.gmra.mxu3 %v14557_v21  ;;  %v10793_v40 = vor.u32 %v13165_v37, %v10790_v31  ;;  %v13101_v49 = vld [vmem:[#allocation2 + $0x1cc] sm:$0xf] }
 0x1cb   : > { %v2013_v61 = vadd.f32 %v2012_v58, %v1964_v42  ;;  %v10537_v58 = vor.u32 %v13101_v49, %v10534_v54 }
 0x1cc   : > { %v14627_v62 = vpack.c.bf16 %v2753_v38, %v2749_v11  ;;  %2653 = vmatpush.bf16.msra.mxu3 %v10793_v40 }
 0x1cd   : > { %v2059_v51 = vpop.f32.mrf.mxu2  ;;  %v2108_v27 = vpop.f32.mrf.mxu3  ;;  %2555 = vmatpush.bf16.msra.mxu1 %v10537_v58 }
 0x1ce   : > { %17179 = vst [vmem:[#allocation14_spill] sm:$0xff] %v14627_v62  ;;  %v2060_v18 = vadd.f32 %v2059_v51, %v2011_v32 }
 0x1d0   : > { %v2109_v23 = vadd.f32 %v2108_v27, %v2060_v18  ;;  %v2122_v35 = vpop.f32.mrf.mxu0  ;;  %v2171_v39 = vpop.f32.mrf.mxu1  ;;  %v13129_v18 = vld [vmem:[#allocation2 + $0x2ac] sm:$0xf]  ;;  %v10646_v27 = vld [vmem:[#allocation2 + $0x2b8] sm:$0xf0] }
 0x1d1   : > { %v2123_v20 = vadd.f32 %v2122_v35, %v14625_v4  ;;  %v10390_v35 = vld [vmem:[#allocation2 + $0xb8] sm:$0xf0] }
 0x1d2   : > { %v2757_v0 = vmax.f32 %v2109_v23, 0.0  ;;  %v10393_v58 = vor.u32 %v13065_v34, %v10390_v35 }
 0x1d3   : > { %v2172_v42 = vadd.f32 %v2171_v39, %v2123_v20  ;;  %2317 = vmatmul.bf16.vlgmr.msrb.gmra.mxu0 %v14400_v47  ;;  %2366 = vmatmul.bf16.vlgmr.msrb.gmra.mxu1 %v14403_v50  ;;  %v13161_v20 = vld [vmem:[#allocation2 + $0x3ac] sm:$0xf]  ;;  %v10774_v39 = vld [vmem:[#allocation2 + $0x3b8] sm:$0xf0] }
 0x1d4   : > { %v10777_v23 = vor.u32 %v13161_v20, %v10774_v39  ;;  %2507 = vmatpush.bf16.msra.mxu0 %v10393_v58  ;;  %v10630_v58 = vld [vmem:[#allocation2 + $0x298] sm:$0xf0] }
 0x1d5   : > { %v2061_v32 = vpop.f32.mrf.mxu2  ;;  %v2110_v38 = vpop.f32.mrf.mxu3 }
 0x1d6   : > { %v2062_v11 = vadd.f32 %v2061_v32, %v2013_v61  ;;  %v10649_v61 = vor.u32 %v13129_v18, %v10646_v27  ;;  %2654 = vmatpush.bf16.msra.mxu3 %v10777_v23  ;;  %v13061_v23 = vld [vmem:[#allocation2 + $0x8c] sm:$0xf] }
 0x1d8   : > { %v2111_v22 = vadd.f32 %v2110_v38, %v2062_v11  ;;  %v2124_v43 = vpop.f32.mrf.mxu0  ;;  %v2173_v51 = vpop.f32.mrf.mxu1  ;;  %2605 = vmatpush.bf16.msra.mxu2 %v10649_v61 }
 0x1d9   : > { %v2125_v17 = vadd.f32 %v2124_v43, %v14625_v4  ;;  %v13097_v43 = vld [vmem:[#allocation2 + $0x1ac] sm:$0xf] }
 0x1da   : > { %v2761_v26 = vmax.f32 %v2111_v22, 0.0  ;;  %2415 = vmatmul.bf16.vlgmr.msrb.gmra.mxu2 %v14410_v1  ;;  %2464 = vmatmul.bf16.vlgmr.msrb.gmra.mxu3 %v14412_v2 }
 0x1db   : > { %v2174_v37 = vadd.f32 %v2173_v51, %v2125_v17  ;;  %v10518_v17 = vld [vmem:[#allocation2 + $0x1b8] sm:$0xf0] }
 0x1dc   : > { %v14635_v31 = vpack.c.bf16 %v2761_v26, %v2757_v0  ;;  %v10521_v0 = vor.u32 %v13097_v43, %v10518_v17  ;;  %v10758_v43 = vld [vmem:[#allocation2 + $0x398] sm:$0xf0] }
 0x1dd   : > { %v2220_v40 = vpop.f32.mrf.mxu2  ;;  %v2269_v54 = vpop.f32.mrf.mxu3 }
 0x1de   : > { %17180 = vst [vmem:[#allocation15_spill] sm:$0xff] %v14635_v31  ;;  %v2221_v49 = vadd.f32 %v2220_v40, %v2172_v42  ;;  %2556 = vmatpush.bf16.msra.mxu1 %v10521_v0 }
 0x1e0   : > { %v2270_v32 = vadd.f32 %v2269_v54, %v2221_v49  ;;  %v2127_v11 = vpop.f32.mrf.mxu0  ;;  %v2176_v22 = vpop.f32.mrf.mxu1  ;;  %v13125_v54 = vld [vmem:[#allocation2 + $0x28c] sm:$0xf] }
 0x1e1   : > { %v2128_v38 = vadd.f32 %v2127_v11, %v14625_v4 }
 0x1e2   : > { %v2702_v35 = vmax.f32 %v2270_v32, 0.0 }
 0x1e3   : > { %v2177_v51 = vadd.f32 %v2176_v22, %v2128_v38  ;;  %2322 = vmatmul.bf16.gmra.mxu0 %v14420_v25  ;;  %2371 = vmatmul.bf16.gmra.mxu1 %v14423_v28  ;;  %v10374_v38 = vld [vmem:[#allocation2 + $0x98] sm:$0xf0]  ;;  %v13157_v22 = vld [vmem:[#allocation2 + $0x38c] sm:$0xf] }
 0x1e4   : > { %v10761_v32 = vor.u32 %v13157_v22, %v10758_v43 }
 0x1e5   : > { %v2222_v42 = vpop.f32.mrf.mxu2  ;;  %v2271_v18 = vpop.f32.mrf.mxu3 }
 0x1e6   : > { %v2223_v26 = vadd.f32 %v2222_v42, %v2174_v37  ;;  %v10633_v37 = vor.u32 %v13125_v54, %v10630_v58  ;;  %v10377_v42 = vor.u32 %v13061_v23, %v10374_v38  ;;  %2655 = vmatpush.bf16.msra.mxu3 %v10761_v32  ;;  %v10614_v32 = vld [vmem:[#allocation2 + $0x278] sm:$0xf0] }
 0x1e8   : > { %v2272_v27 = vadd.f32 %v2271_v18, %v2223_v26  ;;  %v2129_v34 = vpop.f32.mrf.mxu0  ;;  %v2178_v61 = vpop.f32.mrf.mxu1  ;;  %2606 = vmatpush.bf16.msra.mxu2 %v10633_v37  ;;  %2508 = vmatpush.bf16.msra.mxu0 %v10377_v42  ;;  %v13121_v42 = vld [vmem:[#allocation2 + $0x26c] sm:$0xf] }
 0x1e9   : > { %v2130_v40 = vadd.f32 %v2129_v34, %v14625_v4 }
 0x1ea   : > { %v2706_v20 = vmax.f32 %v2272_v27, 0.0  ;;  %2420 = vmatmul.bf16.gmra.mxu2 %v14430_v45  ;;  %2469 = vmatmul.bf16.gmra.mxu3 %v14432_v46 }
 0x1eb   : > { %v2179_v39 = vadd.f32 %v2178_v61, %v2130_v40  ;;  %v13093_v40 = vld [vmem:[#allocation2 + $0x18c] sm:$0xf]  ;;  %v10502_v61 = vld [vmem:[#allocation2 + $0x198] sm:$0xf0] }
 0x1ec   : > { %v14643_v49 = vpack.c.bf16 %v2706_v20, %v2702_v35  ;;  %v10505_v20 = vor.u32 %v13093_v40, %v10502_v61  ;;  %v13153_v40 = vld [vmem:[#allocation2 + $0x36c] sm:$0xf]  ;;  %v10742_v61 = vld [vmem:[#allocation2 + $0x378] sm:$0xf0] }
 0x1ed   : > { %v2225_v11 = vpop.f32.mrf.mxu2  ;;  %v2274_v0 = vpop.f32.mrf.mxu3 }
 0x1ee   : > { %v2226_v17 = vadd.f32 %v2225_v11, %v2177_v51  ;;  %2557 = vmatpush.bf16.msra.mxu1 %v10505_v20 }
 0x1f0   : > { %v2275_v26 = vadd.f32 %v2274_v0, %v2226_v17  ;;  %v2132_v18 = vpop.f32.mrf.mxu0  ;;  %v2181_v34 = vpop.f32.mrf.mxu1 }
 0x1f1   : > { %v2133_v27 = vadd.f32 %v2132_v18, %v14625_v4  ;;  %v13057_v18 = vld [vmem:[#allocation2 + $0x6c] sm:$0xf] }
 0x1f2   : > { %v2710_v22 = vmax.f32 %v2275_v26, 0.0  ;;  %v10745_v26 = vor.u32 %v13153_v40, %v10742_v61 }
 0x1f3   : > { %v2182_v35 = vadd.f32 %v2181_v34, %v2133_v27  ;;  %2327 = vmatmul.bf16.gmra.mxu0 %v14440_v7  ;;  %2376 = vmatmul.bf16.gmra.mxu1 %v14443_v10  ;;  %v10358_v34 = vld [vmem:[#allocation2 + $0x78] sm:$0xf0] }
 0x1f4   : > { %2656 = vmatpush.bf16.msra.mxu3 %v10745_v26  ;;  %v13117_v26 = vld [vmem:[#allocation2 + $0x24c] sm:$0xf] }
 0x1f5   : > { %v2227_v51 = vpop.f32.mrf.mxu2  ;;  %v2276_v58 = vpop.f32.mrf.mxu3 }
 0x1f6   : > { %v2228_v54 = vadd.f32 %v2227_v51, %v2179_v39  ;;  %v10617_v39 = vor.u32 %v13121_v42, %v10614_v32 }
 0x1f8   : > { %v2277_v23 = vadd.f32 %v2276_v58, %v2228_v54  ;;  %v2134_v11 = vpop.f32.mrf.mxu0  ;;  %v2183_v38 = vpop.f32.mrf.mxu1  ;;  %v10361_v54 = vor.u32 %v13057_v18, %v10358_v34  ;;  %2607 = vmatpush.bf16.msra.mxu2 %v10617_v39 }
 0x1f9   : > { %v2135_v37 = vadd.f32 %v2134_v11, %v14625_v4 }
 0x1fa   : > { %v2714_v43 = vmax.f32 %v2277_v23, 0.0  ;;  %2425 = vmatmul.bf16.gmra.mxu2 %v14450_v29  ;;  %2474 = vmatmul.bf16.gmra.mxu3 %v14452_v30 }
 0x1fb   : > { %v2184_v17 = vadd.f32 %v2183_v38, %v2135_v37  ;;  %2509 = vmatpush.bf16.msra.mxu0 %v10361_v54  ;;  %v13089_v38 = vld [vmem:[#allocation2 + $0x16c] sm:$0xf] }
 0x1fc   : > { %v14651_v0 = vpack.c.bf16 %v2714_v43, %v2710_v22  ;;  %v10486_v22 = vld [vmem:[#allocation2 + $0x178] sm:$0xf0] }
 0x1fd   : > { %v2230_v27 = vpop.f32.mrf.mxu2  ;;  %v2279_v51 = vpop.f32.mrf.mxu3  ;;  %v10489_v42 = vor.u32 %v13089_v38, %v10486_v22  ;;  %v10342_v38 = vld [vmem:[#allocation2 + $0x58] sm:$0xf0]  ;;  %v13149_v22 = vld [vmem:[#allocation2 + $0x34c] sm:$0xf] }
 0x1fe   : > { %v2231_v20 = vadd.f32 %v2230_v27, %v2182_v35 }
 0x1ff   : > { %2558 = vmatpush.bf16.msra.mxu1 %v10489_v42  ;;  %v10726_v42 = vld [vmem:[#allocation2 + $0x358] sm:$0xf0] }
 0x200   : > { %v2280_v58 = vadd.f32 %v2279_v51, %v2231_v20  ;;  %v2137_v23 = vpop.f32.mrf.mxu0  ;;  %v2186_v37 = vpop.f32.mrf.mxu1 }
 0x201   : > { %v2138_v11 = vadd.f32 %v2137_v23, %v14625_v4  ;;  %v10598_v23 = vld [vmem:[#allocation2 + $0x258] sm:$0xf0] }
 0x202   : > { %v2718_v61 = vmax.f32 %v2280_v58, 0.0  ;;  %v10729_v58 = vor.u32 %v13149_v22, %v10726_v42 }
 0x203   : > { %v2187_v43 = vadd.f32 %v2186_v37, %v2138_v11  ;;  %2332 = vmatmul.bf16.gmra.mxu0 %v14460_v57  ;;  %2381 = vmatmul.bf16.gmra.mxu1 %v14463_v60  ;;  %v13053_v11 = vld [vmem:[#allocation2 + $0x4c] sm:$0xf] }
 0x204   : > { %2657 = vmatpush.bf16.msra.mxu3 %v10729_v58  ;;  %v13113_v58 = vld [vmem:[#allocation2 + $0x22c] sm:$0xf] }
 0x205   : > { %v2232_v35 = vpop.f32.mrf.mxu2  ;;  %v2281_v18 = vpop.f32.mrf.mxu3 }
 0x206   : > { %v2233_v32 = vadd.f32 %v2232_v35, %v2184_v17  ;;  %v10601_v17 = vor.u32 %v13117_v26, %v10598_v23 }
 0x208   : > { %v2282_v27 = vadd.f32 %v2281_v18, %v2233_v32  ;;  %v2139_v39 = vpop.f32.mrf.mxu0  ;;  %v2188_v40 = vpop.f32.mrf.mxu1  ;;  %v10345_v18 = vor.u32 %v13053_v11, %v10342_v38  ;;  %2608 = vmatpush.bf16.msra.mxu2 %v10601_v17 }
 0x209   : > { %v2140_v34 = vadd.f32 %v2139_v39, %v14625_v4 }
 0x20a   : > { %v2722_v20 = vmax.f32 %v2282_v27, 0.0  ;;  %2430 = vmatmul.bf16.gmra.mxu2 %v14470_v15  ;;  %2479 = vmatmul.bf16.gmra.mxu3 %v14472_v16 }
 0x20b   : > { %v2189_v51 = vadd.f32 %v2188_v40, %v2140_v34  ;;  %2510 = vmatpush.bf16.msra.mxu0 %v10345_v18 }
 0x20c   : > { %v14659_v54 = vpack.c.bf16 %v2722_v20, %v2718_v61  ;;  %v13085_v61 = vld [vmem:[#allocation2 + $0x14c] sm:$0xf]  ;;  %v10470_v20 = vld [vmem:[#allocation2 + $0x158] sm:$0xf0] }
 0x20d   : > { %v2235_v37 = vpop.f32.mrf.mxu2  ;;  %v2284_v32 = vpop.f32.mrf.mxu3  ;;  %v10473_v26 = vor.u32 %v13085_v61, %v10470_v20  ;;  %v10326_v61 = vld [vmem:[#allocation2 + $0x38] sm:$0xf0]  ;;  %v13145_v20 = vld [vmem:[#allocation2 + $0x32c] sm:$0xf] }
 0x20e   : > { %v2236_v35 = vadd.f32 %v2235_v37, %v2187_v43 }
 0x20f   : > { %2559 = vmatpush.bf16.msra.mxu1 %v10473_v26  ;;  %v10710_v26 = vld [vmem:[#allocation2 + $0x338] sm:$0xf0] }
 0x210   : > { %v2285_v27 = vadd.f32 %v2284_v32, %v2236_v35  ;;  %v2142_v39 = vpop.f32.mrf.mxu0  ;;  %v2191_v40 = vpop.f32.mrf.mxu1 }
 0x211   : > { %v2143_v34 = vadd.f32 %v2142_v39, %v14625_v4  ;;  %v10582_v39 = vld [vmem:[#allocation2 + $0x238] sm:$0xf0] }
 0x212   : > { %v2726_v42 = vmax.f32 %v2285_v27, 0.0  ;;  %v10713_v27 = vor.u32 %v13145_v20, %v10710_v26 }
 0x213   : > { %v2192_v31 = vadd.f32 %v2191_v40, %v2143_v34  ;;  %2337 = vmatmul.bf16.gmra.mxu0 %v14480_v48  ;;  %2386 = vmatmul.bf16.gmra.mxu1 %v14483_v52  ;;  %v13049_v34 = vld [vmem:[#allocation2 + $0x2c] sm:$0xf] }
 0x214   : > { %2658 = vmatpush.bf16.msra.mxu3 %v10713_v27  ;;  %v13109_v27 = vld [vmem:[#allocation2 + $0x20c] sm:$0xf] }
 0x215   : > { %v2237_v43 = vpop.f32.mrf.mxu2  ;;  %v2286_v11 = vpop.f32.mrf.mxu3 }
 0x216   : > { %v2238_v23 = vadd.f32 %v2237_v43, %v2189_v51  ;;  %v10585_v51 = vor.u32 %v13113_v58, %v10582_v39 }
 0x218   : > { %v2287_v37 = vadd.f32 %v2286_v11, %v2238_v23  ;;  %v2144_v17 = vpop.f32.mrf.mxu0  ;;  %v2193_v22 = vpop.f32.mrf.mxu1  ;;  %v10329_v11 = vor.u32 %v13049_v34, %v10326_v61  ;;  %2609 = vmatpush.bf16.msra.mxu2 %v10585_v51 }
 0x219   : > { %v2145_v38 = vadd.f32 %v2144_v17, %v14625_v4 }
 0x21a   : > { %v2730_v35 = vmax.f32 %v2287_v37, 0.0  ;;  %2435 = vmatmul.bf16.gmra.mxu2 %v14490_v8  ;;  %2484 = vmatmul.bf16.gmra.mxu3 %v14492_v9 }
 0x21b   : > { %v2194_v32 = vadd.f32 %v2193_v22, %v2145_v38  ;;  %2511 = vmatpush.bf16.msra.mxu0 %v10329_v11 }
 0x21c   : > { %v14667_v18 = vpack.c.bf16 %v2730_v35, %v2726_v42  ;;  %v13081_v42 = vld [vmem:[#allocation2 + $0x12c] sm:$0xf]  ;;  %v10454_v35 = vld [vmem:[#allocation2 + $0x138] sm:$0xf0] }
 0x21d   : > { %v2240_v40 = vpop.f32.mrf.mxu2  ;;  %v2289_v23 = vpop.f32.mrf.mxu3  ;;  %v10457_v58 = vor.u32 %v13081_v42, %v10454_v35  ;;  %v10310_v42 = vld [vmem:[#allocation2 + $0x18] sm:$0xf0]  ;;  %v13141_v35 = vld [vmem:[#allocation2 + $0x30c] sm:$0xf] }
 0x21e   : > { %v2241_v43 = vadd.f32 %v2240_v40, %v2192_v31 }
 0x21f   : > { %2560 = vmatpush.bf16.msra.mxu1 %v10457_v58  ;;  %v10694_v58 = vld [vmem:[#allocation2 + $0x318] sm:$0xf0] }
 0x220   : > { %v2290_v37 = vadd.f32 %v2289_v23, %v2241_v43  ;;  %v2147_v17 = vpop.f32.mrf.mxu0  ;;  %v2196_v22 = vpop.f32.mrf.mxu1 }
 0x221   : > { %v2148_v38 = vadd.f32 %v2147_v17, %v14625_v4  ;;  %v10566_v17 = vld [vmem:[#allocation2 + $0x218] sm:$0xf0] }
 0x222   : > { %v2734_v26 = vmax.f32 %v2290_v37, 0.0  ;;  %v10697_v37 = vor.u32 %v13141_v35, %v10694_v58 }
 0x223   : > { %v2197_v62 = vadd.f32 %v2196_v22, %v2148_v38  ;;  %2342 = vmatmul.bf16.gmra.mxu0 %v14500_v41  ;;  %2391 = vmatmul.bf16.gmra.mxu1 %v14503_v44  ;;  %v13045_v38 = vld [vmem:[#allocation2 + $0xc] sm:$0xf] }
 0x224   : > { %2659 = vmatpush.bf16.msra.mxu3 %v10697_v37 }
 0x225   : > { %v2242_v31 = vpop.f32.mrf.mxu2  ;;  %v2291_v34 = vpop.f32.mrf.mxu3 }
 0x226   : > { %v2243_v39 = vadd.f32 %v2242_v31, %v2194_v32  ;;  %v10569_v32 = vor.u32 %v13109_v27, %v10566_v17 }
 0x228   : > { %v2292_v40 = vadd.f32 %v2291_v34, %v2243_v39  ;;  %v2149_v51 = vpop.f32.mrf.mxu0  ;;  %v2198_v20 = vpop.f32.mrf.mxu1  ;;  %v10313_v34 = vor.u32 %v13045_v38, %v10310_v42  ;;  %2610 = vmatpush.bf16.msra.mxu2 %v10569_v32 }
 0x229   : > { %v2150_v61 = vadd.f32 %v2149_v51, %v14625_v4  ;;  %v10438_v51 = vld [vmem:[#allocation2 + $0x118] sm:$0xf0] }
 0x22a   : > { %v2738_v43 = vmax.f32 %v2292_v40, 0.0  ;;  %2440 = vmatmul.bf16.gmra.mxu2 %v14510_v5  ;;  %2489 = vmatmul.bf16.gmra.mxu3 %v14512_v6  ;;  %v13077_v40 = vld [vmem:[#allocation2 + $0x10c] sm:$0xf] }
 0x22b   : > { %v2199_v23 = vadd.f32 %v2198_v20, %v2150_v61  ;;  %2512 = vmatpush.bf16.msra.mxu0 %v10313_v34 }
 0x22c   : > { %v14675_v11 = vpack.c.bf16 %v2738_v43, %v2734_v26  ;;  %v10441_v26 = vor.u32 %v13077_v40, %v10438_v51 }
 0x22d   : > { %v2245_v22 = vpop.f32.mrf.mxu2  ;;  %v2294_v39 = vpop.f32.mrf.mxu3 }
 0x22e   : > { %v2246_v31 = vadd.f32 %v2245_v22, %v2197_v62  ;;  %2561 = vmatpush.bf16.msra.mxu1 %v10441_v26 }
 0x230   : > { %v2295_v61 = vadd.f32 %v2294_v39, %v2246_v31  ;;  %v2152_v20 = vpop.f32.mrf.mxu0  ;;  %v2201_v36 = vpop.f32.mrf.mxu1 }
 0x231   : > { %v2153_v43 = vadd.f32 %v2152_v20, %v14625_v4 }
 0x232   : > { %v2742_v58 = vmax.f32 %v2295_v61, 0.0 }
 0x233   : > { %v2202_v27 = vadd.f32 %v2201_v36, %v2153_v43  ;;  %2347 = vmatmul.bf16.gmra.mxu0 %v14520_v53  ;;  %2396 = vmatmul.bf16.gmra.mxu1 %v14523_v55 }
 0x235   : > { %v2247_v62 = vpop.f32.mrf.mxu2  ;;  %v2296_v38 = vpop.f32.mrf.mxu3 }
 0x236   : > { %v2248_v17 = vadd.f32 %v2247_v62, %v2199_v23 }
 0x238   : > { %v2297_v22 = vadd.f32 %v2296_v38, %v2248_v17  ;;  %v2154_v32 = vpop.f32.mrf.mxu0  ;;  %v2203_v35 = vpop.f32.mrf.mxu1 }
 0x239   : > { %v2155_v42 = vadd.f32 %v2154_v32, %v14625_v4 }
 0x23a   : > { %v2746_v31 = vmax.f32 %v2297_v22, 0.0  ;;  %2445 = vmatmul.bf16.gmra.mxu2 %v14530_v13  ;;  %2494 = vmatmul.bf16.gmra.mxu3 %v14532_v14 }
 0x23b   : > { %v2204_v39 = vadd.f32 %v2203_v35, %v2155_v42 }
 0x23c   : > { %v14683_v36 = vpack.c.bf16 %v2746_v31, %v2742_v58 }
 0x23d   : > { %v2250_v34 = vpop.f32.mrf.mxu2  ;;  %v2299_v40 = vpop.f32.mrf.mxu3 }
 0x23e   : > { %v2251_v37 = vadd.f32 %v2250_v34, %v2202_v27  ;;  %v11180_v34 = vld [vmem:[#allocation4 + $0x2e0] sm:$0xf] }
 0x240   : > { %v2300_v51 = vadd.f32 %v2299_v40, %v2251_v37  ;;  %v2157_v23 = vpop.f32.mrf.mxu0  ;;  %v2206_v26 = vpop.f32.mrf.mxu1  ;;  %v13266_v37 = vld [vmem:[#allocation4 + $0x2ec] sm:$0xf0] }
 0x241   : > { %v2158_v20 = vadd.f32 %v2157_v23, %v14625_v4 }
 0x242   : > { %v2750_v27 = vmax.f32 %v2300_v51, 0.0  ;;  %v11181_v51 = vor.u32 %v13266_v37, %v11180_v34 }
 0x243   : > { %v2207_v43 = vadd.f32 %v2206_v26, %v2158_v20  ;;  %2352 = vmatmul.bf16.gmra.mxu0 %v14540_v56  ;;  %2401 = vmatmul.bf16.gmra.mxu1 %v14543_v59 }
 0x244   : > { %3673 = vmatpush.bf16.msrb.mxu2 %v11181_v51 }
 0x245   : > { %v2252_v61 = vpop.f32.mrf.mxu2  ;;  %v2301_v17 = vpop.f32.mrf.mxu3 }
 0x246   : > { %v2253_v62 = vadd.f32 %v2252_v61, %v2204_v39  ;;  %v14696_v39 = vld [vmem:[%s17103_s4] sm:$0xf] }
 0x248   : > { %v2302_v38 = vadd.f32 %v2301_v17, %v2253_v62  ;;  %v2159_v22 = vpop.f32.mrf.mxu0  ;;  %v2208_v42 = vpop.f32.mrf.mxu1 }
 0x249   : > { %v2160_v32 = vadd.f32 %v2159_v22, %v14625_v4  ;;  %v14699_v4 = vperm.slane %v14696_v39, 2  ;;  %v13202_v22 = vld [vmem:[#allocation4 + $0xec] sm:$0xf0] }
 0x24a   : > { %v2754_v35 = vmax.f32 %v2302_v38, 0.0  ;;  %2450 = vmatmul.bf16.gmra.mxu2 %v14550_v19  ;;  %2499 = vmatmul.bf16.gmra.mxu3 %v14557_v21  ;;  %v10924_v38 = vld [vmem:[#allocation4 + $0xe0] sm:$0xf] }
 0x24b   : > { %v2209_v58 = vadd.f32 %v2208_v42, %v2160_v32  ;;  %v10925_v42 = vor.u32 %v13202_v22, %v10924_v38 }
 0x24c   : > { %v14691_v31 = vpack.c.bf16 %v2754_v35, %v2750_v27  ;;  %v11308_v27 = vld [vmem:[#allocation4 + $0x3e0] sm:$0xf]  ;;  %v13298_v35 = vld [vmem:[#allocation4 + $0x3ec] sm:$0xf0] }
 0x24d   : > { %v2255_v40 = vpop.f32.mrf.mxu2  ;;  %v2304_v20 = vpop.f32.mrf.mxu3  ;;  %v11309_v34 = vor.u32 %v13298_v35, %v11308_v27  ;;  %3575 = vmatpush.bf16.msrb.mxu0 %v10925_v42  ;;  %v11164_v42 = vld [vmem:[#allocation4 + $0x2c0] sm:$0xf] }
 0x24e   : > { %17181 = vst [vmem:[#allocation16_spill] sm:$0xff] %v14691_v31  ;;  %v2256_v23 = vadd.f32 %v2255_v40, %v2207_v43  ;;  %v11052_v31 = vld [vmem:[#allocation4 + $0x1e0] sm:$0xf]  ;;  %v13234_v43 = vld [vmem:[#allocation4 + $0x1ec] sm:$0xf0] }
 0x24f   : > { %v11053_v40 = vor.u32 %v13234_v43, %v11052_v31  ;;  %3722 = vmatpush.bf16.msrb.mxu3 %v11309_v34  ;;  %v13262_v31 = vld [vmem:[#allocation4 + $0x2cc] sm:$0xf0] }
 0x250   : > { %v2305_v26 = vadd.f32 %v2304_v20, %v2256_v23  ;;  %v2318_v61 = vpop.f32.mrf.mxu0  ;;  %v2367_v17 = vpop.f32.mrf.mxu1  ;;  %v11165_v27 = vor.u32 %v13262_v31, %v11164_v42 }
 0x251   : > { %v2319_v62 = vadd.f32 %v2318_v61, %v14699_v4  ;;  %3624 = vmatpush.bf16.msrb.mxu1 %v11053_v40 }
 0x252   : > { %3674 = vmatpush.bf16.msrb.mxu2 %v11165_v27 }
 0x253   : > { %v2368_v32 = vadd.f32 %v2367_v17, %v2319_v62  ;;  %2513 = vmatmul.bf16.vlgmr.msra.gmra.mxu0 %v14400_v47  ;;  %2562 = vmatmul.bf16.vlgmr.msra.gmra.mxu1 %v14403_v50  ;;  %v2758_v17 = vmax.f32 %v2305_v26, 0.0 }
 0x255   : > { %v2257_v37 = vpop.f32.mrf.mxu2  ;;  %v2306_v23 = vpop.f32.mrf.mxu3 }
 0x256   : > { %v2258_v51 = vadd.f32 %v2257_v37, %v2209_v58 }
 0x258   : > { %v2307_v20 = vadd.f32 %v2306_v23, %v2258_v51  ;;  %v2320_v61 = vpop.f32.mrf.mxu0  ;;  %v2369_v47 = vpop.f32.mrf.mxu1  ;;  %v10908_v51 = vld [vmem:[#allocation4 + $0xc0] sm:$0xf]  ;;  %v13198_v23 = vld [vmem:[#allocation4 + $0xcc] sm:$0xf0] }
 0x259   : > { %v2321_v62 = vadd.f32 %v2320_v61, %v14699_v4  ;;  %v13294_v61 = vld [vmem:[#allocation4 + $0x3cc] sm:$0xf0] }
 0x25a   : > { %v2762_v38 = vmax.f32 %v2307_v20, 0.0  ;;  %2611 = vmatmul.bf16.vlgmr.msra.gmra.mxu2 %v14410_v1  ;;  %2660 = vmatmul.bf16.vlgmr.msra.gmra.mxu3 %v14412_v2  ;;  %v10909_v2 = vor.u32 %v13198_v23, %v10908_v51  ;;  %v11292_v20 = vld [vmem:[#allocation4 + $0x3c0] sm:$0xf]  ;;  %v13258_v51 = vld [vmem:[#allocation4 + $0x2ac] sm:$0xf0] }
 0x25b   : > { %v2370_v22 = vadd.f32 %v2369_v47, %v2321_v62  ;;  %v11036_v62 = vld [vmem:[#allocation4 + $0x1c0] sm:$0xf]  ;;  %v11293_v47 = vor.u32 %v13294_v61, %v11292_v20 }
 0x25c   : > { %v14707_v50 = vpack.c.bf16 %v2762_v38, %v2758_v17  ;;  %3576 = vmatpush.bf16.msrb.mxu0 %v10909_v2 }
 0x25d   : > { %v2416_v58 = vpop.f32.mrf.mxu2  ;;  %v2465_v34 = vpop.f32.mrf.mxu3  ;;  %3723 = vmatpush.bf16.msrb.mxu3 %v11293_v47 }
 0x25e   : > { %v2417_v35 = vadd.f32 %v2416_v58, %v2368_v32  ;;  %v13230_v32 = vld [vmem:[#allocation4 + $0x1cc] sm:$0xf0] }
 0x25f   : > { %v11037_v38 = vor.u32 %v13230_v32, %v11036_v62  ;;  %v10892_v32 = vld [vmem:[#allocation4 + $0xa0] sm:$0xf] }
 0x260   : > { %v2466_v43 = vadd.f32 %v2465_v34, %v2417_v35  ;;  %v2323_v37 = vpop.f32.mrf.mxu0  ;;  %v2372_v26 = vpop.f32.mrf.mxu1 }
 0x261   : > { %v2324_v40 = vadd.f32 %v2323_v37, %v14699_v4  ;;  %3625 = vmatpush.bf16.msrb.mxu1 %v11037_v38  ;;  %v11276_v38 = vld [vmem:[#allocation4 + $0x3a0] sm:$0xf] }
 0x262   : > { %v2703_v34 = vmax.f32 %v2466_v43, 0.0 }
 0x263   : > { %v2373_v1 = vadd.f32 %v2372_v26, %v2324_v40  ;;  %2518 = vmatmul.bf16.gmra.mxu0 %v14420_v25  ;;  %2567 = vmatmul.bf16.gmra.mxu1 %v14423_v28  ;;  %v11148_v26 = vld [vmem:[#allocation4 + $0x2a0] sm:$0xf] }
 0x264   : > { %v11149_v23 = vor.u32 %v13258_v51, %v11148_v26 }
 0x265   : > { %v2418_v17 = vpop.f32.mrf.mxu2  ;;  %v2467_v31 = vpop.f32.mrf.mxu3 }
 0x266   : > { %v2419_v42 = vadd.f32 %v2418_v17, %v2370_v22  ;;  %3675 = vmatpush.bf16.msrb.mxu2 %v11149_v23  ;;  %v13194_v17 = vld [vmem:[#allocation4 + $0xac] sm:$0xf0] }
 0x268   : > { %v2468_v58 = vadd.f32 %v2467_v31, %v2419_v42  ;;  %v2325_v27 = vpop.f32.mrf.mxu0  ;;  %v2374_v25 = vpop.f32.mrf.mxu1  ;;  %v13290_v42 = vld [vmem:[#allocation4 + $0x3ac] sm:$0xf0]  ;;  %v11020_v31 = vld [vmem:[#allocation4 + $0x1a0] sm:$0xf] }
 0x269   : > { %v2326_v35 = vadd.f32 %v2325_v27, %v14699_v4 }
 0x26a   : > { %v2707_v37 = vmax.f32 %v2468_v58, 0.0  ;;  %2616 = vmatmul.bf16.gmra.mxu2 %v14430_v45  ;;  %2665 = vmatmul.bf16.gmra.mxu3 %v14432_v46  ;;  %v10893_v46 = vor.u32 %v13194_v17, %v10892_v32  ;;  %v11277_v58 = vor.u32 %v13290_v42, %v11276_v38  ;;  %v10876_v42 = vld [vmem:[#allocation4 + $0x80] sm:$0xf] }
 0x26b   : > { %v2375_v40 = vadd.f32 %v2374_v25, %v2326_v35 }
 0x26c   : > { %v14715_v28 = vpack.c.bf16 %v2707_v37, %v2703_v34  ;;  %3577 = vmatpush.bf16.msrb.mxu0 %v10893_v46  ;;  %3724 = vmatpush.bf16.msrb.mxu3 %v11277_v58  ;;  %v11260_v58 = vld [vmem:[#allocation4 + $0x380] sm:$0xf] }
 0x26d   : > { %v2421_v22 = vpop.f32.mrf.mxu2  ;;  %v2470_v20 = vpop.f32.mrf.mxu3 }
 0x26e   : > { %v2422_v2 = vadd.f32 %v2421_v22, %v2373_v1  ;;  %v13226_v1 = vld [vmem:[#allocation4 + $0x1ac] sm:$0xf0] }
 0x26f   : > { %v11021_v35 = vor.u32 %v13226_v1, %v11020_v31  ;;  %v13190_v31 = vld [vmem:[#allocation4 + $0x8c] sm:$0xf0] }
 0x270   : > { %v2471_v61 = vadd.f32 %v2470_v20, %v2422_v2  ;;  %v2328_v62 = vpop.f32.mrf.mxu0  ;;  %v2377_v43 = vpop.f32.mrf.mxu1  ;;  %v11132_v20 = vld [vmem:[#allocation4 + $0x280] sm:$0xf]  ;;  %v13286_v1 = vld [vmem:[#allocation4 + $0x38c] sm:$0xf0] }
 0x271   : > { %v2329_v47 = vadd.f32 %v2328_v62, %v14699_v4  ;;  %3626 = vmatpush.bf16.msrb.mxu1 %v11021_v35  ;;  %v13254_v62 = vld [vmem:[#allocation4 + $0x28c] sm:$0xf0]  ;;  %v11261_v35 = vor.u32 %v13286_v1, %v11260_v58  ;;  %v11244_v58 = vld [vmem:[#allocation4 + $0x360] sm:$0xf] }
 0x272   : > { %v2711_v22 = vmax.f32 %v2471_v61, 0.0  ;;  %v13282_v1 = vld [vmem:[#allocation4 + $0x36c] sm:$0xf0] }
 0x273   : > { %v2378_v45 = vadd.f32 %v2377_v43, %v2329_v47  ;;  %2523 = vmatmul.bf16.gmra.mxu0 %v14440_v7  ;;  %2572 = vmatmul.bf16.gmra.mxu1 %v14443_v10  ;;  %v11133_v47 = vor.u32 %v13254_v62, %v11132_v20 }
 0x274   : > { %3725 = vmatpush.bf16.msrb.mxu3 %v11261_v35  ;;  %v11245_v35 = vor.u32 %v13282_v1, %v11244_v58 }
 0x275   : > { %v2423_v27 = vpop.f32.mrf.mxu2  ;;  %v2472_v34 = vpop.f32.mrf.mxu3  ;;  %3676 = vmatpush.bf16.msrb.mxu2 %v11133_v47  ;;  %v13250_v47 = vld [vmem:[#allocation4 + $0x26c] sm:$0xf0] }
 0x276   : > { %v2424_v25 = vadd.f32 %v2423_v27, %v2375_v40  ;;  %v11004_v27 = vld [vmem:[#allocation4 + $0x180] sm:$0xf] }
 0x278   : > { %v2473_v37 = vadd.f32 %v2472_v34, %v2424_v25  ;;  %v2330_v26 = vpop.f32.mrf.mxu0  ;;  %v2379_v7 = vpop.f32.mrf.mxu1  ;;  %3726 = vmatpush.bf16.msrb.mxu3 %v11245_v35 }
 0x279   : > { %v2331_v51 = vadd.f32 %v2330_v26, %v14699_v4 }
 0x27a   : > { %v2715_v23 = vmax.f32 %v2473_v37, 0.0  ;;  %2621 = vmatmul.bf16.gmra.mxu2 %v14450_v29  ;;  %2670 = vmatmul.bf16.gmra.mxu3 %v14452_v30  ;;  %v10877_v30 = vor.u32 %v13190_v31, %v10876_v42  ;;  %v10860_v31 = vld [vmem:[#allocation4 + $0x60] sm:$0xf] }
 0x27b   : > { %v2380_v2 = vadd.f32 %v2379_v7, %v2331_v51 }
 0x27c   : > { %v14723_v10 = vpack.c.bf16 %v2715_v23, %v2711_v22  ;;  %3578 = vmatpush.bf16.msrb.mxu0 %v10877_v30  ;;  %v13186_v30 = vld [vmem:[#allocation4 + $0x6c] sm:$0xf0] }
 0x27d   : > { %v2426_v40 = vpop.f32.mrf.mxu2  ;;  %v2475_v32 = vpop.f32.mrf.mxu3 }
 0x27e   : > { %v2427_v43 = vadd.f32 %v2426_v40, %v2378_v45  ;;  %v13222_v45 = vld [vmem:[#allocation4 + $0x18c] sm:$0xf0]  ;;  %v11116_v40 = vld [vmem:[#allocation4 + $0x260] sm:$0xf] }
 0x27f   : > { %v11005_v34 = vor.u32 %v13222_v45, %v11004_v27  ;;  %v10988_v27 = vld [vmem:[#allocation4 + $0x160] sm:$0xf] }
 0x280   : > { %v2476_v17 = vadd.f32 %v2475_v32, %v2427_v43  ;;  %v2333_v46 = vpop.f32.mrf.mxu0  ;;  %v2382_v61 = vpop.f32.mrf.mxu1  ;;  %v11117_v43 = vor.u32 %v13250_v47, %v11116_v40  ;;  %v13246_v40 = vld [vmem:[#allocation4 + $0x24c] sm:$0xf0] }
 0x281   : > { %v2334_v38 = vadd.f32 %v2333_v46, %v14699_v4  ;;  %3627 = vmatpush.bf16.msrb.mxu1 %v11005_v34 }
 0x282   : > { %v2719_v23 = vmax.f32 %v2476_v17, 0.0  ;;  %3677 = vmatpush.bf16.msrb.mxu2 %v11117_v43 }
 0x283   : > { %v2383_v29 = vadd.f32 %v2382_v61, %v2334_v38  ;;  %2528 = vmatmul.bf16.gmra.mxu0 %v14460_v57  ;;  %2577 = vmatmul.bf16.gmra.mxu1 %v14463_v60 }
 0x285   : > { %v2428_v25 = vpop.f32.mrf.mxu2  ;;  %v2477_v26 = vpop.f32.mrf.mxu3 }
 0x286   : > { %v2429_v37 = vadd.f32 %v2428_v25, %v2380_v2 }
 0x288   : > { %v2478_v51 = vadd.f32 %v2477_v26, %v2429_v37  ;;  %v2335_v7 = vpop.f32.mrf.mxu0  ;;  %v2384_v57 = vpop.f32.mrf.mxu1 }
 0x289   : > { %v2336_v22 = vadd.f32 %v2335_v7, %v14699_v4 }
 0x28a   : > { %v2723_v20 = vmax.f32 %v2478_v51, 0.0  ;;  %2626 = vmatmul.bf16.gmra.mxu2 %v14470_v15  ;;  %2675 = vmatmul.bf16.gmra.mxu3 %v14472_v16  ;;  %v10861_v16 = vor.u32 %v13186_v30, %v10860_v31  ;;  %v11228_v31 = vld [vmem:[#allocation4 + $0x340] sm:$0xf]  ;;  %v13278_v30 = vld [vmem:[#allocation4 + $0x34c] sm:$0xf0] }
 0x28b   : > { %v2385_v62 = vadd.f32 %v2384_v57, %v2336_v22  ;;  %v11229_v58 = vor.u32 %v13278_v30, %v11228_v31 }
 0x28c   : > { %v14731_v60 = vpack.c.bf16 %v2723_v20, %v2719_v23  ;;  %3579 = vmatpush.bf16.msrb.mxu0 %v10861_v16  ;;  %v11100_v20 = vld [vmem:[#allocation4 + $0x240] sm:$0xf] }
 0x28d   : > { %v2431_v2 = vpop.f32.mrf.mxu2  ;;  %v2480_v46 = vpop.f32.mrf.mxu3  ;;  %v11101_v47 = vor.u32 %v13246_v40, %v11100_v20  ;;  %v10972_v16 = vld [vmem:[#allocation4 + $0x140] sm:$0xf]  ;;  %3727 = vmatpush.bf16.msrb.mxu3 %v11229_v58  ;;  %v13210_v40 = vld [vmem:[#allocation4 + $0x12c] sm:$0xf0] }
 0x28e   : > { %v2432_v32 = vadd.f32 %v2431_v2, %v2383_v29  ;;  %v13218_v29 = vld [vmem:[#allocation4 + $0x16c] sm:$0xf0] }
 0x28f   : > { %v10989_v25 = vor.u32 %v13218_v29, %v10988_v27  ;;  %3678 = vmatpush.bf16.msrb.mxu2 %v11101_v47  ;;  %v13274_v58 = vld [vmem:[#allocation4 + $0x32c] sm:$0xf0] }
 0x290   : > { %v2481_v38 = vadd.f32 %v2480_v46, %v2432_v32  ;;  %v2338_v61 = vpop.f32.mrf.mxu0  ;;  %v2387_v17 = vpop.f32.mrf.mxu1 }
 0x291   : > { %v2339_v42 = vadd.f32 %v2338_v61, %v14699_v4  ;;  %3628 = vmatpush.bf16.msrb.mxu1 %v10989_v25 }
 0x292   : > { %v2727_v22 = vmax.f32 %v2481_v38, 0.0 }
 0x293   : > { %v2388_v15 = vadd.f32 %v2387_v17, %v2339_v42  ;;  %2533 = vmatmul.bf16.gmra.mxu0 %v14480_v48  ;;  %2582 = vmatmul.bf16.gmra.mxu1 %v14483_v52  ;;  %v10844_v42 = vld [vmem:[#allocation4 + $0x40] sm:$0xf]  ;;  %v13182_v17 = vld [vmem:[#allocation4 + $0x4c] sm:$0xf0] }
 0x295   : > { %v2433_v45 = vpop.f32.mrf.mxu2  ;;  %v2482_v37 = vpop.f32.mrf.mxu3 }
 0x296   : > { %v2434_v34 = vadd.f32 %v2433_v45, %v2385_v62 }
 0x298   : > { %v2483_v26 = vadd.f32 %v2482_v37, %v2434_v34  ;;  %v2340_v51 = vpop.f32.mrf.mxu0  ;;  %v2389_v48 = vpop.f32.mrf.mxu1 }
 0x299   : > { %v2341_v7 = vadd.f32 %v2340_v51, %v14699_v4 }
 0x29a   : > { %v2731_v57 = vmax.f32 %v2483_v26, 0.0  ;;  %2631 = vmatmul.bf16.gmra.mxu2 %v14490_v8  ;;  %2680 = vmatmul.bf16.gmra.mxu3 %v14492_v9  ;;  %v10845_v9 = vor.u32 %v13182_v17, %v10844_v42  ;;  %v13206_v17 = vld [vmem:[#allocation4 + $0x10c] sm:$0xf0] }
 0x29b   : > { %v2390_v23 = vadd.f32 %v2389_v48, %v2341_v7  ;;  %v13178_v7 = vld [vmem:[#allocation4 + $0x2c] sm:$0xf0]  ;;  %v10956_v48 = vld [vmem:[#allocation4 + $0x120] sm:$0xf] }
 0x29c   : > { %v14739_v52 = vpack.c.bf16 %v2731_v57, %v2727_v22  ;;  %3580 = vmatpush.bf16.msrb.mxu0 %v10845_v9  ;;  %v11084_v57 = vld [vmem:[#allocation4 + $0x220] sm:$0xf] }
 0x29d   : > { %v2436_v62 = vpop.f32.mrf.mxu2  ;;  %v2485_v43 = vpop.f32.mrf.mxu3 }
 0x29e   : > { %v2437_v2 = vadd.f32 %v2436_v62, %v2388_v15  ;;  %v13214_v15 = vld [vmem:[#allocation4 + $0x14c] sm:$0xf0] }
 0x29f   : > { %v10973_v27 = vor.u32 %v13214_v15, %v10972_v16  ;;  %v11212_v16 = vld [vmem:[#allocation4 + $0x320] sm:$0xf] }
 0x2a0   : > { %v2486_v32 = vadd.f32 %v2485_v43, %v2437_v2  ;;  %v2343_v46 = vpop.f32.mrf.mxu0  ;;  %v2392_v38 = vpop.f32.mrf.mxu1  ;;  %v10957_v2 = vor.u32 %v13210_v40, %v10956_v48 }
 0x2a1   : > { %v2344_v61 = vadd.f32 %v2343_v46, %v14699_v4  ;;  %3629 = vmatpush.bf16.msrb.mxu1 %v10973_v27  ;;  %v13174_v46 = vld [vmem:[#allocation4 + $0xc] sm:$0xf0]  ;;  %v11068_v27 = vld [vmem:[#allocation4 + $0x200] sm:$0xf] }
 0x2a2   : > { %v2735_v37 = vmax.f32 %v2486_v32, 0.0 }
 0x2a3   : > { %v2393_v8 = vadd.f32 %v2392_v38, %v2344_v61  ;;  %2538 = vmatmul.bf16.gmra.mxu0 %v14500_v41  ;;  %2587 = vmatmul.bf16.gmra.mxu1 %v14503_v44  ;;  %v10828_v44 = vld [vmem:[#allocation4 + $0x20] sm:$0xf] }
 0x2a4   : > { %v10829_v20 = vor.u32 %v13178_v7, %v10828_v44 }
 0x2a5   : > { %v2438_v1 = vpop.f32.mrf.mxu2  ;;  %v2487_v29 = vpop.f32.mrf.mxu3  ;;  %3630 = vmatpush.bf16.msrb.mxu1 %v10957_v2  ;;  %v13270_v2 = vld [vmem:[#allocation4 + $0x30c] sm:$0xf0] }
 0x2a6   : > { %v2439_v35 = vadd.f32 %v2438_v1, %v2390_v23  ;;  %v13242_v23 = vld [vmem:[#allocation4 + $0x22c] sm:$0xf0]  ;;  %3581 = vmatpush.bf16.msrb.mxu0 %v10829_v20 }
 0x2a7   : > { %v11085_v47 = vor.u32 %v13242_v23, %v11084_v57 }
 0x2a8   : > { %v2488_v45 = vadd.f32 %v2487_v29, %v2439_v35  ;;  %v2345_v25 = vpop.f32.mrf.mxu0  ;;  %v2394_v41 = vpop.f32.mrf.mxu1  ;;  %v13238_v35 = vld [vmem:[#allocation4 + $0x20c] sm:$0xf0] }
 0x2a9   : > { %v2346_v34 = vadd.f32 %v2345_v25, %v14699_v4  ;;  %3679 = vmatpush.bf16.msrb.mxu2 %v11085_v47  ;;  %v11069_v25 = vor.u32 %v13238_v35, %v11068_v27  ;;  %v11196_v47 = vld [vmem:[#allocation4 + $0x300] sm:$0xf]  ;;  %v13200_v27 = vld [vmem:[#allocation4 + $0xe4] sm:$0xf]  ;;  %v10926_v35 = vld [vmem:[#allocation4 + $0xf0] sm:$0xf0] }
 0x2aa   : > { %v2739_v26 = vmax.f32 %v2488_v45, 0.0  ;;  %2636 = vmatmul.bf16.gmra.mxu2 %v14510_v5  ;;  %2685 = vmatmul.bf16.gmra.mxu3 %v14512_v6  ;;  %v10812_v5 = vld [vmem:[#allocation4] sm:$0xf] }
 0x2ab   : > { %v2395_v51 = vadd.f32 %v2394_v41, %v2346_v34  ;;  %v10940_v6 = vld [vmem:[#allocation4 + $0x100] sm:$0xf]  ;;  %v10813_v42 = vor.u32 %v13174_v46, %v10812_v5 }
 0x2ac   : > { %v14747_v22 = vpack.c.bf16 %v2739_v26, %v2735_v37  ;;  %v10941_v30 = vor.u32 %v13206_v17, %v10940_v6 }
 0x2ad   : > { %v2441_v62 = vpop.f32.mrf.mxu2  ;;  %v2490_v32 = vpop.f32.mrf.mxu3  ;;  %3582 = vmatpush.bf16.msrb.mxu0 %v10813_v42  ;;  %3680 = vmatpush.bf16.msrb.mxu2 %v11069_v25 }
 0x2ae   : > { %v2442_v43 = vadd.f32 %v2441_v62, %v2393_v8  ;;  %v11213_v8 = vor.u32 %v13274_v58, %v11212_v16  ;;  %3631 = vmatpush.bf16.msrb.mxu1 %v10941_v30 }
 0x2b0   : > { %v2491_v61 = vadd.f32 %v2490_v32, %v2442_v43  ;;  %v2348_v38 = vpop.f32.mrf.mxu0  ;;  %v2397_v31 = vpop.f32.mrf.mxu1  ;;  %3728 = vmatpush.bf16.msrb.mxu3 %v11213_v8  ;;  %v11197_v32 = vor.u32 %v13270_v2, %v11196_v47  ;;  %v11166_v47 = vld [vmem:[#allocation4 + $0x2d0] sm:$0xf0] }
 0x2b1   : > { %v2349_v9 = vadd.f32 %v2348_v38, %v14699_v4 }
 0x2b2   : > { %v2743_v44 = vmax.f32 %v2491_v61, 0.0 }
 0x2b3   : > { %v2398_v15 = vadd.f32 %v2397_v31, %v2349_v9  ;;  %2543 = vmatmul.bf16.gmra.mxu0 %v14520_v53  ;;  %2592 = vmatmul.bf16.gmra.mxu1 %v14523_v55  ;;  %v13264_v31 = vld [vmem:[#allocation4 + $0x2e4] sm:$0xf] }
 0x2b4   : > { %3729 = vmatpush.bf16.msrb.mxu3 %v11197_v32 }
 0x2b5   : > { %v2443_v1 = vpop.f32.mrf.mxu2  ;;  %v2492_v45 = vpop.f32.mrf.mxu3 }
 0x2b6   : > { %v2444_v29 = vadd.f32 %v2443_v1, %v2395_v51 }
 0x2b8   : > { %v2493_v34 = vadd.f32 %v2492_v45, %v2444_v29  ;;  %v2350_v41 = vpop.f32.mrf.mxu0  ;;  %v2399_v26 = vpop.f32.mrf.mxu1  ;;  %v13296_v29 = vld [vmem:[#allocation4 + $0x3e4] sm:$0xf]  ;;  %v11310_v45 = vld [vmem:[#allocation4 + $0x3f0] sm:$0xf0] }
 0x2b9   : > { %v2351_v37 = vadd.f32 %v2350_v41, %v14699_v4  ;;  %v11313_v25 = vor.u32 %v13296_v29, %v11310_v45 }
 0x2ba   : > { %v2747_v7 = vmax.f32 %v2493_v34, 0.0  ;;  %2641 = vmatmul.bf16.gmra.mxu2 %v14530_v13  ;;  %2690 = vmatmul.bf16.gmra.mxu3 %v14532_v14  ;;  %v11054_v34 = vld [vmem:[#allocation4 + $0x1f0] sm:$0xf0] }
 0x2bb   : > { %v2400_v53 = vadd.f32 %v2399_v26, %v2351_v37  ;;  %3918 = vmatpush.bf16.msra.mxu3 %v11313_v25  ;;  %v13256_v25 = vld [vmem:[#allocation4 + $0x2a4] sm:$0xf] }
 0x2bc   : > { %v14755_v55 = vpack.c.bf16 %v2747_v7, %v2743_v44  ;;  %v14768_v7 = vperm.slane %v14696_v39, 3 }
 0x2bd   : > { %v2446_v48 = vpop.f32.mrf.mxu2  ;;  %v2495_v51 = vpop.f32.mrf.mxu3 }
 0x2be   : > { %v2447_v57 = vadd.f32 %v2446_v48, %v2398_v15 }
 0x2c0   : > { %v2496_v23 = vadd.f32 %v2495_v51, %v2447_v57  ;;  %v2353_v20 = vpop.f32.mrf.mxu0  ;;  %v2402_v62 = vpop.f32.mrf.mxu1 }
 0x2c1   : > { %v2354_v40 = vadd.f32 %v2353_v20, %v14699_v4 }
 0x2c2   : > { %v2751_v42 = vmax.f32 %v2496_v23, 0.0 }
 0x2c3   : > { %v2403_v43 = vadd.f32 %v2402_v62, %v2354_v40  ;;  %2548 = vmatmul.bf16.gmra.mxu0 %v14540_v56  ;;  %2597 = vmatmul.bf16.gmra.mxu1 %v14543_v59  ;;  %v11182_v59 = vld [vmem:[#allocation4 + $0x2f0] sm:$0xf0]  ;;  %v13260_v62 = vld [vmem:[#allocation4 + $0x2c4] sm:$0xf] }
 0x2c4   : > { %v11185_v16 = vor.u32 %v13264_v31, %v11182_v59 }
 0x2c5   : > { %v2448_v13 = vpop.f32.mrf.mxu2  ;;  %v2497_v5 = vpop.f32.mrf.mxu3 }
 0x2c6   : > { %v2449_v14 = vadd.f32 %v2448_v13, %v2400_v53  ;;  %3869 = vmatpush.bf16.msra.mxu2 %v11185_v16 }
 0x2c8   : > { %v2498_v46 = vadd.f32 %v2497_v5, %v2449_v14  ;;  %v2355_v6 = vpop.f32.mrf.mxu0  ;;  %v2404_v38 = vpop.f32.mrf.mxu1 }
 0x2c9   : > { %v2356_v61 = vadd.f32 %v2355_v6, %v14699_v4  ;;  %v13196_v6 = vld [vmem:[#allocation4 + $0xc4] sm:$0xf] }
 0x2ca   : > { %v2755_v17 = vmax.f32 %v2498_v46, 0.0  ;;  %2646 = vmatmul.bf16.gmra.mxu2 %v14550_v19  ;;  %2695 = vmatmul.bf16.gmra.mxu3 %v14557_v21  ;;  %v10929_v19 = vor.u32 %v13200_v27, %v10926_v35  ;;  %v13232_v21 = vld [vmem:[#allocation4 + $0x1e4] sm:$0xf] }
 0x2cb   : > { %v2405_v9 = vadd.f32 %v2404_v38, %v2356_v61  ;;  %v11057_v37 = vor.u32 %v13232_v21, %v11054_v34  ;;  %v10910_v61 = vld [vmem:[#allocation4 + $0xd0] sm:$0xf0] }
 0x2cc   : > { %v14763_v56 = vpack.c.bf16 %v2755_v17, %v2751_v42  ;;  %3771 = vmatpush.bf16.msra.mxu0 %v10929_v19  ;;  %v10913_v38 = vor.u32 %v13196_v6, %v10910_v61  ;;  %v13292_v42 = vld [vmem:[#allocation4 + $0x3c4] sm:$0xf]  ;;  %v11294_v17 = vld [vmem:[#allocation4 + $0x3d0] sm:$0xf0] }
 0x2cd   : > { %v2451_v30 = vpop.f32.mrf.mxu2  ;;  %v2500_v15 = vpop.f32.mrf.mxu3  ;;  %3820 = vmatpush.bf16.msra.mxu1 %v11057_v37  ;;  %v11297_v59 = vor.u32 %v13292_v42, %v11294_v17  ;;  %v11150_v34 = vld [vmem:[#allocation4 + $0x2b0] sm:$0xf0] }
 0x2ce   : > { %v2452_v58 = vadd.f32 %v2451_v30, %v2403_v43  ;;  %v11169_v43 = vor.u32 %v13260_v62, %v11166_v47  ;;  %v11038_v30 = vld [vmem:[#allocation4 + $0x1d0] sm:$0xf0]  ;;  %v11153_v37 = vor.u32 %v13256_v25, %v11150_v34  ;;  %v13288_v47 = vld [vmem:[#allocation4 + $0x3a4] sm:$0xf] }
 0x2cf   : > { %3919 = vmatpush.bf16.msra.mxu3 %v11297_v59  ;;  %v10878_v25 = vld [vmem:[#allocation4 + $0x90] sm:$0xf0] }
 0x2d0   : > { %v2501_v8 = vadd.f32 %v2500_v15, %v2452_v58  ;;  %v2514_v1 = vpop.f32.mrf.mxu0  ;;  %v2563_v4 = vpop.f32.mrf.mxu1  ;;  %3870 = vmatpush.bf16.msra.mxu2 %v11169_v43  ;;  %3772 = vmatpush.bf16.msra.mxu0 %v10913_v38  ;;  %v13224_v43 = vld [vmem:[#allocation4 + $0x1a4] sm:$0xf] }
 0x2d1   : > { %v2515_v20 = vadd.f32 %v2514_v1, %v14768_v7 }
 0x2d2   : > { %v2759_v51 = vmax.f32 %v2501_v8, 0.0 }
 0x2d3   : > { %3583 = vmatmul.bf16.vlgmr.msrb.gmra.mxu0 %v14576_v63  ;;  %3632 = vmatmul.bf16.vlgmr.msrb.gmra.mxu1 %v14643_v49  ;;  %v2564_v13 = vadd.f32 %v2563_v4, %v2515_v20  ;;  %v10894_v20 = vld [vmem:[#allocation4 + $0xb0] sm:$0xf0] }
 0x2d4   : > { %3871 = vmatpush.bf16.msra.mxu2 %v11153_v37  ;;  %v11262_v37 = vld [vmem:[#allocation4 + $0x390] sm:$0xf0] }
 0x2d5   : > { %v2453_v41 = vpop.f32.mrf.mxu2  ;;  %v2502_v44 = vpop.f32.mrf.mxu3 }
 0x2d6   : > { %v2454_v26 = vadd.f32 %v2453_v41, %v2405_v9  ;;  %v13228_v9 = vld [vmem:[#allocation4 + $0x1c4] sm:$0xf] }
 0x2d7   : > { %v11041_v58 = vor.u32 %v13228_v9, %v11038_v30 }
 0x2d8   : > { %v2503_v53 = vadd.f32 %v2502_v44, %v2454_v26  ;;  %v2516_v48 = vpop.f32.mrf.mxu0  ;;  %v2565_v57 = vpop.f32.mrf.mxu1 }
 0x2d9   : > { %v2517_v39 = vadd.f32 %v2516_v48, %v14768_v7  ;;  %3821 = vmatpush.bf16.msra.mxu1 %v11041_v58  ;;  %v11134_v58 = vld [vmem:[#allocation4 + $0x290] sm:$0xf0] }
 0x2da   : > { %v2763_v23 = vmax.f32 %v2503_v53, 0.0  ;;  %3681 = vmatmul.bf16.vlgmr.msrb.gmra.mxu2 %v14715_v28 }
 0x2db   : > { %v2566_v31 = vadd.f32 %v2565_v57, %v2517_v39  ;;  %v11022_v39 = vld [vmem:[#allocation4 + $0x1b0] sm:$0xf0] }
 0x2dc   : > { %v14772_v40 = vpack.c.bf16 %v2763_v23, %v2759_v51  ;;  %v13192_v23 = vld [vmem:[#allocation4 + $0xa4] sm:$0xf] }
 0x2dd   : > { %v2612_v2 = vpop.f32.mrf.mxu2  ;;  %v2661_v32 = vpop.f32.mrf.mxu3  ;;  %v10897_v62 = vor.u32 %v13192_v23, %v10894_v20 }
 0x2de   : > { %v2613_v46 = vadd.f32 %v2612_v2, %v2564_v13  ;;  %v11278_v2 = vld [vmem:[#allocation4 + $0x3b0] sm:$0xf0] }
 0x2df   : > { %v11281_v13 = vor.u32 %v13288_v47, %v11278_v2  ;;  %3773 = vmatpush.bf16.msra.mxu0 %v10897_v62 }
 0x2e0   : > { %v2519_v14 = vpop.f32.mrf.mxu0  ;;  %v2568_v5 = vpop.f32.mrf.mxu1  ;;  %v2662_v15 = vadd.f32 %v2661_v32, %v2613_v46 }
 0x2e1   : > { %v2520_v45 = vadd.f32 %v2519_v14, %v14768_v7  ;;  %3920 = vmatpush.bf16.msra.mxu3 %v11281_v13 }
 0x2e2   : > { %v2704_v19 = vmax.f32 %v2662_v15, 0.0 }
 0x2e3   : > { %3588 = vmatmul.bf16.gmra.mxu0 %v14584_v3  ;;  %3637 = vmatmul.bf16.gmra.mxu1 %v14651_v0  ;;  %v2569_v44 = vadd.f32 %v2568_v5, %v2520_v45  ;;  %v11025_v5 = vor.u32 %v13224_v43, %v11022_v39  ;;  %v13188_v45 = vld [vmem:[#allocation4 + $0x84] sm:$0xf] }
 0x2e4   : > { %v10881_v34 = vor.u32 %v13188_v45, %v10878_v25 }
 0x2e5   : > { %v2614_v16 = vpop.f32.mrf.mxu2  ;;  %v2663_v1 = vpop.f32.mrf.mxu3  ;;  %3822 = vmatpush.bf16.msra.mxu1 %v11025_v5  ;;  %v13248_v5 = vld [vmem:[#allocation4 + $0x264] sm:$0xf] }
 0x2e6   : > { %v2615_v8 = vadd.f32 %v2614_v16, %v2566_v31  ;;  %v13252_v16 = vld [vmem:[#allocation4 + $0x284] sm:$0xf]  ;;  %3774 = vmatpush.bf16.msra.mxu0 %v10881_v34 }
 0x2e8   : > { %v2664_v4 = vadd.f32 %v2663_v1, %v2615_v8  ;;  %v2521_v27 = vpop.f32.mrf.mxu0  ;;  %v2570_v35 = vpop.f32.mrf.mxu1  ;;  %v11137_v8 = vor.u32 %v13252_v16, %v11134_v58  ;;  %v13184_v16 = vld [vmem:[#allocation4 + $0x64] sm:$0xf]  ;;  %v10862_v58 = vld [vmem:[#allocation4 + $0x70] sm:$0xf0] }
 0x2e9   : > { %v2522_v53 = vadd.f32 %v2521_v27, %v14768_v7 }
 0x2ea   : > { %v2708_v29 = vmax.f32 %v2664_v4, 0.0  ;;  %3686 = vmatmul.bf16.gmra.mxu2 %v14723_v10 }
 0x2eb   : > { %v2571_v32 = vadd.f32 %v2570_v35, %v2522_v53  ;;  %3872 = vmatpush.bf16.msra.mxu2 %v11137_v8  ;;  %v13280_v8 = vld [vmem:[#allocation4 + $0x364] sm:$0xf] }
 0x2ec   : > { %v14779_v21 = vpack.c.bf16 %v2708_v29, %v2704_v19 }
 0x2ed   : > { %v2617_v41 = vpop.f32.mrf.mxu2  ;;  %v2666_v26 = vpop.f32.mrf.mxu3 }
 0x2ee   : > { %3730 = vmatmul.bf16.vlgmr.msrb.gmra.mxu3 %v14779_v21  ;;  %v2618_v51 = vadd.f32 %v2617_v41, %v2569_v44  ;;  %v13284_v41 = vld [vmem:[#allocation4 + $0x384] sm:$0xf] }
 0x2ef   : > { %v11265_v53 = vor.u32 %v13284_v41, %v11262_v37 }
 0x2f0   : > { %v2524_v48 = vpop.f32.mrf.mxu0  ;;  %v2573_v57 = vpop.f32.mrf.mxu1  ;;  %v2667_v46 = vadd.f32 %v2666_v26, %v2618_v51  ;;  %v13220_v26 = vld [vmem:[#allocation4 + $0x184] sm:$0xf] }
 0x2f1   : > { %v2525_v59 = vadd.f32 %v2524_v48, %v14768_v7  ;;  %v11006_v48 = vld [vmem:[#allocation4 + $0x190] sm:$0xf0]  ;;  %3921 = vmatpush.bf16.msra.mxu3 %v11265_v53 }
 0x2f2   : > { %v2712_v9 = vmax.f32 %v2667_v46, 0.0  ;;  %v11118_v46 = vld [vmem:[#allocation4 + $0x270] sm:$0xf0] }
 0x2f3   : > { %3593 = vmatmul.bf16.gmra.mxu0 %v14592_v12  ;;  %3642 = vmatmul.bf16.gmra.mxu1 %v14659_v54  ;;  %v2574_v4 = vadd.f32 %v2573_v57, %v2525_v59  ;;  %v11009_v57 = vor.u32 %v13220_v26, %v11006_v48 }
 0x2f5   : > { %v2619_v14 = vpop.f32.mrf.mxu2  ;;  %v2668_v61 = vpop.f32.mrf.mxu3  ;;  %3823 = vmatpush.bf16.msra.mxu1 %v11009_v57 }
 0x2f6   : > { %v2620_v6 = vadd.f32 %v2619_v14, %v2571_v32 }
 0x2f8   : > { %v2669_v38 = vadd.f32 %v2668_v61, %v2620_v6  ;;  %v2526_v42 = vpop.f32.mrf.mxu0  ;;  %v2575_v17 = vpop.f32.mrf.mxu1  ;;  %v11121_v61 = vor.u32 %v13248_v5, %v11118_v46  ;;  %v13180_v46 = vld [vmem:[#allocation4 + $0x44] sm:$0xf] }
 0x2f9   : > { %v2527_v27 = vadd.f32 %v2526_v42, %v14768_v7 }
 0x2fa   : > { %v2716_v31 = vmax.f32 %v2669_v38, 0.0  ;;  %3691 = vmatmul.bf16.gmra.mxu2 %v14731_v60 }
 0x2fb   : > { %v2576_v44 = vadd.f32 %v2575_v17, %v2527_v27  ;;  %3873 = vmatpush.bf16.msra.mxu2 %v11121_v61  ;;  %v17182_v61 = vld [vmem:[#allocation13_spill] sm:$0xff] }
 0x2fc   : > { %v14787_v30 = vpack.c.bf16 %v2716_v31, %v2712_v9 }
 0x2fd   : > { %v2622_v15 = vpop.f32.mrf.mxu2  ;;  %v2671_v1 = vpop.f32.mrf.mxu3 }
 0x2fe   : > { %3735 = vmatmul.bf16.gmra.mxu3 %v14787_v30  ;;  %v2623_v29 = vadd.f32 %v2622_v15, %v2574_v4  ;;  %v10865_v15 = vor.u32 %v13184_v16, %v10862_v58  ;;  %v13216_v4 = vld [vmem:[#allocation4 + $0x164] sm:$0xf]  ;;  %v10974_v58 = vld [vmem:[#allocation4 + $0x150] sm:$0xf0] }
 0x300   : > { %v2529_v35 = vpop.f32.mrf.mxu0  ;;  %v2578_v19 = vpop.f32.mrf.mxu1  ;;  %v2672_v23 = vadd.f32 %v2671_v1, %v2623_v29  ;;  %v11246_v1 = vld [vmem:[#allocation4 + $0x370] sm:$0xf0]  ;;  %3775 = vmatpush.bf16.msra.mxu0 %v10865_v15 }
 0x301   : > { %v2530_v39 = vadd.f32 %v2529_v35, %v14768_v7  ;;  %v11249_v35 = vor.u32 %v13280_v8, %v11246_v1  ;;  %v10990_v29 = vld [vmem:[#allocation4 + $0x170] sm:$0xf0] }
 0x302   : > { %v2720_v32 = vmax.f32 %v2672_v23, 0.0  ;;  %v13244_v23 = vld [vmem:[#allocation4 + $0x244] sm:$0xf] }
 0x303   : > { %3598 = vmatmul.bf16.gmra.mxu0 %v14600_v24  ;;  %3647 = vmatmul.bf16.gmra.mxu1 %v14667_v18  ;;  %v2579_v42 = vadd.f32 %v2578_v19, %v2530_v39  ;;  %v10993_v19 = vor.u32 %v13216_v4, %v10990_v29 }
 0x304   : > { %3922 = vmatpush.bf16.msra.mxu3 %v11249_v35 }
 0x305   : > { %v2624_v51 = vpop.f32.mrf.mxu2  ;;  %v2673_v62 = vpop.f32.mrf.mxu3  ;;  %3824 = vmatpush.bf16.msra.mxu1 %v10993_v19 }
 0x306   : > { %v2625_v20 = vadd.f32 %v2624_v51, %v2576_v44 }
 0x308   : > { %v2674_v47 = vadd.f32 %v2673_v62, %v2625_v20  ;;  %v2531_v2 = vpop.f32.mrf.mxu0  ;;  %v2580_v43 = vpop.f32.mrf.mxu1  ;;  %v11102_v20 = vld [vmem:[#allocation4 + $0x250] sm:$0xf0] }
 0x309   : > { %v2532_v17 = vadd.f32 %v2531_v2, %v14768_v7 }
 0x30a   : > { %v2724_v13 = vmax.f32 %v2674_v47, 0.0  ;;  %3696 = vmatmul.bf16.gmra.mxu2 %v14739_v52  ;;  %v11105_v47 = vor.u32 %v13244_v23, %v11102_v20 }
 0x30b   : > { %v2581_v27 = vadd.f32 %v2580_v43, %v2532_v17  ;;  %v11230_v17 = vld [vmem:[#allocation4 + $0x350] sm:$0xf0] }
 0x30c   : > { %v14795_v14 = vpack.c.bf16 %v2724_v13, %v2720_v32  ;;  %3874 = vmatpush.bf16.msra.mxu2 %v11105_v47 }
 0x30d   : > { %v2627_v6 = vpop.f32.mrf.mxu2  ;;  %v2676_v38 = vpop.f32.mrf.mxu3 }
 0x30e   : > { %3740 = vmatmul.bf16.gmra.mxu3 %v14795_v14  ;;  %v2628_v59 = vadd.f32 %v2627_v6, %v2579_v42  ;;  %v10846_v6 = vld [vmem:[#allocation4 + $0x50] sm:$0xf0]  ;;  %v13276_v42 = vld [vmem:[#allocation4 + $0x344] sm:$0xf] }
 0x30f   : > { %v11233_v16 = vor.u32 %v13276_v42, %v11230_v17 }
 0x310   : > { %v2534_v9 = vpop.f32.mrf.mxu0  ;;  %v2583_v31 = vpop.f32.mrf.mxu1  ;;  %v2677_v25 = vadd.f32 %v2676_v38, %v2628_v59  ;;  %v10849_v38 = vor.u32 %v13180_v46, %v10846_v6 }
 0x311   : > { %v2535_v51 = vadd.f32 %v2534_v9, %v14768_v7  ;;  %v13212_v9 = vld [vmem:[#allocation4 + $0x144] sm:$0xf]  ;;  %3923 = vmatpush.bf16.msra.mxu3 %v11233_v16  ;;  %v11214_v16 = vld [vmem:[#allocation4 + $0x330] sm:$0xf0] }
 0x312   : > { %v2728_v53 = vmax.f32 %v2677_v25, 0.0  ;;  %3776 = vmatpush.bf16.msra.mxu0 %v10849_v38  ;;  %v13176_v25 = vld [vmem:[#allocation4 + $0x24] sm:$0xf]  ;;  %v10942_v38 = vld [vmem:[#allocation4 + $0x110] sm:$0xf0] }
 0x313   : > { %3603 = vmatmul.bf16.gmra.mxu0 %v14608_v33  ;;  %3652 = vmatmul.bf16.gmra.mxu1 %v14675_v11  ;;  %v2584_v43 = vadd.f32 %v2583_v31, %v2535_v51  ;;  %v10977_v31 = vor.u32 %v13212_v9, %v10974_v58  ;;  %v10958_v51 = vld [vmem:[#allocation4 + $0x130] sm:$0xf0]  ;;  %v17183_v58 = vld [vmem:[#allocation14_spill] sm:$0xff] }
 0x315   : > { %v2629_v45 = vpop.f32.mrf.mxu2  ;;  %v2678_v41 = vpop.f32.mrf.mxu3  ;;  %3825 = vmatpush.bf16.msra.mxu1 %v10977_v31 }
 0x316   : > { %v2630_v34 = vadd.f32 %v2629_v45, %v2581_v27 }
 0x318   : > { %v2679_v37 = vadd.f32 %v2678_v41, %v2630_v34  ;;  %v2536_v26 = vpop.f32.mrf.mxu0  ;;  %v2585_v44 = vpop.f32.mrf.mxu1  ;;  %v10830_v34 = vld [vmem:[#allocation4 + $0x30] sm:$0xf0]  ;;  %v13208_v41 = vld [vmem:[#allocation4 + $0x124] sm:$0xf] }
 0x319   : > { %v2537_v32 = vadd.f32 %v2536_v26, %v14768_v7 }
 0x31a   : > { %v2732_v48 = vmax.f32 %v2679_v37, 0.0  ;;  %3701 = vmatmul.bf16.gmra.mxu2 %v14747_v22 }
 0x31b   : > { %v2586_v59 = vadd.f32 %v2585_v44, %v2537_v32  ;;  %v13240_v44 = vld [vmem:[#allocation4 + $0x224] sm:$0xf] }
 0x31c   : > { %v14803_v57 = vpack.c.bf16 %v2732_v48, %v2728_v53  ;;  %v11086_v53 = vld [vmem:[#allocation4 + $0x230] sm:$0xf0]  ;;  %v10833_v48 = vor.u32 %v13176_v25, %v10830_v34  ;;  %v13204_v32 = vld [vmem:[#allocation4 + $0x104] sm:$0xf] }
 0x31d   : > { %v2632_v62 = vpop.f32.mrf.mxu2  ;;  %v2681_v2 = vpop.f32.mrf.mxu3  ;;  %v11089_v20 = vor.u32 %v13240_v44, %v11086_v53  ;;  %v10945_v17 = vor.u32 %v13204_v32, %v10942_v38 }
 0x31e   : > { %3745 = vmatmul.bf16.gmra.mxu3 %v14803_v57  ;;  %v2633_v5 = vadd.f32 %v2632_v62, %v2584_v43  ;;  %v10961_v62 = vor.u32 %v13208_v41, %v10958_v51  ;;  %3777 = vmatpush.bf16.msra.mxu0 %v10833_v48  ;;  %v10814_v43 = vld [vmem:[#allocation4 + $0x10] sm:$0xf0] }
 0x31f   : > { %3875 = vmatpush.bf16.msra.mxu2 %v11089_v20  ;;  %v11198_v20 = vld [vmem:[#allocation4 + $0x310] sm:$0xf0] }
 0x320   : > { %v2539_v13 = vpop.f32.mrf.mxu0  ;;  %v2588_v39 = vpop.f32.mrf.mxu1  ;;  %v2682_v8 = vadd.f32 %v2681_v2, %v2633_v5  ;;  %3826 = vmatpush.bf16.msra.mxu1 %v10961_v62  ;;  %v13172_v2 = vld [vmem:[#allocation4 + $0x4] sm:$0xf] }
 0x321   : > { %v2540_v37 = vadd.f32 %v2539_v13, %v14768_v7  ;;  %v10817_v6 = vor.u32 %v13172_v2, %v10814_v43 }
 0x322   : > { %v2736_v45 = vmax.f32 %v2682_v8, 0.0  ;;  %v17184_v8 = vld [vmem:[#allocation16_spill] sm:$0xff] }
 0x323   : > { %3608 = vmatmul.bf16.gmra.mxu0 %v17182_v61  ;;  %3657 = vmatmul.bf16.gmra.mxu1 %v14683_v36  ;;  %v2589_v5 = vadd.f32 %v2588_v39, %v2540_v37  ;;  %v13236_v39 = vld [vmem:[#allocation4 + $0x204] sm:$0xf] }
 0x324   : > { %3778 = vmatpush.bf16.msra.mxu0 %v10817_v6  ;;  %3827 = vmatpush.bf16.msra.mxu1 %v10945_v17 }
 0x325   : > { %v2634_v15 = vpop.f32.mrf.mxu2  ;;  %v2683_v4 = vpop.f32.mrf.mxu3 }
 0x326   : > { %v2635_v1 = vadd.f32 %v2634_v15, %v2586_v59  ;;  %v13272_v59 = vld [vmem:[#allocation4 + $0x324] sm:$0xf] }
 0x327   : > { %v11217_v15 = vor.u32 %v13272_v59, %v11214_v16 }
 0x328   : > { %v2684_v27 = vadd.f32 %v2683_v4, %v2635_v1  ;;  %v2541_v35 = vpop.f32.mrf.mxu0  ;;  %v2590_v29 = vpop.f32.mrf.mxu1  ;;  %v11070_v4 = vld [vmem:[#allocation4 + $0x210] sm:$0xf0] }
 0x329   : > { %v2542_v13 = vadd.f32 %v2541_v35, %v14768_v7  ;;  %3924 = vmatpush.bf16.msra.mxu3 %v11217_v15 }
 0x32a   : > { %v2740_v19 = vmax.f32 %v2684_v27, 0.0  ;;  %3706 = vmatmul.bf16.gmra.mxu2 %v14755_v55 }
 0x32b   : > { %v2591_v31 = vadd.f32 %v2590_v29, %v2542_v13  ;;  %v17185_v13 = vld [vmem:[#allocation15_spill] sm:$0xff] }
 0x32c   : > { %v14811_v26 = vpack.c.bf16 %v2740_v19, %v2736_v45  ;;  %v11073_v19 = vor.u32 %v13236_v39, %v11070_v4  ;;  %v11188_v39 = vld [vmem:[#allocation4 + $0x2e8] sm:$0xf]  ;;  %v13267_v4 = vld [vmem:[#allocation4 + $0x2f4] sm:$0xf0] }
 0x32d   : > { %v2637_v23 = vpop.f32.mrf.mxu2  ;;  %v2686_v47 = vpop.f32.mrf.mxu3 }
 0x32e   : > { %3750 = vmatmul.bf16.gmra.mxu3 %v14811_v26  ;;  %v2638_v9 = vadd.f32 %v2637_v23, %v2589_v5  ;;  %3876 = vmatpush.bf16.msra.mxu2 %v11073_v19  ;;  %v13268_v23 = vld [vmem:[#allocation4 + $0x304] sm:$0xf] }
 0x32f   : > { %v11201_v62 = vor.u32 %v13268_v23, %v11198_v20  ;;  %v13235_v23 = vld [vmem:[#allocation4 + $0x1f4] sm:$0xf0] }
 0x330   : > { %v2544_v46 = vpop.f32.mrf.mxu0  ;;  %v2593_v42 = vpop.f32.mrf.mxu1  ;;  %v2687_v27 = vadd.f32 %v2686_v47, %v2638_v9 }
 0x331   : > { %v2545_v29 = vadd.f32 %v2544_v46, %v14768_v7  ;;  %3925 = vmatpush.bf16.msra.mxu3 %v11201_v62 }
 0x332   : > { %v2744_v37 = vmax.f32 %v2687_v27, 0.0 }
 0x333   : > { %3613 = vmatmul.bf16.gmra.mxu0 %v17183_v58  ;;  %3662 = vmatmul.bf16.gmra.mxu1 %v17184_v8  ;;  %v2594_v47 = vadd.f32 %v2593_v42, %v2545_v29 }
 0x335   : > { %v2639_v1 = vpop.f32.mrf.mxu2  ;;  %v2688_v45 = vpop.f32.mrf.mxu3 }
 0x336   : > { %v2640_v35 = vadd.f32 %v2639_v1, %v2591_v31  ;;  %v14829_v1 = vld [vmem:[%s17105_s6] sm:$0xf] }
 0x338   : > { %v2689_v25 = vadd.f32 %v2688_v45, %v2640_v35  ;;  %v2546_v34 = vpop.f32.mrf.mxu0  ;;  %v2595_v41 = vpop.f32.mrf.mxu1  ;;  %v11189_v45 = vor.u32 %v13267_v4, %v11188_v39 }
 0x339   : > { %v2547_v2 = vadd.f32 %v2546_v34, %v14768_v7 }
 0x33a   : > { %v2748_v44 = vmax.f32 %v2689_v25, 0.0  ;;  %3711 = vmatmul.bf16.gmra.mxu2 %v14763_v56  ;;  %v14835_v25 = vperm.slane %v14829_v1, 0 }
 0x33b   : > { %v2596_v6 = vadd.f32 %v2595_v41, %v2547_v2  ;;  %4065 = vmatpush.bf16.msrb.mxu2 %v11189_v45  ;;  %v10932_v41 = vld [vmem:[#allocation4 + $0xe8] sm:$0xf] }
 0x33c   : > { %v14819_v53 = vpack.c.bf16 %v2748_v44, %v2744_v37  ;;  %v13203_v37 = vld [vmem:[#allocation4 + $0xf4] sm:$0xf0]  ;;  %v11316_v44 = vld [vmem:[#allocation4 + $0x3e8] sm:$0xf] }
 0x33d   : > { %v2642_v48 = vpop.f32.mrf.mxu2  ;;  %v2691_v51 = vpop.f32.mrf.mxu3  ;;  %v10933_v29 = vor.u32 %v13203_v37, %v10932_v41  ;;  %v11172_v37 = vld [vmem:[#allocation4 + $0x2c8] sm:$0xf] }
 0x33e   : > { %3755 = vmatmul.bf16.gmra.mxu3 %v14819_v53  ;;  %v2643_v5 = vadd.f32 %v2642_v48, %v2594_v47  ;;  %v13299_v48 = vld [vmem:[#allocation4 + $0x3f4] sm:$0xf0] }
 0x33f   : > { %v11317_v2 = vor.u32 %v13299_v48, %v11316_v44  ;;  %3967 = vmatpush.bf16.msrb.mxu0 %v10933_v29  ;;  %v10916_v44 = vld [vmem:[#allocation4 + $0xc8] sm:$0xf]  ;;  %v13199_v48 = vld [vmem:[#allocation4 + $0xd4] sm:$0xf0] }
 0x340   : > { %v2549_v43 = vpop.f32.mrf.mxu0  ;;  %v2598_v32 = vpop.f32.mrf.mxu1  ;;  %v2692_v38 = vadd.f32 %v2691_v51, %v2643_v5  ;;  %v11060_v51 = vld [vmem:[#allocation4 + $0x1e8] sm:$0xf] }
 0x341   : > { %v2550_v27 = vadd.f32 %v2549_v43, %v14768_v7  ;;  %v11061_v43 = vor.u32 %v13235_v23, %v11060_v51  ;;  %4114 = vmatpush.bf16.msrb.mxu3 %v11317_v2  ;;  %v11300_v51 = vld [vmem:[#allocation4 + $0x3c8] sm:$0xf]  ;;  %v13295_v23 = vld [vmem:[#allocation4 + $0x3d4] sm:$0xf0] }
 0x342   : > { %v2752_v31 = vmax.f32 %v2692_v38, 0.0  ;;  %v11044_v2 = vld [vmem:[#allocation4 + $0x1c8] sm:$0xf] }
 0x343   : > { %3618 = vmatmul.bf16.gmra.mxu0 %v17185_v13  ;;  %3667 = vmatmul.bf16.gmra.mxu1 %v14707_v50  ;;  %v2599_v20 = vadd.f32 %v2598_v32, %v2550_v27 }
 0x344   : > { %4016 = vmatpush.bf16.msrb.mxu1 %v11061_v43  ;;  %v13231_v43 = vld [vmem:[#allocation4 + $0x1d4] sm:$0xf0] }
 0x345   : > { %v2644_v46 = vpop.f32.mrf.mxu2  ;;  %v2693_v9 = vpop.f32.mrf.mxu3 }
 0x346   : > { %v2645_v17 = vadd.f32 %v2644_v46, %v2596_v6 }
 0x348   : > { %v2694_v59 = vadd.f32 %v2693_v9, %v2645_v17  ;;  %v2551_v16 = vpop.f32.mrf.mxu0  ;;  %v2600_v15 = vpop.f32.mrf.mxu1 }
 0x349   : > { %v2552_v62 = vadd.f32 %v2551_v16, %v14768_v7 }
 0x34a   : > { %v2756_v42 = vmax.f32 %v2694_v59, 0.0  ;;  %3716 = vmatmul.bf16.gmra.mxu2 %v14772_v40 }
 0x34b   : > { %v2601_v17 = vadd.f32 %v2600_v15, %v2552_v62  ;;  %v10917_v62 = vor.u32 %v13199_v48, %v10916_v44  ;;  %v13291_v44 = vld [vmem:[#allocation4 + $0x3b4] sm:$0xf0] }
 0x34c   : > { %v14832_v35 = vpack.c.bf16 %v2756_v42, %v2752_v31 }
 0x34d   : > { %v2647_v19 = vpop.f32.mrf.mxu2  ;;  %v2696_v34 = vpop.f32.mrf.mxu3  ;;  %3968 = vmatpush.bf16.msrb.mxu0 %v10917_v62 }
 0x34e   : > { %3760 = vmatmul.bf16.gmra.mxu3 %v14832_v35  ;;  %v2648_v46 = vadd.f32 %v2647_v19, %v2599_v20 }
 0x350   : > { %v3584_v47 = vpop.f32.mrf.mxu0  ;;  %v3633_v6 = vpop.f32.mrf.mxu1  ;;  %v2697_v32 = vadd.f32 %v2696_v34, %v2648_v46  ;;  %v13263_v34 = vld [vmem:[#allocation4 + $0x2d4] sm:$0xf0]  ;;  %v11045_v46 = vor.u32 %v13231_v43, %v11044_v2 }
 0x351   : > { %v3585_v5 = vadd.f32 %v3584_v47, %v14835_v25  ;;  %v11173_v29 = vor.u32 %v13263_v34, %v11172_v37  ;;  %v11301_v47 = vor.u32 %v13295_v23, %v11300_v51  ;;  %v13195_v37 = vld [vmem:[#allocation4 + $0xb4] sm:$0xf0]  ;;  %v11284_v34 = vld [vmem:[#allocation4 + $0x3a8] sm:$0xf] }
 0x352   : > { %v2760_v4 = vmax.f32 %v2697_v32, 0.0  ;;  %4017 = vmatpush.bf16.msrb.mxu1 %v11045_v46  ;;  %v11285_v48 = vor.u32 %v13291_v44, %v11284_v34  ;;  %v11028_v51 = vld [vmem:[#allocation4 + $0x1a8] sm:$0xf]  ;;  %v13227_v23 = vld [vmem:[#allocation4 + $0x1b4] sm:$0xf0] }
 0x353   : > { %v3634_v38 = vadd.f32 %v3633_v6, %v3585_v5  ;;  %3779 = vmatmul.bf16.vlgmr.msra.gmra.mxu0 %v14576_v63  ;;  %3828 = vmatmul.bf16.vlgmr.msra.gmra.mxu1 %v14643_v49  ;;  %v11029_v2 = vor.u32 %v13227_v23, %v11028_v51  ;;  %v13255_v34 = vld [vmem:[#allocation4 + $0x294] sm:$0xf0] }
 0x354   : > { %4066 = vmatpush.bf16.msrb.mxu2 %v11173_v29  ;;  %4115 = vmatpush.bf16.msrb.mxu3 %v11301_v47 }
 0x355   : > { %v2649_v9 = vpop.f32.mrf.mxu2  ;;  %v2698_v7 = vpop.f32.mrf.mxu3 }
 0x356   : > { %v2650_v59 = vadd.f32 %v2649_v9, %v2601_v17  ;;  %4018 = vmatpush.bf16.msrb.mxu1 %v11029_v2 }
 0x358   : > { %v2699_v16 = vadd.f32 %v2698_v7, %v2650_v59  ;;  %v3586_v31 = vpop.f32.mrf.mxu0  ;;  %v3635_v39 = vpop.f32.mrf.mxu1  ;;  %4116 = vmatpush.bf16.msrb.mxu3 %v11285_v48  ;;  %v13287_v48 = vld [vmem:[#allocation4 + $0x394] sm:$0xf0] }
 0x359   : > { %v3587_v42 = vadd.f32 %v3586_v31, %v14835_v25 }
 0x35a   : > { %v2764_v27 = vmax.f32 %v2699_v16, 0.0  ;;  %3877 = vmatmul.bf16.vlgmr.msra.gmra.mxu2 %v14715_v28 }
 0x35b   : > { %v3636_v45 = vadd.f32 %v3635_v39, %v3587_v42  ;;  %v11156_v39 = vld [vmem:[#allocation4 + $0x2a8] sm:$0xf] }
 0x35c   : > { %v14844_v19 = vpack.c.bf16 %v2764_v27, %v2760_v4  ;;  %v13259_v4 = vld [vmem:[#allocation4 + $0x2b4] sm:$0xf0]  ;;  %v10900_v27 = vld [vmem:[#allocation4 + $0xa8] sm:$0xf] }
 0x35d   : > { %v3682_v41 = vpop.f32.mrf.mxu2 }
 0x35e   : > { %v3683_v15 = vadd.f32 %v3682_v41, %v3634_v38  ;;  %3765 = vmatmul.bf16.gmra.mxu3 %v14844_v19  ;;  %v11157_v41 = vor.u32 %v13259_v4, %v11156_v39 }
 0x360   : > { %v3589_v20 = vpop.f32.mrf.mxu0  ;;  %v3638_v6 = vpop.f32.mrf.mxu1  ;;  %4067 = vmatpush.bf16.msrb.mxu2 %v11157_v41 }
 0x361   : > { %v3590_v5 = vadd.f32 %v3589_v20, %v14835_v25 }
 0x363   : > { %v3639_v38 = vadd.f32 %v3638_v6, %v3590_v5  ;;  %3784 = vmatmul.bf16.gmra.mxu0 %v14584_v3  ;;  %3833 = vmatmul.bf16.gmra.mxu1 %v14651_v0 }
 0x365   : > { %v3684_v17 = vpop.f32.mrf.mxu2 }
 0x366   : > { %v3685_v9 = vadd.f32 %v3684_v17, %v3636_v45  ;;  %v10901_v45 = vor.u32 %v13195_v37, %v10900_v27  ;;  %v11140_v37 = vld [vmem:[#allocation4 + $0x288] sm:$0xf] }
 0x367   : > { %v11141_v44 = vor.u32 %v13255_v34, %v11140_v37 }
 0x368   : > { %v3591_v32 = vpop.f32.mrf.mxu0  ;;  %v3640_v7 = vpop.f32.mrf.mxu1  ;;  %3969 = vmatpush.bf16.msrb.mxu0 %v10901_v45  ;;  %v11268_v45 = vld [vmem:[#allocation4 + $0x388] sm:$0xf] }
 0x369   : > { %v3592_v59 = vadd.f32 %v3591_v32, %v14835_v25  ;;  %v11269_v23 = vor.u32 %v13287_v48, %v11268_v45  ;;  %4068 = vmatpush.bf16.msrb.mxu2 %v11141_v44  ;;  %v11124_v45 = vld [vmem:[#allocation4 + $0x268] sm:$0xf]  ;;  %v13251_v48 = vld [vmem:[#allocation4 + $0x274] sm:$0xf0] }
 0x36a   : > { %3882 = vmatmul.bf16.gmra.mxu2 %v14723_v10 }
 0x36b   : > { %v3641_v16 = vadd.f32 %v3640_v7, %v3592_v59  ;;  %4117 = vmatpush.bf16.msrb.mxu3 %v11269_v23  ;;  %v11252_v23 = vld [vmem:[#allocation4 + $0x368] sm:$0xf] }
 0x36d   : > { %v3687_v31 = vpop.f32.mrf.mxu2 }
 0x36e   : > { %v3688_v42 = vadd.f32 %v3687_v31, %v3639_v38  ;;  %3926 = vmatmul.bf16.vlgmr.msra.gmra.mxu3 %v14779_v21 }
 0x370   : > { %v3594_v29 = vpop.f32.mrf.mxu0  ;;  %v3643_v62 = vpop.f32.mrf.mxu1 }
 0x371   : > { %v3595_v20 = vadd.f32 %v3594_v29, %v14835_v25  ;;  %v3731_v47 = vpop.f32.mrf.mxu3  ;;  %v13191_v29 = vld [vmem:[#allocation4 + $0x94] sm:$0xf0] }
 0x372   : > { %v3732_v43 = vadd.f32 %v3731_v47, %v3683_v15 }
 0x373   : > { %v3644_v5 = vadd.f32 %v3643_v62, %v3595_v20  ;;  %3789 = vmatmul.bf16.gmra.mxu0 %v14592_v12  ;;  %3838 = vmatmul.bf16.gmra.mxu1 %v14659_v54  ;;  %v11012_v20 = vld [vmem:[#allocation4 + $0x188] sm:$0xf]  ;;  %v13223_v62 = vld [vmem:[#allocation4 + $0x194] sm:$0xf0] }
 0x374   : > { %v4359_v15 = vmax.f32 %v3732_v43, 0.0 }
 0x375   : > { %v3689_v6 = vpop.f32.mrf.mxu2 }
 0x376   : > { %v3690_v46 = vadd.f32 %v3689_v6, %v3641_v16  ;;  %v10884_v16 = vld [vmem:[#allocation4 + $0x88] sm:$0xf] }
 0x378   : > { %v3596_v38 = vpop.f32.mrf.mxu0  ;;  %v3645_v32 = vpop.f32.mrf.mxu1 }
 0x379   : > { %v3597_v17 = vadd.f32 %v3596_v38, %v14835_v25  ;;  %v3733_v59 = vpop.f32.mrf.mxu3 }
 0x37a   : > { %v3734_v7 = vadd.f32 %v3733_v59, %v3685_v9  ;;  %3887 = vmatmul.bf16.gmra.mxu2 %v14731_v60  ;;  %v10885_v9 = vor.u32 %v13191_v29, %v10884_v16 }
 0x37b   : > { %v3646_v31 = vadd.f32 %v3645_v32, %v3597_v17 }
 0x37c   : > { %v4363_v39 = vmax.f32 %v3734_v7, 0.0  ;;  %3970 = vmatpush.bf16.msrb.mxu0 %v10885_v9  ;;  %v13187_v9 = vld [vmem:[#allocation4 + $0x74] sm:$0xf0] }
 0x37d   : > { %v3692_v4 = vpop.f32.mrf.mxu2 }
 0x37e   : > { %v14858_v27 = vpack.c.bf16 %v4363_v39, %v4359_v15  ;;  %v3693_v41 = vadd.f32 %v3692_v4, %v3644_v5  ;;  %3931 = vmatmul.bf16.gmra.mxu3 %v14787_v30  ;;  %v11013_v5 = vor.u32 %v13223_v62, %v11012_v20  ;;  %v13283_v20 = vld [vmem:[#allocation4 + $0x374] sm:$0xf0] }
 0x380   : > { %v3599_v51 = vpop.f32.mrf.mxu0  ;;  %v3648_v2 = vpop.f32.mrf.mxu1  ;;  %4019 = vmatpush.bf16.msrb.mxu1 %v11013_v5 }
 0x381   : > { %v3600_v47 = vadd.f32 %v3599_v51, %v14835_v25  ;;  %v3736_v43 = vpop.f32.mrf.mxu3  ;;  %v11125_v51 = vor.u32 %v13251_v48, %v11124_v45 }
 0x382   : > { %v3737_v6 = vadd.f32 %v3736_v43, %v3688_v42  ;;  %v13219_v43 = vld [vmem:[#allocation4 + $0x174] sm:$0xf0] }
 0x383   : > { %v3649_v38 = vadd.f32 %v3648_v2, %v3600_v47  ;;  %3794 = vmatmul.bf16.gmra.mxu0 %v14600_v24  ;;  %3843 = vmatmul.bf16.gmra.mxu1 %v14667_v18  ;;  %v11253_v47 = vor.u32 %v13283_v20, %v11252_v23  ;;  %v10996_v2 = vld [vmem:[#allocation4 + $0x168] sm:$0xf] }
 0x384   : > { %v4367_v42 = vmax.f32 %v3737_v6, 0.0  ;;  %4069 = vmatpush.bf16.msrb.mxu2 %v11125_v51  ;;  %v11108_v20 = vld [vmem:[#allocation4 + $0x248] sm:$0xf] }
 0x385   : > { %v3694_v17 = vpop.f32.mrf.mxu2  ;;  %4118 = vmatpush.bf16.msrb.mxu3 %v11253_v47  ;;  %v13183_v47 = vld [vmem:[#allocation4 + $0x54] sm:$0xf0] }
 0x386   : > { %v3695_v32 = vadd.f32 %v3694_v17, %v3646_v31  ;;  %v10868_v31 = vld [vmem:[#allocation4 + $0x68] sm:$0xf] }
 0x388   : > { %v3601_v59 = vpop.f32.mrf.mxu0  ;;  %v3650_v15 = vpop.f32.mrf.mxu1 }
 0x389   : > { %v3602_v7 = vadd.f32 %v3601_v59, %v14835_v25  ;;  %v3738_v39 = vpop.f32.mrf.mxu3 }
 0x38a   : > { %v3739_v4 = vadd.f32 %v3738_v39, %v3690_v46  ;;  %3892 = vmatmul.bf16.gmra.mxu2 %v14739_v52  ;;  %v10869_v46 = vor.u32 %v13187_v9, %v10868_v31 }
 0x38b   : > { %v3651_v37 = vadd.f32 %v3650_v15, %v3602_v7 }
 0x38c   : > { %v4371_v34 = vmax.f32 %v3739_v4, 0.0  ;;  %3971 = vmatpush.bf16.msrb.mxu0 %v10869_v46 }
 0x38d   : > { %v3697_v16 = vpop.f32.mrf.mxu2 }
 0x38e   : > { %v14866_v44 = vpack.c.bf16 %v4371_v34, %v4367_v42  ;;  %v3698_v29 = vadd.f32 %v3697_v16, %v3649_v38  ;;  %3936 = vmatmul.bf16.gmra.mxu3 %v14795_v14  ;;  %v10997_v38 = vor.u32 %v13219_v43, %v10996_v2  ;;  %v11236_v2 = vld [vmem:[#allocation4 + $0x348] sm:$0xf]  ;;  %v13279_v43 = vld [vmem:[#allocation4 + $0x354] sm:$0xf0] }
 0x390   : > { %v3604_v62 = vpop.f32.mrf.mxu0  ;;  %v3653_v6 = vpop.f32.mrf.mxu1  ;;  %4020 = vmatpush.bf16.msrb.mxu1 %v10997_v38  ;;  %v13215_v38 = vld [vmem:[#allocation4 + $0x154] sm:$0xf0] }
 0x391   : > { %v3605_v5 = vadd.f32 %v3604_v62, %v14835_v25  ;;  %v3741_v17 = vpop.f32.mrf.mxu3  ;;  %v10852_v62 = vld [vmem:[#allocation4 + $0x48] sm:$0xf] }
 0x392   : > { %v3742_v59 = vadd.f32 %v3741_v17, %v3693_v41  ;;  %v10980_v17 = vld [vmem:[#allocation4 + $0x148] sm:$0xf] }
 0x393   : > { %v3654_v7 = vadd.f32 %v3653_v6, %v3605_v5  ;;  %3799 = vmatmul.bf16.gmra.mxu0 %v14608_v33  ;;  %3848 = vmatmul.bf16.gmra.mxu1 %v14675_v11  ;;  %v10853_v5 = vor.u32 %v13183_v47, %v10852_v62  ;;  %v11237_v6 = vor.u32 %v13279_v43, %v11236_v2  ;;  %v10964_v47 = vld [vmem:[#allocation4 + $0x128] sm:$0xf] }
 0x394   : > { %v4375_v41 = vmax.f32 %v3742_v59, 0.0 }
 0x395   : > { %v3699_v15 = vpop.f32.mrf.mxu2  ;;  %3972 = vmatpush.bf16.msrb.mxu0 %v10853_v5  ;;  %4119 = vmatpush.bf16.msrb.mxu3 %v11237_v6  ;;  %v13211_v5 = vld [vmem:[#allocation4 + $0x134] sm:$0xf0] }
 0x396   : > { %v3700_v39 = vadd.f32 %v3699_v15, %v3651_v37  ;;  %v13247_v37 = vld [vmem:[#allocation4 + $0x254] sm:$0xf0] }
 0x397   : > { %v11109_v46 = vor.u32 %v13247_v37, %v11108_v20 }
 0x398   : > { %v3606_v4 = vpop.f32.mrf.mxu0  ;;  %v3655_v34 = vpop.f32.mrf.mxu1 }
 0x399   : > { %v3607_v42 = vadd.f32 %v3606_v4, %v14835_v25  ;;  %v3743_v16 = vpop.f32.mrf.mxu3  ;;  %4070 = vmatpush.bf16.msrb.mxu2 %v11109_v46  ;;  %v13179_v46 = vld [vmem:[#allocation4 + $0x34] sm:$0xf0] }
 0x39a   : > { %v3744_v45 = vadd.f32 %v3743_v16, %v3695_v32  ;;  %3897 = vmatmul.bf16.gmra.mxu2 %v14747_v22 }
 0x39b   : > { %v3656_v48 = vadd.f32 %v3655_v34, %v3607_v42 }
 0x39c   : > { %v4379_v31 = vmax.f32 %v3744_v45, 0.0 }
 0x39d   : > { %v3702_v51 = vpop.f32.mrf.mxu2 }
 0x39e   : > { %v14874_v9 = vpack.c.bf16 %v4379_v31, %v4375_v41  ;;  %v14876_v23 = vadd.f32 %v3702_v51, %v3654_v7  ;;  %3941 = vmatmul.bf16.gmra.mxu3 %v14803_v57  ;;  %v10981_v7 = vor.u32 %v13215_v38, %v10980_v17  ;;  %v10965_v17 = vor.u32 %v13211_v5, %v10964_v47  ;;  %v11076_v5 = vld [vmem:[#allocation4 + $0x208] sm:$0xf] }
 0x3a0   : > { %v3609_v32 = vpop.f32.mrf.mxu0  ;;  %v3658_v15 = vpop.f32.mrf.mxu1  ;;  %4021 = vmatpush.bf16.msrb.mxu1 %v10981_v7  ;;  %v13275_v7 = vld [vmem:[#allocation4 + $0x334] sm:$0xf0] }
 0x3a1   : > { %v3610_v59 = vadd.f32 %v3609_v32, %v14835_v25  ;;  %v3746_v4 = vpop.f32.mrf.mxu3 }
 0x3a2   : > { %v3747_v42 = vadd.f32 %v3746_v4, %v3698_v29  ;;  %v10836_v29 = vld [vmem:[#allocation4 + $0x28] sm:$0xf] }
 0x3a3   : > { %v3659_v34 = vadd.f32 %v3658_v15, %v3610_v59  ;;  %3804 = vmatmul.bf16.gmra.mxu0 %v17182_v61  ;;  %3853 = vmatmul.bf16.gmra.mxu1 %v14683_v36  ;;  %v10837_v32 = vor.u32 %v13179_v46, %v10836_v29  ;;  %v11092_v59 = vld [vmem:[#allocation4 + $0x228] sm:$0xf]  ;;  %v13243_v15 = vld [vmem:[#allocation4 + $0x234] sm:$0xf0] }
 0x3a4   : > { %v4383_v2 = vmax.f32 %v3747_v42, 0.0  ;;  %v11093_v4 = vor.u32 %v13243_v15, %v11092_v59  ;;  %4022 = vmatpush.bf16.msrb.mxu1 %v10965_v17 }
 0x3a5   : > { %v3704_v16 = vpop.f32.mrf.mxu2  ;;  %3973 = vmatpush.bf16.msrb.mxu0 %v10837_v32 }
 0x3a6   : > { %v3705_v45 = vadd.f32 %v3704_v16, %v3656_v48  ;;  %v10820_v16 = vld [vmem:[#allocation4 + $0x8] sm:$0xf]  ;;  %4071 = vmatpush.bf16.msrb.mxu2 %v11093_v4 }
 0x3a8   : > { %v3611_v41 = vpop.f32.mrf.mxu0  ;;  %v3660_v51 = vpop.f32.mrf.mxu1 }
 0x3a9   : > { %v3612_v31 = vadd.f32 %v3611_v41, %v14835_v25  ;;  %v3748_v20 = vpop.f32.mrf.mxu3  ;;  %v13175_v41 = vld [vmem:[#allocation4 + $0x14] sm:$0xf0] }
 0x3aa   : > { %v3749_v37 = vadd.f32 %v3748_v20, %v3700_v39  ;;  %3902 = vmatmul.bf16.gmra.mxu2 %v14755_v55  ;;  %v11220_v39 = vld [vmem:[#allocation4 + $0x328] sm:$0xf] }
 0x3ab   : > { %v3661_v62 = vadd.f32 %v3660_v51, %v3612_v31  ;;  %v11221_v31 = vor.u32 %v13275_v7, %v11220_v39  ;;  %v10821_v51 = vor.u32 %v13175_v41, %v10820_v16  ;;  %v10948_v20 = vld [vmem:[#allocation4 + $0x108] sm:$0xf] }
 0x3ac   : > { %v4387_v43 = vmax.f32 %v3749_v37, 0.0  ;;  %v13207_v37 = vld [vmem:[#allocation4 + $0x114] sm:$0xf0] }
 0x3ad   : > { %v3707_v6 = vpop.f32.mrf.mxu2  ;;  %v10949_v47 = vor.u32 %v13207_v37, %v10948_v20  ;;  %4120 = vmatpush.bf16.msrb.mxu3 %v11221_v31  ;;  %3974 = vmatpush.bf16.msrb.mxu0 %v10821_v51  ;;  %v13271_v37 = vld [vmem:[#allocation4 + $0x314] sm:$0xf0] }
 0x3ae   : > { %v14884_v38 = vpack.c.bf16 %v4387_v43, %v4383_v2  ;;  %v3708_v48 = vadd.f32 %v3707_v6, %v3659_v34  ;;  %3946 = vmatmul.bf16.gmra.mxu3 %v14811_v26  ;;  %v13239_v6 = vld [vmem:[#allocation4 + $0x214] sm:$0xf0] }
 0x3af   : > { %4023 = vmatpush.bf16.msrb.mxu1 %v10949_v47  ;;  %v11077_v59 = vor.u32 %v13239_v6, %v11076_v5 }
 0x3b0   : > { %17186 = vst [vmem:[#allocation13_spill] sm:$0xff] %v14884_v38  ;;  %v3614_v42 = vpop.f32.mrf.mxu0  ;;  %v3663_v46 = vpop.f32.mrf.mxu1  ;;  %v10950_v38 = vld [vmem:[#allocation4 + $0x118] sm:$0xf0] }
 0x3b1   : > { %v3615_v29 = vadd.f32 %v3614_v42, %v14835_v25  ;;  %v3751_v34 = vpop.f32.mrf.mxu3  ;;  %4072 = vmatpush.bf16.msrb.mxu2 %v11077_v59 }
 0x3b2   : > { %v3752_v2 = vadd.f32 %v3751_v34, %v14876_v23 }
 0x3b3   : > { %v3664_v43 = vadd.f32 %v3663_v46, %v3615_v29  ;;  %3809 = vmatmul.bf16.gmra.mxu0 %v17183_v58  ;;  %3858 = vmatmul.bf16.gmra.mxu1 %v17184_v8 }
 0x3b4   : > { %v4391_v41 = vmax.f32 %v3752_v2, 0.0 }
 0x3b5   : > { %v3709_v32 = vpop.f32.mrf.mxu2 }
 0x3b6   : > { %v3710_v17 = vadd.f32 %v3709_v32, %v3661_v62  ;;  %v11204_v62 = vld [vmem:[#allocation4 + $0x308] sm:$0xf] }
 0x3b7   : > { %v11205_v29 = vor.u32 %v13271_v37, %v11204_v62  ;;  %v11190_v37 = vld [vmem:[#allocation4 + $0x2f8] sm:$0xf0] }
 0x3b8   : > { %v3616_v15 = vpop.f32.mrf.mxu0  ;;  %v3665_v4 = vpop.f32.mrf.mxu1 }
 0x3b9   : > { %v3617_v39 = vadd.f32 %v3616_v15, %v14835_v25  ;;  %v3753_v7 = vpop.f32.mrf.mxu3  ;;  %4121 = vmatpush.bf16.msrb.mxu3 %v11205_v29 }
 0x3ba   : > { %v3754_v23 = vadd.f32 %v3753_v7, %v3705_v45  ;;  %3907 = vmatmul.bf16.gmra.mxu2 %v14763_v56 }
 0x3bb   : > { %v3666_v16 = vadd.f32 %v3665_v4, %v3617_v39 }
 0x3bc   : > { %v4395_v42 = vmax.f32 %v3754_v23, 0.0 }
 0x3bd   : > { %v3712_v31 = vpop.f32.mrf.mxu2 }
 0x3be   : > { %v14893_v51 = vpack.c.bf16 %v4395_v42, %v4391_v41  ;;  %v3713_v20 = vadd.f32 %v3712_v31, %v3664_v43  ;;  %3951 = vmatmul.bf16.gmra.mxu3 %v14819_v53 }
 0x3c0   : > { %17187 = vst [vmem:[#allocation14_spill] sm:$0xff] %v14893_v51  ;;  %v3619_v46 = vpop.f32.mrf.mxu0  ;;  %v3668_v47 = vpop.f32.mrf.mxu1  ;;  %v10822_v51 = vld [vmem:[#allocation4 + $0x18] sm:$0xf0] }
 0x3c1   : > { %v3620_v34 = vadd.f32 %v3619_v46, %v14835_v25  ;;  %v3756_v32 = vpop.f32.mrf.mxu3  ;;  %v10934_v46 = vld [vmem:[#allocation4 + $0xf8] sm:$0xf0] }
 0x3c2   : > { %v3757_v45 = vadd.f32 %v3756_v32, %v3708_v48  ;;  %v14902_v48 = vperm.slane %v14829_v1, 1 }
 0x3c3   : > { %v3669_v5 = vadd.f32 %v3668_v47, %v3620_v34  ;;  %3814 = vmatmul.bf16.gmra.mxu0 %v17185_v13  ;;  %3863 = vmatmul.bf16.gmra.mxu1 %v14707_v50  ;;  %v11318_v34 = vld [vmem:[#allocation4 + $0x3f8] sm:$0xf0] }
 0x3c4   : > { %v4399_v23 = vmax.f32 %v3757_v45, 0.0 }
 0x3c5   : > { %v3714_v2 = vpop.f32.mrf.mxu2 }
 0x3c6   : > { %v3715_v6 = vadd.f32 %v3714_v2, %v3666_v16  ;;  %v13265_v16 = vld [vmem:[#allocation4 + $0x2ec] sm:$0xf] }
 0x3c7   : > { %v11193_v29 = vor.u32 %v13265_v16, %v11190_v37  ;;  %v13233_v2 = vld [vmem:[#allocation4 + $0x1ec] sm:$0xf] }
 0x3c8   : > { %v3621_v43 = vpop.f32.mrf.mxu0  ;;  %v3670_v15 = vpop.f32.mrf.mxu1 }
 0x3c9   : > { %v3622_v59 = vadd.f32 %v3621_v43, %v14835_v25  ;;  %v3758_v39 = vpop.f32.mrf.mxu3  ;;  %v13201_v25 = vld [vmem:[#allocation4 + $0xec] sm:$0xf]  ;;  %v11062_v43 = vld [vmem:[#allocation4 + $0x1f8] sm:$0xf0]  ;;  %4261 = vmatpush.bf16.msra.mxu2 %v11193_v29 }
 0x3ca   : > { %v3759_v4 = vadd.f32 %v3758_v39, %v3710_v17  ;;  %3912 = vmatmul.bf16.gmra.mxu2 %v14772_v40  ;;  %v13297_v17 = vld [vmem:[#allocation4 + $0x3ec] sm:$0xf]  ;;  %v10937_v32 = vor.u32 %v13201_v25, %v10934_v46 }
 0x3cb   : > { %v3671_v7 = vadd.f32 %v3670_v15, %v3622_v59  ;;  %v11321_v45 = vor.u32 %v13297_v17, %v11318_v34 }
 0x3cc   : > { %v4403_v41 = vmax.f32 %v3759_v4, 0.0  ;;  %4163 = vmatpush.bf16.msra.mxu0 %v10937_v32 }
 0x3cd   : > { %v3717_v42 = vpop.f32.mrf.mxu2  ;;  %4310 = vmatpush.bf16.msra.mxu3 %v11321_v45  ;;  %v13261_v45 = vld [vmem:[#allocation4 + $0x2cc] sm:$0xf] }
 0x3ce   : > { %v14904_v31 = vpack.c.bf16 %v4403_v41, %v4399_v23  ;;  %v3718_v62 = vadd.f32 %v3717_v42, %v3669_v5  ;;  %3956 = vmatmul.bf16.gmra.mxu3 %v14832_v35  ;;  %v11065_v5 = vor.u32 %v13233_v2, %v11062_v43  ;;  %v11174_v2 = vld [vmem:[#allocation4 + $0x2d8] sm:$0xf0] }
 0x3cf   : > { %v11177_v43 = vor.u32 %v13261_v45, %v11174_v2 }
 0x3d0   : > { %17188 = vst [vmem:[#allocation16_spill] sm:$0xff] %v14904_v31  ;;  %v3780_v47 = vpop.f32.mrf.mxu0  ;;  %v3829_v15 = vpop.f32.mrf.mxu1  ;;  %4212 = vmatpush.bf16.msra.mxu1 %v11065_v5 }
 0x3d1   : > { %v3761_v59 = vpop.f32.mrf.mxu3  ;;  %v3781_v1 = vadd.f32 %v3780_v47, %v14902_v48  ;;  %4262 = vmatpush.bf16.msra.mxu2 %v11177_v43 }
 0x3d2   : > { %v3762_v39 = vadd.f32 %v3761_v59, %v3713_v20  ;;  %v10918_v59 = vld [vmem:[#allocation4 + $0xd8] sm:$0xf0] }
 0x3d3   : > { %v3830_v4 = vadd.f32 %v3829_v15, %v3781_v1  ;;  %3975 = vmatmul.bf16.vlgmr.msrb.gmra.mxu0 %v14576_v63  ;;  %4024 = vmatmul.bf16.vlgmr.msrb.gmra.mxu1 %v14643_v49  ;;  %v13293_v1 = vld [vmem:[#allocation4 + $0x3cc] sm:$0xf]  ;;  %v11302_v15 = vld [vmem:[#allocation4 + $0x3d8] sm:$0xf0] }
 0x3d4   : > { %v4407_v20 = vmax.f32 %v3762_v39, 0.0 }
 0x3d5   : > { %v3719_v23 = vpop.f32.mrf.mxu2 }
 0x3d6   : > { %v3720_v41 = vadd.f32 %v3719_v23, %v3671_v7  ;;  %v13197_v7 = vld [vmem:[#allocation4 + $0xcc] sm:$0xf]  ;;  %v11305_v23 = vor.u32 %v13293_v1, %v11302_v15 }
 0x3d8   : > { %v3782_v42 = vpop.f32.mrf.mxu0  ;;  %v3831_v25 = vpop.f32.mrf.mxu1  ;;  %4311 = vmatpush.bf16.msra.mxu3 %v11305_v23 }
 0x3d9   : > { %v3763_v16 = vpop.f32.mrf.mxu3  ;;  %v3783_v37 = vadd.f32 %v3782_v42, %v14902_v48  ;;  %v13229_v42 = vld [vmem:[#allocation4 + $0x1cc] sm:$0xf] }
 0x3da   : > { %v3764_v46 = vadd.f32 %v3763_v16, %v3715_v6  ;;  %4073 = vmatmul.bf16.vlgmr.msrb.gmra.mxu2 %v14715_v28  ;;  %v10921_v6 = vor.u32 %v13197_v7, %v10918_v59  ;;  %v11046_v16 = vld [vmem:[#allocation4 + $0x1d8] sm:$0xf0] }
 0x3db   : > { %v3832_v29 = vadd.f32 %v3831_v25, %v3783_v37 }
 0x3dc   : > { %v4411_v17 = vmax.f32 %v3764_v46, 0.0  ;;  %4164 = vmatpush.bf16.msra.mxu0 %v10921_v6 }
 0x3dd   : > { %v3878_v34 = vpop.f32.mrf.mxu2 }
 0x3de   : > { %v14912_v47 = vpack.c.bf16 %v4411_v17, %v4407_v20  ;;  %v3879_v32 = vadd.f32 %v3878_v34, %v3830_v4  ;;  %3961 = vmatmul.bf16.gmra.mxu3 %v14844_v19  ;;  %v11049_v4 = vor.u32 %v13229_v42, %v11046_v16  ;;  %v13257_v42 = vld [vmem:[#allocation4 + $0x2ac] sm:$0xf]  ;;  %v11158_v16 = vld [vmem:[#allocation4 + $0x2b8] sm:$0xf0] }
 0x3e0   : > { %17189 = vst [vmem:[#allocation15_spill] sm:$0xff] %v14912_v47  ;;  %v3785_v5 = vpop.f32.mrf.mxu0  ;;  %v3834_v25 = vpop.f32.mrf.mxu1  ;;  %4213 = vmatpush.bf16.msra.mxu1 %v11049_v4  ;;  %v11286_v4 = vld [vmem:[#allocation4 + $0x3b8] sm:$0xf0]  ;;  %v13217_v47 = vld [vmem:[#allocation4 + $0x16c] sm:$0xf] }
 0x3e1   : > { %v3766_v39 = vpop.f32.mrf.mxu3  ;;  %v3786_v37 = vadd.f32 %v3785_v5, %v14902_v48 }
 0x3e2   : > { %v3767_v46 = vadd.f32 %v3766_v39, %v3718_v62  ;;  %v11161_v39 = vor.u32 %v13257_v42, %v11158_v16 }
 0x3e3   : > { %v3835_v20 = vadd.f32 %v3834_v25, %v3786_v37  ;;  %3980 = vmatmul.bf16.gmra.mxu0 %v14584_v3  ;;  %4029 = vmatmul.bf16.gmra.mxu1 %v14651_v0  ;;  %v10902_v37 = vld [vmem:[#allocation4 + $0xb8] sm:$0xf0]  ;;  %v13289_v25 = vld [vmem:[#allocation4 + $0x3ac] sm:$0xf] }
 0x3e4   : > { %v4415_v62 = vmax.f32 %v3767_v46, 0.0  ;;  %4263 = vmatpush.bf16.msra.mxu2 %v11161_v39 }
 0x3e5   : > { %v3880_v17 = vpop.f32.mrf.mxu2 }
 0x3e6   : > { %v3881_v34 = vadd.f32 %v3880_v17, %v3832_v29  ;;  %v13193_v29 = vld [vmem:[#allocation4 + $0xac] sm:$0xf] }
 0x3e8   : > { %v3787_v45 = vpop.f32.mrf.mxu0  ;;  %v3836_v59 = vpop.f32.mrf.mxu1 }
 0x3e9   : > { %v3768_v2 = vpop.f32.mrf.mxu3  ;;  %v3788_v7 = vadd.f32 %v3787_v45, %v14902_v48  ;;  %v11289_v45 = vor.u32 %v13289_v25, %v11286_v4 }
 0x3ea   : > { %v3769_v1 = vadd.f32 %v3768_v2, %v3720_v41  ;;  %4078 = vmatmul.bf16.gmra.mxu2 %v14723_v10  ;;  %v10905_v41 = vor.u32 %v13193_v29, %v10902_v37  ;;  %v13225_v2 = vld [vmem:[#allocation4 + $0x1ac] sm:$0xf] }
 0x3eb   : > { %v3837_v43 = vadd.f32 %v3836_v59, %v3788_v7  ;;  %v11030_v7 = vld [vmem:[#allocation4 + $0x1b8] sm:$0xf0]  ;;  %4312 = vmatpush.bf16.msra.mxu3 %v11289_v45 }
 0x3ec   : > { %v4419_v15 = vmax.f32 %v3769_v1, 0.0  ;;  %4165 = vmatpush.bf16.msra.mxu0 %v10905_v41 }
 0x3ed   : > { %v3883_v5 = vpop.f32.mrf.mxu2 }
 0x3ee   : > { %v14920_v6 = vpack.c.bf16 %v4419_v15, %v4415_v62  ;;  %v3884_v23 = vadd.f32 %v3883_v5, %v3835_v20  ;;  %4122 = vmatmul.bf16.vlgmr.msrb.gmra.mxu3 %v14779_v21  ;;  %v11033_v20 = vor.u32 %v13225_v2, %v11030_v7  ;;  %v13253_v7 = vld [vmem:[#allocation4 + $0x28c] sm:$0xf] }
 0x3f0   : > { %17190 = vst [vmem:[#allocation17_spill] sm:$0xff] %v14920_v6  ;;  %v3790_v17 = vpop.f32.mrf.mxu0  ;;  %v3839_v59 = vpop.f32.mrf.mxu1  ;;  %4214 = vmatpush.bf16.msra.mxu1 %v11033_v20  ;;  %v13285_v20 = vld [vmem:[#allocation4 + $0x38c] sm:$0xf] }
 0x3f1   : > { %v3791_v46 = vadd.f32 %v3790_v17, %v14902_v48  ;;  %v3927_v1 = vpop.f32.mrf.mxu3  ;;  %v13221_v6 = vld [vmem:[#allocation4 + $0x18c] sm:$0xf] }
 0x3f2   : > { %v3928_v62 = vadd.f32 %v3927_v1, %v3879_v32  ;;  %v10886_v1 = vld [vmem:[#allocation4 + $0x98] sm:$0xf0] }
 0x3f3   : > { %v3840_v15 = vadd.f32 %v3839_v59, %v3791_v46  ;;  %3985 = vmatmul.bf16.gmra.mxu0 %v14592_v12  ;;  %4034 = vmatmul.bf16.gmra.mxu1 %v14659_v54  ;;  %v11142_v46 = vld [vmem:[#allocation4 + $0x298] sm:$0xf0] }
 0x3f4   : > { %v4360_v32 = vmax.f32 %v3928_v62, 0.0  ;;  %v11145_v59 = vor.u32 %v13253_v7, %v11142_v46 }
 0x3f5   : > { %v3885_v5 = vpop.f32.mrf.mxu2 }
 0x3f6   : > { %v3886_v42 = vadd.f32 %v3885_v5, %v3837_v43  ;;  %v13189_v43 = vld [vmem:[#allocation4 + $0x8c] sm:$0xf]  ;;  %v11270_v5 = vld [vmem:[#allocation4 + $0x398] sm:$0xf0]  ;;  %4264 = vmatpush.bf16.msra.mxu2 %v11145_v59 }
 0x3f8   : > { %v3792_v16 = vpop.f32.mrf.mxu0  ;;  %v3841_v37 = vpop.f32.mrf.mxu1 }
 0x3f9   : > { %v3793_v29 = vadd.f32 %v3792_v16, %v14902_v48  ;;  %v3929_v25 = vpop.f32.mrf.mxu3 }
 0x3fa   : > { %v3930_v4 = vadd.f32 %v3929_v25, %v3881_v34  ;;  %4083 = vmatmul.bf16.gmra.mxu2 %v14731_v60  ;;  %v10889_v34 = vor.u32 %v13189_v43, %v10886_v1  ;;  %v11273_v25 = vor.u32 %v13285_v20, %v11270_v5 }
 0x3fb   : > { %v3842_v39 = vadd.f32 %v3841_v37, %v3793_v29  ;;  %v11014_v29 = vld [vmem:[#allocation4 + $0x198] sm:$0xf0] }
 0x3fc   : > { %v4364_v17 = vmax.f32 %v3930_v4, 0.0  ;;  %4166 = vmatpush.bf16.msra.mxu0 %v10889_v34  ;;  %4313 = vmatpush.bf16.msra.mxu3 %v11273_v25 }
 0x3fd   : > { %v3888_v41 = vpop.f32.mrf.mxu2 }
 0x3fe   : > { %v14928_v45 = vpack.c.bf16 %v4364_v17, %v4360_v32  ;;  %v3889_v2 = vadd.f32 %v3888_v41, %v3840_v15  ;;  %4127 = vmatmul.bf16.gmra.mxu3 %v14787_v30  ;;  %v11017_v15 = vor.u32 %v13221_v6, %v11014_v29  ;;  %v13249_v29 = vld [vmem:[#allocation4 + $0x26c] sm:$0xf] }
 0x400   : > { %v3795_v16 = vpop.f32.mrf.mxu0  ;;  %v3844_v37 = vpop.f32.mrf.mxu1  ;;  %4215 = vmatpush.bf16.msra.mxu1 %v11017_v15  ;;  %v13281_v15 = vld [vmem:[#allocation4 + $0x36c] sm:$0xf] }
 0x401   : > { %v3796_v62 = vadd.f32 %v3795_v16, %v14902_v48  ;;  %v3932_v4 = vpop.f32.mrf.mxu3 }
 0x402   : > { %v3933_v32 = vadd.f32 %v3932_v4, %v3884_v23  ;;  %v10870_v4 = vld [vmem:[#allocation4 + $0x78] sm:$0xf0] }
 0x403   : > { %v3845_v17 = vadd.f32 %v3844_v37, %v3796_v62  ;;  %3990 = vmatmul.bf16.gmra.mxu0 %v14600_v24  ;;  %4039 = vmatmul.bf16.gmra.mxu1 %v14667_v18  ;;  %v11126_v62 = vld [vmem:[#allocation4 + $0x278] sm:$0xf0] }
 0x404   : > { %v4368_v23 = vmax.f32 %v3933_v32, 0.0  ;;  %v11129_v37 = vor.u32 %v13249_v29, %v11126_v62 }
 0x405   : > { %v3890_v41 = vpop.f32.mrf.mxu2 }
 0x406   : > { %v3891_v7 = vadd.f32 %v3890_v41, %v3842_v39  ;;  %v13185_v39 = vld [vmem:[#allocation4 + $0x6c] sm:$0xf]  ;;  %v11254_v41 = vld [vmem:[#allocation4 + $0x378] sm:$0xf0]  ;;  %4265 = vmatpush.bf16.msra.mxu2 %v11129_v37 }
 0x408   : > { %v3797_v46 = vpop.f32.mrf.mxu0  ;;  %v3846_v1 = vpop.f32.mrf.mxu1 }
 0x409   : > { %v3798_v43 = vadd.f32 %v3797_v46, %v14902_v48  ;;  %v3934_v20 = vpop.f32.mrf.mxu3 }
 0x40a   : > { %v3935_v5 = vadd.f32 %v3934_v20, %v3886_v42  ;;  %4088 = vmatmul.bf16.gmra.mxu2 %v14739_v52  ;;  %v10873_v42 = vor.u32 %v13185_v39, %v10870_v4  ;;  %v11257_v20 = vor.u32 %v13281_v15, %v11254_v41 }
 0x40b   : > { %v3847_v6 = vadd.f32 %v3846_v1, %v3798_v43  ;;  %v10998_v43 = vld [vmem:[#allocation4 + $0x178] sm:$0xf0] }
 0x40c   : > { %v4372_v59 = vmax.f32 %v3935_v5, 0.0  ;;  %4167 = vmatpush.bf16.msra.mxu0 %v10873_v42  ;;  %4314 = vmatpush.bf16.msra.mxu3 %v11257_v20 }
 0x40d   : > { %v3893_v16 = vpop.f32.mrf.mxu2 }
 0x40e   : > { %v14936_v34 = vpack.c.bf16 %v4372_v59, %v4368_v23  ;;  %v3894_v25 = vadd.f32 %v3893_v16, %v3845_v17  ;;  %4132 = vmatmul.bf16.gmra.mxu3 %v14795_v14  ;;  %v11001_v17 = vor.u32 %v13217_v47, %v10998_v43  ;;  %v13245_v43 = vld [vmem:[#allocation4 + $0x24c] sm:$0xf] }
 0x410   : > { %v3800_v46 = vpop.f32.mrf.mxu0  ;;  %v3849_v1 = vpop.f32.mrf.mxu1  ;;  %4216 = vmatpush.bf16.msra.mxu1 %v11001_v17  ;;  %v13277_v17 = vld [vmem:[#allocation4 + $0x34c] sm:$0xf] }
 0x411   : > { %v3801_v32 = vadd.f32 %v3800_v46, %v14902_v48  ;;  %v3937_v5 = vpop.f32.mrf.mxu3 }
 0x412   : > { %v3938_v23 = vadd.f32 %v3937_v5, %v3889_v2  ;;  %v10854_v5 = vld [vmem:[#allocation4 + $0x58] sm:$0xf0] }
 0x413   : > { %v3850_v59 = vadd.f32 %v3849_v1, %v3801_v32  ;;  %3995 = vmatmul.bf16.gmra.mxu0 %v14608_v33  ;;  %4044 = vmatmul.bf16.gmra.mxu1 %v14675_v11  ;;  %v13181_v32 = vld [vmem:[#allocation4 + $0x4c] sm:$0xf] }
 0x414   : > { %v4376_v2 = vmax.f32 %v3938_v23, 0.0  ;;  %v10982_v23 = vld [vmem:[#allocation4 + $0x158] sm:$0xf0] }
 0x415   : > { %v3895_v16 = vpop.f32.mrf.mxu2 }
 0x416   : > { %v3896_v29 = vadd.f32 %v3895_v16, %v3847_v6  ;;  %v11110_v6 = vld [vmem:[#allocation4 + $0x258] sm:$0xf0] }
 0x417   : > { %v11113_v1 = vor.u32 %v13245_v43, %v11110_v6  ;;  %v11238_v16 = vld [vmem:[#allocation4 + $0x358] sm:$0xf0] }
 0x418   : > { %v3802_v62 = vpop.f32.mrf.mxu0  ;;  %v3851_v4 = vpop.f32.mrf.mxu1 }
 0x419   : > { %v3803_v39 = vadd.f32 %v3802_v62, %v14902_v48  ;;  %v3939_v15 = vpop.f32.mrf.mxu3  ;;  %v10857_v62 = vor.u32 %v13181_v32, %v10854_v5  ;;  %4266 = vmatpush.bf16.msra.mxu2 %v11113_v1 }
 0x41a   : > { %v3940_v41 = vadd.f32 %v3939_v15, %v3891_v7  ;;  %4093 = vmatmul.bf16.gmra.mxu2 %v14747_v22  ;;  %v11241_v15 = vor.u32 %v13277_v17, %v11238_v16 }
 0x41b   : > { %v3852_v47 = vadd.f32 %v3851_v4, %v3803_v39  ;;  %v13213_v39 = vld [vmem:[#allocation4 + $0x14c] sm:$0xf]  ;;  %4168 = vmatpush.bf16.msra.mxu0 %v10857_v62  ;;  %v10838_v62 = vld [vmem:[#allocation4 + $0x38] sm:$0xf0] }
 0x41c   : > { %v4380_v37 = vmax.f32 %v3940_v41, 0.0  ;;  %4315 = vmatpush.bf16.msra.mxu3 %v11241_v15  ;;  %v13209_v15 = vld [vmem:[#allocation4 + $0x12c] sm:$0xf] }
 0x41d   : > { %v3898_v46 = vpop.f32.mrf.mxu2 }
 0x41e   : > { %v14944_v42 = vpack.c.bf16 %v4380_v37, %v4376_v2  ;;  %v14946_v20 = vadd.f32 %v3898_v46, %v3850_v59  ;;  %4137 = vmatmul.bf16.gmra.mxu3 %v14803_v57  ;;  %v10985_v59 = vor.u32 %v13213_v39, %v10982_v23 }
 0x420   : > { %v3805_v7 = vpop.f32.mrf.mxu0  ;;  %v3854_v41 = vpop.f32.mrf.mxu1  ;;  %4217 = vmatpush.bf16.msra.mxu1 %v10985_v59 }
 0x421   : > { %v3806_v4 = vadd.f32 %v3805_v7, %v14902_v48  ;;  %v3942_v2 = vpop.f32.mrf.mxu3 }
 0x422   : > { %v3943_v37 = vadd.f32 %v3942_v2, %v3894_v25  ;;  %v13177_v25 = vld [vmem:[#allocation4 + $0x2c] sm:$0xf] }
 0x423   : > { %v3855_v46 = vadd.f32 %v3854_v41, %v3806_v4  ;;  %4000 = vmatmul.bf16.gmra.mxu0 %v17182_v61  ;;  %4049 = vmatmul.bf16.gmra.mxu1 %v14683_v36  ;;  %v10841_v4 = vor.u32 %v13177_v25, %v10838_v62  ;;  %v10966_v41 = vld [vmem:[#allocation4 + $0x138] sm:$0xf0]  ;;  %v13205_v62 = vld [vmem:[#allocation4 + $0x10c] sm:$0xf] }
 0x424   : > { %v4384_v39 = vmax.f32 %v3943_v37, 0.0  ;;  %v10969_v59 = vor.u32 %v13209_v15, %v10966_v41 }
 0x425   : > { %v3900_v43 = vpop.f32.mrf.mxu2  ;;  %4169 = vmatpush.bf16.msra.mxu0 %v10841_v4 }
 0x426   : > { %v3901_v6 = vadd.f32 %v3900_v43, %v3852_v47  ;;  %v13241_v43 = vld [vmem:[#allocation4 + $0x22c] sm:$0xf]  ;;  %4218 = vmatpush.bf16.msra.mxu1 %v10969_v59  ;;  %v11078_v59 = vld [vmem:[#allocation4 + $0x218] sm:$0xf0] }
 0x428   : > { %v3807_v32 = vpop.f32.mrf.mxu0  ;;  %v3856_v17 = vpop.f32.mrf.mxu1 }
 0x429   : > { %v3808_v5 = vadd.f32 %v3807_v32, %v14902_v48  ;;  %v3944_v16 = vpop.f32.mrf.mxu3  ;;  %v11094_v32 = vld [vmem:[#allocation4 + $0x238] sm:$0xf0] }
 0x42a   : > { %v3945_v7 = vadd.f32 %v3944_v16, %v3896_v29  ;;  %4098 = vmatmul.bf16.gmra.mxu2 %v14755_v55  ;;  %v13273_v29 = vld [vmem:[#allocation4 + $0x32c] sm:$0xf]  ;;  %v11097_v16 = vor.u32 %v13241_v43, %v11094_v32 }
 0x42b   : > { %v3857_v1 = vadd.f32 %v3856_v17, %v3808_v5  ;;  %v11222_v5 = vld [vmem:[#allocation4 + $0x338] sm:$0xf0]  ;;  %v13173_v17 = vld [vmem:[#allocation4 + $0xc] sm:$0xf] }
 0x42c   : > { %v4388_v23 = vmax.f32 %v3945_v7, 0.0  ;;  %v11225_v7 = vor.u32 %v13273_v29, %v11222_v5  ;;  %v10825_v25 = vor.u32 %v13173_v17, %v10822_v51  ;;  %4267 = vmatpush.bf16.msra.mxu2 %v11097_v16  ;;  %v13237_v51 = vld [vmem:[#allocation4 + $0x20c] sm:$0xf] }
 0x42d   : > { %v3903_v2 = vpop.f32.mrf.mxu2  ;;  %v11081_v32 = vor.u32 %v13237_v51, %v11078_v59 }
 0x42e   : > { %v14954_v31 = vpack.c.bf16 %v4388_v23, %v4384_v39  ;;  %v3904_v47 = vadd.f32 %v3903_v2, %v3855_v46  ;;  %4142 = vmatmul.bf16.gmra.mxu3 %v14811_v26  ;;  %v10953_v23 = vor.u32 %v13205_v62, %v10950_v38  ;;  %4170 = vmatpush.bf16.msra.mxu0 %v10825_v25 }
 0x42f   : > { %4316 = vmatpush.bf16.msra.mxu3 %v11225_v7 }
 0x430   : > { %v3810_v37 = vpop.f32.mrf.mxu0  ;;  %v3859_v39 = vpop.f32.mrf.mxu1  ;;  %4219 = vmatpush.bf16.msra.mxu1 %v10953_v23  ;;  %4268 = vmatpush.bf16.msra.mxu2 %v11081_v32 }
 0x431   : > { %v3811_v15 = vadd.f32 %v3810_v37, %v14902_v48  ;;  %v3947_v46 = vpop.f32.mrf.mxu3 }
 0x432   : > { %v3948_v41 = vadd.f32 %v3947_v46, %v14946_v20 }
 0x433   : > { %v3860_v4 = vadd.f32 %v3859_v39, %v3811_v15  ;;  %4005 = vmatmul.bf16.gmra.mxu0 %v17183_v58  ;;  %4054 = vmatmul.bf16.gmra.mxu1 %v17184_v8  ;;  %v11206_v39 = vld [vmem:[#allocation4 + $0x318] sm:$0xf0] }
 0x434   : > { %v4392_v37 = vmax.f32 %v3948_v41, 0.0 }
 0x435   : > { %v3905_v2 = vpop.f32.mrf.mxu2 }
 0x436   : > { %v3906_v43 = vadd.f32 %v3905_v2, %v3857_v1  ;;  %v13269_v1 = vld [vmem:[#allocation4 + $0x30c] sm:$0xf] }
 0x437   : > { %v11209_v46 = vor.u32 %v13269_v1, %v11206_v39 }
 0x438   : > { %v3812_v29 = vpop.f32.mrf.mxu0  ;;  %v3861_v38 = vpop.f32.mrf.mxu1 }
 0x439   : > { %v3813_v16 = vadd.f32 %v3812_v29, %v14902_v48  ;;  %v3949_v5 = vpop.f32.mrf.mxu3  ;;  %4317 = vmatpush.bf16.msra.mxu3 %v11209_v46 }
 0x43a   : > { %v3950_v20 = vadd.f32 %v3949_v5, %v3901_v6  ;;  %4103 = vmatmul.bf16.gmra.mxu2 %v14763_v56 }
 0x43b   : > { %v3862_v17 = vadd.f32 %v3861_v38, %v3813_v16 }
 0x43c   : > { %v4396_v7 = vmax.f32 %v3950_v20, 0.0 }
 0x43d   : > { %v3908_v25 = vpop.f32.mrf.mxu2 }
 0x43e   : > { %v14963_v62 = vpack.c.bf16 %v4396_v7, %v4392_v37  ;;  %v3909_v15 = vadd.f32 %v3908_v25, %v3860_v4  ;;  %4147 = vmatmul.bf16.gmra.mxu3 %v14819_v53 }
 0x440   : > { %v3815_v23 = vpop.f32.mrf.mxu0  ;;  %v3864_v51 = vpop.f32.mrf.mxu1 }
 0x441   : > { %v3816_v2 = vadd.f32 %v3815_v23, %v14902_v48  ;;  %v3952_v59 = vpop.f32.mrf.mxu3 }
 0x442   : > { %v3953_v6 = vadd.f32 %v3952_v59, %v3904_v47  ;;  %v14974_v47 = vld [vmem:[%s17105_s6] sm:$0xf] }
 0x443   : > { %v3865_v32 = vadd.f32 %v3864_v51, %v3816_v2  ;;  %4010 = vmatmul.bf16.gmra.mxu0 %v17185_v13  ;;  %4059 = vmatmul.bf16.gmra.mxu1 %v14707_v50  ;;  %v14977_v39 = vperm.slane %v14974_v47, 2 }
 0x444   : > { %v4400_v7 = vmax.f32 %v3953_v6, 0.0 }
 0x445   : > { %v3910_v41 = vpop.f32.mrf.mxu2 }
 0x446   : > { %v3911_v29 = vadd.f32 %v3910_v41, %v3862_v17 }
 0x448   : > { %v3817_v4 = vpop.f32.mrf.mxu0  ;;  %v3866_v38 = vpop.f32.mrf.mxu1 }
 0x449   : > { %v3818_v16 = vadd.f32 %v3817_v4, %v14902_v48  ;;  %v3954_v5 = vpop.f32.mrf.mxu3 }
 0x44a   : > { %v3955_v20 = vadd.f32 %v3954_v5, %v3906_v43  ;;  %4108 = vmatmul.bf16.gmra.mxu2 %v14772_v40 }
 0x44b   : > { %v3867_v37 = vadd.f32 %v3866_v38, %v3818_v16 }
 0x44c   : > { %v4404_v25 = vmax.f32 %v3955_v20, 0.0 }
 0x44d   : > { %v3913_v1 = vpop.f32.mrf.mxu2 }
 0x44e   : > { %v14979_v17 = vpack.c.bf16 %v4404_v25, %v4400_v7  ;;  %v3914_v48 = vadd.f32 %v3913_v1, %v3865_v32  ;;  %4152 = vmatmul.bf16.gmra.mxu3 %v14832_v35 }
 0x450   : > { %v3976_v43 = vpop.f32.mrf.mxu0  ;;  %v4025_v2 = vpop.f32.mrf.mxu1 }
 0x451   : > { %v3957_v46 = vpop.f32.mrf.mxu3  ;;  %v3977_v23 = vadd.f32 %v3976_v43, %v14977_v39 }
 0x452   : > { %v3958_v51 = vadd.f32 %v3957_v46, %v3909_v15 }
 0x453   : > { %v4026_v59 = vadd.f32 %v4025_v2, %v3977_v23  ;;  %4171 = vmatmul.bf16.vlgmr.msra.gmra.mxu0 %v14576_v63  ;;  %4220 = vmatmul.bf16.vlgmr.msra.gmra.mxu1 %v14643_v49  ;;  %v11692_v63 = vld [vmem:[#allocation6 + $0x2e0] sm:$0xf]  ;;  %v13394_v49 = vld [vmem:[#allocation6 + $0x2ec] sm:$0xf0] }
 0x454   : > { %v4408_v7 = vmax.f32 %v3958_v51, 0.0  ;;  %v11693_v46 = vor.u32 %v13394_v49, %v11692_v63  ;;  %v13330_v23 = vld [vmem:[#allocation6 + $0xec] sm:$0xf0]  ;;  %v11820_v2 = vld [vmem:[#allocation6 + $0x3e0] sm:$0xf] }
 0x455   : > { %v3915_v6 = vpop.f32.mrf.mxu2 }
 0x456   : > { %v3916_v41 = vadd.f32 %v3915_v6, %v3867_v37  ;;  %v11436_v37 = vld [vmem:[#allocation6 + $0xe0] sm:$0xf]  ;;  %v13426_v6 = vld [vmem:[#allocation6 + $0x3ec] sm:$0xf0]  ;;  %5331 = vmatpush.bf16.msrb.mxu2 %v11693_v46 }
 0x458   : > { %v3978_v4 = vpop.f32.mrf.mxu0  ;;  %v4027_v32 = vpop.f32.mrf.mxu1 }
 0x459   : > { %v3959_v16 = vpop.f32.mrf.mxu3  ;;  %v3979_v38 = vadd.f32 %v3978_v4, %v14977_v39 }
 0x45a   : > { %v3960_v5 = vadd.f32 %v3959_v16, %v3911_v29  ;;  %4269 = vmatmul.bf16.vlgmr.msra.gmra.mxu2 %v14715_v28  ;;  %v11437_v29 = vor.u32 %v13330_v23, %v11436_v37  ;;  %v11821_v16 = vor.u32 %v13426_v6, %v11820_v2 }
 0x45b   : > { %v4028_v20 = vadd.f32 %v4027_v32, %v3979_v38 }
 0x45c   : > { %v4412_v25 = vmax.f32 %v3960_v5, 0.0  ;;  %5233 = vmatpush.bf16.msrb.mxu0 %v11437_v29  ;;  %5380 = vmatpush.bf16.msrb.mxu3 %v11821_v16  ;;  %v11564_v5 = vld [vmem:[#allocation6 + $0x1e0] sm:$0xf] }
 0x45d   : > { %v4074_v1 = vpop.f32.mrf.mxu2  ;;  %v11676_v16 = vld [vmem:[#allocation6 + $0x2c0] sm:$0xf] }
 0x45e   : > { %v14987_v15 = vpack.c.bf16 %v4412_v25, %v4408_v7  ;;  %v4075_v43 = vadd.f32 %v4074_v1, %v4026_v59  ;;  %4157 = vmatmul.bf16.gmra.mxu3 %v14844_v19  ;;  %v13362_v7 = vld [vmem:[#allocation6 + $0x1ec] sm:$0xf0] }
 0x45f   : > { %v11565_v1 = vor.u32 %v13362_v7, %v11564_v5  ;;  %v11804_v5 = vld [vmem:[#allocation6 + $0x3c0] sm:$0xf]  ;;  %v13422_v7 = vld [vmem:[#allocation6 + $0x3cc] sm:$0xf0] }
 0x460   : > { %v3981_v4 = vpop.f32.mrf.mxu0  ;;  %v4030_v38 = vpop.f32.mrf.mxu1 }
 0x461   : > { %v3962_v28 = vpop.f32.mrf.mxu3  ;;  %v3982_v51 = vadd.f32 %v3981_v4, %v14977_v39  ;;  %5282 = vmatpush.bf16.msrb.mxu1 %v11565_v1  ;;  %v11805_v1 = vor.u32 %v13422_v7, %v11804_v5  ;;  %v11660_v7 = vld [vmem:[#allocation6 + $0x2a0] sm:$0xf] }
 0x462   : > { %v3963_v32 = vadd.f32 %v3962_v28, %v3914_v48  ;;  %v11420_v28 = vld [vmem:[#allocation6 + $0xc0] sm:$0xf] }
 0x463   : > { %v4031_v59 = vadd.f32 %v4030_v38, %v3982_v51  ;;  %4176 = vmatmul.bf16.gmra.mxu0 %v14584_v3  ;;  %4225 = vmatmul.bf16.gmra.mxu1 %v14651_v0  ;;  %v13326_v38 = vld [vmem:[#allocation6 + $0xcc] sm:$0xf0] }
 0x464   : > { %v4416_v6 = vmax.f32 %v3963_v32, 0.0  ;;  %5381 = vmatpush.bf16.msrb.mxu3 %v11805_v1  ;;  %v13322_v1 = vld [vmem:[#allocation6 + $0xac] sm:$0xf0] }
 0x465   : > { %v4076_v25 = vpop.f32.mrf.mxu2 }
 0x466   : > { %v4077_v63 = vadd.f32 %v4076_v25, %v4028_v20  ;;  %v13390_v20 = vld [vmem:[#allocation6 + $0x2cc] sm:$0xf0] }
 0x467   : > { %v11677_v51 = vor.u32 %v13390_v20, %v11676_v16 }
 0x468   : > { %v3983_v49 = vpop.f32.mrf.mxu0  ;;  %v4032_v2 = vpop.f32.mrf.mxu1 }
 0x469   : > { %v3964_v37 = vpop.f32.mrf.mxu3  ;;  %v3984_v23 = vadd.f32 %v3983_v49, %v14977_v39  ;;  %5332 = vmatpush.bf16.msrb.mxu2 %v11677_v51 }
 0x46a   : > { %v3965_v46 = vadd.f32 %v3964_v37, %v3916_v41  ;;  %4274 = vmatmul.bf16.gmra.mxu2 %v14723_v10  ;;  %v11421_v41 = vor.u32 %v13326_v38, %v11420_v28 }
 0x46b   : > { %v4033_v48 = vadd.f32 %v4032_v2, %v3984_v23  ;;  %v13358_v23 = vld [vmem:[#allocation6 + $0x1cc] sm:$0xf0] }
 0x46c   : > { %v4420_v4 = vmax.f32 %v3965_v46, 0.0  ;;  %5234 = vmatpush.bf16.msrb.mxu0 %v11421_v41 }
 0x46d   : > { %v4079_v3 = vpop.f32.mrf.mxu2 }
 0x46e   : > { %v14995_v29 = vpack.c.bf16 %v4420_v4, %v4416_v6  ;;  %v4080_v0 = vadd.f32 %v4079_v3, %v4031_v59  ;;  %4318 = vmatmul.bf16.vlgmr.msra.gmra.mxu3 %v14779_v21  ;;  %v11548_v21 = vld [vmem:[#allocation6 + $0x1c0] sm:$0xf] }
 0x46f   : > { %v11549_v46 = vor.u32 %v13358_v23, %v11548_v21 }
 0x470   : > { %v3986_v25 = vpop.f32.mrf.mxu0  ;;  %v4035_v32 = vpop.f32.mrf.mxu1 }
 0x471   : > { %v3987_v10 = vadd.f32 %v3986_v25, %v14977_v39  ;;  %v4123_v49 = vpop.f32.mrf.mxu3  ;;  %5283 = vmatpush.bf16.msrb.mxu1 %v11549_v46  ;;  %v11404_v25 = vld [vmem:[#allocation6 + $0xa0] sm:$0xf]  ;;  %v13354_v46 = vld [vmem:[#allocation6 + $0x1ac] sm:$0xf0] }
 0x472   : > { %v4124_v37 = vadd.f32 %v4123_v49, %v4075_v43 }
 0x473   : > { %v4036_v59 = vadd.f32 %v4035_v32, %v3987_v10  ;;  %4181 = vmatmul.bf16.gmra.mxu0 %v14592_v12  ;;  %4230 = vmatmul.bf16.gmra.mxu1 %v14659_v54  ;;  %v11788_v10 = vld [vmem:[#allocation6 + $0x3a0] sm:$0xf]  ;;  %v13418_v32 = vld [vmem:[#allocation6 + $0x3ac] sm:$0xf0] }
 0x474   : > { %v4361_v51 = vmax.f32 %v4124_v37, 0.0  ;;  %v11789_v21 = vor.u32 %v13418_v32, %v11788_v10  ;;  %v13318_v32 = vld [vmem:[#allocation6 + $0x8c] sm:$0xf0] }
 0x475   : > { %v4081_v2 = vpop.f32.mrf.mxu2 }
 0x476   : > { %v4082_v6 = vadd.f32 %v4081_v2, %v4033_v48  ;;  %v13386_v48 = vld [vmem:[#allocation6 + $0x2ac] sm:$0xf0]  ;;  %5382 = vmatpush.bf16.msrb.mxu3 %v11789_v21 }
 0x477   : > { %v11661_v41 = vor.u32 %v13386_v48, %v11660_v7 }
 0x478   : > { %v3988_v4 = vpop.f32.mrf.mxu0  ;;  %v4037_v16 = vpop.f32.mrf.mxu1 }
 0x479   : > { %v3989_v3 = vadd.f32 %v3988_v4, %v14977_v39  ;;  %v4125_v20 = vpop.f32.mrf.mxu3  ;;  %5333 = vmatpush.bf16.msrb.mxu2 %v11661_v41  ;;  %v11644_v41 = vld [vmem:[#allocation6 + $0x280] sm:$0xf] }
 0x47a   : > { %v4126_v28 = vadd.f32 %v4125_v20, %v4077_v63  ;;  %4279 = vmatmul.bf16.gmra.mxu2 %v14731_v60  ;;  %v11405_v63 = vor.u32 %v13322_v1, %v11404_v25  ;;  %v11388_v1 = vld [vmem:[#allocation6 + $0x80] sm:$0xf] }
 0x47b   : > { %v4038_v43 = vadd.f32 %v4037_v16, %v3989_v3 }
 0x47c   : > { %v4365_v38 = vmax.f32 %v4126_v28, 0.0  ;;  %5235 = vmatpush.bf16.msrb.mxu0 %v11405_v63  ;;  %v13414_v63 = vld [vmem:[#allocation6 + $0x38c] sm:$0xf0] }
 0x47d   : > { %v4084_v12 = vpop.f32.mrf.mxu2 }
 0x47e   : > { %v15003_v5 = vpack.c.bf16 %v4365_v38, %v4361_v51  ;;  %v4085_v54 = vadd.f32 %v4084_v12, %v4036_v59  ;;  %4323 = vmatmul.bf16.gmra.mxu3 %v14787_v30  ;;  %v11532_v30 = vld [vmem:[#allocation6 + $0x1a0] sm:$0xf] }
 0x47f   : > { %v11533_v3 = vor.u32 %v13354_v46, %v11532_v30  ;;  %v13350_v30 = vld [vmem:[#allocation6 + $0x18c] sm:$0xf0] }
 0x480   : > { %v3991_v49 = vpop.f32.mrf.mxu0  ;;  %v4040_v37 = vpop.f32.mrf.mxu1 }
 0x481   : > { %v3992_v60 = vadd.f32 %v3991_v49, %v14977_v39  ;;  %v4128_v23 = vpop.f32.mrf.mxu3  ;;  %5284 = vmatpush.bf16.msrb.mxu1 %v11533_v3  ;;  %v11772_v49 = vld [vmem:[#allocation6 + $0x380] sm:$0xf] }
 0x482   : > { %v4129_v2 = vadd.f32 %v4128_v23, %v4080_v0 }
 0x483   : > { %v4041_v59 = vadd.f32 %v4040_v37, %v3992_v60  ;;  %4186 = vmatmul.bf16.gmra.mxu0 %v14600_v24  ;;  %4235 = vmatmul.bf16.gmra.mxu1 %v14667_v18  ;;  %v11773_v60 = vor.u32 %v13414_v63, %v11772_v49  ;;  %v13410_v49 = vld [vmem:[#allocation6 + $0x36c] sm:$0xf0] }
 0x484   : > { %v4369_v7 = vmax.f32 %v4129_v2, 0.0 }
 0x485   : > { %v4086_v4 = vpop.f32.mrf.mxu2  ;;  %5383 = vmatpush.bf16.msrb.mxu3 %v11773_v60 }
 0x486   : > { %v4087_v16 = vadd.f32 %v4086_v4, %v4038_v43  ;;  %v13382_v43 = vld [vmem:[#allocation6 + $0x28c] sm:$0xf0] }
 0x487   : > { %v11645_v10 = vor.u32 %v13382_v43, %v11644_v41  ;;  %v13378_v41 = vld [vmem:[#allocation6 + $0x26c] sm:$0xf0]  ;;  %v11372_v43 = vld [vmem:[#allocation6 + $0x60] sm:$0xf] }
 0x488   : > { %v3993_v20 = vpop.f32.mrf.mxu0  ;;  %v4042_v51 = vpop.f32.mrf.mxu1 }
 0x489   : > { %v3994_v28 = vadd.f32 %v3993_v20, %v14977_v39  ;;  %v4130_v38 = vpop.f32.mrf.mxu3  ;;  %5334 = vmatpush.bf16.msrb.mxu2 %v11645_v10  ;;  %v13314_v10 = vld [vmem:[#allocation6 + $0x6c] sm:$0xf0] }
 0x48a   : > { %v4131_v12 = vadd.f32 %v4130_v38, %v4082_v6  ;;  %4284 = vmatmul.bf16.gmra.mxu2 %v14739_v52  ;;  %v11389_v6 = vor.u32 %v13318_v32, %v11388_v1  ;;  %v11756_v32 = vld [vmem:[#allocation6 + $0x360] sm:$0xf]  ;;  %v11373_v63 = vor.u32 %v13314_v10, %v11372_v43 }
 0x48b   : > { %v4043_v0 = vadd.f32 %v4042_v51, %v3994_v28 }
 0x48c   : > { %v4373_v48 = vmax.f32 %v4131_v12, 0.0  ;;  %5236 = vmatpush.bf16.msrb.mxu0 %v11389_v6 }
 0x48d   : > { %v4089_v24 = vpop.f32.mrf.mxu2 }
 0x48e   : > { %v15011_v25 = vpack.c.bf16 %v4373_v48, %v4369_v7  ;;  %v4090_v18 = vadd.f32 %v4089_v24, %v4041_v59  ;;  %4328 = vmatmul.bf16.gmra.mxu3 %v14795_v14  ;;  %v11516_v14 = vld [vmem:[#allocation6 + $0x180] sm:$0xf] }
 0x48f   : > { %v11517_v4 = vor.u32 %v13350_v30, %v11516_v14  ;;  %v11356_v30 = vld [vmem:[#allocation6 + $0x40] sm:$0xf] }
 0x490   : > { %v3996_v21 = vpop.f32.mrf.mxu0  ;;  %v4045_v37 = vpop.f32.mrf.mxu1  ;;  %5237 = vmatpush.bf16.msrb.mxu0 %v11373_v63 }
 0x491   : > { %v3997_v52 = vadd.f32 %v3996_v21, %v14977_v39  ;;  %v4133_v23 = vpop.f32.mrf.mxu3  ;;  %5285 = vmatpush.bf16.msrb.mxu1 %v11517_v4  ;;  %v11484_v4 = vld [vmem:[#allocation6 + $0x140] sm:$0xf] }
 0x492   : > { %v4134_v2 = vadd.f32 %v4133_v23, %v4085_v54  ;;  %v13346_v23 = vld [vmem:[#allocation6 + $0x16c] sm:$0xf0] }
 0x493   : > { %v4046_v59 = vadd.f32 %v4045_v37, %v3997_v52  ;;  %4191 = vmatmul.bf16.gmra.mxu0 %v14608_v33  ;;  %4240 = vmatmul.bf16.gmra.mxu1 %v14675_v11 }
 0x494   : > { %v4377_v7 = vmax.f32 %v4134_v2, 0.0 }
 0x495   : > { %v4091_v46 = vpop.f32.mrf.mxu2 }
 0x496   : > { %v4092_v3 = vadd.f32 %v4091_v46, %v4043_v0  ;;  %v11628_v0 = vld [vmem:[#allocation6 + $0x260] sm:$0xf]  ;;  %v13310_v46 = vld [vmem:[#allocation6 + $0x4c] sm:$0xf0] }
 0x497   : > { %v11629_v1 = vor.u32 %v13378_v41, %v11628_v0 }
 0x498   : > { %v3998_v20 = vpop.f32.mrf.mxu0  ;;  %v4047_v51 = vpop.f32.mrf.mxu1 }
 0x499   : > { %v3999_v28 = vadd.f32 %v3998_v20, %v14977_v39  ;;  %v4135_v38 = vpop.f32.mrf.mxu3  ;;  %5335 = vmatpush.bf16.msrb.mxu2 %v11629_v1  ;;  %v13338_v1 = vld [vmem:[#allocation6 + $0x12c] sm:$0xf0] }
 0x49a   : > { %v4136_v12 = vadd.f32 %v4135_v38, %v4087_v16  ;;  %4289 = vmatmul.bf16.gmra.mxu2 %v14747_v22  ;;  %v11757_v22 = vor.u32 %v13410_v49, %v11756_v32  ;;  %v11612_v49 = vld [vmem:[#allocation6 + $0x240] sm:$0xf] }
 0x49b   : > { %v4048_v54 = vadd.f32 %v4047_v51, %v3999_v28  ;;  %v11357_v28 = vor.u32 %v13310_v46, %v11356_v30 }
 0x49c   : > { %v4381_v48 = vmax.f32 %v4136_v12, 0.0  ;;  %5384 = vmatpush.bf16.msrb.mxu3 %v11757_v22 }
 0x49d   : > { %v4094_v33 = vpop.f32.mrf.mxu2  ;;  %5238 = vmatpush.bf16.msrb.mxu0 %v11357_v28 }
 0x49e   : > { %v15019_v24 = vpack.c.bf16 %v4381_v48, %v4377_v7  ;;  %v15021_v11 = vadd.f32 %v4094_v33, %v4046_v59  ;;  %4333 = vmatmul.bf16.gmra.mxu3 %v14803_v57  ;;  %v11500_v57 = vld [vmem:[#allocation6 + $0x160] sm:$0xf]  ;;  %v13306_v48 = vld [vmem:[#allocation6 + $0x2c] sm:$0xf0] }
 0x49f   : > { %v11501_v2 = vor.u32 %v13346_v23, %v11500_v57  ;;  %v11468_v33 = vld [vmem:[#allocation6 + $0x120] sm:$0xf] }
 0x4a0   : > { %v4001_v16 = vpop.f32.mrf.mxu0  ;;  %v4050_v6 = vpop.f32.mrf.mxu1  ;;  %v11469_v32 = vor.u32 %v13338_v1, %v11468_v33  ;;  %v11452_v57 = vld [vmem:[#allocation6 + $0x100] sm:$0xf] }
 0x4a1   : > { %v4002_v21 = vadd.f32 %v4001_v16, %v14977_v39  ;;  %v4138_v60 = vpop.f32.mrf.mxu3  ;;  %5286 = vmatpush.bf16.msrb.mxu1 %v11501_v2  ;;  %v13374_v16 = vld [vmem:[#allocation6 + $0x24c] sm:$0xf0] }
 0x4a2   : > { %v4139_v52 = vadd.f32 %v4138_v60, %v4090_v18  ;;  %v13342_v18 = vld [vmem:[#allocation6 + $0x14c] sm:$0xf0]  ;;  %v11324_v60 = vld [vmem:[#allocation6] sm:$0xf] }
 0x4a3   : > { %v4051_v37 = vadd.f32 %v4050_v6, %v4002_v21  ;;  %4196 = vmatmul.bf16.gmra.mxu0 %v17182_v61  ;;  %4245 = vmatmul.bf16.gmra.mxu1 %v14683_v36  ;;  %v11485_v61 = vor.u32 %v13342_v18, %v11484_v4  ;;  %v13406_v21 = vld [vmem:[#allocation6 + $0x34c] sm:$0xf0] }
 0x4a4   : > { %v4385_v0 = vmax.f32 %v4139_v52, 0.0  ;;  %v13302_v52 = vld [vmem:[#allocation6 + $0xc] sm:$0xf0] }
 0x4a5   : > { %v4096_v59 = vpop.f32.mrf.mxu2  ;;  %5287 = vmatpush.bf16.msrb.mxu1 %v11485_v61  ;;  %v11325_v2 = vor.u32 %v13302_v52, %v11324_v60  ;;  %v13366_v61 = vld [vmem:[#allocation6 + $0x20c] sm:$0xf0] }
 0x4a6   : > { %v15027_v14 = vadd.f32 %v4096_v59, %v4048_v54  ;;  %v11340_v54 = vld [vmem:[#allocation6 + $0x20] sm:$0xf]  ;;  %v13334_v59 = vld [vmem:[#allocation6 + $0x10c] sm:$0xf0] }
 0x4a7   : > { %v11341_v43 = vor.u32 %v13306_v48, %v11340_v54 }
 0x4a8   : > { %v4003_v20 = vpop.f32.mrf.mxu0  ;;  %v4052_v38 = vpop.f32.mrf.mxu1 }
 0x4a9   : > { %v4004_v51 = vadd.f32 %v4003_v20, %v14977_v39  ;;  %v4140_v12 = vpop.f32.mrf.mxu3  ;;  %5239 = vmatpush.bf16.msrb.mxu0 %v11341_v43  ;;  %5288 = vmatpush.bf16.msrb.mxu1 %v11469_v32  ;;  %v13370_v20 = vld [vmem:[#allocation6 + $0x22c] sm:$0xf0] }
 0x4aa   : > { %v4141_v7 = vadd.f32 %v4140_v12, %v4092_v3  ;;  %4294 = vmatmul.bf16.gmra.mxu2 %v14755_v55  ;;  %v11613_v55 = vor.u32 %v13374_v16, %v11612_v49  ;;  %v11740_v3 = vld [vmem:[#allocation6 + $0x340] sm:$0xf]  ;;  %v13402_v49 = vld [vmem:[#allocation6 + $0x32c] sm:$0xf0] }
 0x4ab   : > { %v4053_v36 = vadd.f32 %v4052_v38, %v4004_v51  ;;  %v11741_v6 = vor.u32 %v13406_v21, %v11740_v3  ;;  %v11580_v12 = vld [vmem:[#allocation6 + $0x200] sm:$0xf] }
 0x4ac   : > { %v4389_v41 = vmax.f32 %v4141_v7, 0.0  ;;  %5336 = vmatpush.bf16.msrb.mxu2 %v11613_v55  ;;  %v11581_v54 = vor.u32 %v13366_v61, %v11580_v12 }
 0x4ad   : > { %v4099_v10 = vpop.f32.mrf.mxu2  ;;  %5385 = vmatpush.bf16.msrb.mxu3 %v11741_v6  ;;  %5240 = vmatpush.bf16.msrb.mxu0 %v11325_v2 }
 0x4ae   : > { %v15031_v63 = vpack.c.bf16 %v4389_v41, %v4385_v0  ;;  %v4100_v22 = vadd.f32 %v4099_v10, %v4051_v37  ;;  %4338 = vmatmul.bf16.gmra.mxu3 %v14811_v26  ;;  %v11453_v37 = vor.u32 %v13334_v59, %v11452_v57  ;;  %v11596_v26 = vld [vmem:[#allocation6 + $0x220] sm:$0xf] }
 0x4af   : > { %v11597_v18 = vor.u32 %v13370_v20, %v11596_v26 }
 0x4b0   : > { %v4006_v23 = vpop.f32.mrf.mxu0  ;;  %v4055_v46 = vpop.f32.mrf.mxu1  ;;  %5289 = vmatpush.bf16.msrb.mxu1 %v11453_v37 }
 0x4b1   : > { %v4007_v30 = vadd.f32 %v4006_v23, %v14977_v39  ;;  %v4143_v4 = vpop.f32.mrf.mxu3  ;;  %5337 = vmatpush.bf16.msrb.mxu2 %v11597_v18 }
 0x4b2   : > { %v4144_v28 = vadd.f32 %v4143_v4, %v15021_v11 }
 0x4b3   : > { %v4056_v51 = vadd.f32 %v4055_v46, %v4007_v30  ;;  %4201 = vmatmul.bf16.gmra.mxu0 %v17183_v58  ;;  %4250 = vmatmul.bf16.gmra.mxu1 %v17184_v8 }
 0x4b4   : > { %v4393_v43 = vmax.f32 %v4144_v28, 0.0 }
 0x4b5   : > { %v4101_v38 = vpop.f32.mrf.mxu2  ;;  %5338 = vmatpush.bf16.msrb.mxu2 %v11581_v54 }
 0x4b6   : > { %v4102_v7 = vadd.f32 %v4101_v38, %v4053_v36  ;;  %v11724_v36 = vld [vmem:[#allocation6 + $0x320] sm:$0xf] }
 0x4b7   : > { %v11725_v16 = vor.u32 %v13402_v49, %v11724_v36 }
 0x4b8   : > { %v4008_v48 = vpop.f32.mrf.mxu0  ;;  %v4057_v0 = vpop.f32.mrf.mxu1 }
 0x4b9   : > { %v4009_v33 = vadd.f32 %v4008_v48, %v14977_v39  ;;  %v4145_v11 = vpop.f32.mrf.mxu3  ;;  %5386 = vmatpush.bf16.msrb.mxu3 %v11725_v16 }
 0x4ba   : > { %v4146_v41 = vadd.f32 %v4145_v11, %v15027_v14  ;;  %4299 = vmatmul.bf16.gmra.mxu2 %v14763_v56  ;;  %v13392_v11 = vld [vmem:[#allocation6 + $0x2e4] sm:$0xf] }
 0x4bb   : > { %v4058_v58 = vadd.f32 %v4057_v0, %v4009_v33 }
 0x4bc   : > { %v4397_v1 = vmax.f32 %v4146_v41, 0.0  ;;  %v11694_v41 = vld [vmem:[#allocation6 + $0x2f0] sm:$0xf0] }
 0x4bd   : > { %v4104_v8 = vpop.f32.mrf.mxu2 }
 0x4be   : > { %v15041_v10 = vpack.c.bf16 %v4397_v1, %v4393_v43  ;;  %v4105_v32 = vadd.f32 %v4104_v8, %v4056_v51  ;;  %4343 = vmatmul.bf16.gmra.mxu3 %v14819_v53  ;;  %v13328_v1 = vld [vmem:[#allocation6 + $0xe4] sm:$0xf]  ;;  %v11438_v8 = vld [vmem:[#allocation6 + $0xf0] sm:$0xf0] }
 0x4bf   : > { %v11441_v16 = vor.u32 %v13328_v1, %v11438_v8 }
 0x4c0   : > { %v4011_v55 = vpop.f32.mrf.mxu0  ;;  %v4060_v21 = vpop.f32.mrf.mxu1 }
 0x4c1   : > { %v4012_v3 = vadd.f32 %v4011_v55, %v14977_v39  ;;  %v4148_v6 = vpop.f32.mrf.mxu3  ;;  %v11822_v55 = vld [vmem:[#allocation6 + $0x3f0] sm:$0xf0]  ;;  %5429 = vmatpush.bf16.msra.mxu0 %v11441_v16 }
 0x4c2   : > { %v4149_v14 = vadd.f32 %v4148_v6, %v4100_v22  ;;  %v11566_v6 = vld [vmem:[#allocation6 + $0x1f0] sm:$0xf0] }
 0x4c3   : > { %v4061_v56 = vadd.f32 %v4060_v21, %v4012_v3  ;;  %4206 = vmatmul.bf16.gmra.mxu0 %v17185_v13  ;;  %4255 = vmatmul.bf16.gmra.mxu1 %v14707_v50  ;;  %v11708_v50 = vld [vmem:[#allocation6 + $0x300] sm:$0xf]  ;;  %v13398_v13 = vld [vmem:[#allocation6 + $0x30c] sm:$0xf0] }
 0x4c4   : > { %v4401_v46 = vmax.f32 %v4149_v14, 0.0  ;;  %v11709_v20 = vor.u32 %v13398_v13, %v11708_v50 }
 0x4c5   : > { %v4106_v60 = vpop.f32.mrf.mxu2 }
 0x4c6   : > { %v4107_v52 = vadd.f32 %v4106_v60, %v4058_v58  ;;  %5387 = vmatpush.bf16.msrb.mxu3 %v11709_v20  ;;  %v11697_v58 = vor.u32 %v13392_v11, %v11694_v41  ;;  %v13324_v20 = vld [vmem:[#allocation6 + $0xc4] sm:$0xf]  ;;  %v11550_v11 = vld [vmem:[#allocation6 + $0x1d0] sm:$0xf0] }
 0x4c8   : > { %v4013_v57 = vpop.f32.mrf.mxu0  ;;  %v4062_v23 = vpop.f32.mrf.mxu1  ;;  %5527 = vmatpush.bf16.msra.mxu2 %v11697_v58 }
 0x4c9   : > { %v4014_v53 = vadd.f32 %v4013_v57, %v14977_v39  ;;  %v4150_v2 = vpop.f32.mrf.mxu3 }
 0x4ca   : > { %v4151_v59 = vadd.f32 %v4150_v2, %v4102_v7  ;;  %4304 = vmatmul.bf16.gmra.mxu2 %v14772_v40 }
 0x4cb   : > { %v4063_v30 = vadd.f32 %v4062_v23, %v4014_v53  ;;  %v15072_v23 = vperm.slane %v14974_v47, 3 }
 0x4cc   : > { %v4405_v4 = vmax.f32 %v4151_v59, 0.0 }
 0x4cd   : > { %v4109_v37 = vpop.f32.mrf.mxu2 }
 0x4ce   : > { %v15049_v22 = vpack.c.bf16 %v4405_v4, %v4401_v46  ;;  %v4110_v26 = vadd.f32 %v4109_v37, %v4061_v56  ;;  %4348 = vmatmul.bf16.gmra.mxu3 %v14832_v35  ;;  %v13388_v4 = vld [vmem:[#allocation6 + $0x2c4] sm:$0xf]  ;;  %v11678_v37 = vld [vmem:[#allocation6 + $0x2d0] sm:$0xf0] }
 0x4d0   : > { %v4172_v28 = vpop.f32.mrf.mxu0  ;;  %v15052_v39 = vpop.f32.mrf.mxu1 }
 0x4d1   : > { %v4153_v18 = vpop.f32.mrf.mxu3  ;;  %v4173_v50 = vadd.f32 %v4172_v28, %v15072_v23  ;;  %v13356_v28 = vld [vmem:[#allocation6 + $0x1c4] sm:$0xf] }
 0x4d2   : > { %v4154_v51 = vadd.f32 %v4153_v18, %v4105_v32  ;;  %v13424_v32 = vld [vmem:[#allocation6 + $0x3e4] sm:$0xf]  ;;  %v11422_v18 = vld [vmem:[#allocation6 + $0xd0] sm:$0xf0]  ;;  %v11553_v58 = vor.u32 %v13356_v28, %v11550_v11 }
 0x4d3   : > { %5241 = vmatmul.bf16.vlgmr.msrb.gmra.mxu0 %v14858_v27  ;;  %5290 = vmatmul.bf16.vlgmr.msrb.gmra.mxu1 %v14928_v45  ;;  %v11825_v21 = vor.u32 %v13424_v32, %v11822_v55 }
 0x4d4   : > { %v4409_v54 = vmax.f32 %v4154_v51, 0.0  ;;  %v13420_v51 = vld [vmem:[#allocation6 + $0x3c4] sm:$0xf] }
 0x4d5   : > { %v4111_v40 = vpop.f32.mrf.mxu2  ;;  %5576 = vmatpush.bf16.msra.mxu3 %v11825_v21 }
 0x4d6   : > { %v4112_v38 = vadd.f32 %v4111_v40, %v4063_v30 }
 0x4d8   : > { %v4174_v12 = vpop.f32.mrf.mxu0  ;;  %v15056_v7 = vpop.f32.mrf.mxu1 }
 0x4d9   : > { %v4155_v61 = vpop.f32.mrf.mxu3 }
 0x4da   : > { %v4156_v35 = vadd.f32 %v4155_v61, %v4107_v52  ;;  %5339 = vmatmul.bf16.vlgmr.msrb.gmra.mxu2 %v15003_v5  ;;  %v11806_v61 = vld [vmem:[#allocation6 + $0x3d0] sm:$0xf0] }
 0x4dc   : > { %v4413_v48 = vmax.f32 %v4156_v35, 0.0  ;;  %v4175_v35 = vadd.f32 %v4174_v12, %v15072_v23 }
 0x4dd   : > { %v4270_v33 = vpop.f32.mrf.mxu2 }
 0x4de   : > { %v15059_v0 = vpack.c.bf16 %v4413_v48, %v4409_v54  ;;  %4353 = vmatmul.bf16.gmra.mxu3 %v14844_v19  ;;  %v13360_v19 = vld [vmem:[#allocation6 + $0x1e4] sm:$0xf]  ;;  %v11809_v54 = vor.u32 %v13420_v51, %v11806_v61  ;;  %v4222_v48 = vadd.f32 %v15052_v39, %v4173_v50  ;;  %v4224_v1 = vadd.f32 %v15056_v7, %v4175_v35  ;;  %v11790_v50 = vld [vmem:[#allocation6 + $0x3b0] sm:$0xf0] }
 0x4df   : > { %v11569_v56 = vor.u32 %v13360_v19, %v11566_v6  ;;  %v17191_v51 = vld [vmem:[#allocation13_spill] sm:$0xff] }
 0x4e0   : > { %v15062_v43 = vpop.f32.mrf.mxu0  ;;  %v15064_v49 = vpop.f32.mrf.mxu1  ;;  %5577 = vmatpush.bf16.msra.mxu3 %v11809_v54  ;;  %v4271_v8 = vadd.f32 %v4270_v33, %v4222_v48 }
 0x4e1   : > { %v4158_v36 = vpop.f32.mrf.mxu3  ;;  %5478 = vmatpush.bf16.msra.mxu1 %v11569_v56  ;;  %v13384_v56 = vld [vmem:[#allocation6 + $0x2a4] sm:$0xf]  ;;  %v4178_v33 = vadd.f32 %v15062_v43, %v15072_v23 }
 0x4e2   : > { %v4159_v3 = vadd.f32 %v4158_v36, %v4110_v26  ;;  %v11681_v26 = vor.u32 %v13388_v4, %v11678_v37 }
 0x4e3   : > { %5246 = vmatmul.bf16.gmra.mxu0 %v14866_v44  ;;  %5295 = vmatmul.bf16.gmra.mxu1 %v14936_v34  ;;  %v4227_v43 = vadd.f32 %v15064_v49, %v4178_v33 }
 0x4e4   : > { %v4417_v2 = vmax.f32 %v4159_v3, 0.0  ;;  %5528 = vmatpush.bf16.msra.mxu2 %v11681_v26 }
 0x4e5   : > { %v4272_v14 = vpop.f32.mrf.mxu2  ;;  %5479 = vmatpush.bf16.msra.mxu1 %v11553_v58 }
 0x4e6   : > { %v4273_v32 = vadd.f32 %v4272_v14, %v4224_v1 }
 0x4e8   : > { %v4179_v60 = vpop.f32.mrf.mxu0  ;;  %v15068_v57 = vpop.f32.mrf.mxu1 }
 0x4e9   : > { %v4160_v52 = vpop.f32.mrf.mxu3 }
 0x4ea   : > { %v4161_v53 = vadd.f32 %v4160_v52, %v4112_v38  ;;  %5344 = vmatmul.bf16.gmra.mxu2 %v15011_v25  ;;  %v11425_v38 = vor.u32 %v13324_v20, %v11422_v18  ;;  %v11662_v52 = vld [vmem:[#allocation6 + $0x2b0] sm:$0xf0]  ;;  %v4180_v20 = vadd.f32 %v4179_v60, %v15072_v23 }
 0x4eb   : > { %v11665_v7 = vor.u32 %v13384_v56, %v11662_v52  ;;  %v11390_v56 = vld [vmem:[#allocation6 + $0x90] sm:$0xf0]  ;;  %v13412_v52 = vld [vmem:[#allocation6 + $0x384] sm:$0xf] }
 0x4ec   : > { %v4421_v59 = vmax.f32 %v4161_v53, 0.0  ;;  %5430 = vmatpush.bf16.msra.mxu0 %v11425_v38  ;;  %v13320_v53 = vld [vmem:[#allocation6 + $0xa4] sm:$0xf]  ;;  %v11534_v38 = vld [vmem:[#allocation6 + $0x1b0] sm:$0xf0]  ;;  %v4229_v54 = vadd.f32 %v15068_v57, %v4180_v20 }
 0x4ed   : > { %v15074_v30 = vpop.f32.mrf.mxu2  ;;  %5529 = vmatpush.bf16.msra.mxu2 %v11665_v7  ;;  %v11646_v57 = vld [vmem:[#allocation6 + $0x290] sm:$0xf0] }
 0x4ee   : > { %v15076_v46 = vpack.c.bf16 %v4421_v59, %v4417_v2  ;;  %v11406_v2 = vld [vmem:[#allocation6 + $0xb0] sm:$0xf0]  ;;  %v13416_v59 = vld [vmem:[#allocation6 + $0x3a4] sm:$0xf]  ;;  %v4276_v48 = vadd.f32 %v15074_v30, %v4227_v43 }
 0x4ef   : > { %v11409_v26 = vor.u32 %v13320_v53, %v11406_v2  ;;  %v11793_v18 = vor.u32 %v13416_v59, %v11790_v50  ;;  %v11774_v2 = vld [vmem:[#allocation6 + $0x390] sm:$0xf0]  ;;  %v13348_v50 = vld [vmem:[#allocation6 + $0x184] sm:$0xf] }
 0x4f0   : > { %v15079_v13 = vpop.f32.mrf.mxu0  ;;  %v15081_v40 = vpop.f32.mrf.mxu1  ;;  %v11518_v20 = vld [vmem:[#allocation6 + $0x190] sm:$0xf0] }
 0x4f1   : > { %v4319_v47 = vpop.f32.mrf.mxu3  ;;  %5431 = vmatpush.bf16.msra.mxu0 %v11409_v26  ;;  %5578 = vmatpush.bf16.msra.mxu3 %v11793_v18  ;;  %v4183_v30 = vadd.f32 %v15079_v13, %v15072_v23  ;;  %v17192_v26 = vld [vmem:[#allocation14_spill] sm:$0xff]  ;;  %v11521_v43 = vor.u32 %v13348_v50, %v11518_v20 }
 0x4f2   : > { %v4320_v36 = vadd.f32 %v4319_v47, %v4271_v8  ;;  %v13352_v47 = vld [vmem:[#allocation6 + $0x1a4] sm:$0xf] }
 0x4f3   : > { %5251 = vmatmul.bf16.gmra.mxu0 %v14874_v9  ;;  %5300 = vmatmul.bf16.gmra.mxu1 %v14944_v42  ;;  %v11537_v35 = vor.u32 %v13352_v47, %v11534_v38  ;;  %v4232_v13 = vadd.f32 %v15081_v40, %v4183_v30  ;;  %v13408_v30 = vld [vmem:[#allocation6 + $0x364] sm:$0xf] }
 0x4f4   : > { %v4362_v39 = vmax.f32 %v4320_v36, 0.0 }
 0x4f5   : > { %v4277_v41 = vpop.f32.mrf.mxu2  ;;  %5480 = vmatpush.bf16.msra.mxu1 %v11537_v35 }
 0x4f6   : > { %v4278_v28 = vadd.f32 %v4277_v41, %v4229_v54 }
 0x4f8   : > { %v4184_v12 = vpop.f32.mrf.mxu0  ;;  %v15088_v16 = vpop.f32.mrf.mxu1 }
 0x4f9   : > { %v4321_v55 = vpop.f32.mrf.mxu3  ;;  %v4185_v59 = vadd.f32 %v4184_v12, %v15072_v23  ;;  %5481 = vmatpush.bf16.msra.mxu1 %v11521_v43 }
 0x4fa   : > { %v4322_v3 = vadd.f32 %v4321_v55, %v4273_v32  ;;  %5349 = vmatmul.bf16.gmra.mxu2 %v15019_v24 }
 0x4fb   : > { %v4234_v47 = vadd.f32 %v15088_v16, %v4185_v59  ;;  %v13376_v16 = vld [vmem:[#allocation6 + $0x264] sm:$0xf]  ;;  %v17193_v59 = vld [vmem:[#allocation16_spill] sm:$0xff] }
 0x4fc   : > { %v4366_v21 = vmax.f32 %v4322_v3, 0.0  ;;  %v13380_v3 = vld [vmem:[#allocation6 + $0x284] sm:$0xf] }
 0x4fd   : > { %v15091_v19 = vpop.f32.mrf.mxu2 }
 0x4fe   : > { %v15093_v6 = vpack.c.bf16 %v4366_v21, %v4362_v39  ;;  %v11649_v39 = vor.u32 %v13380_v3, %v11646_v57  ;;  %v13316_v21 = vld [vmem:[#allocation6 + $0x84] sm:$0xf]  ;;  %v4281_v38 = vadd.f32 %v15091_v19, %v4232_v13 }
 0x4ff   : > { %v11393_v53 = vor.u32 %v13316_v21, %v11390_v56  ;;  %v13312_v57 = vld [vmem:[#allocation6 + $0x64] sm:$0xf] }
 0x500   : > { %5388 = vmatmul.bf16.vlgmr.msrb.gmra.mxu3 %v15093_v6  ;;  %v15098_v14 = vpop.f32.mrf.mxu0  ;;  %v15100_v4 = vpop.f32.mrf.mxu1  ;;  %5530 = vmatpush.bf16.msra.mxu2 %v11649_v39  ;;  %v11374_v39 = vld [vmem:[#allocation6 + $0x70] sm:$0xf0] }
 0x501   : > { %v4324_v37 = vpop.f32.mrf.mxu3  ;;  %5432 = vmatpush.bf16.msra.mxu0 %v11393_v53 }
 0x502   : > { %v4325_v60 = vadd.f32 %v4324_v37, %v4276_v48  ;;  %v11777_v37 = vor.u32 %v13412_v52, %v11774_v2  ;;  %v11377_v52 = vor.u32 %v13312_v57, %v11374_v39 }
 0x503   : > { %5256 = vmatmul.bf16.gmra.mxu0 %v17191_v51  ;;  %5305 = vmatmul.bf16.gmra.mxu1 %v14954_v31 }
 0x504   : > { %v4370_v8 = vmax.f32 %v4325_v60, 0.0  ;;  %5579 = vmatpush.bf16.msra.mxu3 %v11777_v37  ;;  %v13344_v37 = vld [vmem:[#allocation6 + $0x164] sm:$0xf] }
 0x505   : > { %v4282_v61 = vpop.f32.mrf.mxu2  ;;  %5433 = vmatpush.bf16.msra.mxu0 %v11377_v52 }
 0x506   : > { %v4283_v35 = vadd.f32 %v4282_v61, %v4234_v47  ;;  %v4188_v61 = vadd.f32 %v15098_v14, %v15072_v23  ;;  %v11502_v14 = vld [vmem:[#allocation6 + $0x170] sm:$0xf0] }
 0x507   : > { %v11505_v50 = vor.u32 %v13344_v37, %v11502_v14  ;;  %v13300_v14 = vld [vmem:[#allocation6 + $0x4] sm:$0xf] }
 0x508   : > { %v4189_v11 = vpop.f32.mrf.mxu0  ;;  %v15108_v58 = vpop.f32.mrf.mxu1  ;;  %v4237_v13 = vadd.f32 %v15100_v4, %v4188_v61  ;;  %v13336_v61 = vld [vmem:[#allocation6 + $0x124] sm:$0xf] }
 0x509   : > { %v4326_v1 = vpop.f32.mrf.mxu3  ;;  %v4190_v53 = vadd.f32 %v4189_v11, %v15072_v23  ;;  %5482 = vmatpush.bf16.msra.mxu1 %v11505_v50  ;;  %v13308_v11 = vld [vmem:[#allocation6 + $0x44] sm:$0xf] }
 0x50a   : > { %v4327_v49 = vadd.f32 %v4326_v1, %v4278_v28  ;;  %5354 = vmatmul.bf16.gmra.mxu2 %v15031_v63  ;;  %v13332_v50 = vld [vmem:[#allocation6 + $0x104] sm:$0xf] }
 0x50b   : > { %v4239_v43 = vadd.f32 %v15108_v58, %v4190_v53  ;;  %v13304_v58 = vld [vmem:[#allocation6 + $0x24] sm:$0xf]  ;;  %v11614_v53 = vld [vmem:[#allocation6 + $0x250] sm:$0xf0] }
 0x50c   : > { %v4374_v32 = vmax.f32 %v4327_v49, 0.0 }
 0x50d   : > { %v15111_v36 = vpop.f32.mrf.mxu2 }
 0x50e   : > { %v15113_v55 = vpack.c.bf16 %v4374_v32, %v4370_v8  ;;  %v11630_v32 = vld [vmem:[#allocation6 + $0x270] sm:$0xf0]  ;;  %v4286_v47 = vadd.f32 %v15111_v36, %v4237_v13 }
 0x50f   : > { %v11633_v19 = vor.u32 %v13376_v16, %v11630_v32  ;;  %v11342_v36 = vld [vmem:[#allocation6 + $0x30] sm:$0xf0] }
 0x510   : > { %5393 = vmatmul.bf16.gmra.mxu3 %v15113_v55  ;;  %v15118_v41 = vpop.f32.mrf.mxu0  ;;  %v15120_v7 = vpop.f32.mrf.mxu1  ;;  %v11326_v13 = vld [vmem:[#allocation6 + $0x10] sm:$0xf0] }
 0x511   : > { %v4329_v33 = vpop.f32.mrf.mxu3  ;;  %5531 = vmatpush.bf16.msra.mxu2 %v11633_v19 }
 0x512   : > { %v4330_v12 = vadd.f32 %v4329_v33, %v4281_v38  ;;  %v11758_v33 = vld [vmem:[#allocation6 + $0x370] sm:$0xf0] }
 0x513   : > { %5261 = vmatmul.bf16.gmra.mxu0 %v17192_v26  ;;  %5310 = vmatmul.bf16.gmra.mxu1 %v14963_v62  ;;  %v11761_v2 = vor.u32 %v13408_v30, %v11758_v33  ;;  %v11358_v38 = vld [vmem:[#allocation6 + $0x50] sm:$0xf0]  ;;  %v13372_v33 = vld [vmem:[#allocation6 + $0x244] sm:$0xf] }
 0x514   : > { %v4378_v60 = vmax.f32 %v4330_v12, 0.0  ;;  %v11361_v4 = vor.u32 %v13308_v11, %v11358_v38  ;;  %v11470_v30 = vld [vmem:[#allocation6 + $0x130] sm:$0xf0]  ;;  %v11617_v37 = vor.u32 %v13372_v33, %v11614_v53  ;;  %v13404_v11 = vld [vmem:[#allocation6 + $0x344] sm:$0xf] }
 0x515   : > { %v4287_v18 = vpop.f32.mrf.mxu2  ;;  %5580 = vmatpush.bf16.msra.mxu3 %v11761_v2  ;;  %v11473_v52 = vor.u32 %v13336_v61, %v11470_v30  ;;  %v11742_v38 = vld [vmem:[#allocation6 + $0x350] sm:$0xf0] }
 0x516   : > { %v4288_v12 = vadd.f32 %v4287_v18, %v4239_v43  ;;  %5434 = vmatpush.bf16.msra.mxu0 %v11361_v4  ;;  %v11345_v18 = vor.u32 %v13304_v58, %v11342_v36  ;;  %v4193_v43 = vadd.f32 %v15118_v41, %v15072_v23  ;;  %5532 = vmatpush.bf16.msra.mxu2 %v11617_v37  ;;  %v11598_v41 = vld [vmem:[#allocation6 + $0x230] sm:$0xf0] }
 0x517   : > { %v11745_v4 = vor.u32 %v13404_v11, %v11742_v38  ;;  %v17194_v58 = vld [vmem:[#allocation15_spill] sm:$0xff] }
 0x518   : > { %v15128_v54 = vpop.f32.mrf.mxu0  ;;  %v15130_v48 = vpop.f32.mrf.mxu1  ;;  %v4242_v61 = vadd.f32 %v15120_v7, %v4193_v43 }
 0x519   : > { %v4331_v40 = vpop.f32.mrf.mxu3  ;;  %5581 = vmatpush.bf16.msra.mxu3 %v11745_v4 }
 0x51a   : > { %v4332_v28 = vadd.f32 %v4331_v40, %v4283_v35  ;;  %5359 = vmatmul.bf16.gmra.mxu2 %v15041_v10  ;;  %v13340_v35 = vld [vmem:[#allocation6 + $0x144] sm:$0xf]  ;;  %5435 = vmatpush.bf16.msra.mxu0 %v11345_v18  ;;  %v11582_v18 = vld [vmem:[#allocation6 + $0x210] sm:$0xf0] }
 0x51c   : > { %v4382_v1 = vmax.f32 %v4332_v28, 0.0 }
 0x51d   : > { %v15133_v49 = vpop.f32.mrf.mxu2 }
 0x51e   : > { %v15135_v8 = vpack.c.bf16 %v4382_v1, %v4378_v60  ;;  %v11486_v60 = vld [vmem:[#allocation6 + $0x150] sm:$0xf0] }
 0x51f   : > { %v11489_v32 = vor.u32 %v13340_v35, %v11486_v60  ;;  %v11329_v35 = vor.u32 %v13300_v14, %v11326_v13  ;;  %v11454_v60 = vld [vmem:[#allocation6 + $0x110] sm:$0xf0] }
 0x520   : > { %5398 = vmatmul.bf16.gmra.mxu3 %v15135_v8  ;;  %v15140_v3 = vpop.f32.mrf.mxu0  ;;  %v15142_v21 = vpop.f32.mrf.mxu1 }
 0x521   : > { %v4334_v56 = vpop.f32.mrf.mxu3  ;;  %5483 = vmatpush.bf16.msra.mxu1 %v11489_v32  ;;  %v4195_v32 = vadd.f32 %v15128_v54, %v15072_v23  ;;  %5436 = vmatpush.bf16.msra.mxu0 %v11329_v35  ;;  %v4291_v54 = vadd.f32 %v15133_v49, %v4242_v61  ;;  %v11726_v35 = vld [vmem:[#allocation6 + $0x330] sm:$0xf0] }
 0x522   : > { %v4335_v40 = vadd.f32 %v4334_v56, %v4286_v47 }
 0x523   : > { %5266 = vmatmul.bf16.gmra.mxu0 %v17193_v59  ;;  %5315 = vmatmul.bf16.gmra.mxu1 %v14979_v17  ;;  %v4244_v30 = vadd.f32 %v15130_v48, %v4195_v32  ;;  %v4198_v48 = vadd.f32 %v15140_v3, %v15072_v23  ;;  %v17195_v32 = vld [vmem:[#allocation17_spill] sm:$0xff] }
 0x524   : > { %v4386_v57 = vmax.f32 %v4335_v40, 0.0 }
 0x525   : > { %v15148_v20 = vpop.f32.mrf.mxu2  ;;  %5484 = vmatpush.bf16.msra.mxu1 %v11473_v52 }
 0x526   : > { %v4293_v33 = vadd.f32 %v15148_v20, %v4244_v30  ;;  %v13400_v20 = vld [vmem:[#allocation6 + $0x324] sm:$0xf] }
 0x528   : > { %v15152_v28 = vpop.f32.mrf.mxu0  ;;  %v15154_v1 = vpop.f32.mrf.mxu1 }
 0x529   : > { %v4336_v16 = vpop.f32.mrf.mxu3 }
 0x52a   : > { %v4337_v19 = vadd.f32 %v4336_v16, %v4288_v12  ;;  %5364 = vmatmul.bf16.gmra.mxu2 %v15049_v22  ;;  %v13368_v16 = vld [vmem:[#allocation6 + $0x224] sm:$0xf] }
 0x52b   : > { %v11601_v36 = vor.u32 %v13368_v16, %v11598_v41  ;;  %v4200_v16 = vadd.f32 %v15152_v28, %v15072_v23 }
 0x52c   : > { %v4390_v39 = vmax.f32 %v4337_v19, 0.0  ;;  %v11457_v19 = vor.u32 %v13332_v50, %v11454_v60  ;;  %v11729_v60 = vor.u32 %v13400_v20, %v11726_v35 }
 0x52d   : > { %v15157_v56 = vpop.f32.mrf.mxu2  ;;  %5533 = vmatpush.bf16.msra.mxu2 %v11601_v36  ;;  %v4249_v41 = vadd.f32 %v15154_v1, %v4200_v16 }
 0x52e   : > { %v15159_v2 = vpack.c.bf16 %v4390_v39, %v4386_v57  ;;  %5485 = vmatpush.bf16.msra.mxu1 %v11457_v19  ;;  %v13364_v39 = vld [vmem:[#allocation6 + $0x204] sm:$0xf]  ;;  %5582 = vmatpush.bf16.msra.mxu3 %v11729_v60  ;;  %v4247_v19 = vadd.f32 %v15142_v21, %v4198_v48  ;;  %v15197_v21 = vld [vmem:[%s17107_s8] sm:$0xf] }
 0x52f   : > { %v11585_v52 = vor.u32 %v13364_v39, %v11582_v18  ;;  %v15202_v1 = vperm.slane %v15197_v21, 0 }
 0x530   : > { %5403 = vmatmul.bf16.gmra.mxu3 %v15159_v2  ;;  %v15164_v47 = vpop.f32.mrf.mxu0  ;;  %v15166_v12 = vpop.f32.mrf.mxu1  ;;  %v4296_v36 = vadd.f32 %v15157_v56, %v4247_v19 }
 0x531   : > { %v4339_v40 = vpop.f32.mrf.mxu3  ;;  %5534 = vmatpush.bf16.msra.mxu2 %v11585_v52 }
 0x532   : > { %v4340_v53 = vadd.f32 %v4339_v40, %v4291_v54 }
 0x533   : > { %5271 = vmatmul.bf16.gmra.mxu0 %v17194_v58  ;;  %5320 = vmatmul.bf16.gmra.mxu1 %v14987_v15 }
 0x534   : > { %v4394_v50 = vmax.f32 %v4340_v53, 0.0 }
 0x535   : > { %v4297_v57 = vpop.f32.mrf.mxu2 }
 0x536   : > { %v4298_v61 = vadd.f32 %v4297_v57, %v4249_v41  ;;  %v4203_v57 = vadd.f32 %v15164_v47, %v15072_v23 }
 0x538   : > { %v4204_v37 = vpop.f32.mrf.mxu0  ;;  %v4253_v14 = vpop.f32.mrf.mxu1  ;;  %v4252_v16 = vadd.f32 %v15166_v12, %v4203_v57 }
 0x539   : > { %v4341_v13 = vpop.f32.mrf.mxu3 }
 0x53a   : > { %v4342_v7 = vadd.f32 %v4341_v13, %v4293_v33  ;;  %5369 = vmatmul.bf16.gmra.mxu2 %v15059_v0 }
 0x53c   : > { %v4398_v43 = vmax.f32 %v4342_v7, 0.0  ;;  %v13396_v7 = vld [vmem:[#allocation6 + $0x304] sm:$0xf] }
 0x53d   : > { %v4300_v11 = vpop.f32.mrf.mxu2 }
 0x53e   : > { %v15177_v38 = vpack.c.bf16 %v4398_v43, %v4394_v50  ;;  %v11710_v50 = vld [vmem:[#allocation6 + $0x310] sm:$0xf0]  ;;  %v4301_v41 = vadd.f32 %v4300_v11, %v4252_v16  ;;  %v13395_v11 = vld [vmem:[#allocation6 + $0x2f4] sm:$0xf0] }
 0x53f   : > { %v11713_v35 = vor.u32 %v13396_v7, %v11710_v50 }
 0x540   : > { %5408 = vmatmul.bf16.gmra.mxu3 %v15177_v38  ;;  %v4207_v49 = vpop.f32.mrf.mxu0  ;;  %v15182_v40 = vpop.f32.mrf.mxu1 }
 0x541   : > { %v4344_v4 = vpop.f32.mrf.mxu3  ;;  %5583 = vmatpush.bf16.msra.mxu3 %v11713_v35  ;;  %v13331_v35 = vld [vmem:[#allocation6 + $0xf4] sm:$0xf0] }
 0x542   : > { %v4345_v39 = vadd.f32 %v4344_v4, %v4296_v36  ;;  %v4205_v4 = vadd.f32 %v4204_v37, %v15072_v23 }
 0x543   : > { %5276 = vmatmul.bf16.gmra.mxu0 %v17195_v32  ;;  %5325 = vmatmul.bf16.gmra.mxu1 %v14995_v29 }
 0x544   : > { %v4402_v28 = vmax.f32 %v4345_v39, 0.0  ;;  %v4254_v19 = vadd.f32 %v4253_v14, %v4205_v4  ;;  %v11700_v14 = vld [vmem:[#allocation6 + $0x2e8] sm:$0xf] }
 0x545   : > { %v4302_v3 = vpop.f32.mrf.mxu2  ;;  %v11828_v4 = vld [vmem:[#allocation6 + $0x3e8] sm:$0xf] }
 0x546   : > { %v4303_v36 = vadd.f32 %v4302_v3, %v4254_v19  ;;  %v11701_v3 = vor.u32 %v13395_v11, %v11700_v14 }
 0x548   : > { %v4209_v18 = vpop.f32.mrf.mxu0  ;;  %v15191_v30 = vpop.f32.mrf.mxu1  ;;  %5723 = vmatpush.bf16.msrb.mxu2 %v11701_v3 }
 0x549   : > { %v4346_v54 = vpop.f32.mrf.mxu3 }
 0x54a   : > { %v4347_v52 = vadd.f32 %v4346_v54, %v4298_v61  ;;  %5374 = vmatmul.bf16.gmra.mxu2 %v15076_v46 }
 0x54c   : > { %v4406_v33 = vmax.f32 %v4347_v52, 0.0 }
 0x54d   : > { %v15199_v53 = vpop.f32.mrf.mxu2 }
 0x54e   : > { %v15204_v56 = vpack.c.bf16 %v4406_v33, %v4402_v28 }
 0x550   : > { %5413 = vmatmul.bf16.gmra.mxu3 %v15204_v56  ;;  %v5242_v13 = vpop.f32.mrf.mxu0  ;;  %v5291_v20 = vpop.f32.mrf.mxu1 }
 0x551   : > { %v4349_v43 = vpop.f32.mrf.mxu3  ;;  %v5243_v48 = vadd.f32 %v5242_v13, %v15202_v1 }
 0x552   : > { %v4350_v61 = vadd.f32 %v4349_v43, %v4301_v41  ;;  %v4208_v43 = vadd.f32 %v4207_v49, %v15072_v23  ;;  %v11572_v49 = vld [vmem:[#allocation6 + $0x1e8] sm:$0xf] }
 0x553   : > { %v5292_v60 = vadd.f32 %v5291_v20, %v5243_v48  ;;  %5437 = vmatmul.bf16.vlgmr.msra.gmra.mxu0 %v14858_v27  ;;  %5486 = vmatmul.bf16.vlgmr.msra.gmra.mxu1 %v14928_v45  ;;  %v11444_v20 = vld [vmem:[#allocation6 + $0xe8] sm:$0xf] }
 0x554   : > { %v4410_v13 = vmax.f32 %v4350_v61, 0.0  ;;  %v13427_v61 = vld [vmem:[#allocation6 + $0x3f4] sm:$0xf0] }
 0x555   : > { %v4307_v47 = vpop.f32.mrf.mxu2 }
 0x558   : > { %v5244_v39 = vpop.f32.mrf.mxu0  ;;  %v5293_v28 = vpop.f32.mrf.mxu1 }
 0x559   : > { %v4351_v54 = vpop.f32.mrf.mxu3  ;;  %v5245_v52 = vadd.f32 %v5244_v39, %v15202_v1  ;;  %v11829_v39 = vor.u32 %v13427_v61, %v11828_v4 }
 0x55a   : > { %v4352_v33 = vadd.f32 %v4351_v54, %v4303_v36  ;;  %5535 = vmatmul.bf16.vlgmr.msra.gmra.mxu2 %v15003_v5  ;;  %v11445_v36 = vor.u32 %v13331_v35, %v11444_v20 }
 0x55b   : > { %v5294_v37 = vadd.f32 %v5293_v28, %v5245_v52  ;;  %v13363_v52 = vld [vmem:[#allocation6 + $0x1f4] sm:$0xf0]  ;;  %v4257_v28 = vadd.f32 %v15182_v40, %v4208_v43  ;;  %5772 = vmatpush.bf16.msrb.mxu3 %v11829_v39 }
 0x55c   : > { %v4414_v7 = vmax.f32 %v4352_v33, 0.0  ;;  %5625 = vmatpush.bf16.msrb.mxu0 %v11445_v36  ;;  %v11573_v33 = vor.u32 %v13363_v52, %v11572_v49  ;;  %v13327_v39 = vld [vmem:[#allocation6 + $0xd4] sm:$0xf0]  ;;  %v11812_v49 = vld [vmem:[#allocation6 + $0x3c8] sm:$0xf] }
 0x55d   : > { %v5340_v50 = vpop.f32.mrf.mxu2  ;;  %v13423_v52 = vld [vmem:[#allocation6 + $0x3d4] sm:$0xf0] }
 0x55e   : > { %v15216_v12 = vpack.c.bf16 %v4414_v7, %v4410_v13  ;;  %v15218_v57 = vadd.f32 %v5340_v50, %v5292_v60  ;;  %v4210_v60 = vadd.f32 %v4209_v18, %v15072_v23  ;;  %v4306_v50 = vadd.f32 %v15199_v53, %v4257_v28  ;;  %5674 = vmatpush.bf16.msrb.mxu1 %v11573_v33 }
 0x55f   : > { %v11813_v33 = vor.u32 %v13423_v52, %v11812_v49 }
 0x560   : > { %5418 = vmatmul.bf16.gmra.mxu3 %v15216_v12  ;;  %v5247_v48 = vpop.f32.mrf.mxu0  ;;  %v5296_v41 = vpop.f32.mrf.mxu1  ;;  %v4259_v7 = vadd.f32 %v15191_v30, %v4210_v60 }
 0x561   : > { %v4354_v16 = vpop.f32.mrf.mxu3  ;;  %v5248_v19 = vadd.f32 %v5247_v48, %v15202_v1  ;;  %5773 = vmatpush.bf16.msrb.mxu3 %v11813_v33  ;;  %v11540_v33 = vld [vmem:[#allocation6 + $0x1a8] sm:$0xf] }
 0x562   : > { %v4308_v23 = vadd.f32 %v4307_v47, %v4259_v7  ;;  %v4355_v18 = vadd.f32 %v4354_v16, %v4306_v50  ;;  %v13391_v16 = vld [vmem:[#allocation6 + $0x2d4] sm:$0xf0] }
 0x563   : > { %v5297_v54 = vadd.f32 %v5296_v41, %v5248_v19  ;;  %5442 = vmatmul.bf16.gmra.mxu0 %v14866_v44  ;;  %5491 = vmatmul.bf16.gmra.mxu1 %v14936_v34  ;;  %v11428_v41 = vld [vmem:[#allocation6 + $0xc8] sm:$0xf]  ;;  %v13359_v7 = vld [vmem:[#allocation6 + $0x1d4] sm:$0xf0] }
 0x564   : > { %v4418_v35 = vmax.f32 %v4355_v18, 0.0  ;;  %v11429_v28 = vor.u32 %v13327_v39, %v11428_v41 }
 0x565   : > { %v5342_v13 = vpop.f32.mrf.mxu2 }
 0x566   : > { %v15229_v14 = vadd.f32 %v5342_v13, %v5294_v37  ;;  %v11684_v37 = vld [vmem:[#allocation6 + $0x2c8] sm:$0xf]  ;;  %5626 = vmatpush.bf16.msrb.mxu0 %v11429_v28 }
 0x567   : > { %v11685_v60 = vor.u32 %v13391_v16, %v11684_v37  ;;  %v11412_v37 = vld [vmem:[#allocation6 + $0xa8] sm:$0xf] }
 0x568   : > { %v5249_v11 = vpop.f32.mrf.mxu0  ;;  %v5298_v40 = vpop.f32.mrf.mxu1 }
 0x569   : > { %v4356_v3 = vpop.f32.mrf.mxu3  ;;  %v5250_v48 = vadd.f32 %v5249_v11, %v15202_v1  ;;  %5724 = vmatpush.bf16.msrb.mxu2 %v11685_v60  ;;  %v13419_v60 = vld [vmem:[#allocation6 + $0x3b4] sm:$0xf0] }
 0x56a   : > { %v4357_v43 = vadd.f32 %v4356_v3, %v4308_v23  ;;  %5540 = vmatmul.bf16.gmra.mxu2 %v15011_v25 }
 0x56b   : > { %v5299_v20 = vadd.f32 %v5298_v40, %v5250_v48 }
 0x56c   : > { %v4422_v4 = vmax.f32 %v4357_v43, 0.0 }
 0x56d   : > { %v5345_v19 = vpop.f32.mrf.mxu2 }
 0x56e   : > { %v15233_v30 = vpack.c.bf16 %v4422_v4, %v4418_v35  ;;  %v15235_v53 = vadd.f32 %v5345_v19, %v5297_v54  ;;  %v11556_v54 = vld [vmem:[#allocation6 + $0x1c8] sm:$0xf] }
 0x56f   : > { %v11557_v50 = vor.u32 %v13359_v7, %v11556_v54  ;;  %v11668_v19 = vld [vmem:[#allocation6 + $0x2a8] sm:$0xf] }
 0x570   : > { %5423 = vmatmul.bf16.gmra.mxu3 %v15233_v30  ;;  %v5252_v47 = vpop.f32.mrf.mxu0  ;;  %v5301_v61 = vpop.f32.mrf.mxu1 }
 0x571   : > { %v5253_v36 = vadd.f32 %v5252_v47, %v15202_v1  ;;  %5675 = vmatpush.bf16.msrb.mxu1 %v11557_v50  ;;  %v13387_v47 = vld [vmem:[#allocation6 + $0x2b4] sm:$0xf0] }
 0x572   : > { %v11669_v41 = vor.u32 %v13387_v47, %v11668_v19 }
 0x573   : > { %v5302_v13 = vadd.f32 %v5301_v61, %v5253_v36  ;;  %5447 = vmatmul.bf16.gmra.mxu0 %v14874_v9  ;;  %5496 = vmatmul.bf16.gmra.mxu1 %v14944_v42  ;;  %v13323_v36 = vld [vmem:[#allocation6 + $0xb4] sm:$0xf0]  ;;  %v11796_v61 = vld [vmem:[#allocation6 + $0x3a8] sm:$0xf] }
 0x574   : > { %v11413_v39 = vor.u32 %v13323_v36, %v11412_v37  ;;  %v11797_v49 = vor.u32 %v13419_v60, %v11796_v61  ;;  %5725 = vmatpush.bf16.msrb.mxu2 %v11669_v41  ;;  %v11652_v41 = vld [vmem:[#allocation6 + $0x288] sm:$0xf]  ;;  %v13383_v36 = vld [vmem:[#allocation6 + $0x294] sm:$0xf0] }
 0x575   : > { %v5347_v23 = vpop.f32.mrf.mxu2  ;;  %v11396_v61 = vld [vmem:[#allocation6 + $0x88] sm:$0xf] }
 0x576   : > { %v15241_v18 = vadd.f32 %v5347_v23, %v5299_v20  ;;  %5627 = vmatpush.bf16.msrb.mxu0 %v11413_v39  ;;  %5774 = vmatpush.bf16.msrb.mxu3 %v11797_v49  ;;  %v11653_v49 = vor.u32 %v13383_v36, %v11652_v41 }
 0x578   : > { %v5254_v11 = vpop.f32.mrf.mxu0  ;;  %v5303_v48 = vpop.f32.mrf.mxu1  ;;  %5726 = vmatpush.bf16.msrb.mxu2 %v11653_v49 }
 0x579   : > { %v5255_v3 = vadd.f32 %v5254_v11, %v15202_v1 }
 0x57a   : > { %5545 = vmatmul.bf16.gmra.mxu2 %v15019_v24 }
 0x57b   : > { %v5304_v40 = vadd.f32 %v5303_v48, %v5255_v3 }
 0x57d   : > { %v5350_v43 = vpop.f32.mrf.mxu2 }
 0x57e   : > { %v15245_v35 = vadd.f32 %v5350_v43, %v5302_v13  ;;  %v13355_v13 = vld [vmem:[#allocation6 + $0x1b4] sm:$0xf0] }
 0x57f   : > { %v11541_v7 = vor.u32 %v13355_v13, %v11540_v33  ;;  %v11780_v33 = vld [vmem:[#allocation6 + $0x388] sm:$0xf] }
 0x580   : > { %5584 = vmatmul.bf16.vlgmr.msra.gmra.mxu3 %v15093_v6  ;;  %v5257_v4 = vpop.f32.mrf.mxu0  ;;  %v5306_v16 = vpop.f32.mrf.mxu1 }
 0x581   : > { %v5258_v20 = vadd.f32 %v5257_v4, %v15202_v1  ;;  %5676 = vmatpush.bf16.msrb.mxu1 %v11541_v7 }
 0x583   : > { %v5307_v52 = vadd.f32 %v5306_v16, %v5258_v20  ;;  %v5389_v28 = vpop.f32.mrf.mxu3  ;;  %5452 = vmatmul.bf16.gmra.mxu0 %v17191_v51  ;;  %5501 = vmatmul.bf16.gmra.mxu1 %v14954_v31 }
 0x584   : > { %v5390_v54 = vadd.f32 %v5389_v28, %v15218_v57  ;;  %v13319_v28 = vld [vmem:[#allocation6 + $0x94] sm:$0xf0] }
 0x585   : > { %v5352_v50 = vpop.f32.mrf.mxu2  ;;  %v11397_v13 = vor.u32 %v13319_v28, %v11396_v61  ;;  %v11636_v28 = vld [vmem:[#allocation6 + $0x268] sm:$0xf] }
 0x586   : > { %v15252_v23 = vadd.f32 %v5352_v50, %v5304_v40  ;;  %v6017_v47 = vmax.f32 %v5390_v54, 0.0  ;;  %v11524_v50 = vld [vmem:[#allocation6 + $0x188] sm:$0xf] }
 0x587   : > { %5628 = vmatpush.bf16.msrb.mxu0 %v11397_v13 }
 0x588   : > { %v5259_v11 = vpop.f32.mrf.mxu0  ;;  %v5308_v48 = vpop.f32.mrf.mxu1 }
 0x589   : > { %v5260_v3 = vadd.f32 %v5259_v11, %v15202_v1  ;;  %v13351_v11 = vld [vmem:[#allocation6 + $0x194] sm:$0xf0] }
 0x58a   : > { %5550 = vmatmul.bf16.gmra.mxu2 %v15031_v63 }
 0x58b   : > { %v5309_v43 = vadd.f32 %v5308_v48, %v5260_v3  ;;  %v5391_v4 = vpop.f32.mrf.mxu3  ;;  %v11525_v48 = vor.u32 %v13351_v11, %v11524_v50  ;;  %v13315_v50 = vld [vmem:[#allocation6 + $0x74] sm:$0xf0]  ;;  %v11764_v11 = vld [vmem:[#allocation6 + $0x368] sm:$0xf] }
 0x58c   : > { %v5392_v19 = vadd.f32 %v5391_v4, %v15229_v14  ;;  %v13415_v14 = vld [vmem:[#allocation6 + $0x394] sm:$0xf0] }
 0x58d   : > { %v5355_v57 = vpop.f32.mrf.mxu2  ;;  %v11781_v54 = vor.u32 %v13415_v14, %v11780_v33  ;;  %5677 = vmatpush.bf16.msrb.mxu1 %v11525_v48  ;;  %v13379_v33 = vld [vmem:[#allocation6 + $0x274] sm:$0xf0]  ;;  %v11380_v14 = vld [vmem:[#allocation6 + $0x68] sm:$0xf] }
 0x58e   : > { %v6021_v37 = vmax.f32 %v5392_v19, 0.0  ;;  %v15257_v20 = vadd.f32 %v5355_v57, %v5307_v52  ;;  %v11381_v48 = vor.u32 %v13315_v50, %v11380_v14  ;;  %v13343_v14 = vld [vmem:[#allocation6 + $0x154] sm:$0xf0] }
 0x58f   : > { %5775 = vmatpush.bf16.msrb.mxu3 %v11781_v54 }
 0x590   : > { %v15259_v16 = vpack.c.bf16 %v6021_v37, %v6017_v47  ;;  %5589 = vmatmul.bf16.gmra.mxu3 %v15113_v55  ;;  %v5262_v40 = vpop.f32.mrf.mxu0  ;;  %v5311_v39 = vpop.f32.mrf.mxu1  ;;  %5629 = vmatpush.bf16.msrb.mxu0 %v11381_v48 }
 0x591   : > { %v5263_v60 = vadd.f32 %v5262_v40, %v15202_v1 }
 0x592   : > { %17196 = vst [vmem:[#allocation13_spill] sm:$0xff] %v15259_v16 }
 0x593   : > { %v5312_v7 = vadd.f32 %v5311_v39, %v5263_v60  ;;  %v5394_v52 = vpop.f32.mrf.mxu3  ;;  %5457 = vmatmul.bf16.gmra.mxu0 %v17192_v26  ;;  %5506 = vmatmul.bf16.gmra.mxu1 %v14963_v62 }
 0x594   : > { %v5395_v3 = vadd.f32 %v5394_v52, %v15235_v53  ;;  %v11637_v52 = vor.u32 %v13379_v33, %v11636_v28 }
 0x595   : > { %v5357_v4 = vpop.f32.mrf.mxu2 }
 0x596   : > { %v15266_v19 = vadd.f32 %v5357_v4, %v5309_v43  ;;  %v6025_v61 = vmax.f32 %v5395_v3, 0.0  ;;  %5727 = vmatpush.bf16.msrb.mxu2 %v11637_v52 }
 0x598   : > { %v5264_v57 = vpop.f32.mrf.mxu0  ;;  %v5313_v37 = vpop.f32.mrf.mxu1 }
 0x599   : > { %v5265_v47 = vadd.f32 %v5264_v57, %v15202_v1  ;;  %v11508_v57 = vld [vmem:[#allocation6 + $0x168] sm:$0xf] }
 0x59a   : > { %5555 = vmatmul.bf16.gmra.mxu2 %v15041_v10 }
 0x59b   : > { %v5314_v40 = vadd.f32 %v5313_v37, %v5265_v47  ;;  %v5396_v41 = vpop.f32.mrf.mxu3  ;;  %v13347_v47 = vld [vmem:[#allocation6 + $0x174] sm:$0xf0] }
 0x59c   : > { %v5397_v36 = vadd.f32 %v5396_v41, %v15241_v18  ;;  %v13411_v18 = vld [vmem:[#allocation6 + $0x374] sm:$0xf0]  ;;  %v11509_v41 = vor.u32 %v13347_v47, %v11508_v57 }
 0x59d   : > { %v5360_v53 = vpop.f32.mrf.mxu2  ;;  %v11765_v3 = vor.u32 %v13411_v18, %v11764_v11  ;;  %v11348_v11 = vld [vmem:[#allocation6 + $0x28] sm:$0xf] }
 0x59e   : > { %v6029_v60 = vmax.f32 %v5397_v36, 0.0  ;;  %v15271_v39 = vadd.f32 %v5360_v53, %v5312_v7  ;;  %5678 = vmatpush.bf16.msrb.mxu1 %v11509_v41  ;;  %v11476_v18 = vld [vmem:[#allocation6 + $0x128] sm:$0xf] }
 0x59f   : > { %5776 = vmatpush.bf16.msrb.mxu3 %v11765_v3  ;;  %v11620_v41 = vld [vmem:[#allocation6 + $0x248] sm:$0xf] }
 0x5a0   : > { %v15273_v49 = vpack.c.bf16 %v6029_v60, %v6025_v61  ;;  %5594 = vmatmul.bf16.gmra.mxu3 %v15135_v8  ;;  %v5267_v43 = vpop.f32.mrf.mxu0  ;;  %v5316_v54 = vpop.f32.mrf.mxu1  ;;  %v11364_v61 = vld [vmem:[#allocation6 + $0x48] sm:$0xf]  ;;  %v13311_v60 = vld [vmem:[#allocation6 + $0x54] sm:$0xf0] }
 0x5a1   : > { %v5268_v13 = vadd.f32 %v5267_v43, %v15202_v1  ;;  %v11492_v43 = vld [vmem:[#allocation6 + $0x148] sm:$0xf]  ;;  %v11365_v33 = vor.u32 %v13311_v60, %v11364_v61 }
 0x5a2   : > { %v11493_v52 = vor.u32 %v13343_v14, %v11492_v43  ;;  %v13303_v14 = vld [vmem:[#allocation6 + $0x14] sm:$0xf0] }
 0x5a3   : > { %v5317_v4 = vadd.f32 %v5316_v54, %v5268_v13  ;;  %v5399_v7 = vpop.f32.mrf.mxu3  ;;  %5462 = vmatmul.bf16.gmra.mxu0 %v17193_v59  ;;  %5511 = vmatmul.bf16.gmra.mxu1 %v14979_v17 }
 0x5a4   : > { %v5400_v37 = vadd.f32 %v5399_v7, %v15245_v35  ;;  %5630 = vmatpush.bf16.msrb.mxu0 %v11365_v33  ;;  %5679 = vmatpush.bf16.msrb.mxu1 %v11493_v52  ;;  %v13339_v7 = vld [vmem:[#allocation6 + $0x134] sm:$0xf0]  ;;  %v11332_v33 = vld [vmem:[#allocation6 + $0x8] sm:$0xf] }
 0x5a5   : > { %v5362_v36 = vpop.f32.mrf.mxu2  ;;  %v11477_v47 = vor.u32 %v13339_v7, %v11476_v18  ;;  %v11748_v52 = vld [vmem:[#allocation6 + $0x348] sm:$0xf]  ;;  %v13335_v18 = vld [vmem:[#allocation6 + $0x114] sm:$0xf0] }
 0x5a6   : > { %v15280_v53 = vadd.f32 %v5362_v36, %v5314_v40  ;;  %v13307_v40 = vld [vmem:[#allocation6 + $0x34] sm:$0xf0]  ;;  %v6033_v61 = vmax.f32 %v5400_v37, 0.0 }
 0x5a7   : > { %v11349_v3 = vor.u32 %v13307_v40, %v11348_v11  ;;  %v13375_v36 = vld [vmem:[#allocation6 + $0x254] sm:$0xf0]  ;;  %v11333_v11 = vor.u32 %v13303_v14, %v11332_v33 }
 0x5a8   : > { %v5269_v28 = vpop.f32.mrf.mxu0  ;;  %v5318_v54 = vpop.f32.mrf.mxu1  ;;  %5680 = vmatpush.bf16.msrb.mxu1 %v11477_v47 }
 0x5a9   : > { %v5270_v13 = vadd.f32 %v5269_v28, %v15202_v1  ;;  %5631 = vmatpush.bf16.msrb.mxu0 %v11349_v3  ;;  %v11621_v28 = vor.u32 %v13375_v36, %v11620_v41  ;;  %v13371_v3 = vld [vmem:[#allocation6 + $0x234] sm:$0xf0] }
 0x5aa   : > { %5560 = vmatmul.bf16.gmra.mxu2 %v15049_v22 }
 0x5ab   : > { %v5319_v35 = vadd.f32 %v5318_v54, %v5270_v13  ;;  %v5401_v50 = vpop.f32.mrf.mxu3  ;;  %v11460_v13 = vld [vmem:[#allocation6 + $0x108] sm:$0xf]  ;;  %5728 = vmatpush.bf16.msrb.mxu2 %v11621_v28  ;;  %v13367_v28 = vld [vmem:[#allocation6 + $0x214] sm:$0xf0] }
 0x5ac   : > { %v5402_v48 = vadd.f32 %v5401_v50, %v15252_v23  ;;  %v13407_v50 = vld [vmem:[#allocation6 + $0x354] sm:$0xf0]  ;;  %v11461_v7 = vor.u32 %v13335_v18, %v11460_v13 }
 0x5ad   : > { %v5365_v57 = vpop.f32.mrf.mxu2  ;;  %5632 = vmatpush.bf16.msrb.mxu0 %v11333_v11 }
 0x5ae   : > { %v6037_v60 = vmax.f32 %v5402_v48, 0.0  ;;  %v15285_v43 = vadd.f32 %v5365_v57, %v5317_v4  ;;  %v11749_v4 = vor.u32 %v13407_v50, %v11748_v52  ;;  %v11604_v48 = vld [vmem:[#allocation6 + $0x228] sm:$0xf]  ;;  %5681 = vmatpush.bf16.msrb.mxu1 %v11461_v7  ;;  %v13403_v7 = vld [vmem:[#allocation6 + $0x334] sm:$0xf0] }
 0x5af   : > { %v11605_v57 = vor.u32 %v13371_v3, %v11604_v48  ;;  %v11732_v3 = vld [vmem:[#allocation6 + $0x328] sm:$0xf] }
 0x5b0   : > { %v15287_v54 = vpack.c.bf16 %v6037_v60, %v6033_v61  ;;  %5599 = vmatmul.bf16.gmra.mxu3 %v15159_v2  ;;  %v5272_v23 = vpop.f32.mrf.mxu0  ;;  %v5321_v40 = vpop.f32.mrf.mxu1  ;;  %v11588_v60 = vld [vmem:[#allocation6 + $0x208] sm:$0xf] }
 0x5b1   : > { %v5273_v37 = vadd.f32 %v5272_v23, %v15202_v1  ;;  %5777 = vmatpush.bf16.msrb.mxu3 %v11749_v4  ;;  %5729 = vmatpush.bf16.msrb.mxu2 %v11605_v57  ;;  %v11589_v14 = vor.u32 %v13367_v28, %v11588_v60 }
 0x5b2   : > { %17197 = vst [vmem:[#allocation14_spill] sm:$0xff] %v15287_v54 }
 0x5b3   : > { %v5322_v47 = vadd.f32 %v5321_v40, %v5273_v37  ;;  %v5404_v41 = vpop.f32.mrf.mxu3  ;;  %5467 = vmatmul.bf16.gmra.mxu0 %v17194_v58  ;;  %5516 = vmatmul.bf16.gmra.mxu1 %v14987_v15 }
 0x5b4   : > { %v5405_v36 = vadd.f32 %v5404_v41, %v15257_v20 }
 0x5b5   : > { %v5367_v61 = vpop.f32.mrf.mxu2  ;;  %5730 = vmatpush.bf16.msrb.mxu2 %v11589_v14 }
 0x5b6   : > { %v15294_v33 = vadd.f32 %v5367_v61, %v5319_v35  ;;  %v6041_v40 = vmax.f32 %v5405_v36, 0.0  ;;  %v11733_v61 = vor.u32 %v13403_v7, %v11732_v3  ;;  %v11716_v3 = vld [vmem:[#allocation6 + $0x308] sm:$0xf]  ;;  %v13399_v7 = vld [vmem:[#allocation6 + $0x314] sm:$0xf0] }
 0x5b8   : > { %v5274_v23 = vpop.f32.mrf.mxu0  ;;  %v5323_v52 = vpop.f32.mrf.mxu1  ;;  %5778 = vmatpush.bf16.msrb.mxu3 %v11733_v61  ;;  %v11717_v61 = vor.u32 %v13399_v7, %v11716_v3  ;;  %v13393_v3 = vld [vmem:[#allocation6 + $0x2ec] sm:$0xf]  ;;  %v11702_v7 = vld [vmem:[#allocation6 + $0x2f8] sm:$0xf0] }
 0x5b9   : > { %v5275_v13 = vadd.f32 %v5274_v23, %v15202_v1 }
 0x5ba   : > { %5565 = vmatmul.bf16.gmra.mxu2 %v15059_v0 }
 0x5bb   : > { %v5324_v50 = vadd.f32 %v5323_v52, %v5275_v13  ;;  %v5406_v11 = vpop.f32.mrf.mxu3 }
 0x5bc   : > { %v5407_v20 = vadd.f32 %v5406_v11, %v15266_v19  ;;  %5779 = vmatpush.bf16.msrb.mxu3 %v11717_v61 }
 0x5bd   : > { %v5370_v37 = vpop.f32.mrf.mxu2 }
 0x5be   : > { %v6045_v4 = vmax.f32 %v5407_v20, 0.0  ;;  %v15299_v18 = vadd.f32 %v5370_v37, %v5322_v47 }
 0x5c0   : > { %v15301_v48 = vpack.c.bf16 %v6045_v4, %v6041_v40  ;;  %5604 = vmatmul.bf16.gmra.mxu3 %v15177_v38  ;;  %v5277_v35 = vpop.f32.mrf.mxu0  ;;  %v5326_v41 = vpop.f32.mrf.mxu1  ;;  %v15314_v40 = vperm.slane %v15197_v21, 1 }
 0x5c1   : > { %v5278_v57 = vadd.f32 %v5277_v35, %v15202_v1 }
 0x5c2   : > { %17198 = vst [vmem:[#allocation16_spill] sm:$0xff] %v15301_v48  ;;  %v11622_v48 = vld [vmem:[#allocation6 + $0x258] sm:$0xf0] }
 0x5c3   : > { %v5327_v60 = vadd.f32 %v5326_v41, %v5278_v57  ;;  %v5409_v28 = vpop.f32.mrf.mxu3  ;;  %5472 = vmatmul.bf16.gmra.mxu0 %v17195_v32  ;;  %5521 = vmatmul.bf16.gmra.mxu1 %v14995_v29 }
 0x5c4   : > { %v5410_v19 = vadd.f32 %v5409_v28, %v15271_v39 }
 0x5c5   : > { %v5372_v47 = vpop.f32.mrf.mxu2 }
 0x5c6   : > { %v15308_v36 = vadd.f32 %v5372_v47, %v5324_v50  ;;  %v6049_v39 = vmax.f32 %v5410_v19, 0.0 }
 0x5c8   : > { %v5279_v14 = vpop.f32.mrf.mxu0  ;;  %v5328_v13 = vpop.f32.mrf.mxu1 }
 0x5c9   : > { %v5280_v23 = vadd.f32 %v5279_v14, %v15202_v1 }
 0x5ca   : > { %5570 = vmatmul.bf16.gmra.mxu2 %v15076_v46 }
 0x5cb   : > { %v5329_v52 = vadd.f32 %v5328_v13, %v5280_v23  ;;  %v5411_v11 = vpop.f32.mrf.mxu3 }
 0x5cc   : > { %v5412_v20 = vadd.f32 %v5411_v11, %v15280_v53 }
 0x5cd   : > { %v5375_v37 = vpop.f32.mrf.mxu2 }
 0x5ce   : > { %v6053_v4 = vmax.f32 %v5412_v20, 0.0  ;;  %v15316_v35 = vadd.f32 %v5375_v37, %v5327_v60 }
 0x5d0   : > { %v15318_v50 = vpack.c.bf16 %v6053_v4, %v6049_v39  ;;  %5609 = vmatmul.bf16.gmra.mxu3 %v15204_v56  ;;  %v5438_v1 = vpop.f32.mrf.mxu0  ;;  %v5487_v41 = vpop.f32.mrf.mxu1 }
 0x5d1   : > { %v5439_v57 = vadd.f32 %v5438_v1, %v15314_v40 }
 0x5d2   : > { %17199 = vst [vmem:[#allocation15_spill] sm:$0xff] %v15318_v50 }
 0x5d3   : > { %v5488_v53 = vadd.f32 %v5487_v41, %v5439_v57  ;;  %v5414_v28 = vpop.f32.mrf.mxu3  ;;  %5633 = vmatmul.bf16.vlgmr.msrb.gmra.mxu0 %v14858_v27  ;;  %5682 = vmatmul.bf16.vlgmr.msrb.gmra.mxu1 %v14928_v45  ;;  %v13329_v57 = vld [vmem:[#allocation6 + $0xec] sm:$0xf] }
 0x5d4   : > { %v5415_v21 = vadd.f32 %v5414_v28, %v15285_v43  ;;  %v11705_v28 = vor.u32 %v13393_v3, %v11702_v7 }
 0x5d5   : > { %v5377_v60 = vpop.f32.mrf.mxu2 }
 0x5d6   : > { %v15325_v19 = vadd.f32 %v5377_v60, %v5329_v52  ;;  %v6057_v39 = vmax.f32 %v5415_v21, 0.0  ;;  %v11446_v60 = vld [vmem:[#allocation6 + $0xf8] sm:$0xf0]  ;;  %5919 = vmatpush.bf16.msra.mxu2 %v11705_v28 }
 0x5d8   : > { %v5440_v47 = vpop.f32.mrf.mxu0  ;;  %v5489_v23 = vpop.f32.mrf.mxu1 }
 0x5d9   : > { %v5441_v14 = vadd.f32 %v5440_v47, %v15314_v40  ;;  %v13425_v47 = vld [vmem:[#allocation6 + $0x3ec] sm:$0xf] }
 0x5da   : > { %5731 = vmatmul.bf16.vlgmr.msrb.gmra.mxu2 %v15003_v5 }
 0x5db   : > { %v5490_v13 = vadd.f32 %v5489_v23, %v5441_v14  ;;  %v5416_v11 = vpop.f32.mrf.mxu3  ;;  %v11449_v14 = vor.u32 %v13329_v57, %v11446_v60 }
 0x5dc   : > { %v5417_v20 = vadd.f32 %v5416_v11, %v15294_v33  ;;  %v11830_v33 = vld [vmem:[#allocation6 + $0x3f8] sm:$0xf0]  ;;  %v13361_v11 = vld [vmem:[#allocation6 + $0x1ec] sm:$0xf] }
 0x5dd   : > { %v5536_v37 = vpop.f32.mrf.mxu2  ;;  %v11833_v21 = vor.u32 %v13425_v47, %v11830_v33  ;;  %5821 = vmatpush.bf16.msra.mxu0 %v11449_v14 }
 0x5de   : > { %v6061_v4 = vmax.f32 %v5417_v20, 0.0  ;;  %v15330_v1 = vadd.f32 %v5536_v37, %v5488_v53  ;;  %v11574_v20 = vld [vmem:[#allocation6 + $0x1f8] sm:$0xf0] }
 0x5df   : > { %5968 = vmatpush.bf16.msra.mxu3 %v11833_v21  ;;  %v13389_v21 = vld [vmem:[#allocation6 + $0x2cc] sm:$0xf] }
 0x5e0   : > { %v15332_v43 = vpack.c.bf16 %v6061_v4, %v6057_v39  ;;  %5614 = vmatmul.bf16.gmra.mxu3 %v15216_v12  ;;  %v5443_v52 = vpop.f32.mrf.mxu0  ;;  %v5492_v61 = vpop.f32.mrf.mxu1  ;;  %v11577_v39 = vor.u32 %v13361_v11, %v11574_v20  ;;  %v13325_v11 = vld [vmem:[#allocation6 + $0xcc] sm:$0xf] }
 0x5e1   : > { %v5444_v41 = vadd.f32 %v5443_v52, %v15314_v40 }
 0x5e2   : > { %17200 = vst [vmem:[#allocation17_spill] sm:$0xff] %v15332_v43  ;;  %5870 = vmatpush.bf16.msra.mxu1 %v11577_v39 }
 0x5e3   : > { %v5493_v23 = vadd.f32 %v5492_v61, %v5444_v41  ;;  %v5419_v53 = vpop.f32.mrf.mxu3  ;;  %5638 = vmatmul.bf16.gmra.mxu0 %v14866_v44  ;;  %5687 = vmatmul.bf16.gmra.mxu1 %v14936_v34 }
 0x5e4   : > { %v5420_v37 = vadd.f32 %v5419_v53, %v15299_v18  ;;  %v11686_v53 = vld [vmem:[#allocation6 + $0x2d8] sm:$0xf0] }
 0x5e5   : > { %v5538_v4 = vpop.f32.mrf.mxu2 }
 0x5e6   : > { %v15339_v52 = vadd.f32 %v5538_v4, %v5490_v13  ;;  %v6065_v60 = vmax.f32 %v5420_v37, 0.0  ;;  %v11689_v4 = vor.u32 %v13389_v21, %v11686_v53 }
 0x5e8   : > { %v5445_v3 = vpop.f32.mrf.mxu0  ;;  %v5494_v57 = vpop.f32.mrf.mxu1  ;;  %5920 = vmatpush.bf16.msra.mxu2 %v11689_v4 }
 0x5e9   : > { %v5446_v7 = vadd.f32 %v5445_v3, %v15314_v40  ;;  %v11430_v3 = vld [vmem:[#allocation6 + $0xd8] sm:$0xf0] }
 0x5ea   : > { %5736 = vmatmul.bf16.gmra.mxu2 %v15011_v25 }
 0x5eb   : > { %v5495_v41 = vadd.f32 %v5494_v57, %v5446_v7  ;;  %v5421_v61 = vpop.f32.mrf.mxu3  ;;  %v13421_v7 = vld [vmem:[#allocation6 + $0x3cc] sm:$0xf]  ;;  %v11433_v57 = vor.u32 %v13325_v11, %v11430_v3 }
 0x5ec   : > { %v5422_v28 = vadd.f32 %v5421_v61, %v15308_v36  ;;  %v11814_v36 = vld [vmem:[#allocation6 + $0x3d8] sm:$0xf0] }
 0x5ed   : > { %v5541_v18 = vpop.f32.mrf.mxu2  ;;  %v11817_v37 = vor.u32 %v13421_v7, %v11814_v36  ;;  %5822 = vmatpush.bf16.msra.mxu0 %v11433_v57 }
 0x5ee   : > { %v6069_v47 = vmax.f32 %v5422_v28, 0.0  ;;  %v15344_v33 = vadd.f32 %v5541_v18, %v5493_v23  ;;  %v13357_v28 = vld [vmem:[#allocation6 + $0x1cc] sm:$0xf]  ;;  %v11558_v18 = vld [vmem:[#allocation6 + $0x1d8] sm:$0xf0] }
 0x5ef   : > { %5969 = vmatpush.bf16.msra.mxu3 %v11817_v37  ;;  %v13385_v37 = vld [vmem:[#allocation6 + $0x2ac] sm:$0xf] }
 0x5f0   : > { %v15346_v14 = vpack.c.bf16 %v6069_v47, %v6065_v60  ;;  %5619 = vmatmul.bf16.gmra.mxu3 %v15233_v30  ;;  %v5448_v13 = vpop.f32.mrf.mxu0  ;;  %v5497_v39 = vpop.f32.mrf.mxu1  ;;  %v11561_v47 = vor.u32 %v13357_v28, %v11558_v18  ;;  %v11670_v28 = vld [vmem:[#allocation6 + $0x2b8] sm:$0xf0]  ;;  %v13321_v18 = vld [vmem:[#allocation6 + $0xac] sm:$0xf] }
 0x5f1   : > { %v5449_v20 = vadd.f32 %v5448_v13, %v15314_v40 }
 0x5f2   : > { %17201 = vst [vmem:[#allocation18_spill] sm:$0xff] %v15346_v14  ;;  %5871 = vmatpush.bf16.msra.mxu1 %v11561_v47 }
 0x5f3   : > { %v5498_v61 = vadd.f32 %v5497_v39, %v5449_v20  ;;  %v5424_v23 = vpop.f32.mrf.mxu3  ;;  %5643 = vmatmul.bf16.gmra.mxu0 %v14874_v9  ;;  %5692 = vmatmul.bf16.gmra.mxu1 %v14944_v42 }
 0x5f4   : > { %v5425_v60 = vadd.f32 %v5424_v23, %v15316_v35 }
 0x5f5   : > { %v5543_v13 = vpop.f32.mrf.mxu2 }
 0x5f6   : > { %v15353_v21 = vadd.f32 %v5543_v13, %v5495_v41  ;;  %v6073_v7 = vmax.f32 %v5425_v60, 0.0 }
 0x5f8   : > { %v5450_v53 = vpop.f32.mrf.mxu0  ;;  %v5499_v20 = vpop.f32.mrf.mxu1 }
 0x5f9   : > { %v5451_v11 = vadd.f32 %v5450_v53, %v15314_v40  ;;  %v11673_v53 = vor.u32 %v13385_v37, %v11670_v28 }
 0x5fa   : > { %5741 = vmatmul.bf16.gmra.mxu2 %v15019_v24 }
 0x5fb   : > { %v5500_v39 = vadd.f32 %v5499_v20, %v5451_v11  ;;  %v5426_v4 = vpop.f32.mrf.mxu3  ;;  %v11414_v11 = vld [vmem:[#allocation6 + $0xb8] sm:$0xf0]  ;;  %v13417_v20 = vld [vmem:[#allocation6 + $0x3ac] sm:$0xf]  ;;  %5921 = vmatpush.bf16.msra.mxu2 %v11673_v53 }
 0x5fc   : > { %v5427_v3 = vadd.f32 %v5426_v4, %v15325_v19  ;;  %v11798_v19 = vld [vmem:[#allocation6 + $0x3b8] sm:$0xf0]  ;;  %v11417_v4 = vor.u32 %v13321_v18, %v11414_v11 }
 0x5fd   : > { %v5546_v35 = vpop.f32.mrf.mxu2  ;;  %v11801_v60 = vor.u32 %v13417_v20, %v11798_v19 }
 0x5fe   : > { %v6077_v36 = vmax.f32 %v5427_v3, 0.0  ;;  %v15358_v57 = vadd.f32 %v5546_v35, %v5498_v61  ;;  %v13353_v35 = vld [vmem:[#allocation6 + $0x1ac] sm:$0xf]  ;;  %5823 = vmatpush.bf16.msra.mxu0 %v11417_v4 }
 0x5ff   : > { %5970 = vmatpush.bf16.msra.mxu3 %v11801_v60  ;;  %v11654_v60 = vld [vmem:[#allocation6 + $0x298] sm:$0xf0] }
 0x600   : > { %v15360_v23 = vpack.c.bf16 %v6077_v36, %v6073_v7  ;;  %5780 = vmatmul.bf16.vlgmr.msrb.gmra.mxu3 %v15093_v6  ;;  %v5453_v41 = vpop.f32.mrf.mxu0  ;;  %v5502_v13 = vpop.f32.mrf.mxu1  ;;  %v11542_v7 = vld [vmem:[#allocation6 + $0x1b8] sm:$0xf0] }
 0x601   : > { %v5454_v47 = vadd.f32 %v5453_v41, %v15314_v40  ;;  %v11545_v41 = vor.u32 %v13353_v35, %v11542_v7  ;;  %v13317_v35 = vld [vmem:[#allocation6 + $0x8c] sm:$0xf] }
 0x602   : > { %17202 = vst [vmem:[#allocation19_spill] sm:$0xff] %v15360_v23 }
 0x603   : > { %v5503_v3 = vadd.f32 %v5502_v13, %v5454_v47  ;;  %v5585_v61 = vpop.f32.mrf.mxu3  ;;  %5648 = vmatmul.bf16.gmra.mxu0 %v17191_v51  ;;  %5697 = vmatmul.bf16.gmra.mxu1 %v14954_v31 }
 0x604   : > { %v5586_v36 = vadd.f32 %v5585_v61, %v15330_v1  ;;  %5872 = vmatpush.bf16.msra.mxu1 %v11545_v41 }
 0x605   : > { %v5548_v23 = vpop.f32.mrf.mxu2 }
 0x606   : > { %v15367_v37 = vadd.f32 %v5548_v23, %v5500_v39  ;;  %v6018_v20 = vmax.f32 %v5586_v36, 0.0  ;;  %v13381_v23 = vld [vmem:[#allocation6 + $0x28c] sm:$0xf] }
 0x608   : > { %v5455_v28 = vpop.f32.mrf.mxu0  ;;  %v5504_v47 = vpop.f32.mrf.mxu1 }
 0x609   : > { %v5456_v18 = vadd.f32 %v5455_v28, %v15314_v40  ;;  %v11657_v28 = vor.u32 %v13381_v23, %v11654_v60 }
 0x60a   : > { %5746 = vmatmul.bf16.gmra.mxu2 %v15031_v63 }
 0x60b   : > { %v5505_v13 = vadd.f32 %v5504_v47, %v5456_v18  ;;  %v5587_v53 = vpop.f32.mrf.mxu3  ;;  %v11398_v18 = vld [vmem:[#allocation6 + $0x98] sm:$0xf0]  ;;  %v13413_v47 = vld [vmem:[#allocation6 + $0x38c] sm:$0xf]  ;;  %5922 = vmatpush.bf16.msra.mxu2 %v11657_v28 }
 0x60c   : > { %v5588_v11 = vadd.f32 %v5587_v53, %v15339_v52  ;;  %v11782_v52 = vld [vmem:[#allocation6 + $0x398] sm:$0xf0]  ;;  %v11401_v53 = vor.u32 %v13317_v35, %v11398_v18 }
 0x60d   : > { %v5551_v1 = vpop.f32.mrf.mxu2  ;;  %v11785_v36 = vor.u32 %v13413_v47, %v11782_v52 }
 0x60e   : > { %v6022_v19 = vmax.f32 %v5588_v11, 0.0  ;;  %v15372_v4 = vadd.f32 %v5551_v1, %v5503_v3  ;;  %v13349_v1 = vld [vmem:[#allocation6 + $0x18c] sm:$0xf]  ;;  %5824 = vmatpush.bf16.msra.mxu0 %v11401_v53 }
 0x60f   : > { %5971 = vmatpush.bf16.msra.mxu3 %v11785_v36  ;;  %v11638_v36 = vld [vmem:[#allocation6 + $0x278] sm:$0xf0] }
 0x610   : > { %v15374_v61 = vpack.c.bf16 %v6022_v19, %v6018_v20  ;;  %5785 = vmatmul.bf16.gmra.mxu3 %v15113_v55  ;;  %v5458_v39 = vpop.f32.mrf.mxu0  ;;  %v5507_v41 = vpop.f32.mrf.mxu1  ;;  %v11526_v20 = vld [vmem:[#allocation6 + $0x198] sm:$0xf0] }
 0x611   : > { %v5459_v7 = vadd.f32 %v5458_v39, %v15314_v40  ;;  %v11529_v39 = vor.u32 %v13349_v1, %v11526_v20  ;;  %v13313_v1 = vld [vmem:[#allocation6 + $0x6c] sm:$0xf] }
 0x612   : > { %17203 = vst [vmem:[#allocation20_spill] sm:$0xff] %v15374_v61 }
 0x613   : > { %v5508_v11 = vadd.f32 %v5507_v41, %v5459_v7  ;;  %v5590_v3 = vpop.f32.mrf.mxu3  ;;  %5653 = vmatmul.bf16.gmra.mxu0 %v17192_v26  ;;  %5702 = vmatmul.bf16.gmra.mxu1 %v14963_v62 }
 0x614   : > { %v5591_v19 = vadd.f32 %v5590_v3, %v15344_v33  ;;  %5873 = vmatpush.bf16.msra.mxu1 %v11529_v39 }
 0x615   : > { %v5553_v14 = vpop.f32.mrf.mxu2 }
 0x616   : > { %v15381_v23 = vadd.f32 %v5553_v14, %v5505_v13  ;;  %v6026_v47 = vmax.f32 %v5591_v19, 0.0  ;;  %v13377_v13 = vld [vmem:[#allocation6 + $0x26c] sm:$0xf] }
 0x618   : > { %v5460_v60 = vpop.f32.mrf.mxu0  ;;  %v5509_v7 = vpop.f32.mrf.mxu1 }
 0x619   : > { %v5461_v35 = vadd.f32 %v5460_v60, %v15314_v40  ;;  %v11641_v60 = vor.u32 %v13377_v13, %v11638_v36  ;;  %v13309_v36 = vld [vmem:[#allocation6 + $0x4c] sm:$0xf] }
 0x61a   : > { %5751 = vmatmul.bf16.gmra.mxu2 %v15041_v10 }
 0x61b   : > { %v5510_v41 = vadd.f32 %v5509_v7, %v5461_v35  ;;  %v5592_v28 = vpop.f32.mrf.mxu3  ;;  %v11382_v35 = vld [vmem:[#allocation6 + $0x78] sm:$0xf0]  ;;  %v13409_v7 = vld [vmem:[#allocation6 + $0x36c] sm:$0xf]  ;;  %5923 = vmatpush.bf16.msra.mxu2 %v11641_v60 }
 0x61c   : > { %v5593_v18 = vadd.f32 %v5592_v28, %v15353_v21  ;;  %v11766_v21 = vld [vmem:[#allocation6 + $0x378] sm:$0xf0]  ;;  %v11385_v28 = vor.u32 %v13313_v1, %v11382_v35 }
 0x61d   : > { %v5556_v33 = vpop.f32.mrf.mxu2  ;;  %v11769_v19 = vor.u32 %v13409_v7, %v11766_v21  ;;  %v11366_v1 = vld [vmem:[#allocation6 + $0x58] sm:$0xf0] }
 0x61e   : > { %v6030_v52 = vmax.f32 %v5593_v18, 0.0  ;;  %v15386_v53 = vadd.f32 %v5556_v33, %v5508_v11  ;;  %v13345_v33 = vld [vmem:[#allocation6 + $0x16c] sm:$0xf]  ;;  %5825 = vmatpush.bf16.msra.mxu0 %v11385_v28  ;;  %v11369_v35 = vor.u32 %v13309_v36, %v11366_v1  ;;  %v11494_v7 = vld [vmem:[#allocation6 + $0x158] sm:$0xf0] }
 0x61f   : > { %5972 = vmatpush.bf16.msra.mxu3 %v11769_v19  ;;  %v13305_v19 = vld [vmem:[#allocation6 + $0x2c] sm:$0xf] }
 0x620   : > { %v15388_v3 = vpack.c.bf16 %v6030_v52, %v6026_v47  ;;  %5790 = vmatmul.bf16.gmra.mxu3 %v15135_v8  ;;  %v5463_v14 = vpop.f32.mrf.mxu0  ;;  %v5512_v39 = vpop.f32.mrf.mxu1  ;;  %v11510_v47 = vld [vmem:[#allocation6 + $0x178] sm:$0xf0]  ;;  %v13373_v1 = vld [vmem:[#allocation6 + $0x24c] sm:$0xf] }
 0x621   : > { %v5464_v20 = vadd.f32 %v5463_v14, %v15314_v40  ;;  %v11513_v14 = vor.u32 %v13345_v33, %v11510_v47  ;;  %v11478_v47 = vld [vmem:[#allocation6 + $0x138] sm:$0xf0] }
 0x622   : > { %5826 = vmatpush.bf16.msra.mxu0 %v11369_v35  ;;  %v11625_v35 = vor.u32 %v13373_v1, %v11622_v48  ;;  %v11606_v48 = vld [vmem:[#allocation6 + $0x238] sm:$0xf0] }
 0x623   : > { %v5513_v18 = vadd.f32 %v5512_v39, %v5464_v20  ;;  %v5595_v11 = vpop.f32.mrf.mxu3  ;;  %5658 = vmatmul.bf16.gmra.mxu0 %v17193_v59  ;;  %5707 = vmatmul.bf16.gmra.mxu1 %v14979_v17  ;;  %v13341_v20 = vld [vmem:[#allocation6 + $0x14c] sm:$0xf] }
 0x624   : > { %v5596_v52 = vadd.f32 %v5595_v11, %v15358_v57  ;;  %5874 = vmatpush.bf16.msra.mxu1 %v11513_v14  ;;  %v11497_v50 = vor.u32 %v13341_v20, %v11494_v7  ;;  %v13301_v7 = vld [vmem:[#allocation6 + $0xc] sm:$0xf]  ;;  %5924 = vmatpush.bf16.msra.mxu2 %v11625_v35 }
 0x625   : > { %v5558_v43 = vpop.f32.mrf.mxu2  ;;  %v13365_v35 = vld [vmem:[#allocation6 + $0x20c] sm:$0xf] }
 0x626   : > { %v15395_v13 = vadd.f32 %v5558_v43, %v5510_v41  ;;  %v11350_v43 = vld [vmem:[#allocation6 + $0x38] sm:$0xf0]  ;;  %v13337_v41 = vld [vmem:[#allocation6 + $0x12c] sm:$0xf] }
 0x627   : > { %v11353_v33 = vor.u32 %v13305_v19, %v11350_v43  ;;  %v11481_v36 = vor.u32 %v13337_v41, %v11478_v47  ;;  %v11750_v19 = vld [vmem:[#allocation6 + $0x358] sm:$0xf0] }
 0x628   : > { %v5465_v39 = vpop.f32.mrf.mxu0  ;;  %v5514_v21 = vpop.f32.mrf.mxu1  ;;  %5875 = vmatpush.bf16.msra.mxu1 %v11497_v50  ;;  %v11334_v50 = vld [vmem:[#allocation6 + $0x18] sm:$0xf0] }
 0x629   : > { %v5466_v60 = vadd.f32 %v5465_v39, %v15314_v40  ;;  %v6034_v39 = vmax.f32 %v5596_v52, 0.0  ;;  %5827 = vmatpush.bf16.msra.mxu0 %v11353_v33  ;;  %v11337_v43 = vor.u32 %v13301_v7, %v11334_v50  ;;  %v13369_v33 = vld [vmem:[#allocation6 + $0x22c] sm:$0xf]  ;;  %v11590_v7 = vld [vmem:[#allocation6 + $0x218] sm:$0xf0] }
 0x62a   : > { %5756 = vmatmul.bf16.gmra.mxu2 %v15049_v22 }
 0x62b   : > { %v5515_v57 = vadd.f32 %v5514_v21, %v5466_v60  ;;  %v5597_v28 = vpop.f32.mrf.mxu3  ;;  %v13333_v60 = vld [vmem:[#allocation6 + $0x10c] sm:$0xf] }
 0x62c   : > { %v5598_v11 = vadd.f32 %v5597_v28, %v15367_v37  ;;  %5876 = vmatpush.bf16.msra.mxu1 %v11481_v36  ;;  %v13405_v28 = vld [vmem:[#allocation6 + $0x34c] sm:$0xf] }
 0x62d   : > { %v5561_v14 = vpop.f32.mrf.mxu2  ;;  %5828 = vmatpush.bf16.msra.mxu0 %v11337_v43 }
 0x62e   : > { %v6038_v54 = vmax.f32 %v5598_v11, 0.0  ;;  %v15400_v20 = vadd.f32 %v5561_v14, %v5513_v18  ;;  %v11753_v18 = vor.u32 %v13405_v28, %v11750_v19  ;;  %v11462_v11 = vld [vmem:[#allocation6 + $0x118] sm:$0xf0]  ;;  %v11609_v14 = vor.u32 %v13369_v33, %v11606_v48 }
 0x62f   : > { %v11465_v47 = vor.u32 %v13333_v60, %v11462_v11 }
 0x630   : > { %v15402_v21 = vpack.c.bf16 %v6038_v54, %v6034_v39  ;;  %5795 = vmatmul.bf16.gmra.mxu3 %v15159_v2  ;;  %v5468_v37 = vpop.f32.mrf.mxu0  ;;  %v5517_v41 = vpop.f32.mrf.mxu1  ;;  %5925 = vmatpush.bf16.msra.mxu2 %v11609_v14  ;;  %v11734_v14 = vld [vmem:[#allocation6 + $0x338] sm:$0xf0] }
 0x631   : > { %v5469_v52 = vadd.f32 %v5468_v37, %v15314_v40  ;;  %5973 = vmatpush.bf16.msra.mxu3 %v11753_v18  ;;  %5877 = vmatpush.bf16.msra.mxu1 %v11465_v47  ;;  %v11593_v37 = vor.u32 %v13365_v35, %v11590_v7  ;;  %v13401_v47 = vld [vmem:[#allocation6 + $0x32c] sm:$0xf] }
 0x632   : > { %v11737_v35 = vor.u32 %v13401_v47, %v11734_v14 }
 0x633   : > { %v5518_v36 = vadd.f32 %v5517_v41, %v5469_v52  ;;  %v5600_v54 = vpop.f32.mrf.mxu3  ;;  %5663 = vmatmul.bf16.gmra.mxu0 %v17194_v58  ;;  %5712 = vmatmul.bf16.gmra.mxu1 %v14987_v15 }
 0x634   : > { %v5601_v1 = vadd.f32 %v5600_v54, %v15372_v4  ;;  %5926 = vmatpush.bf16.msra.mxu2 %v11593_v37 }
 0x635   : > { %v5563_v39 = vpop.f32.mrf.mxu2  ;;  %5974 = vmatpush.bf16.msra.mxu3 %v11737_v35 }
 0x636   : > { %v15409_v50 = vadd.f32 %v5563_v39, %v5515_v57  ;;  %v6042_v18 = vmax.f32 %v5601_v1, 0.0 }
 0x638   : > { %v5470_v28 = vpop.f32.mrf.mxu0  ;;  %v5519_v19 = vpop.f32.mrf.mxu1 }
 0x639   : > { %v5471_v60 = vadd.f32 %v5470_v28, %v15314_v40 }
 0x63a   : > { %5761 = vmatmul.bf16.gmra.mxu2 %v15059_v0 }
 0x63b   : > { %v5520_v43 = vadd.f32 %v5519_v19, %v5471_v60  ;;  %v5602_v52 = vpop.f32.mrf.mxu3 }
 0x63c   : > { %v5603_v4 = vadd.f32 %v5602_v52, %v15381_v23 }
 0x63d   : > { %v5566_v41 = vpop.f32.mrf.mxu2 }
 0x63e   : > { %v6046_v11 = vmax.f32 %v5603_v4, 0.0  ;;  %v15414_v33 = vadd.f32 %v5566_v41, %v5518_v36 }
 0x640   : > { %v15416_v48 = vpack.c.bf16 %v6046_v11, %v6042_v18  ;;  %5800 = vmatmul.bf16.gmra.mxu3 %v15177_v38  ;;  %v5473_v57 = vpop.f32.mrf.mxu0  ;;  %v5522_v39 = vpop.f32.mrf.mxu1  ;;  %v15429_v11 = vld [vmem:[%s17107_s8] sm:$0xf] }
 0x641   : > { %v5474_v54 = vadd.f32 %v5473_v57, %v15314_v40 }
 0x643   : > { %v5523_v7 = vadd.f32 %v5522_v39, %v5474_v54  ;;  %v5605_v37 = vpop.f32.mrf.mxu3  ;;  %5668 = vmatmul.bf16.gmra.mxu0 %v17195_v32  ;;  %5717 = vmatmul.bf16.gmra.mxu1 %v14995_v29  ;;  %v13397_v54 = vld [vmem:[#allocation6 + $0x30c] sm:$0xf] }
 0x644   : > { %v5606_v23 = vadd.f32 %v5605_v37, %v15386_v53  ;;  %v15432_v53 = vperm.slane %v15429_v11, 2 }
 0x645   : > { %v5568_v36 = vpop.f32.mrf.mxu2 }
 0x646   : > { %v5569_v1 = vadd.f32 %v5568_v36, %v5520_v43  ;;  %v6050_v43 = vmax.f32 %v5606_v23, 0.0 }
 0x648   : > { %v5475_v28 = vpop.f32.mrf.mxu0  ;;  %v5524_v19 = vpop.f32.mrf.mxu1 }
 0x649   : > { %v5476_v60 = vadd.f32 %v5475_v28, %v15314_v40 }
 0x64a   : > { %5766 = vmatmul.bf16.gmra.mxu2 %v15076_v46 }
 0x64b   : > { %v5525_v52 = vadd.f32 %v5524_v19, %v5476_v60  ;;  %v5607_v4 = vpop.f32.mrf.mxu3 }
 0x64c   : > { %v5608_v41 = vadd.f32 %v5607_v4, %v15395_v13  ;;  %v11718_v13 = vld [vmem:[#allocation6 + $0x318] sm:$0xf0] }
 0x64d   : > { %v5571_v18 = vpop.f32.mrf.mxu2  ;;  %v11721_v37 = vor.u32 %v13397_v54, %v11718_v13 }
 0x64e   : > { %v6054_v57 = vmax.f32 %v5608_v41, 0.0  ;;  %v15434_v47 = vadd.f32 %v5571_v18, %v5523_v7 }
 0x64f   : > { %5975 = vmatpush.bf16.msra.mxu3 %v11721_v37 }
 0x650   : > { %v15436_v40 = vpack.c.bf16 %v6054_v57, %v6050_v43  ;;  %5805 = vmatmul.bf16.gmra.mxu3 %v15204_v56  ;;  %v5634_v14 = vpop.f32.mrf.mxu0  ;;  %v5683_v35 = vpop.f32.mrf.mxu1 }
 0x651   : > { %v5635_v39 = vadd.f32 %v5634_v14, %v15432_v53 }
 0x653   : > { %v5684_v36 = vadd.f32 %v5683_v35, %v5635_v39  ;;  %v5610_v28 = vpop.f32.mrf.mxu3  ;;  %5829 = vmatmul.bf16.vlgmr.msra.gmra.mxu0 %v14858_v27  ;;  %5878 = vmatmul.bf16.vlgmr.msra.gmra.mxu1 %v14928_v45 }
 0x654   : > { %v5611_v23 = vadd.f32 %v5610_v28, %v15400_v20 }
 0x655   : > { %v5573_v7 = vpop.f32.mrf.mxu2 }
 0x656   : > { %v15443_v60 = vadd.f32 %v5573_v7, %v5525_v52  ;;  %v6058_v27 = vmax.f32 %v5611_v23, 0.0 }
 0x658   : > { %v5636_v19 = vpop.f32.mrf.mxu0  ;;  %v5685_v41 = vpop.f32.mrf.mxu1 }
 0x659   : > { %v5637_v4 = vadd.f32 %v5636_v19, %v15432_v53 }
 0x65a   : > { %5927 = vmatmul.bf16.vlgmr.msra.gmra.mxu2 %v15003_v5 }
 0x65b   : > { %v5686_v18 = vadd.f32 %v5685_v41, %v5637_v4  ;;  %v5612_v43 = vpop.f32.mrf.mxu3 }
 0x65c   : > { %v5613_v57 = vadd.f32 %v5612_v43, %v15409_v50 }
 0x65d   : > { %v5732_v14 = vpop.f32.mrf.mxu2 }
 0x65e   : > { %v6062_v54 = vmax.f32 %v5613_v57, 0.0  ;;  %v15448_v13 = vadd.f32 %v5732_v14, %v5684_v36 }
 0x660   : > { %v15450_v20 = vpack.c.bf16 %v6062_v54, %v6058_v27  ;;  %5810 = vmatmul.bf16.gmra.mxu3 %v15216_v12  ;;  %v5639_v45 = vpop.f32.mrf.mxu0  ;;  %v5688_v39 = vpop.f32.mrf.mxu1  ;;  %v13522_v27 = vld [vmem:[#allocation7 + $0x2ec] sm:$0xf0] }
 0x661   : > { %v5640_v52 = vadd.f32 %v5639_v45, %v15432_v53 }
 0x663   : > { %v5689_v35 = vadd.f32 %v5688_v39, %v5640_v52  ;;  %v5615_v37 = vpop.f32.mrf.mxu3  ;;  %5834 = vmatmul.bf16.gmra.mxu0 %v14866_v44  ;;  %5883 = vmatmul.bf16.gmra.mxu1 %v14936_v34 }
 0x664   : > { %v5616_v5 = vadd.f32 %v5615_v37, %v15414_v33  ;;  %v13458_v37 = vld [vmem:[#allocation7 + $0xec] sm:$0xf0] }
 0x665   : > { %v5734_v50 = vpop.f32.mrf.mxu2 }
 0x666   : > { %v15457_v28 = vadd.f32 %v5734_v50, %v5686_v18  ;;  %v6066_v57 = vmax.f32 %v5616_v5, 0.0  ;;  %v12204_v18 = vld [vmem:[#allocation7 + $0x2e0] sm:$0xf] }
 0x667   : > { %v12205_v52 = vor.u32 %v13522_v27, %v12204_v18 }
 0x668   : > { %v5641_v36 = vpop.f32.mrf.mxu0  ;;  %v5690_v7 = vpop.f32.mrf.mxu1 }
 0x669   : > { %v5642_v23 = vadd.f32 %v5641_v36, %v15432_v53  ;;  %6989 = vmatpush.bf16.msrb.mxu2 %v12205_v52  ;;  %v13554_v36 = vld [vmem:[#allocation7 + $0x3ec] sm:$0xf0] }
 0x66a   : > { %5932 = vmatmul.bf16.gmra.mxu2 %v15011_v25 }
 0x66b   : > { %v5691_v19 = vadd.f32 %v5690_v7, %v5642_v23  ;;  %v5617_v4 = vpop.f32.mrf.mxu3 }
 0x66c   : > { %v5618_v41 = vadd.f32 %v5617_v4, %v5569_v1  ;;  %v11948_v1 = vld [vmem:[#allocation7 + $0xe0] sm:$0xf] }
 0x66d   : > { %v5737_v43 = vpop.f32.mrf.mxu2  ;;  %v11949_v50 = vor.u32 %v13458_v37, %v11948_v1  ;;  %v12188_v1 = vld [vmem:[#allocation7 + $0x2c0] sm:$0xf]  ;;  %v13518_v37 = vld [vmem:[#allocation7 + $0x2cc] sm:$0xf0] }
 0x66e   : > { %v6070_v14 = vmax.f32 %v5618_v41, 0.0  ;;  %v15461_v44 = vadd.f32 %v5737_v43, %v5689_v35  ;;  %v12332_v35 = vld [vmem:[#allocation7 + $0x3e0] sm:$0xf]  ;;  %v13490_v43 = vld [vmem:[#allocation7 + $0x1ec] sm:$0xf0] }
 0x66f   : > { %v12333_v7 = vor.u32 %v13554_v36, %v12332_v35  ;;  %6891 = vmatpush.bf16.msrb.mxu0 %v11949_v50  ;;  %v12076_v41 = vld [vmem:[#allocation7 + $0x1e0] sm:$0xf] }
 0x670   : > { %v15463_v33 = vpack.c.bf16 %v6070_v14, %v6066_v57  ;;  %5815 = vmatmul.bf16.gmra.mxu3 %v15233_v30  ;;  %v5644_v34 = vpop.f32.mrf.mxu0  ;;  %v5693_v45 = vpop.f32.mrf.mxu1  ;;  %v12077_v57 = vor.u32 %v13490_v43, %v12076_v41  ;;  %v13550_v41 = vld [vmem:[#allocation7 + $0x3cc] sm:$0xf0] }
 0x671   : > { %v5645_v54 = vadd.f32 %v5644_v34, %v15432_v53  ;;  %7038 = vmatpush.bf16.msrb.mxu3 %v12333_v7 }
 0x672   : > { %6940 = vmatpush.bf16.msrb.mxu1 %v12077_v57 }
 0x673   : > { %v5694_v25 = vadd.f32 %v5693_v45, %v5645_v54  ;;  %v5620_v39 = vpop.f32.mrf.mxu3  ;;  %5839 = vmatmul.bf16.gmra.mxu0 %v14874_v9  ;;  %5888 = vmatmul.bf16.gmra.mxu1 %v14944_v42 }
 0x674   : > { %v5621_v5 = vadd.f32 %v5620_v39, %v15434_v47 }
 0x675   : > { %v5739_v23 = vpop.f32.mrf.mxu2 }
 0x676   : > { %v15470_v4 = vadd.f32 %v5739_v23, %v5691_v19  ;;  %v6074_v54 = vmax.f32 %v5621_v5, 0.0  ;;  %v13454_v5 = vld [vmem:[#allocation7 + $0xcc] sm:$0xf0] }
 0x678   : > { %v5646_v9 = vpop.f32.mrf.mxu0  ;;  %v5695_v34 = vpop.f32.mrf.mxu1 }
 0x679   : > { %v5647_v14 = vadd.f32 %v5646_v9, %v15432_v53 }
 0x67a   : > { %5937 = vmatmul.bf16.gmra.mxu2 %v15019_v24  ;;  %v12189_v24 = vor.u32 %v13518_v37, %v12188_v1 }
 0x67b   : > { %v5696_v47 = vadd.f32 %v5695_v34, %v5647_v14  ;;  %v5622_v42 = vpop.f32.mrf.mxu3  ;;  %v12060_v14 = vld [vmem:[#allocation7 + $0x1c0] sm:$0xf]  ;;  %v13486_v34 = vld [vmem:[#allocation7 + $0x1cc] sm:$0xf0] }
 0x67c   : > { %v5623_v18 = vadd.f32 %v5622_v42, %v15443_v60  ;;  %6990 = vmatpush.bf16.msrb.mxu2 %v12189_v24  ;;  %v11932_v60 = vld [vmem:[#allocation7 + $0xc0] sm:$0xf]  ;;  %v12061_v42 = vor.u32 %v13486_v34, %v12060_v14  ;;  %v13514_v24 = vld [vmem:[#allocation7 + $0x2ac] sm:$0xf0] }
 0x67d   : > { %v5742_v27 = vpop.f32.mrf.mxu2  ;;  %v12044_v34 = vld [vmem:[#allocation7 + $0x1a0] sm:$0xf] }
 0x67e   : > { %v6078_v19 = vmax.f32 %v5623_v18, 0.0  ;;  %v15475_v45 = vadd.f32 %v5742_v27, %v5694_v25  ;;  %v12316_v25 = vld [vmem:[#allocation7 + $0x3c0] sm:$0xf]  ;;  %6941 = vmatpush.bf16.msrb.mxu1 %v12061_v42  ;;  %v13482_v42 = vld [vmem:[#allocation7 + $0x1ac] sm:$0xf0] }
 0x67f   : > { %v12317_v57 = vor.u32 %v13550_v41, %v12316_v25  ;;  %v13546_v41 = vld [vmem:[#allocation7 + $0x3ac] sm:$0xf0] }
 0x680   : > { %v15477_v52 = vpack.c.bf16 %v6078_v19, %v6074_v54  ;;  %5976 = vmatmul.bf16.vlgmr.msra.gmra.mxu3 %v15093_v6  ;;  %v5649_v39 = vpop.f32.mrf.mxu0  ;;  %v5698_v50 = vpop.f32.mrf.mxu1  ;;  %v11933_v6 = vor.u32 %v13454_v5, %v11932_v60 }
 0x681   : > { %v5650_v35 = vadd.f32 %v5649_v39, %v15432_v53  ;;  %7039 = vmatpush.bf16.msrb.mxu3 %v12317_v57 }
 0x682   : > { %6892 = vmatpush.bf16.msrb.mxu0 %v11933_v6 }
 0x683   : > { %v5699_v36 = vadd.f32 %v5698_v50, %v5650_v35  ;;  %v5781_v23 = vpop.f32.mrf.mxu3  ;;  %5844 = vmatmul.bf16.gmra.mxu0 %v17191_v51  ;;  %5893 = vmatmul.bf16.gmra.mxu1 %v14954_v31  ;;  %v12172_v50 = vld [vmem:[#allocation7 + $0x2a0] sm:$0xf] }
 0x684   : > { %v5782_v7 = vadd.f32 %v5781_v23, %v15448_v13 }
 0x685   : > { %v5744_v43 = vpop.f32.mrf.mxu2 }
 0x686   : > { %v15484_v9 = vadd.f32 %v5744_v43, %v5696_v47  ;;  %v6019_v39 = vmax.f32 %v5782_v7, 0.0  ;;  %v13450_v7 = vld [vmem:[#allocation7 + $0xac] sm:$0xf0] }
 0x688   : > { %v5651_v51 = vpop.f32.mrf.mxu0  ;;  %v5700_v27 = vpop.f32.mrf.mxu1 }
 0x689   : > { %v5652_v18 = vadd.f32 %v5651_v51, %v15432_v53  ;;  %v12045_v51 = vor.u32 %v13482_v42, %v12044_v34  ;;  %v13442_v34 = vld [vmem:[#allocation7 + $0x6c] sm:$0xf0]  ;;  %v12012_v42 = vld [vmem:[#allocation7 + $0x160] sm:$0xf] }
 0x68a   : > { %5942 = vmatmul.bf16.gmra.mxu2 %v15031_v63  ;;  %v12173_v63 = vor.u32 %v13514_v24, %v12172_v50  ;;  %v12028_v50 = vld [vmem:[#allocation7 + $0x180] sm:$0xf] }
 0x68b   : > { %v5701_v13 = vadd.f32 %v5700_v27, %v5652_v18  ;;  %v5783_v31 = vpop.f32.mrf.mxu3  ;;  %6942 = vmatpush.bf16.msrb.mxu1 %v12045_v51  ;;  %v13474_v51 = vld [vmem:[#allocation7 + $0x16c] sm:$0xf0] }
 0x68c   : > { %v5784_v54 = vadd.f32 %v5783_v31, %v15457_v28  ;;  %6991 = vmatpush.bf16.msrb.mxu2 %v12173_v63  ;;  %v11916_v28 = vld [vmem:[#allocation7 + $0xa0] sm:$0xf]  ;;  %v13510_v63 = vld [vmem:[#allocation7 + $0x28c] sm:$0xf0] }
 0x68d   : > { %v5747_v19 = vpop.f32.mrf.mxu2 }
 0x68e   : > { %v6023_v47 = vmax.f32 %v5784_v54, 0.0  ;;  %v15489_v1 = vadd.f32 %v5747_v19, %v5699_v36  ;;  %v12300_v36 = vld [vmem:[#allocation7 + $0x3a0] sm:$0xf] }
 0x68f   : > { %v12301_v57 = vor.u32 %v13546_v41, %v12300_v36  ;;  %v13542_v41 = vld [vmem:[#allocation7 + $0x38c] sm:$0xf0] }
 0x690   : > { %v15491_v37 = vpack.c.bf16 %v6023_v47, %v6019_v39  ;;  %5981 = vmatmul.bf16.gmra.mxu3 %v15113_v55  ;;  %v5654_v35 = vpop.f32.mrf.mxu0  ;;  %v5703_v60 = vpop.f32.mrf.mxu1  ;;  %v11917_v55 = vor.u32 %v13450_v7, %v11916_v28  ;;  %v11900_v47 = vld [vmem:[#allocation7 + $0x80] sm:$0xf] }
 0x691   : > { %v5655_v23 = vadd.f32 %v5654_v35, %v15432_v53  ;;  %7040 = vmatpush.bf16.msrb.mxu3 %v12301_v57  ;;  %v13446_v35 = vld [vmem:[#allocation7 + $0x8c] sm:$0xf0] }
 0x692   : > { %6893 = vmatpush.bf16.msrb.mxu0 %v11917_v55  ;;  %v12284_v55 = vld [vmem:[#allocation7 + $0x380] sm:$0xf] }
 0x693   : > { %v5704_v5 = vadd.f32 %v5703_v60, %v5655_v23  ;;  %v5786_v25 = vpop.f32.mrf.mxu3  ;;  %5849 = vmatmul.bf16.gmra.mxu0 %v17192_v26  ;;  %5898 = vmatmul.bf16.gmra.mxu1 %v14963_v62  ;;  %v12156_v60 = vld [vmem:[#allocation7 + $0x280] sm:$0xf]  ;;  %v12285_v57 = vor.u32 %v13542_v41, %v12284_v55 }
 0x694   : > { %v5787_v6 = vadd.f32 %v5786_v25, %v15461_v44  ;;  %v13478_v25 = vld [vmem:[#allocation7 + $0x18c] sm:$0xf0]  ;;  %v12157_v7 = vor.u32 %v13510_v63, %v12156_v60  ;;  %v12124_v41 = vld [vmem:[#allocation7 + $0x240] sm:$0xf] }
 0x695   : > { %v5749_v43 = vpop.f32.mrf.mxu2  ;;  %v12029_v36 = vor.u32 %v13478_v25, %v12028_v50  ;;  %7041 = vmatpush.bf16.msrb.mxu3 %v12285_v57  ;;  %v12140_v50 = vld [vmem:[#allocation7 + $0x260] sm:$0xf]  ;;  %v13434_v25 = vld [vmem:[#allocation7 + $0x2c] sm:$0xf0] }
 0x696   : > { %v15498_v14 = vadd.f32 %v5749_v43, %v5701_v13  ;;  %v6027_v19 = vmax.f32 %v5787_v6, 0.0  ;;  %6992 = vmatpush.bf16.msrb.mxu2 %v12157_v7  ;;  %v11884_v43 = vld [vmem:[#allocation7 + $0x60] sm:$0xf] }
 0x697   : > { %6943 = vmatpush.bf16.msrb.mxu1 %v12029_v36  ;;  %v13466_v36 = vld [vmem:[#allocation7 + $0x12c] sm:$0xf0] }
 0x698   : > { %v5656_v26 = vpop.f32.mrf.mxu0  ;;  %v5705_v27 = vpop.f32.mrf.mxu1 }
 0x699   : > { %v5657_v18 = vadd.f32 %v5656_v26, %v15432_v53 }
 0x69a   : > { %5947 = vmatmul.bf16.gmra.mxu2 %v15041_v10  ;;  %v11901_v10 = vor.u32 %v13446_v35, %v11900_v47 }
 0x69b   : > { %v5706_v44 = vadd.f32 %v5705_v27, %v5657_v18  ;;  %v5788_v62 = vpop.f32.mrf.mxu3  ;;  %v11885_v18 = vor.u32 %v13442_v34, %v11884_v43  ;;  %v12013_v27 = vor.u32 %v13474_v51, %v12012_v42  ;;  %v13502_v43 = vld [vmem:[#allocation7 + $0x24c] sm:$0xf0]  ;;  %v11836_v51 = vld [vmem:[#allocation7] sm:$0xf] }
 0x69c   : > { %v5789_v31 = vadd.f32 %v5788_v62, %v15470_v4  ;;  %6894 = vmatpush.bf16.msrb.mxu0 %v11901_v10  ;;  %v11852_v10 = vld [vmem:[#allocation7 + $0x20] sm:$0xf]  ;;  %v12125_v42 = vor.u32 %v13502_v43, %v12124_v41 }
 0x69d   : > { %v5752_v54 = vpop.f32.mrf.mxu2  ;;  %6944 = vmatpush.bf16.msrb.mxu1 %v12013_v27  ;;  %v11853_v7 = vor.u32 %v13434_v25, %v11852_v10  ;;  %v13494_v10 = vld [vmem:[#allocation7 + $0x20c] sm:$0xf0] }
 0x69e   : > { %v6031_v13 = vmax.f32 %v5789_v31, 0.0  ;;  %v15503_v39 = vadd.f32 %v5752_v54, %v5704_v5  ;;  %v13438_v31 = vld [vmem:[#allocation7 + $0x4c] sm:$0xf0]  ;;  %v11996_v54 = vld [vmem:[#allocation7 + $0x140] sm:$0xf] }
 0x6a0   : > { %v15505_v24 = vpack.c.bf16 %v6031_v13, %v6027_v19  ;;  %5986 = vmatmul.bf16.gmra.mxu3 %v15135_v8  ;;  %v5659_v23 = vpop.f32.mrf.mxu0  ;;  %v5708_v4 = vpop.f32.mrf.mxu1  ;;  %6895 = vmatpush.bf16.msrb.mxu0 %v11885_v18  ;;  %v11964_v18 = vld [vmem:[#allocation7 + $0x100] sm:$0xf] }
 0x6a1   : > { %v5660_v28 = vadd.f32 %v5659_v23, %v15432_v53  ;;  %v13506_v23 = vld [vmem:[#allocation7 + $0x26c] sm:$0xf0] }
 0x6a2   : > { %v12141_v60 = vor.u32 %v13506_v23, %v12140_v50  ;;  %v13538_v50 = vld [vmem:[#allocation7 + $0x36c] sm:$0xf0] }
 0x6a3   : > { %v5709_v5 = vadd.f32 %v5708_v4, %v5660_v28  ;;  %v5791_v6 = vpop.f32.mrf.mxu3  ;;  %5854 = vmatmul.bf16.gmra.mxu0 %v17193_v59  ;;  %5903 = vmatmul.bf16.gmra.mxu1 %v14979_v17  ;;  %v11868_v59 = vld [vmem:[#allocation7 + $0x40] sm:$0xf] }
 0x6a4   : > { %v5792_v8 = vadd.f32 %v5791_v6, %v15475_v45  ;;  %v11869_v13 = vor.u32 %v13438_v31, %v11868_v59  ;;  %v13470_v45 = vld [vmem:[#allocation7 + $0x14c] sm:$0xf0]  ;;  %v11980_v28 = vld [vmem:[#allocation7 + $0x120] sm:$0xf]  ;;  %6993 = vmatpush.bf16.msrb.mxu2 %v12141_v60 }
 0x6a5   : > { %v5754_v26 = vpop.f32.mrf.mxu2  ;;  %v11997_v35 = vor.u32 %v13470_v45, %v11996_v54  ;;  %v11981_v55 = vor.u32 %v13466_v36, %v11980_v28  ;;  %v13462_v31 = vld [vmem:[#allocation7 + $0x10c] sm:$0xf0] }
 0x6a6   : > { %v15512_v62 = vadd.f32 %v5754_v26, %v5706_v44  ;;  %6896 = vmatpush.bf16.msrb.mxu0 %v11869_v13  ;;  %v6035_v57 = vmax.f32 %v5792_v8, 0.0  ;;  %v13430_v26 = vld [vmem:[#allocation7 + $0xc] sm:$0xf0]  ;;  %v11965_v8 = vor.u32 %v13462_v31, %v11964_v18 }
 0x6a7   : > { %6945 = vmatpush.bf16.msrb.mxu1 %v11997_v35  ;;  %v11837_v59 = vor.u32 %v13430_v26, %v11836_v51  ;;  %v13498_v13 = vld [vmem:[#allocation7 + $0x22c] sm:$0xf0]  ;;  %v12268_v35 = vld [vmem:[#allocation7 + $0x360] sm:$0xf] }
 0x6a8   : > { %v5661_v19 = vpop.f32.mrf.mxu0  ;;  %v5710_v47 = vpop.f32.mrf.mxu1  ;;  %6994 = vmatpush.bf16.msrb.mxu2 %v12125_v42  ;;  %v12269_v23 = vor.u32 %v13538_v50, %v12268_v35  ;;  %v13534_v18 = vld [vmem:[#allocation7 + $0x34c] sm:$0xf0] }
 0x6a9   : > { %v5662_v17 = vadd.f32 %v5661_v19, %v15432_v53  ;;  %v13530_v50 = vld [vmem:[#allocation7 + $0x32c] sm:$0xf0] }
 0x6aa   : > { %5952 = vmatmul.bf16.gmra.mxu2 %v15049_v22  ;;  %6897 = vmatpush.bf16.msrb.mxu0 %v11853_v7 }
 0x6ab   : > { %v5711_v44 = vadd.f32 %v5710_v47, %v5662_v17  ;;  %v5793_v63 = vpop.f32.mrf.mxu3  ;;  %6946 = vmatpush.bf16.msrb.mxu1 %v11981_v55  ;;  %7042 = vmatpush.bf16.msrb.mxu3 %v12269_v23 }
 0x6ac   : > { %v5794_v4 = vadd.f32 %v5793_v63, %v15484_v9  ;;  %v12092_v63 = vld [vmem:[#allocation7 + $0x200] sm:$0xf] }
 0x6ad   : > { %v5757_v6 = vpop.f32.mrf.mxu2  ;;  %v12093_v28 = vor.u32 %v13494_v10, %v12092_v63 }
 0x6ae   : > { %v6039_v34 = vmax.f32 %v5794_v4, 0.0  ;;  %v15517_v22 = vadd.f32 %v5757_v6, %v5709_v5  ;;  %v12108_v5 = vld [vmem:[#allocation7 + $0x220] sm:$0xf]  ;;  %6898 = vmatpush.bf16.msrb.mxu0 %v11837_v59 }
 0x6af   : > { %v12109_v45 = vor.u32 %v13498_v13, %v12108_v5  ;;  %6947 = vmatpush.bf16.msrb.mxu1 %v11965_v8 }
 0x6b0   : > { %v15519_v27 = vpack.c.bf16 %v6039_v34, %v6035_v57  ;;  %5991 = vmatmul.bf16.gmra.mxu3 %v15159_v2  ;;  %v5664_v9 = vpop.f32.mrf.mxu0  ;;  %v5713_v19 = vpop.f32.mrf.mxu1 }
 0x6b1   : > { %v5665_v54 = vadd.f32 %v5664_v9, %v15432_v53  ;;  %6995 = vmatpush.bf16.msrb.mxu2 %v12109_v45 }
 0x6b3   : > { %v5714_v17 = vadd.f32 %v5713_v19, %v5665_v54  ;;  %v5796_v47 = vpop.f32.mrf.mxu3  ;;  %5859 = vmatmul.bf16.gmra.mxu0 %v17194_v58  ;;  %5908 = vmatmul.bf16.gmra.mxu1 %v14987_v15 }
 0x6b4   : > { %v5797_v2 = vadd.f32 %v5796_v47, %v15489_v1 }
 0x6b5   : > { %v5759_v60 = vpop.f32.mrf.mxu2  ;;  %6996 = vmatpush.bf16.msrb.mxu2 %v12093_v28 }
 0x6b6   : > { %v5760_v25 = vadd.f32 %v5759_v60, %v5711_v44  ;;  %v6043_v55 = vmax.f32 %v5797_v2, 0.0 }
 0x6b8   : > { %v5666_v4 = vpop.f32.mrf.mxu0  ;;  %v5715_v58 = vpop.f32.mrf.mxu1 }
 0x6b9   : > { %v5667_v7 = vadd.f32 %v5666_v4, %v15432_v53 }
 0x6ba   : > { %5957 = vmatmul.bf16.gmra.mxu2 %v15059_v0  ;;  %v12252_v0 = vld [vmem:[#allocation7 + $0x340] sm:$0xf] }
 0x6bb   : > { %v5716_v1 = vadd.f32 %v5715_v58, %v5667_v7  ;;  %v5798_v36 = vpop.f32.mrf.mxu3  ;;  %v12253_v9 = vor.u32 %v13534_v18, %v12252_v0 }
 0x6bc   : > { %v5799_v15 = vadd.f32 %v5798_v36, %v15498_v14 }
 0x6bd   : > { %v5762_v6 = vpop.f32.mrf.mxu2  ;;  %7043 = vmatpush.bf16.msrb.mxu3 %v12253_v9  ;;  %v13520_v9 = vld [vmem:[#allocation7 + $0x2e4] sm:$0xf] }
 0x6be   : > { %v6047_v41 = vmax.f32 %v5799_v15, 0.0  ;;  %v5763_v43 = vadd.f32 %v5762_v6, %v5714_v17  ;;  %v12220_v6 = vld [vmem:[#allocation7 + $0x300] sm:$0xf] }
 0x6c0   : > { %v15529_v57 = vpack.c.bf16 %v6047_v41, %v6043_v55  ;;  %5996 = vmatmul.bf16.gmra.mxu3 %v15177_v38  ;;  %v5669_v44 = vpop.f32.mrf.mxu0  ;;  %v5718_v42 = vpop.f32.mrf.mxu1  ;;  %v13526_v55 = vld [vmem:[#allocation7 + $0x30c] sm:$0xf0] }
 0x6c1   : > { %v5670_v34 = vadd.f32 %v5669_v44, %v15432_v53 }
 0x6c3   : > { %v5719_v51 = vadd.f32 %v5718_v42, %v5670_v34  ;;  %v5801_v26 = vpop.f32.mrf.mxu3  ;;  %5864 = vmatmul.bf16.gmra.mxu0 %v17195_v32  ;;  %5913 = vmatmul.bf16.gmra.mxu1 %v14995_v29 }
 0x6c4   : > { %v5802_v14 = vadd.f32 %v5801_v26, %v15503_v39 }
 0x6c5   : > { %v5764_v59 = vpop.f32.mrf.mxu2 }
 0x6c6   : > { %v5765_v31 = vadd.f32 %v5764_v59, %v5716_v1  ;;  %v6051_v45 = vmax.f32 %v5802_v14, 0.0  ;;  %v12206_v59 = vld [vmem:[#allocation7 + $0x2f0] sm:$0xf0] }
 0x6c8   : > { %v5671_v54 = vpop.f32.mrf.mxu0  ;;  %v5720_v19 = vpop.f32.mrf.mxu1 }
 0x6c9   : > { %v5672_v38 = vadd.f32 %v5671_v54, %v15432_v53 }
 0x6ca   : > { %5962 = vmatmul.bf16.gmra.mxu2 %v15076_v46  ;;  %v12236_v46 = vld [vmem:[#allocation7 + $0x320] sm:$0xf] }
 0x6cb   : > { %v5721_v8 = vadd.f32 %v5720_v19, %v5672_v38  ;;  %v5803_v5 = vpop.f32.mrf.mxu3  ;;  %v12209_v38 = vor.u32 %v13520_v9, %v12206_v59  ;;  %v11934_v9 = vld [vmem:[#allocation7 + $0xd0] sm:$0xf0]  ;;  %v13548_v59 = vld [vmem:[#allocation7 + $0x3c4] sm:$0xf] }
 0x6cc   : > { %v5804_v32 = vadd.f32 %v5803_v5, %v15512_v62  ;;  %v12237_v62 = vor.u32 %v13530_v50, %v12236_v46  ;;  %v11950_v5 = vld [vmem:[#allocation7 + $0xf0] sm:$0xf0]  ;;  %v13488_v46 = vld [vmem:[#allocation7 + $0x1e4] sm:$0xf] }
 0x6cd   : > { %v5767_v13 = vpop.f32.mrf.mxu2  ;;  %7185 = vmatpush.bf16.msra.mxu2 %v12209_v38  ;;  %v12078_v50 = vld [vmem:[#allocation7 + $0x1f0] sm:$0xf0] }
 0x6ce   : > { %v6055_v17 = vmax.f32 %v5804_v32, 0.0  ;;  %v5768_v39 = vadd.f32 %v5767_v13, %v5719_v51  ;;  %7044 = vmatpush.bf16.msrb.mxu3 %v12237_v62  ;;  %v13552_v32 = vld [vmem:[#allocation7 + $0x3e4] sm:$0xf] }
 0x6d0   : > { %v15539_v47 = vpack.c.bf16 %v6055_v17, %v6051_v45  ;;  %6001 = vmatmul.bf16.gmra.mxu3 %v15204_v56  ;;  %v15542_v29 = vpop.f32.mrf.mxu0  ;;  %v15544_v35 = vpop.f32.mrf.mxu1  ;;  %v12334_v17 = vld [vmem:[#allocation7 + $0x3f0] sm:$0xf0] }
 0x6d3   : > { %v5806_v53 = vpop.f32.mrf.mxu3  ;;  %6899 = vmatmul.bf16.vlgmr.msrb.gmra.mxu0 %v15259_v16  ;;  %6948 = vmatmul.bf16.vlgmr.msrb.gmra.mxu1 %v15374_v61 }
 0x6d4   : > { %v5807_v2 = vadd.f32 %v5806_v53, %v15517_v22  ;;  %v12337_v53 = vor.u32 %v13552_v32, %v12334_v17 }
 0x6d5   : > { %v5769_v23 = vpop.f32.mrf.mxu2 }
 0x6d6   : > { %v5770_v60 = vadd.f32 %v5769_v23, %v5721_v8  ;;  %v6059_v7 = vmax.f32 %v5807_v2, 0.0  ;;  %v17204_v8 = vld [vmem:[#allocation14_spill] sm:$0xff]  ;;  %v12081_v2 = vor.u32 %v13488_v46, %v12078_v50 }
 0x6d8   : > { %v15549_v63 = vpop.f32.mrf.mxu0  ;;  %v15551_v56 = vpop.f32.mrf.mxu1  ;;  %7136 = vmatpush.bf16.msra.mxu1 %v12081_v2 }
 0x6da   : > { %6997 = vmatmul.bf16.vlgmr.msrb.gmra.mxu2 %v15491_v37 }
 0x6db   : > { %v5808_v10 = vpop.f32.mrf.mxu3 }
 0x6dc   : > { %v5809_v28 = vadd.f32 %v5808_v10, %v5760_v25  ;;  %v12221_v25 = vor.u32 %v13526_v55, %v12220_v6 }
 0x6dd   : > { %v15554_v4 = vpop.f32.mrf.mxu2 }
 0x6de   : > { %v6063_v58 = vmax.f32 %v5809_v28, 0.0  ;;  %7045 = vmatpush.bf16.msrb.mxu3 %v12221_v25  ;;  %v12190_v25 = vld [vmem:[#allocation7 + $0x2d0] sm:$0xf0] }
 0x6e0   : > { %v15556_v1 = vpack.c.bf16 %v6063_v58, %v6059_v7  ;;  %6006 = vmatmul.bf16.gmra.mxu3 %v15216_v12  ;;  %v15559_v22 = vpop.f32.mrf.mxu0  ;;  %v15561_v36 = vpop.f32.mrf.mxu1  ;;  %v15593_v7 = vperm.slane %v15429_v11, 3  ;;  %v13452_v11 = vld [vmem:[#allocation7 + $0xc4] sm:$0xf] }
 0x6e2   : > { %7234 = vmatpush.bf16.msra.mxu3 %v12337_v53  ;;  %v5833_v38 = vadd.f32 %v15549_v63, %v15593_v7 }
 0x6e3   : > { %v5811_v15 = vpop.f32.mrf.mxu3  ;;  %6904 = vmatmul.bf16.gmra.mxu0 %v15273_v49  ;;  %6953 = vmatmul.bf16.gmra.mxu1 %v15388_v3 }
 0x6e4   : > { %v5812_v41 = vadd.f32 %v5811_v15, %v5763_v43  ;;  %v5882_v53 = vadd.f32 %v15551_v56, %v5833_v38  ;;  %v11918_v38 = vld [vmem:[#allocation7 + $0xb0] sm:$0xf0] }
 0x6e5   : > { %v15565_v44 = vpop.f32.mrf.mxu2 }
 0x6e6   : > { %v6067_v0 = vmax.f32 %v5812_v41, 0.0  ;;  %v13516_v41 = vld [vmem:[#allocation7 + $0x2c4] sm:$0xf]  ;;  %v5931_v2 = vadd.f32 %v15565_v44, %v5882_v53  ;;  %v5836_v44 = vadd.f32 %v15559_v22, %v15593_v7  ;;  %v12046_v53 = vld [vmem:[#allocation7 + $0x1b0] sm:$0xf0] }
 0x6e8   : > { %v15567_v34 = vpop.f32.mrf.mxu0  ;;  %v15569_v42 = vpop.f32.mrf.mxu1  ;;  %v5885_v22 = vadd.f32 %v15561_v36, %v5836_v44  ;;  %v13444_v44 = vld [vmem:[#allocation7 + $0x84] sm:$0xf] }
 0x6ea   : > { %7002 = vmatmul.bf16.gmra.mxu2 %v15505_v24 }
 0x6eb   : > { %v5813_v12 = vpop.f32.mrf.mxu3 }
 0x6ec   : > { %v5814_v51 = vadd.f32 %v5813_v12, %v5765_v31  ;;  %v13456_v31 = vld [vmem:[#allocation7 + $0xe4] sm:$0xf] }
 0x6ed   : > { %v15572_v26 = vpop.f32.mrf.mxu2  ;;  %v11953_v45 = vor.u32 %v13456_v31, %v11950_v5  ;;  %v12318_v31 = vld [vmem:[#allocation7 + $0x3d0] sm:$0xf0] }
 0x6ee   : > { %v6071_v18 = vmax.f32 %v5814_v51, 0.0  ;;  %v12193_v51 = vor.u32 %v13516_v41, %v12190_v25  ;;  %v12321_v32 = vor.u32 %v13548_v59, %v12318_v31  ;;  %v13448_v59 = vld [vmem:[#allocation7 + $0xa4] sm:$0xf]  ;;  %v5838_v31 = vadd.f32 %v15567_v34, %v15593_v7 }
 0x6ef   : > { %7087 = vmatpush.bf16.msra.mxu0 %v11953_v45  ;;  %v12062_v45 = vld [vmem:[#allocation7 + $0x1d0] sm:$0xf0] }
 0x6f0   : > { %v15574_v14 = vpack.c.bf16 %v6071_v18, %v6067_v0  ;;  %6011 = vmatmul.bf16.gmra.mxu3 %v15233_v30  ;;  %v15577_v43 = vpop.f32.mrf.mxu0  ;;  %v15579_v54 = vpop.f32.mrf.mxu1  ;;  %v5831_v0 = vadd.f32 %v15542_v29, %v15593_v7  ;;  %v17205_v18 = vld [vmem:[#allocation16_spill] sm:$0xff]  ;;  %7186 = vmatpush.bf16.msra.mxu2 %v12193_v51  ;;  %v13484_v29 = vld [vmem:[#allocation7 + $0x1c4] sm:$0xf]  ;;  %v12174_v51 = vld [vmem:[#allocation7 + $0x2b0] sm:$0xf0] }
 0x6f1   : > { %7235 = vmatpush.bf16.msra.mxu3 %v12321_v32  ;;  %v12065_v17 = vor.u32 %v13484_v29, %v12062_v45  ;;  %v11921_v32 = vor.u32 %v13448_v59, %v11918_v38  ;;  %v13476_v59 = vld [vmem:[#allocation7 + $0x184] sm:$0xf] }
 0x6f3   : > { %v5816_v19 = vpop.f32.mrf.mxu3  ;;  %6909 = vmatmul.bf16.gmra.mxu0 %v17204_v8  ;;  %6958 = vmatmul.bf16.gmra.mxu1 %v15402_v21 }
 0x6f4   : > { %v5817_v13 = vadd.f32 %v5816_v19, %v5768_v39  ;;  %v11937_v19 = vor.u32 %v13452_v11, %v11934_v9  ;;  %7137 = vmatpush.bf16.msra.mxu1 %v12065_v17  ;;  %v17206_v9 = vld [vmem:[#allocation15_spill] sm:$0xff]  ;;  %v13480_v17 = vld [vmem:[#allocation7 + $0x1a4] sm:$0xf] }
 0x6f5   : > { %v15583_v30 = vpop.f32.mrf.mxu2 }
 0x6f6   : > { %v6075_v58 = vmax.f32 %v5817_v13, 0.0  ;;  %v5880_v13 = vadd.f32 %v15544_v35, %v5831_v0  ;;  %7088 = vmatpush.bf16.msra.mxu0 %v11937_v19  ;;  %v13544_v19 = vld [vmem:[#allocation7 + $0x3a4] sm:$0xf] }
 0x6f8   : > { %v15585_v62 = vpop.f32.mrf.mxu0  ;;  %v15587_v23 = vpop.f32.mrf.mxu1  ;;  %v5929_v46 = vadd.f32 %v15554_v4, %v5880_v13  ;;  %v13512_v4 = vld [vmem:[#allocation7 + $0x2a4] sm:$0xf]  ;;  %v12302_v13 = vld [vmem:[#allocation7 + $0x3b0] sm:$0xf0] }
 0x6f9   : > { %v12177_v11 = vor.u32 %v13512_v4, %v12174_v51  ;;  %v12305_v45 = vor.u32 %v13544_v19, %v12302_v13  ;;  %v13508_v19 = vld [vmem:[#allocation7 + $0x284] sm:$0xf] }
 0x6fa   : > { %7007 = vmatmul.bf16.gmra.mxu2 %v15519_v27  ;;  %7089 = vmatpush.bf16.msra.mxu0 %v11921_v32 }
 0x6fb   : > { %v5818_v39 = vpop.f32.mrf.mxu3  ;;  %7187 = vmatpush.bf16.msra.mxu2 %v12177_v11  ;;  %7236 = vmatpush.bf16.msra.mxu3 %v12305_v45 }
 0x6fc   : > { %v5819_v10 = vadd.f32 %v5818_v39, %v5770_v60 }
 0x6fd   : > { %v15590_v28 = vpop.f32.mrf.mxu2 }
 0x6fe   : > { %v6079_v15 = vmax.f32 %v5819_v10, 0.0 }
 0x700   : > { %v15595_v6 = vpack.c.bf16 %v6079_v15, %v6075_v58  ;;  %v15597_v55 = vpop.f32.mrf.mxu0  ;;  %v15599_v12 = vpop.f32.mrf.mxu1 }
 0x703   : > { %v5977_v60 = vpop.f32.mrf.mxu3  ;;  %6914 = vmatmul.bf16.gmra.mxu0 %v17205_v18  ;;  %6963 = vmatmul.bf16.gmra.mxu1 %v15416_v48 }
 0x704   : > { %v5978_v39 = vadd.f32 %v5977_v60, %v5929_v46  ;;  %v12049_v46 = vor.u32 %v13480_v17, %v12046_v53  ;;  %v17207_v53 = vld [vmem:[#allocation17_spill] sm:$0xff] }
 0x705   : > { %v15607_v5 = vpop.f32.mrf.mxu2 }
 0x706   : > { %v6020_v15 = vmax.f32 %v5978_v39, 0.0  ;;  %v5934_v39 = vadd.f32 %v15572_v26, %v5885_v22  ;;  %7138 = vmatpush.bf16.msra.mxu1 %v12049_v46  ;;  %v5841_v22 = vadd.f32 %v15577_v43, %v15593_v7  ;;  %v13540_v46 = vld [vmem:[#allocation7 + $0x384] sm:$0xf] }
 0x708   : > { %v15612_v50 = vpop.f32.mrf.mxu0  ;;  %v15614_v63 = vpop.f32.mrf.mxu1 }
 0x70a   : > { %7012 = vmatmul.bf16.gmra.mxu2 %v15529_v57 }
 0x70b   : > { %v5979_v35 = vpop.f32.mrf.mxu3 }
 0x70c   : > { %v5980_v10 = vadd.f32 %v5979_v35, %v5931_v2  ;;  %v5887_v2 = vadd.f32 %v15569_v42, %v5838_v31  ;;  %v11902_v42 = vld [vmem:[#allocation7 + $0x90] sm:$0xf0] }
 0x70d   : > { %v15618_v58 = vpop.f32.mrf.mxu2  ;;  %v12158_v31 = vld [vmem:[#allocation7 + $0x290] sm:$0xf0]  ;;  %v11905_v32 = vor.u32 %v13444_v44, %v11902_v42  ;;  %v5890_v42 = vadd.f32 %v15579_v54, %v5841_v22 }
 0x70e   : > { %v6024_v41 = vmax.f32 %v5980_v10, 0.0  ;;  %v5936_v10 = vadd.f32 %v15583_v30, %v5887_v2  ;;  %v12030_v30 = vld [vmem:[#allocation7 + $0x190] sm:$0xf0]  ;;  %v12161_v13 = vor.u32 %v13508_v19, %v12158_v31  ;;  %v13468_v31 = vld [vmem:[#allocation7 + $0x144] sm:$0xf] }
 0x70f   : > { %v12033_v45 = vor.u32 %v13476_v59, %v12030_v30  ;;  %7090 = vmatpush.bf16.msra.mxu0 %v11905_v32  ;;  %v12286_v2 = vld [vmem:[#allocation7 + $0x390] sm:$0xf0]  ;;  %v13436_v59 = vld [vmem:[#allocation7 + $0x44] sm:$0xf]  ;;  %v5939_v32 = vadd.f32 %v15590_v28, %v5890_v42 }
 0x710   : > { %v15620_v25 = vpack.c.bf16 %v6024_v41, %v6020_v15  ;;  %v15622_v56 = vpop.f32.mrf.mxu0  ;;  %v15624_v0 = vpop.f32.mrf.mxu1  ;;  %7188 = vmatpush.bf16.msra.mxu2 %v12161_v13  ;;  %v11870_v19 = vld [vmem:[#allocation7 + $0x50] sm:$0xf0] }
 0x711   : > { %7139 = vmatpush.bf16.msra.mxu1 %v12033_v45  ;;  %v11873_v13 = vor.u32 %v13436_v59, %v11870_v19  ;;  %v11854_v28 = vld [vmem:[#allocation7 + $0x30] sm:$0xf0]  ;;  %v13500_v19 = vld [vmem:[#allocation7 + $0x244] sm:$0xf] }
 0x712   : > { %7046 = vmatmul.bf16.vlgmr.msrb.gmra.mxu3 %v15620_v25  ;;  %v11982_v42 = vld [vmem:[#allocation7 + $0x130] sm:$0xf0] }
 0x713   : > { %v5982_v60 = vpop.f32.mrf.mxu3  ;;  %6919 = vmatmul.bf16.gmra.mxu0 %v17206_v9  ;;  %6968 = vmatmul.bf16.gmra.mxu1 %v15436_v40 }
 0x714   : > { %v5983_v15 = vadd.f32 %v5982_v60, %v5934_v39  ;;  %v13440_v39 = vld [vmem:[#allocation7 + $0x64] sm:$0xf] }
 0x715   : > { %v15633_v29 = vpop.f32.mrf.mxu2 }
 0x716   : > { %v6028_v51 = vmax.f32 %v5983_v15, 0.0  ;;  %v12289_v15 = vor.u32 %v13540_v46, %v12286_v2  ;;  %v11998_v46 = vld [vmem:[#allocation7 + $0x150] sm:$0xf0] }
 0x717   : > { %v12001_v45 = vor.u32 %v13468_v31, %v11998_v46  ;;  %v12126_v31 = vld [vmem:[#allocation7 + $0x250] sm:$0xf0] }
 0x718   : > { %v15638_v35 = vpop.f32.mrf.mxu0  ;;  %v15640_v34 = vpop.f32.mrf.mxu1  ;;  %7237 = vmatpush.bf16.msra.mxu3 %v12289_v15  ;;  %v11838_v46 = vld [vmem:[#allocation7 + $0x10] sm:$0xf0] }
 0x71a   : > { %7017 = vmatmul.bf16.gmra.mxu2 %v15539_v47 }
 0x71b   : > { %v5984_v36 = vpop.f32.mrf.mxu3 }
 0x71c   : > { %v5985_v41 = vadd.f32 %v5984_v36, %v5936_v10  ;;  %v5843_v10 = vadd.f32 %v15585_v62, %v15593_v7  ;;  %v11886_v36 = vld [vmem:[#allocation7 + $0x70] sm:$0xf0] }
 0x71d   : > { %v15644_v4 = vpop.f32.mrf.mxu2 }
 0x71e   : > { %v6032_v11 = vmax.f32 %v5985_v41, 0.0  ;;  %v13472_v41 = vld [vmem:[#allocation7 + $0x164] sm:$0xf]  ;;  %v5892_v62 = vadd.f32 %v15587_v23, %v5843_v10 }
 0x71f   : > { %v13432_v23 = vld [vmem:[#allocation7 + $0x24] sm:$0xf] }
 0x720   : > { %v15646_v26 = vpack.c.bf16 %v6032_v11, %v6028_v51  ;;  %v15648_v38 = vpop.f32.mrf.mxu0  ;;  %v15650_v60 = vpop.f32.mrf.mxu1  ;;  %v12014_v51 = vld [vmem:[#allocation7 + $0x170] sm:$0xf0]  ;;  %v11889_v11 = vor.u32 %v13440_v39, %v11886_v36  ;;  %v13504_v39 = vld [vmem:[#allocation7 + $0x264] sm:$0xf]  ;;  %v5941_v54 = vadd.f32 %v15607_v5, %v5892_v62  ;;  %v12129_v62 = vor.u32 %v13500_v19, %v12126_v31 }
 0x721   : > { %v12017_v44 = vor.u32 %v13472_v41, %v12014_v51  ;;  %v12142_v36 = vld [vmem:[#allocation7 + $0x270] sm:$0xf0]  ;;  %v13464_v10 = vld [vmem:[#allocation7 + $0x124] sm:$0xf]  ;;  %v5848_v31 = vadd.f32 %v15612_v50, %v15593_v7 }
 0x722   : > { %7051 = vmatmul.bf16.gmra.mxu3 %v15646_v26  ;;  %7091 = vmatpush.bf16.msra.mxu0 %v11889_v11  ;;  %v12145_v15 = vor.u32 %v13504_v39, %v12142_v36  ;;  %v11857_v11 = vor.u32 %v13432_v23, %v11854_v28  ;;  %v13496_v23 = vld [vmem:[#allocation7 + $0x224] sm:$0xf]  ;;  %v12110_v28 = vld [vmem:[#allocation7 + $0x230] sm:$0xf0] }
 0x723   : > { %v5987_v17 = vpop.f32.mrf.mxu3  ;;  %6924 = vmatmul.bf16.gmra.mxu0 %v17207_v53  ;;  %6973 = vmatmul.bf16.gmra.mxu1 %v15450_v20  ;;  %v12270_v19 = vld [vmem:[#allocation7 + $0x370] sm:$0xf0] }
 0x724   : > { %7140 = vmatpush.bf16.msra.mxu1 %v12017_v44  ;;  %v5988_v22 = vadd.f32 %v5987_v17, %v5939_v32  ;;  %7189 = vmatpush.bf16.msra.mxu2 %v12145_v15  ;;  %v11985_v44 = vor.u32 %v13464_v10, %v11982_v42  ;;  %v13428_v32 = vld [vmem:[#allocation7 + $0x4] sm:$0xf]  ;;  %v11966_v15 = vld [vmem:[#allocation7 + $0x110] sm:$0xf0]  ;;  %v12113_v10 = vor.u32 %v13496_v23, %v12110_v28 }
 0x725   : > { %v15659_v43 = vpop.f32.mrf.mxu2  ;;  %v13536_v42 = vld [vmem:[#allocation7 + $0x364] sm:$0xf] }
 0x726   : > { %7092 = vmatpush.bf16.msra.mxu0 %v11873_v13  ;;  %v6036_v5 = vmax.f32 %v5988_v22, 0.0  ;;  %v13460_v13 = vld [vmem:[#allocation7 + $0x104] sm:$0xf]  ;;  %v5846_v22 = vadd.f32 %v15597_v55, %v15593_v7 }
 0x727   : > { %v13492_v55 = vld [vmem:[#allocation7 + $0x204] sm:$0xf] }
 0x728   : > { %v15664_v30 = vpop.f32.mrf.mxu0  ;;  %v15666_v2 = vpop.f32.mrf.mxu1  ;;  %7141 = vmatpush.bf16.msra.mxu1 %v12001_v45  ;;  %7190 = vmatpush.bf16.msra.mxu2 %v12129_v62  ;;  %v11969_v45 = vor.u32 %v13460_v13, %v11966_v15  ;;  %v5895_v62 = vadd.f32 %v15599_v12, %v5846_v22 }
 0x72a   : > { %7022 = vmatmul.bf16.gmra.mxu2 %v15556_v1  ;;  %7093 = vmatpush.bf16.msra.mxu0 %v11857_v11  ;;  %v17208_v11 = vld [vmem:[#allocation18_spill] sm:$0xff]  ;;  %v5944_v13 = vadd.f32 %v15618_v58, %v5895_v62 }
 0x72b   : > { %v5989_v41 = vpop.f32.mrf.mxu3 }
 0x72c   : > { %v5990_v51 = vadd.f32 %v5989_v41, %v5941_v54  ;;  %v11841_v54 = vor.u32 %v13428_v32, %v11838_v46  ;;  %7142 = vmatpush.bf16.msra.mxu1 %v11985_v44  ;;  %v12273_v44 = vor.u32 %v13536_v42, %v12270_v19  ;;  %7191 = vmatpush.bf16.msra.mxu2 %v12113_v10 }
 0x72d   : > { %v15670_v59 = vpop.f32.mrf.mxu2  ;;  %v5897_v46 = vadd.f32 %v15614_v63, %v5848_v31  ;;  %v5851_v19 = vadd.f32 %v15622_v56, %v15593_v7  ;;  %v13532_v31 = vld [vmem:[#allocation7 + $0x344] sm:$0xf] }
 0x72e   : > { %v6040_v17 = vmax.f32 %v5990_v51, 0.0  ;;  %7094 = vmatpush.bf16.msra.mxu0 %v11841_v54  ;;  %7238 = vmatpush.bf16.msra.mxu3 %v12273_v44  ;;  %v12254_v44 = vld [vmem:[#allocation7 + $0x350] sm:$0xf0] }
 0x72f   : > { %v5946_v54 = vadd.f32 %v15633_v29, %v5897_v46 }
 0x730   : > { %v15672_v39 = vpack.c.bf16 %v6040_v17, %v6036_v5  ;;  %v15674_v36 = vpop.f32.mrf.mxu0  ;;  %v15676_v41 = vpop.f32.mrf.mxu1  ;;  %7143 = vmatpush.bf16.msra.mxu1 %v11969_v45  ;;  %v12094_v17 = vld [vmem:[#allocation7 + $0x210] sm:$0xf0] }
 0x731   : > { %v12097_v32 = vor.u32 %v13492_v55, %v12094_v17  ;;  %v5853_v55 = vadd.f32 %v15638_v35, %v15593_v7  ;;  %v12257_v17 = vor.u32 %v13532_v31, %v12254_v44  ;;  %v15725_v35 = vld [vmem:[%s17109_s10] sm:$0xf]  ;;  %v5856_v44 = vadd.f32 %v15648_v38, %v15593_v7 }
 0x732   : > { %7056 = vmatmul.bf16.gmra.mxu3 %v15672_v39 }
 0x733   : > { %v5992_v51 = vpop.f32.mrf.mxu3  ;;  %6929 = vmatmul.bf16.gmra.mxu0 %v17208_v11  ;;  %6978 = vmatmul.bf16.gmra.mxu1 %v15463_v33  ;;  %v5902_v56 = vadd.f32 %v15640_v34, %v5853_v55  ;;  %v15730_v34 = vperm.slane %v15725_v35, 0 }
 0x734   : > { %7192 = vmatpush.bf16.msra.mxu2 %v12097_v32  ;;  %v5993_v23 = vadd.f32 %v5992_v51, %v5944_v13  ;;  %v17209_v51 = vld [vmem:[#allocation19_spill] sm:$0xff]  ;;  %v5900_v32 = vadd.f32 %v15624_v0, %v5851_v19  ;;  %7239 = vmatpush.bf16.msra.mxu3 %v12257_v17 }
 0x735   : > { %v15685_v5 = vpop.f32.mrf.mxu2 }
 0x736   : > { %v6044_v12 = vmax.f32 %v5993_v23, 0.0  ;;  %v5949_v46 = vadd.f32 %v15644_v4, %v5900_v32  ;;  %v5951_v23 = vadd.f32 %v15659_v43, %v5902_v56  ;;  %v13528_v32 = vld [vmem:[#allocation7 + $0x324] sm:$0xf]  ;;  %v12238_v56 = vld [vmem:[#allocation7 + $0x330] sm:$0xf0] }
 0x738   : > { %v15690_v15 = vpop.f32.mrf.mxu0  ;;  %v15692_v50 = vpop.f32.mrf.mxu1 }
 0x73a   : > { %7027 = vmatmul.bf16.gmra.mxu2 %v15574_v14 }
 0x73b   : > { %v5994_v45 = vpop.f32.mrf.mxu3 }
 0x73c   : > { %v5995_v28 = vadd.f32 %v5994_v45, %v5946_v54 }
 0x73d   : > { %v15696_v10 = vpop.f32.mrf.mxu2 }
 0x73e   : > { %v6048_v22 = vmax.f32 %v5995_v28, 0.0 }
 0x740   : > { %v15698_v42 = vpack.c.bf16 %v6048_v22, %v6044_v12  ;;  %v15700_v63 = vpop.f32.mrf.mxu0  ;;  %v15702_v58 = vpop.f32.mrf.mxu1 }
 0x742   : > { %7061 = vmatmul.bf16.gmra.mxu3 %v15698_v42 }
 0x743   : > { %v5997_v29 = vpop.f32.mrf.mxu3  ;;  %6934 = vmatmul.bf16.gmra.mxu0 %v17209_v51  ;;  %6983 = vmatmul.bf16.gmra.mxu1 %v15477_v52 }
 0x744   : > { %v5998_v45 = vadd.f32 %v5997_v29, %v5949_v46  ;;  %v5858_v46 = vadd.f32 %v15664_v30, %v15593_v7 }
 0x745   : > { %v15711_v62 = vpop.f32.mrf.mxu2 }
 0x746   : > { %v6052_v4 = vmax.f32 %v5998_v45, 0.0  ;;  %v5907_v38 = vadd.f32 %v15666_v2, %v5858_v46 }
 0x748   : > { %v15716_v13 = vpop.f32.mrf.mxu0  ;;  %v15718_v54 = vpop.f32.mrf.mxu1 }
 0x74a   : > { %7032 = vmatmul.bf16.gmra.mxu2 %v15595_v6 }
 0x74b   : > { %v5999_v0 = vpop.f32.mrf.mxu3 }
 0x74c   : > { %v6000_v28 = vadd.f32 %v5999_v0, %v5951_v23  ;;  %v12241_v23 = vor.u32 %v13528_v32, %v12238_v56  ;;  %v5905_v0 = vadd.f32 %v15650_v60, %v5856_v44 }
 0x74d   : > { %v15727_v12 = vpop.f32.mrf.mxu2 }
 0x74e   : > { %v6056_v22 = vmax.f32 %v6000_v28, 0.0  ;;  %7240 = vmatpush.bf16.msra.mxu3 %v12241_v23  ;;  %v5954_v28 = vadd.f32 %v15670_v59, %v5905_v0 }
 0x750   : > { %v15732_v19 = vpack.c.bf16 %v6056_v22, %v6052_v4  ;;  %v6900_v43 = vpop.f32.mrf.mxu0  ;;  %v6949_v31 = vpop.f32.mrf.mxu1 }
 0x751   : > { %v6901_v29 = vadd.f32 %v6900_v43, %v15730_v34 }
 0x752   : > { %7066 = vmatmul.bf16.gmra.mxu3 %v15732_v19 }
 0x753   : > { %v6950_v55 = vadd.f32 %v6949_v31, %v6901_v29  ;;  %v6002_v17 = vpop.f32.mrf.mxu3  ;;  %7095 = vmatmul.bf16.vlgmr.msra.gmra.mxu0 %v15259_v16  ;;  %7144 = vmatmul.bf16.vlgmr.msra.gmra.mxu1 %v15374_v61  ;;  %v5956_v29 = vadd.f32 %v15685_v5, %v5907_v38  ;;  %v5861_v5 = vadd.f32 %v15674_v36, %v15593_v7  ;;  %v13524_v38 = vld [vmem:[#allocation7 + $0x304] sm:$0xf] }
 0x754   : > { %v6003_v31 = vadd.f32 %v6002_v17, %v5954_v28  ;;  %v12222_v28 = vld [vmem:[#allocation7 + $0x310] sm:$0xf0] }
 0x755   : > { %v15742_v45 = vpop.f32.mrf.mxu2 }
 0x756   : > { %v6060_v16 = vmax.f32 %v6003_v31, 0.0 }
 0x758   : > { %v6902_v4 = vpop.f32.mrf.mxu0  ;;  %v6951_v43 = vpop.f32.mrf.mxu1 }
 0x759   : > { %v6903_v22 = vadd.f32 %v6902_v4, %v15730_v34  ;;  %v5910_v4 = vadd.f32 %v15676_v41, %v5861_v5 }
 0x75a   : > { %7193 = vmatmul.bf16.vlgmr.msra.gmra.mxu2 %v15491_v37 }
 0x75b   : > { %v6952_v30 = vadd.f32 %v6951_v43, %v6903_v22  ;;  %v6004_v32 = vpop.f32.mrf.mxu3  ;;  %v5959_v43 = vadd.f32 %v15696_v10, %v5910_v4 }
 0x75c   : > { %v6005_v56 = vadd.f32 %v6004_v32, %v5956_v29 }
 0x75d   : > { %v6998_v61 = vpop.f32.mrf.mxu2 }
 0x75e   : > { %v6064_v60 = vmax.f32 %v6005_v56, 0.0  ;;  %v15750_v44 = vadd.f32 %v6998_v61, %v6950_v55  ;;  %v5863_v61 = vadd.f32 %v15690_v15, %v15593_v7 }
 0x760   : > { %v15752_v2 = vpack.c.bf16 %v6064_v60, %v6060_v16  ;;  %v6905_v59 = vpop.f32.mrf.mxu0  ;;  %v6954_v23 = vpop.f32.mrf.mxu1  ;;  %v12225_v16 = vor.u32 %v13524_v38, %v12222_v28  ;;  %v5912_v36 = vadd.f32 %v15692_v50, %v5863_v61  ;;  %v12212_v50 = vld [vmem:[#allocation7 + $0x2e8] sm:$0xf]  ;;  %v13523_v38 = vld [vmem:[#allocation7 + $0x2f4] sm:$0xf0] }
 0x761   : > { %v6906_v46 = vadd.f32 %v6905_v59, %v15730_v34  ;;  %v12213_v10 = vor.u32 %v13523_v38, %v12212_v50 }
 0x762   : > { %7071 = vmatmul.bf16.gmra.mxu3 %v15752_v2  ;;  %v5961_v56 = vadd.f32 %v15711_v62, %v5912_v36  ;;  %v13459_v36 = vld [vmem:[#allocation7 + $0xf4] sm:$0xf0] }
 0x763   : > { %v6955_v17 = vadd.f32 %v6954_v23, %v6906_v46  ;;  %v6007_v0 = vpop.f32.mrf.mxu3  ;;  %7100 = vmatmul.bf16.gmra.mxu0 %v15273_v49  ;;  %7149 = vmatmul.bf16.gmra.mxu1 %v15388_v3 }
 0x764   : > { %7241 = vmatpush.bf16.msra.mxu3 %v12225_v16  ;;  %v6008_v15 = vadd.f32 %v6007_v0, %v5959_v43  ;;  %7381 = vmatpush.bf16.msrb.mxu2 %v12213_v10  ;;  %v5866_v0 = vadd.f32 %v15700_v63, %v15593_v7  ;;  %v12340_v43 = vld [vmem:[#allocation7 + $0x3e8] sm:$0xf] }
 0x765   : > { %v7000_v55 = vpop.f32.mrf.mxu2 }
 0x766   : > { %v15763_v22 = vadd.f32 %v7000_v55, %v6952_v30  ;;  %v6068_v30 = vmax.f32 %v6008_v15, 0.0  ;;  %v13491_v15 = vld [vmem:[#allocation7 + $0x1f4] sm:$0xf0] }
 0x768   : > { %v6907_v29 = vpop.f32.mrf.mxu0  ;;  %v6956_v32 = vpop.f32.mrf.mxu1 }
 0x769   : > { %v6908_v31 = vadd.f32 %v6907_v29, %v15730_v34  ;;  %v5868_v29 = vadd.f32 %v15716_v13, %v15593_v7 }
 0x76a   : > { %7198 = vmatmul.bf16.gmra.mxu2 %v15505_v24 }
 0x76b   : > { %v6957_v60 = vadd.f32 %v6956_v32, %v6908_v31  ;;  %v6009_v59 = vpop.f32.mrf.mxu3  ;;  %v13555_v32 = vld [vmem:[#allocation7 + $0x3f4] sm:$0xf0] }
 0x76c   : > { %v6010_v46 = vadd.f32 %v6009_v59, %v5961_v56  ;;  %v12084_v56 = vld [vmem:[#allocation7 + $0x1e8] sm:$0xf]  ;;  %v12341_v63 = vor.u32 %v13555_v32, %v12340_v43 }
 0x76d   : > { %v7003_v41 = vpop.f32.mrf.mxu2 }
 0x76e   : > { %v6072_v23 = vmax.f32 %v6010_v46, 0.0  ;;  %v15770_v5 = vadd.f32 %v7003_v41, %v6955_v17  ;;  %v11956_v17 = vld [vmem:[#allocation7 + $0xe8] sm:$0xf]  ;;  %v12085_v46 = vor.u32 %v13491_v15, %v12084_v56  ;;  %v5915_v41 = vadd.f32 %v15702_v58, %v5866_v0  ;;  %7430 = vmatpush.bf16.msrb.mxu3 %v12341_v63  ;;  %v13455_v15 = vld [vmem:[#allocation7 + $0xd4] sm:$0xf0] }
 0x76f   : > { %v11957_v31 = vor.u32 %v13459_v36, %v11956_v17  ;;  %v11940_v56 = vld [vmem:[#allocation7 + $0xc8] sm:$0xf]  ;;  %v13551_v63 = vld [vmem:[#allocation7 + $0x3d4] sm:$0xf0] }
 0x770   : > { %v15772_v28 = vpack.c.bf16 %v6072_v23, %v6068_v30  ;;  %v6910_v61 = vpop.f32.mrf.mxu0  ;;  %v6959_v62 = vpop.f32.mrf.mxu1  ;;  %7332 = vmatpush.bf16.msrb.mxu1 %v12085_v46  ;;  %v5917_v23 = vadd.f32 %v15718_v54, %v5868_v29  ;;  %v5964_v7 = vadd.f32 %v15727_v12, %v5915_v41  ;;  %v12068_v46 = vld [vmem:[#allocation7 + $0x1c8] sm:$0xf]  ;;  %v13487_v41 = vld [vmem:[#allocation7 + $0x1d4] sm:$0xf0] }
 0x771   : > { %v6911_v16 = vadd.f32 %v6910_v61, %v15730_v34  ;;  %7283 = vmatpush.bf16.msrb.mxu0 %v11957_v31 }
 0x772   : > { %7076 = vmatmul.bf16.gmra.mxu3 %v15772_v28  ;;  %v5966_v10 = vadd.f32 %v15742_v45, %v5917_v23  ;;  %v12196_v45 = vld [vmem:[#allocation7 + $0x2c8] sm:$0xf] }
 0x773   : > { %v6960_v55 = vadd.f32 %v6959_v62, %v6911_v16  ;;  %v6012_v4 = vpop.f32.mrf.mxu3  ;;  %7105 = vmatmul.bf16.gmra.mxu0 %v17204_v8  ;;  %7154 = vmatmul.bf16.gmra.mxu1 %v15402_v21 }
 0x774   : > { %v6013_v61 = vadd.f32 %v6012_v4, %v5964_v7  ;;  %v13519_v4 = vld [vmem:[#allocation7 + $0x2d4] sm:$0xf0] }
 0x775   : > { %v7005_v59 = vpop.f32.mrf.mxu2  ;;  %v12197_v32 = vor.u32 %v13519_v4, %v12196_v45  ;;  %v11924_v4 = vld [vmem:[#allocation7 + $0xa8] sm:$0xf] }
 0x776   : > { %v15783_v30 = vadd.f32 %v7005_v59, %v6957_v60  ;;  %v6076_v0 = vmax.f32 %v6013_v61, 0.0  ;;  %v12324_v59 = vld [vmem:[#allocation7 + $0x3c8] sm:$0xf] }
 0x777   : > { %7382 = vmatpush.bf16.msrb.mxu2 %v12197_v32  ;;  %v12325_v7 = vor.u32 %v13551_v63, %v12324_v59  ;;  %v13451_v32 = vld [vmem:[#allocation7 + $0xb4] sm:$0xf0]  ;;  %v12052_v59 = vld [vmem:[#allocation7 + $0x1a8] sm:$0xf] }
 0x778   : > { %v6912_v13 = vpop.f32.mrf.mxu0  ;;  %v6961_v38 = vpop.f32.mrf.mxu1 }
 0x779   : > { %v6913_v50 = vadd.f32 %v6912_v13, %v15730_v34  ;;  %v12069_v13 = vor.u32 %v13487_v41, %v12068_v46  ;;  %7431 = vmatpush.bf16.msrb.mxu3 %v12325_v7 }
 0x77a   : > { %7203 = vmatmul.bf16.gmra.mxu2 %v15519_v27 }
 0x77b   : > { %v6962_v16 = vadd.f32 %v6961_v38, %v6913_v50  ;;  %v6014_v58 = vpop.f32.mrf.mxu3  ;;  %7333 = vmatpush.bf16.msrb.mxu1 %v12069_v13 }
 0x77c   : > { %v6015_v60 = vadd.f32 %v6014_v58, %v5966_v10 }
 0x77d   : > { %v7008_v62 = vpop.f32.mrf.mxu2 }
 0x77e   : > { %v6080_v17 = vmax.f32 %v6015_v60, 0.0  ;;  %v15790_v36 = vadd.f32 %v7008_v62, %v6960_v55  ;;  %v11941_v55 = vor.u32 %v13455_v15, %v11940_v56  ;;  %v12308_v56 = vld [vmem:[#allocation7 + $0x3a8] sm:$0xf]  ;;  %v11925_v15 = vor.u32 %v13451_v32, %v11924_v4 }
 0x780   : > { %v15792_v54 = vpack.c.bf16 %v6080_v17, %v6076_v0  ;;  %v6915_v12 = vpop.f32.mrf.mxu0  ;;  %v6964_v29 = vpop.f32.mrf.mxu1  ;;  %7284 = vmatpush.bf16.msrb.mxu0 %v11941_v55  ;;  %v13483_v55 = vld [vmem:[#allocation7 + $0x1b4] sm:$0xf0] }
 0x781   : > { %v6916_v43 = vadd.f32 %v6915_v12, %v15730_v34 }
 0x782   : > { %7081 = vmatmul.bf16.gmra.mxu3 %v15792_v54 }
 0x783   : > { %v6965_v31 = vadd.f32 %v6964_v29, %v6916_v43  ;;  %7110 = vmatmul.bf16.gmra.mxu0 %v17205_v18  ;;  %7159 = vmatmul.bf16.gmra.mxu1 %v15416_v48  ;;  %v13515_v43 = vld [vmem:[#allocation7 + $0x2b4] sm:$0xf0] }
 0x784   : > { %7285 = vmatpush.bf16.msrb.mxu0 %v11925_v15  ;;  %v13479_v15 = vld [vmem:[#allocation7 + $0x194] sm:$0xf0] }
 0x785   : > { %v7010_v23 = vpop.f32.mrf.mxu2 }
 0x786   : > { %v15798_v50 = vadd.f32 %v7010_v23, %v6962_v16  ;;  %v12180_v16 = vld [vmem:[#allocation7 + $0x2a8] sm:$0xf]  ;;  %v12053_v23 = vor.u32 %v13483_v55, %v12052_v59 }
 0x787   : > { %v12181_v45 = vor.u32 %v13515_v43, %v12180_v16  ;;  %v13447_v43 = vld [vmem:[#allocation7 + $0x94] sm:$0xf0] }
 0x788   : > { %v6917_v38 = vpop.f32.mrf.mxu0  ;;  %v6966_v61 = vpop.f32.mrf.mxu1  ;;  %7334 = vmatpush.bf16.msrb.mxu1 %v12053_v23  ;;  %v12292_v23 = vld [vmem:[#allocation7 + $0x388] sm:$0xf] }
 0x789   : > { %v6918_v10 = vadd.f32 %v6917_v38, %v15730_v34  ;;  %7383 = vmatpush.bf16.msrb.mxu2 %v12181_v45  ;;  %v12036_v45 = vld [vmem:[#allocation7 + $0x188] sm:$0xf] }
 0x78a   : > { %7208 = vmatmul.bf16.gmra.mxu2 %v15529_v57  ;;  %v12037_v55 = vor.u32 %v13479_v15, %v12036_v45  ;;  %v12004_v15 = vld [vmem:[#allocation7 + $0x148] sm:$0xf] }
 0x78b   : > { %v6967_v58 = vadd.f32 %v6966_v61, %v6918_v10 }
 0x78c   : > { %7335 = vmatpush.bf16.msrb.mxu1 %v12037_v55  ;;  %v13471_v55 = vld [vmem:[#allocation7 + $0x154] sm:$0xf0] }
 0x78d   : > { %v7013_v60 = vpop.f32.mrf.mxu2 }
 0x78e   : > { %v15802_v62 = vadd.f32 %v7013_v60, %v6965_v31  ;;  %v13547_v31 = vld [vmem:[#allocation7 + $0x3b4] sm:$0xf0] }
 0x78f   : > { %v12309_v41 = vor.u32 %v13547_v31, %v12308_v56 }
 0x790   : > { %v6920_v0 = vpop.f32.mrf.mxu0  ;;  %v6969_v12 = vpop.f32.mrf.mxu1 }
 0x791   : > { %v6921_v17 = vadd.f32 %v6920_v0, %v15730_v34  ;;  %7432 = vmatpush.bf16.msrb.mxu3 %v12309_v41 }
 0x792   : > { %7242 = vmatmul.bf16.vlgmr.msra.gmra.mxu3 %v15620_v25 }
 0x793   : > { %v6970_v29 = vadd.f32 %v6969_v12, %v6921_v17  ;;  %7115 = vmatmul.bf16.gmra.mxu0 %v17206_v9  ;;  %7164 = vmatmul.bf16.gmra.mxu1 %v15436_v40 }
 0x795   : > { %v7015_v63 = vpop.f32.mrf.mxu2  ;;  %v7047_v46 = vpop.f32.mrf.mxu3 }
 0x796   : > { %v15808_v7 = vadd.f32 %v7015_v63, %v6967_v58  ;;  %v7048_v13 = vadd.f32 %v7047_v46, %v15750_v44  ;;  %v11908_v58 = vld [vmem:[#allocation7 + $0x88] sm:$0xf]  ;;  %v13511_v46 = vld [vmem:[#allocation7 + $0x294] sm:$0xf0] }
 0x797   : > { %v11909_v56 = vor.u32 %v13447_v43, %v11908_v58 }
 0x798   : > { %v6922_v38 = vpop.f32.mrf.mxu0  ;;  %v6971_v61 = vpop.f32.mrf.mxu1  ;;  %v7675_v44 = vmax.f32 %v7048_v13, 0.0  ;;  %v13543_v13 = vld [vmem:[#allocation7 + $0x394] sm:$0xf0] }
 0x799   : > { %v6923_v10 = vadd.f32 %v6922_v38, %v15730_v34  ;;  %7286 = vmatpush.bf16.msrb.mxu0 %v11909_v56  ;;  %v11892_v38 = vld [vmem:[#allocation7 + $0x68] sm:$0xf]  ;;  %v13439_v56 = vld [vmem:[#allocation7 + $0x54] sm:$0xf0] }
 0x79a   : > { %7213 = vmatmul.bf16.gmra.mxu2 %v15539_v47 }
 0x79b   : > { %v6972_v60 = vadd.f32 %v6971_v61, %v6923_v10  ;;  %v12293_v10 = vor.u32 %v13543_v13, %v12292_v23  ;;  %v13443_v61 = vld [vmem:[#allocation7 + $0x74] sm:$0xf0]  ;;  %v12005_v23 = vor.u32 %v13471_v55, %v12004_v15 }
 0x79c   : > { %v11893_v43 = vor.u32 %v13443_v61, %v11892_v38  ;;  %v13507_v13 = vld [vmem:[#allocation7 + $0x274] sm:$0xf0]  ;;  %v11988_v61 = vld [vmem:[#allocation7 + $0x128] sm:$0xf] }
 0x79d   : > { %v7018_v0 = vpop.f32.mrf.mxu2  ;;  %v7049_v17 = vpop.f32.mrf.mxu3  ;;  %7433 = vmatpush.bf16.msrb.mxu3 %v12293_v10  ;;  %v13435_v10 = vld [vmem:[#allocation7 + $0x34] sm:$0xf0] }
 0x79e   : > { %v15813_v12 = vadd.f32 %v7018_v0, %v6970_v29  ;;  %v7050_v16 = vadd.f32 %v7049_v17, %v15763_v22  ;;  %v12164_v29 = vld [vmem:[#allocation7 + $0x288] sm:$0xf]  ;;  %v13475_v17 = vld [vmem:[#allocation7 + $0x174] sm:$0xf0]  ;;  %7287 = vmatpush.bf16.msrb.mxu0 %v11893_v43 }
 0x79f   : > { %v12165_v41 = vor.u32 %v13511_v46, %v12164_v29  ;;  %v12020_v0 = vld [vmem:[#allocation7 + $0x168] sm:$0xf]  ;;  %v13431_v55 = vld [vmem:[#allocation7 + $0x14] sm:$0xf0] }
 0x7a0   : > { %v7679_v4 = vmax.f32 %v7050_v16, 0.0  ;;  %v6925_v32 = vpop.f32.mrf.mxu0  ;;  %v6974_v59 = vpop.f32.mrf.mxu1  ;;  %v12021_v45 = vor.u32 %v13475_v17, %v12020_v0  ;;  %v13467_v17 = vld [vmem:[#allocation7 + $0x134] sm:$0xf0] }
 0x7a1   : > { %v6926_v31 = vadd.f32 %v6925_v32, %v15730_v34  ;;  %7384 = vmatpush.bf16.msrb.mxu2 %v12165_v41  ;;  %v11876_v32 = vld [vmem:[#allocation7 + $0x48] sm:$0xf]  ;;  %v11989_v43 = vor.u32 %v13467_v17, %v11988_v61  ;;  %v13499_v17 = vld [vmem:[#allocation7 + $0x234] sm:$0xf0] }
 0x7a2   : > { %v15817_v63 = vpack.c.bf16 %v7679_v4, %v7675_v44  ;;  %7247 = vmatmul.bf16.gmra.mxu3 %v15646_v26  ;;  %7336 = vmatpush.bf16.msrb.mxu1 %v12021_v45  ;;  %v12148_v41 = vld [vmem:[#allocation7 + $0x268] sm:$0xf] }
 0x7a3   : > { %v6975_v22 = vadd.f32 %v6974_v59, %v6926_v31  ;;  %7120 = vmatmul.bf16.gmra.mxu0 %v17207_v53  ;;  %7169 = vmatmul.bf16.gmra.mxu1 %v15450_v20  ;;  %v11877_v59 = vor.u32 %v13439_v56, %v11876_v32  ;;  %v12132_v45 = vld [vmem:[#allocation7 + $0x248] sm:$0xf]  ;;  %v13503_v32 = vld [vmem:[#allocation7 + $0x254] sm:$0xf0] }
 0x7a4   : > { %17210 = vst [vmem:[#allocation14_spill] sm:$0xff] %v15817_v63 }
 0x7a5   : > { %v7020_v16 = vpop.f32.mrf.mxu2  ;;  %v7052_v58 = vpop.f32.mrf.mxu3  ;;  %7288 = vmatpush.bf16.msrb.mxu0 %v11877_v59  ;;  %v11844_v59 = vld [vmem:[#allocation7 + $0x8] sm:$0xf] }
 0x7a6   : > { %v15822_v44 = vadd.f32 %v7020_v16, %v6972_v60  ;;  %v7053_v4 = vadd.f32 %v7052_v58, %v15770_v5  ;;  %v12149_v60 = vor.u32 %v13507_v13, %v12148_v41  ;;  %7337 = vmatpush.bf16.msrb.mxu1 %v12005_v23  ;;  %v11860_v5 = vld [vmem:[#allocation7 + $0x28] sm:$0xf]  ;;  %v11845_v13 = vor.u32 %v13431_v55, %v11844_v59 }
 0x7a7   : > { %v11861_v0 = vor.u32 %v13435_v10, %v11860_v5 }
 0x7a8   : > { %v6927_v31 = vpop.f32.mrf.mxu0  ;;  %v6976_v46 = vpop.f32.mrf.mxu1  ;;  %7385 = vmatpush.bf16.msrb.mxu2 %v12149_v60  ;;  %v13463_v60 = vld [vmem:[#allocation7 + $0x114] sm:$0xf0] }
 0x7a9   : > { %v6928_v29 = vadd.f32 %v6927_v31, %v15730_v34  ;;  %v12133_v31 = vor.u32 %v13503_v32, %v12132_v45  ;;  %7289 = vmatpush.bf16.msrb.mxu0 %v11861_v0 }
 0x7aa   : > { %7218 = vmatmul.bf16.gmra.mxu2 %v15556_v1  ;;  %7338 = vmatpush.bf16.msrb.mxu1 %v11989_v43 }
 0x7ab   : > { %v6977_v38 = vadd.f32 %v6976_v46, %v6928_v29  ;;  %v11972_v29 = vld [vmem:[#allocation7 + $0x108] sm:$0xf]  ;;  %v7683_v46 = vmax.f32 %v7053_v4, 0.0 }
 0x7ac   : > { %7386 = vmatpush.bf16.msrb.mxu2 %v12133_v31  ;;  %v11973_v61 = vor.u32 %v13463_v60, %v11972_v29  ;;  %v12276_v4 = vld [vmem:[#allocation7 + $0x368] sm:$0xf]  ;;  %v13495_v31 = vld [vmem:[#allocation7 + $0x214] sm:$0xf0] }
 0x7ad   : > { %v7023_v16 = vpop.f32.mrf.mxu2  ;;  %v7054_v58 = vpop.f32.mrf.mxu3  ;;  %7290 = vmatpush.bf16.msrb.mxu0 %v11845_v13 }
 0x7ae   : > { %v15827_v56 = vadd.f32 %v7023_v16, %v6975_v22  ;;  %v7055_v15 = vadd.f32 %v7054_v58, %v15783_v30  ;;  %v12116_v22 = vld [vmem:[#allocation7 + $0x228] sm:$0xf]  ;;  %7339 = vmatpush.bf16.msrb.mxu1 %v11973_v61  ;;  %v13539_v58 = vld [vmem:[#allocation7 + $0x374] sm:$0xf0] }
 0x7af   : > { %v12117_v30 = vor.u32 %v13499_v17, %v12116_v22  ;;  %v12277_v43 = vor.u32 %v13539_v58, %v12276_v4 }
 0x7b0   : > { %v7687_v23 = vmax.f32 %v7055_v15, 0.0  ;;  %v6930_v41 = vpop.f32.mrf.mxu0  ;;  %v6979_v10 = vpop.f32.mrf.mxu1  ;;  %v12100_v15 = vld [vmem:[#allocation7 + $0x208] sm:$0xf] }
 0x7b1   : > { %v6931_v5 = vadd.f32 %v6930_v41, %v15730_v34  ;;  %7387 = vmatpush.bf16.msrb.mxu2 %v12117_v30  ;;  %7434 = vmatpush.bf16.msrb.mxu3 %v12277_v43  ;;  %v12101_v29 = vor.u32 %v13495_v31, %v12100_v15  ;;  %v12260_v43 = vld [vmem:[#allocation7 + $0x348] sm:$0xf] }
 0x7b2   : > { %v15831_v16 = vpack.c.bf16 %v7687_v23, %v7683_v46  ;;  %7252 = vmatmul.bf16.gmra.mxu3 %v15672_v39 }
 0x7b3   : > { %v6980_v0 = vadd.f32 %v6979_v10, %v6931_v5  ;;  %7125 = vmatmul.bf16.gmra.mxu0 %v17208_v11  ;;  %7174 = vmatmul.bf16.gmra.mxu1 %v15463_v33 }
 0x7b4   : > { %17211 = vst [vmem:[#allocation16_spill] sm:$0xff] %v15831_v16 }
 0x7b5   : > { %v7025_v45 = vpop.f32.mrf.mxu2  ;;  %v7057_v32 = vpop.f32.mrf.mxu3  ;;  %7388 = vmatpush.bf16.msrb.mxu2 %v12101_v29 }
 0x7b6   : > { %v15836_v59 = vadd.f32 %v7025_v45, %v6977_v38  ;;  %v7058_v55 = vadd.f32 %v7057_v32, %v15790_v36  ;;  %v13535_v45 = vld [vmem:[#allocation7 + $0x354] sm:$0xf0] }
 0x7b8   : > { %v6932_v46 = vpop.f32.mrf.mxu0  ;;  %v6981_v41 = vpop.f32.mrf.mxu1  ;;  %v7691_v38 = vmax.f32 %v7058_v55, 0.0 }
 0x7b9   : > { %v6933_v23 = vadd.f32 %v6932_v46, %v15730_v34 }
 0x7ba   : > { %7223 = vmatmul.bf16.gmra.mxu2 %v15574_v14 }
 0x7bb   : > { %v6982_v13 = vadd.f32 %v6981_v41, %v6933_v23 }
 0x7bd   : > { %v7028_v60 = vpop.f32.mrf.mxu2  ;;  %v7059_v5 = vpop.f32.mrf.mxu3 }
 0x7be   : > { %v15841_v10 = vadd.f32 %v7028_v60, %v6980_v0  ;;  %v7060_v61 = vadd.f32 %v7059_v5, %v15798_v50  ;;  %v12261_v0 = vor.u32 %v13535_v45, %v12260_v43  ;;  %v15856_v5 = vperm.slane %v15725_v35, 1  ;;  %v17214_v43 = vld [vmem:[#allocation13_spill] sm:$0xff]  ;;  %v12244_v45 = vld [vmem:[#allocation7 + $0x328] sm:$0xf]  ;;  %v13531_v35 = vld [vmem:[#allocation7 + $0x334] sm:$0xf0] }
 0x7c0   : > { %v7695_v22 = vmax.f32 %v7060_v61, 0.0  ;;  %v6935_v17 = vpop.f32.mrf.mxu0  ;;  %v6984_v30 = vpop.f32.mrf.mxu1  ;;  %7435 = vmatpush.bf16.msrb.mxu3 %v12261_v0  ;;  %v17215_v0 = vld [vmem:[#allocation20_spill] sm:$0xff] }
 0x7c1   : > { %v6936_v36 = vadd.f32 %v6935_v17, %v15730_v34 }
 0x7c2   : > { %v15845_v4 = vpack.c.bf16 %v7695_v22, %v7691_v38  ;;  %7257 = vmatmul.bf16.gmra.mxu3 %v15698_v42 }
 0x7c3   : > { %v6985_v58 = vadd.f32 %v6984_v30, %v6936_v36  ;;  %7130 = vmatmul.bf16.gmra.mxu0 %v17209_v51  ;;  %7179 = vmatmul.bf16.gmra.mxu1 %v15477_v52 }
 0x7c4   : > { %17212 = vst [vmem:[#allocation15_spill] sm:$0xff] %v15845_v4 }
 0x7c5   : > { %v7030_v32 = vpop.f32.mrf.mxu2  ;;  %v7062_v50 = vpop.f32.mrf.mxu3 }
 0x7c6   : > { %v15850_v15 = vadd.f32 %v7030_v32, %v6982_v13  ;;  %v7063_v31 = vadd.f32 %v7062_v50, %v15802_v62 }
 0x7c8   : > { %v6937_v55 = vpop.f32.mrf.mxu0  ;;  %v6986_v46 = vpop.f32.mrf.mxu1  ;;  %v7699_v38 = vmax.f32 %v7063_v31, 0.0 }
 0x7c9   : > { %v6938_v29 = vadd.f32 %v6937_v55, %v15730_v34 }
 0x7ca   : > { %7228 = vmatmul.bf16.gmra.mxu2 %v15595_v6 }
 0x7cb   : > { %v6987_v23 = vadd.f32 %v6986_v46, %v6938_v29 }
 0x7cd   : > { %v7033_v41 = vpop.f32.mrf.mxu2  ;;  %v7064_v60 = vpop.f32.mrf.mxu3 }
 0x7ce   : > { %v15858_v61 = vadd.f32 %v7033_v41, %v6985_v58  ;;  %v7065_v13 = vadd.f32 %v7064_v60, %v15808_v7  ;;  %v12245_v58 = vor.u32 %v13531_v35, %v12244_v45 }
 0x7d0   : > { %v7703_v22 = vmax.f32 %v7065_v13, 0.0  ;;  %v7096_v62 = vpop.f32.mrf.mxu0  ;;  %v7145_v36 = vpop.f32.mrf.mxu1  ;;  %7436 = vmatpush.bf16.msrb.mxu3 %v12245_v58  ;;  %v12228_v58 = vld [vmem:[#allocation7 + $0x308] sm:$0xf] }
 0x7d1   : > { %v7097_v17 = vadd.f32 %v7096_v62, %v15856_v5 }
 0x7d2   : > { %v15862_v34 = vpack.c.bf16 %v7703_v22, %v7699_v38  ;;  %7262 = vmatmul.bf16.gmra.mxu3 %v15732_v19 }
 0x7d3   : > { %v7146_v30 = vadd.f32 %v7145_v36, %v7097_v17  ;;  %7291 = vmatmul.bf16.vlgmr.msrb.gmra.mxu0 %v17214_v43  ;;  %7340 = vmatmul.bf16.vlgmr.msrb.gmra.mxu1 %v17215_v0 }
 0x7d4   : > { %17213 = vst [vmem:[#allocation17_spill] sm:$0xff] %v15862_v34 }
 0x7d5   : > { %v7035_v32 = vpop.f32.mrf.mxu2  ;;  %v7067_v7 = vpop.f32.mrf.mxu3 }
 0x7d6   : > { %v15867_v50 = vadd.f32 %v7035_v32, %v6987_v23  ;;  %v7068_v31 = vadd.f32 %v7067_v7, %v15813_v12  ;;  %v13527_v32 = vld [vmem:[#allocation7 + $0x314] sm:$0xf0] }
 0x7d8   : > { %v7098_v55 = vpop.f32.mrf.mxu0  ;;  %v7147_v46 = vpop.f32.mrf.mxu1  ;;  %v7707_v62 = vmax.f32 %v7068_v31, 0.0 }
 0x7d9   : > { %v7099_v29 = vadd.f32 %v7098_v55, %v15856_v5 }
 0x7da   : > { %7389 = vmatmul.bf16.vlgmr.msrb.gmra.mxu2 %v15491_v37 }
 0x7db   : > { %v7148_v41 = vadd.f32 %v7147_v46, %v7099_v29 }
 0x7dd   : > { %v7069_v60 = vpop.f32.mrf.mxu3  ;;  %v7194_v13 = vpop.f32.mrf.mxu2 }
 0x7de   : > { %v7070_v38 = vadd.f32 %v7069_v60, %v15822_v44  ;;  %v15873_v22 = vadd.f32 %v7194_v13, %v7146_v30  ;;  %v12229_v44 = vor.u32 %v13527_v32, %v12228_v58 }
 0x7e0   : > { %v7711_v17 = vmax.f32 %v7070_v38, 0.0  ;;  %v7101_v23 = vpop.f32.mrf.mxu0  ;;  %v7150_v12 = vpop.f32.mrf.mxu1  ;;  %7437 = vmatpush.bf16.msrb.mxu3 %v12229_v44  ;;  %v13521_v44 = vld [vmem:[#allocation7 + $0x2ec] sm:$0xf] }
 0x7e1   : > { %v7102_v36 = vadd.f32 %v7101_v23, %v15856_v5 }
 0x7e2   : > { %v15876_v45 = vpack.c.bf16 %v7711_v17, %v7707_v62  ;;  %7267 = vmatmul.bf16.gmra.mxu3 %v15752_v2 }
 0x7e3   : > { %v7151_v35 = vadd.f32 %v7150_v12, %v7102_v36  ;;  %7296 = vmatmul.bf16.gmra.mxu0 %v15273_v49  ;;  %7345 = vmatmul.bf16.gmra.mxu1 %v15388_v3 }
 0x7e4   : > { %17216 = vst [vmem:[#allocation18_spill] sm:$0xff] %v15876_v45 }
 0x7e5   : > { %v7072_v30 = vpop.f32.mrf.mxu3  ;;  %v7196_v7 = vpop.f32.mrf.mxu2 }
 0x7e6   : > { %v7073_v31 = vadd.f32 %v7072_v30, %v15827_v56  ;;  %v15882_v55 = vadd.f32 %v7196_v7, %v7148_v41  ;;  %v12214_v30 = vld [vmem:[#allocation7 + $0x2f8] sm:$0xf0] }
 0x7e8   : > { %v7103_v29 = vpop.f32.mrf.mxu0  ;;  %v7152_v60 = vpop.f32.mrf.mxu1  ;;  %v7715_v36 = vmax.f32 %v7073_v31, 0.0 }
 0x7e9   : > { %v7104_v46 = vadd.f32 %v7103_v29, %v15856_v5  ;;  %v12217_v29 = vor.u32 %v13521_v44, %v12214_v30 }
 0x7ea   : > { %7394 = vmatmul.bf16.gmra.mxu2 %v15505_v24 }
 0x7eb   : > { %v7153_v13 = vadd.f32 %v7152_v60, %v7104_v46  ;;  %v13457_v46 = vld [vmem:[#allocation7 + $0xec] sm:$0xf]  ;;  %v12342_v60 = vld [vmem:[#allocation7 + $0x3f8] sm:$0xf0]  ;;  %7577 = vmatpush.bf16.msra.mxu2 %v12217_v29 }
 0x7ed   : > { %v7074_v38 = vpop.f32.mrf.mxu3  ;;  %v7199_v62 = vpop.f32.mrf.mxu2 }
 0x7ee   : > { %v7075_v17 = vadd.f32 %v7074_v38, %v15836_v59  ;;  %v15887_v23 = vadd.f32 %v7199_v62, %v7151_v35  ;;  %v11958_v59 = vld [vmem:[#allocation7 + $0xf8] sm:$0xf0]  ;;  %v13553_v35 = vld [vmem:[#allocation7 + $0x3ec] sm:$0xf] }
 0x7ef   : > { %v11961_v31 = vor.u32 %v13457_v46, %v11958_v59  ;;  %v13489_v38 = vld [vmem:[#allocation7 + $0x1ec] sm:$0xf]  ;;  %v12086_v62 = vld [vmem:[#allocation7 + $0x1f8] sm:$0xf0] }
 0x7f0   : > { %v7719_v12 = vmax.f32 %v7075_v17, 0.0  ;;  %v7106_v58 = vpop.f32.mrf.mxu0  ;;  %v7155_v41 = vpop.f32.mrf.mxu1 }
 0x7f1   : > { %v7107_v56 = vadd.f32 %v7106_v58, %v15856_v5  ;;  %v12089_v58 = vor.u32 %v13489_v38, %v12086_v62  ;;  %7479 = vmatpush.bf16.msra.mxu0 %v11961_v31 }
 0x7f2   : > { %v15890_v32 = vpack.c.bf16 %v7719_v12, %v7715_v36  ;;  %7272 = vmatmul.bf16.gmra.mxu3 %v15772_v28  ;;  %v12345_v12 = vor.u32 %v13553_v35, %v12342_v60 }
 0x7f3   : > { %v7156_v7 = vadd.f32 %v7155_v41, %v7107_v56  ;;  %7301 = vmatmul.bf16.gmra.mxu0 %v17204_v8  ;;  %7350 = vmatmul.bf16.gmra.mxu1 %v15402_v21 }
 0x7f4   : > { %17217 = vst [vmem:[#allocation19_spill] sm:$0xff] %v15890_v32  ;;  %7626 = vmatpush.bf16.msra.mxu3 %v12345_v12  ;;  %7528 = vmatpush.bf16.msra.mxu1 %v12089_v58 }
 0x7f5   : > { %v7077_v17 = vpop.f32.mrf.mxu3  ;;  %v7201_v36 = vpop.f32.mrf.mxu2 }
 0x7f6   : > { %v7078_v32 = vadd.f32 %v7077_v17, %v15841_v10  ;;  %v15896_v56 = vadd.f32 %v7201_v36, %v7153_v13  ;;  %v13517_v17 = vld [vmem:[#allocation7 + $0x2cc] sm:$0xf]  ;;  %v12198_v36 = vld [vmem:[#allocation7 + $0x2d8] sm:$0xf0] }
 0x7f7   : > { %v12201_v58 = vor.u32 %v13517_v17, %v12198_v36 }
 0x7f8   : > { %v7108_v41 = vpop.f32.mrf.mxu0  ;;  %v7157_v30 = vpop.f32.mrf.mxu1  ;;  %v7723_v60 = vmax.f32 %v7078_v32, 0.0 }
 0x7f9   : > { %v7109_v44 = vadd.f32 %v7108_v41, %v15856_v5  ;;  %v13453_v41 = vld [vmem:[#allocation7 + $0xcc] sm:$0xf]  ;;  %7578 = vmatpush.bf16.msra.mxu2 %v12201_v58 }
 0x7fa   : > { %7399 = vmatmul.bf16.gmra.mxu2 %v15519_v27 }
 0x7fb   : > { %v7158_v46 = vadd.f32 %v7157_v30, %v7109_v44  ;;  %v13485_v44 = vld [vmem:[#allocation7 + $0x1cc] sm:$0xf]  ;;  %v12070_v30 = vld [vmem:[#allocation7 + $0x1d8] sm:$0xf0] }
 0x7fd   : > { %v7079_v59 = vpop.f32.mrf.mxu3  ;;  %v7204_v45 = vpop.f32.mrf.mxu2 }
 0x7fe   : > { %v7080_v29 = vadd.f32 %v7079_v59, %v15850_v15  ;;  %v15901_v35 = vadd.f32 %v7204_v45, %v7156_v7  ;;  %v11942_v15 = vld [vmem:[#allocation7 + $0xd8] sm:$0xf0]  ;;  %v13549_v45 = vld [vmem:[#allocation7 + $0x3cc] sm:$0xf] }
 0x7ff   : > { %v11945_v32 = vor.u32 %v13453_v41, %v11942_v15  ;;  %v12326_v7 = vld [vmem:[#allocation7 + $0x3d8] sm:$0xf0] }
 0x800   : > { %v7727_v10 = vmax.f32 %v7080_v29, 0.0  ;;  %v7111_v13 = vpop.f32.mrf.mxu0  ;;  %v7160_v38 = vpop.f32.mrf.mxu1 }
 0x801   : > { %v7112_v31 = vadd.f32 %v7111_v13, %v15856_v5  ;;  %7480 = vmatpush.bf16.msra.mxu0 %v11945_v32 }
 0x802   : > { %v15904_v62 = vpack.c.bf16 %v7727_v10, %v7723_v60  ;;  %7277 = vmatmul.bf16.gmra.mxu3 %v15792_v54  ;;  %v12329_v60 = vor.u32 %v13549_v45, %v12326_v7  ;;  %v12073_v10 = vor.u32 %v13485_v44, %v12070_v30 }
 0x803   : > { %v7161_v12 = vadd.f32 %v7160_v38, %v7112_v31  ;;  %7306 = vmatmul.bf16.gmra.mxu0 %v17205_v18  ;;  %7355 = vmatmul.bf16.gmra.mxu1 %v15416_v48 }
 0x804   : > { %17218 = vst [vmem:[#allocation13_spill] sm:$0xff] %v15904_v62  ;;  %7627 = vmatpush.bf16.msra.mxu3 %v12329_v60  ;;  %7529 = vmatpush.bf16.msra.mxu1 %v12073_v10 }
 0x805   : > { %v7082_v59 = vpop.f32.mrf.mxu3  ;;  %v7206_v29 = vpop.f32.mrf.mxu2 }
 0x806   : > { %v7083_v13 = vadd.f32 %v7082_v59, %v15858_v61  ;;  %v15910_v31 = vadd.f32 %v7206_v29, %v7158_v46  ;;  %v13513_v59 = vld [vmem:[#allocation7 + $0x2ac] sm:$0xf]  ;;  %v12182_v29 = vld [vmem:[#allocation7 + $0x2b8] sm:$0xf0] }
 0x807   : > { %v12185_v10 = vor.u32 %v13513_v59, %v12182_v29 }
 0x808   : > { %v7113_v38 = vpop.f32.mrf.mxu0  ;;  %v7162_v36 = vpop.f32.mrf.mxu1  ;;  %v7731_v7 = vmax.f32 %v7083_v13, 0.0  ;;  %v12310_v13 = vld [vmem:[#allocation7 + $0x3b8] sm:$0xf0] }
 0x809   : > { %v7114_v17 = vadd.f32 %v7113_v38, %v15856_v5  ;;  %v13449_v38 = vld [vmem:[#allocation7 + $0xac] sm:$0xf]  ;;  %7579 = vmatpush.bf16.msra.mxu2 %v12185_v10 }
 0x80a   : > { %7404 = vmatmul.bf16.gmra.mxu2 %v15529_v57 }
 0x80b   : > { %v7163_v41 = vadd.f32 %v7162_v36, %v7114_v17  ;;  %v13481_v17 = vld [vmem:[#allocation7 + $0x1ac] sm:$0xf]  ;;  %v12054_v36 = vld [vmem:[#allocation7 + $0x1b8] sm:$0xf0] }
 0x80d   : > { %v7084_v15 = vpop.f32.mrf.mxu3  ;;  %v7209_v62 = vpop.f32.mrf.mxu2 }
 0x80e   : > { %v7085_v58 = vadd.f32 %v7084_v15, %v15867_v50  ;;  %v15915_v45 = vadd.f32 %v7209_v62, %v7161_v12  ;;  %v11926_v50 = vld [vmem:[#allocation7 + $0xb8] sm:$0xf0]  ;;  %v13545_v62 = vld [vmem:[#allocation7 + $0x3ac] sm:$0xf] }
 0x80f   : > { %v11929_v12 = vor.u32 %v13449_v38, %v11926_v50 }
 0x810   : > { %v7735_v61 = vmax.f32 %v7085_v58, 0.0  ;;  %v7116_v46 = vpop.f32.mrf.mxu0  ;;  %v7165_v44 = vpop.f32.mrf.mxu1 }
 0x811   : > { %v7117_v32 = vadd.f32 %v7116_v46, %v15856_v5  ;;  %7481 = vmatpush.bf16.msra.mxu0 %v11929_v12 }
 0x812   : > { %v15918_v30 = vpack.c.bf16 %v7735_v61, %v7731_v7  ;;  %7438 = vmatmul.bf16.vlgmr.msrb.gmra.mxu3 %v15620_v25  ;;  %v12313_v7 = vor.u32 %v13545_v62, %v12310_v13  ;;  %v12057_v61 = vor.u32 %v13481_v17, %v12054_v36  ;;  %v11910_v62 = vld [vmem:[#allocation7 + $0x98] sm:$0xf0]  ;;  %v13477_v13 = vld [vmem:[#allocation7 + $0x18c] sm:$0xf] }
 0x813   : > { %v7166_v60 = vadd.f32 %v7165_v44, %v7117_v32  ;;  %7311 = vmatmul.bf16.gmra.mxu0 %v17206_v9  ;;  %7360 = vmatmul.bf16.gmra.mxu1 %v15436_v40 }
 0x814   : > { %17219 = vst [vmem:[#allocation20_spill] sm:$0xff] %v15918_v30  ;;  %7628 = vmatpush.bf16.msra.mxu3 %v12313_v7  ;;  %7530 = vmatpush.bf16.msra.mxu1 %v12057_v61 }
 0x815   : > { %v7211_v15 = vpop.f32.mrf.mxu2  ;;  %v7243_v58 = vpop.f32.mrf.mxu3 }
 0x816   : > { %v15923_v46 = vadd.f32 %v7211_v15, %v7163_v41  ;;  %v7244_v32 = vadd.f32 %v7243_v58, %v15873_v22  ;;  %v13445_v41 = vld [vmem:[#allocation7 + $0x8c] sm:$0xf]  ;;  %v12038_v15 = vld [vmem:[#allocation7 + $0x198] sm:$0xf0] }
 0x817   : > { %v11913_v36 = vor.u32 %v13445_v41, %v11910_v62  ;;  %v12041_v61 = vor.u32 %v13477_v13, %v12038_v15  ;;  %v11894_v41 = vld [vmem:[#allocation7 + $0x78] sm:$0xf0]  ;;  %v13473_v62 = vld [vmem:[#allocation7 + $0x16c] sm:$0xf] }
 0x818   : > { %v7118_v44 = vpop.f32.mrf.mxu0  ;;  %v7167_v29 = vpop.f32.mrf.mxu1  ;;  %v7676_v22 = vmax.f32 %v7244_v32, 0.0  ;;  %v13541_v32 = vld [vmem:[#allocation7 + $0x38c] sm:$0xf]  ;;  %v12022_v13 = vld [vmem:[#allocation7 + $0x178] sm:$0xf0] }
 0x819   : > { %v7119_v59 = vadd.f32 %v7118_v44, %v15856_v5  ;;  %7482 = vmatpush.bf16.msra.mxu0 %v11913_v36  ;;  %7531 = vmatpush.bf16.msra.mxu1 %v12041_v61  ;;  %v12025_v15 = vor.u32 %v13473_v62, %v12022_v13  ;;  %v11878_v61 = vld [vmem:[#allocation7 + $0x58] sm:$0xf0]  ;;  %v13465_v62 = vld [vmem:[#allocation7 + $0x12c] sm:$0xf] }
 0x81a   : > { %7409 = vmatmul.bf16.gmra.mxu2 %v15539_v47 }
 0x81b   : > { %v7168_v38 = vadd.f32 %v7167_v29, %v7119_v59  ;;  %v12166_v59 = vld [vmem:[#allocation7 + $0x298] sm:$0xf0] }
 0x81c   : > { %v12294_v29 = vld [vmem:[#allocation7 + $0x398] sm:$0xf0] }
 0x81d   : > { %v7214_v50 = vpop.f32.mrf.mxu2  ;;  %v7245_v30 = vpop.f32.mrf.mxu3  ;;  %7532 = vmatpush.bf16.msra.mxu1 %v12025_v15 }
 0x81e   : > { %v15928_v34 = vadd.f32 %v7214_v50, %v7166_v60  ;;  %v7246_v10 = vadd.f32 %v7245_v30, %v15882_v55  ;;  %v13509_v60 = vld [vmem:[#allocation7 + $0x28c] sm:$0xf] }
 0x81f   : > { %v12169_v30 = vor.u32 %v13509_v60, %v12166_v59  ;;  %v13441_v50 = vld [vmem:[#allocation7 + $0x6c] sm:$0xf] }
 0x820   : > { %v7680_v12 = vmax.f32 %v7246_v10, 0.0  ;;  %v7121_v17 = vpop.f32.mrf.mxu0  ;;  %v7170_v7 = vpop.f32.mrf.mxu1  ;;  %v12297_v10 = vor.u32 %v13541_v32, %v12294_v29  ;;  %v13469_v60 = vld [vmem:[#allocation7 + $0x14c] sm:$0xf]  ;;  %v12006_v29 = vld [vmem:[#allocation7 + $0x158] sm:$0xf0] }
 0x821   : > { %v7122_v58 = vadd.f32 %v7121_v17, %v15856_v5  ;;  %7580 = vmatpush.bf16.msra.mxu2 %v12169_v30  ;;  %v11897_v17 = vor.u32 %v13441_v50, %v11894_v41  ;;  %v13505_v30 = vld [vmem:[#allocation7 + $0x26c] sm:$0xf]  ;;  %v12150_v50 = vld [vmem:[#allocation7 + $0x278] sm:$0xf0] }
 0x822   : > { %v15932_v44 = vpack.c.bf16 %v7680_v12, %v7676_v22  ;;  %7443 = vmatmul.bf16.gmra.mxu3 %v15646_v26 }
 0x823   : > { %v7171_v55 = vadd.f32 %v7170_v7, %v7122_v58  ;;  %7316 = vmatmul.bf16.gmra.mxu0 %v17207_v53  ;;  %7365 = vmatmul.bf16.gmra.mxu1 %v15450_v20  ;;  %v13437_v7 = vld [vmem:[#allocation7 + $0x4c] sm:$0xf] }
 0x824   : > { %17220 = vst [vmem:[#allocation21_spill] sm:$0xff] %v15932_v44  ;;  %7629 = vmatpush.bf16.msra.mxu3 %v12297_v10  ;;  %7483 = vmatpush.bf16.msra.mxu0 %v11897_v17  ;;  %v11881_v32 = vor.u32 %v13437_v7, %v11878_v61  ;;  %v12009_v44 = vor.u32 %v13469_v60, %v12006_v29  ;;  %v11862_v10 = vld [vmem:[#allocation7 + $0x38] sm:$0xf0]  ;;  %v13501_v7 = vld [vmem:[#allocation7 + $0x24c] sm:$0xf] }
 0x825   : > { %v7216_v22 = vpop.f32.mrf.mxu2  ;;  %v7248_v12 = vpop.f32.mrf.mxu3  ;;  %v12134_v61 = vld [vmem:[#allocation7 + $0x258] sm:$0xf0] }
 0x826   : > { %v15937_v36 = vadd.f32 %v7216_v22, %v7168_v38  ;;  %v7249_v58 = vadd.f32 %v7248_v12, %v15887_v23  ;;  %v12153_v38 = vor.u32 %v13505_v30, %v12150_v50  ;;  %7533 = vmatpush.bf16.msra.mxu1 %v12009_v44  ;;  %v13433_v23 = vld [vmem:[#allocation7 + $0x2c] sm:$0xf]  ;;  %v11990_v22 = vld [vmem:[#allocation7 + $0x138] sm:$0xf0]  ;;  %v12137_v29 = vor.u32 %v13501_v7, %v12134_v61 }
 0x827   : > { %v11865_v13 = vor.u32 %v13433_v23, %v11862_v10  ;;  %v11993_v15 = vor.u32 %v13465_v62, %v11990_v22  ;;  %v13461_v44 = vld [vmem:[#allocation7 + $0x10c] sm:$0xf]  ;;  %v11974_v23 = vld [vmem:[#allocation7 + $0x118] sm:$0xf0] }
 0x828   : > { %v7123_v59 = vpop.f32.mrf.mxu0  ;;  %v7172_v16 = vpop.f32.mrf.mxu1  ;;  %7484 = vmatpush.bf16.msra.mxu0 %v11881_v32  ;;  %7581 = vmatpush.bf16.msra.mxu2 %v12153_v38  ;;  %v7684_v32 = vmax.f32 %v7249_v58, 0.0  ;;  %v11977_v22 = vor.u32 %v13461_v44, %v11974_v23  ;;  %v13537_v58 = vld [vmem:[#allocation7 + $0x36c] sm:$0xf] }
 0x829   : > { %v7124_v4 = vadd.f32 %v7123_v59, %v15856_v5 }
 0x82a   : > { %7414 = vmatmul.bf16.gmra.mxu2 %v15556_v1  ;;  %7534 = vmatpush.bf16.msra.mxu1 %v11993_v15 }
 0x82b   : > { %v7173_v41 = vadd.f32 %v7172_v16, %v7124_v4  ;;  %v13429_v16 = vld [vmem:[#allocation7 + $0xc] sm:$0xf]  ;;  %v11846_v4 = vld [vmem:[#allocation7 + $0x18] sm:$0xf0] }
 0x82c   : > { %7485 = vmatpush.bf16.msra.mxu0 %v11865_v13  ;;  %7582 = vmatpush.bf16.msra.mxu2 %v12137_v29  ;;  %v11849_v38 = vor.u32 %v13429_v16, %v11846_v4  ;;  %v12102_v29 = vld [vmem:[#allocation7 + $0x218] sm:$0xf0] }
 0x82d   : > { %v7219_v12 = vpop.f32.mrf.mxu2  ;;  %v7250_v17 = vpop.f32.mrf.mxu3 }
 0x82e   : > { %v15942_v60 = vadd.f32 %v7219_v12, %v7171_v55  ;;  %v7251_v59 = vadd.f32 %v7250_v17, %v15896_v56  ;;  %v13497_v55 = vld [vmem:[#allocation7 + $0x22c] sm:$0xf]  ;;  %v12118_v12 = vld [vmem:[#allocation7 + $0x238] sm:$0xf0]  ;;  %7535 = vmatpush.bf16.msra.mxu1 %v11977_v22 }
 0x82f   : > { %v12121_v56 = vor.u32 %v13497_v55, %v12118_v12  ;;  %v12278_v17 = vld [vmem:[#allocation7 + $0x378] sm:$0xf0] }
 0x830   : > { %v7688_v30 = vmax.f32 %v7251_v59, 0.0  ;;  %v7126_v50 = vpop.f32.mrf.mxu0  ;;  %v7175_v62 = vpop.f32.mrf.mxu1  ;;  %7486 = vmatpush.bf16.msra.mxu0 %v11849_v38  ;;  %v12281_v15 = vor.u32 %v13537_v58, %v12278_v17  ;;  %v13493_v59 = vld [vmem:[#allocation7 + $0x20c] sm:$0xf] }
 0x831   : > { %v7127_v10 = vadd.f32 %v7126_v50, %v15856_v5  ;;  %7583 = vmatpush.bf16.msra.mxu2 %v12121_v56  ;;  %v12105_v44 = vor.u32 %v13493_v59, %v12102_v29 }
 0x832   : > { %v15946_v63 = vpack.c.bf16 %v7688_v30, %v7684_v32  ;;  %7448 = vmatmul.bf16.gmra.mxu3 %v15672_v39 }
 0x833   : > { %v7176_v13 = vadd.f32 %v7175_v62, %v7127_v10  ;;  %7321 = vmatmul.bf16.gmra.mxu0 %v17208_v11  ;;  %7370 = vmatmul.bf16.gmra.mxu1 %v15463_v33 }
 0x834   : > { %17221 = vst [vmem:[#allocation22_spill] sm:$0xff] %v15946_v63  ;;  %7630 = vmatpush.bf16.msra.mxu3 %v12281_v15  ;;  %v13533_v15 = vld [vmem:[#allocation7 + $0x34c] sm:$0xf] }
 0x835   : > { %v7221_v7 = vpop.f32.mrf.mxu2  ;;  %v7253_v61 = vpop.f32.mrf.mxu3  ;;  %7584 = vmatpush.bf16.msra.mxu2 %v12105_v44 }
 0x836   : > { %v15951_v16 = vadd.f32 %v7221_v7, %v7173_v41  ;;  %v7254_v4 = vadd.f32 %v7253_v61, %v15901_v35  ;;  %v12262_v7 = vld [vmem:[#allocation7 + $0x358] sm:$0xf0] }
 0x838   : > { %v7128_v32 = vpop.f32.mrf.mxu0  ;;  %v7177_v50 = vpop.f32.mrf.mxu1  ;;  %v7692_v41 = vmax.f32 %v7254_v4, 0.0 }
 0x839   : > { %v7129_v30 = vadd.f32 %v7128_v32, %v15856_v5 }
 0x83a   : > { %7419 = vmatmul.bf16.gmra.mxu2 %v15574_v14 }
 0x83b   : > { %v7178_v38 = vadd.f32 %v7177_v50, %v7129_v30 }
 0x83d   : > { %v7224_v23 = vpop.f32.mrf.mxu2  ;;  %v7255_v10 = vpop.f32.mrf.mxu3 }
 0x83e   : > { %v15956_v62 = vadd.f32 %v7224_v23, %v7176_v13  ;;  %v7256_v22 = vadd.f32 %v7255_v10, %v15910_v31  ;;  %v12265_v13 = vor.u32 %v13533_v15, %v12262_v7  ;;  %v15973_v10 = vld [vmem:[%s17109_s10] sm:$0xf]  ;;  %v13529_v7 = vld [vmem:[#allocation7 + $0x32c] sm:$0xf] }
 0x83f   : > { %17223 = vst [vmem:[#allocation24_spill] sm:$0xff] %v15973_v10 }
 0x840   : > { %v7696_v55 = vmax.f32 %v7256_v22, 0.0  ;;  %v7131_v12 = vpop.f32.mrf.mxu0  ;;  %v7180_v56 = vpop.f32.mrf.mxu1  ;;  %7631 = vmatpush.bf16.msra.mxu3 %v12265_v13  ;;  %v12246_v13 = vld [vmem:[#allocation7 + $0x338] sm:$0xf0] }
 0x841   : > { %v7132_v35 = vadd.f32 %v7131_v12, %v15856_v5 }
 0x842   : > { %v15960_v58 = vpack.c.bf16 %v7696_v55, %v7692_v41  ;;  %7453 = vmatmul.bf16.gmra.mxu3 %v15698_v42 }
 0x843   : > { %v7181_v17 = vadd.f32 %v7180_v56, %v7132_v35  ;;  %7326 = vmatmul.bf16.gmra.mxu0 %v17209_v51  ;;  %7375 = vmatmul.bf16.gmra.mxu1 %v15477_v52 }
 0x844   : > { %17222 = vst [vmem:[#allocation23_spill] sm:$0xff] %v15960_v58 }
 0x845   : > { %v7226_v61 = vpop.f32.mrf.mxu2  ;;  %v7258_v31 = vpop.f32.mrf.mxu3 }
 0x846   : > { %v15965_v59 = vadd.f32 %v7226_v61, %v7178_v38  ;;  %v7259_v29 = vadd.f32 %v7258_v31, %v15915_v45  ;;  %v15976_v38 = vperm.slane %v15973_v10, 2  ;;  %v12652_v10 = vld [vmem:[#allocation9 + $0x260] sm:$0xf] }
 0x848   : > { %v7133_v4 = vpop.f32.mrf.mxu0  ;;  %v7182_v32 = vpop.f32.mrf.mxu1  ;;  %v7700_v41 = vmax.f32 %v7259_v29, 0.0 }
 0x849   : > { %v7134_v44 = vadd.f32 %v7133_v4, %v15856_v5 }
 0x84a   : > { %7424 = vmatmul.bf16.gmra.mxu2 %v15595_v6 }
 0x84b   : > { %v7183_v30 = vadd.f32 %v7182_v32, %v7134_v44 }
 0x84d   : > { %v7229_v50 = vpop.f32.mrf.mxu2  ;;  %v7260_v23 = vpop.f32.mrf.mxu3 }
 0x84e   : > { %v15978_v22 = vadd.f32 %v7229_v50, %v7181_v17  ;;  %v7261_v45 = vadd.f32 %v7260_v23, %v15923_v46  ;;  %v12249_v17 = vor.u32 %v13529_v7, %v12246_v13 }
 0x850   : > { %v7704_v5 = vmax.f32 %v7261_v45, 0.0  ;;  %v7292_v55 = vpop.f32.mrf.mxu0  ;;  %v7341_v35 = vpop.f32.mrf.mxu1  ;;  %7632 = vmatpush.bf16.msra.mxu3 %v12249_v17 }
 0x851   : > { %v7293_v12 = vadd.f32 %v7292_v55, %v15976_v38  ;;  %v12230_v55 = vld [vmem:[#allocation7 + $0x318] sm:$0xf0] }
 0x852   : > { %v15982_v56 = vpack.c.bf16 %v7704_v5, %v7700_v41  ;;  %7458 = vmatmul.bf16.gmra.mxu3 %v15732_v19 }
 0x853   : > { %v15985_v15 = vadd.f32 %v7341_v35, %v7293_v12  ;;  %7487 = vmatmul.bf16.vlgmr.msra.gmra.mxu0 %v17214_v43  ;;  %7536 = vmatmul.bf16.vlgmr.msra.gmra.mxu1 %v17215_v0 }
 0x854   : > { %17224 = vst [vmem:[#allocation25_spill] sm:$0xff] %v15982_v56 }
 0x855   : > { %v7231_v46 = vpop.f32.mrf.mxu2  ;;  %v7263_v61 = vpop.f32.mrf.mxu3 }
 0x856   : > { %v15989_v31 = vadd.f32 %v7231_v46, %v7183_v30  ;;  %v7264_v29 = vadd.f32 %v7263_v61, %v15928_v34 }
 0x858   : > { %v15992_v4 = vpop.f32.mrf.mxu0  ;;  %v15994_v44 = vpop.f32.mrf.mxu1  ;;  %v7708_v0 = vmax.f32 %v7264_v29, 0.0 }
 0x85a   : > { %7585 = vmatmul.bf16.vlgmr.msra.gmra.mxu2 %v15491_v37  ;;  %v13525_v37 = vld [vmem:[#allocation7 + $0x30c] sm:$0xf] }
 0x85b   : > { %v12233_v12 = vor.u32 %v13525_v37, %v12230_v55 }
 0x85d   : > { %v7265_v32 = vpop.f32.mrf.mxu3  ;;  %v15997_v43 = vpop.f32.mrf.mxu2  ;;  %7633 = vmatpush.bf16.msra.mxu3 %v12233_v12 }
 0x85e   : > { %v7266_v50 = vadd.f32 %v7265_v32, %v15937_v36 }
 0x860   : > { %v7712_v23 = vmax.f32 %v7266_v50, 0.0  ;;  %v7297_v45 = vpop.f32.mrf.mxu0  ;;  %v7346_v41 = vpop.f32.mrf.mxu1 }
 0x861   : > { %v7298_v30 = vadd.f32 %v7297_v45, %v15976_v38 }
 0x862   : > { %v16001_v5 = vpack.c.bf16 %v7712_v23, %v7708_v0  ;;  %7463 = vmatmul.bf16.gmra.mxu3 %v15752_v2 }
 0x863   : > { %v16004_v34 = vadd.f32 %v7346_v41, %v7298_v30  ;;  %7492 = vmatmul.bf16.gmra.mxu0 %v15273_v49  ;;  %7541 = vmatmul.bf16.gmra.mxu1 %v15388_v3 }
 0x864   : > { %17225 = vst [vmem:[#allocation26_spill] sm:$0xff] %v16001_v5 }
 0x865   : > { %v7268_v36 = vpop.f32.mrf.mxu3  ;;  %v16008_v35 = vpop.f32.mrf.mxu2 }
 0x866   : > { %v7269_v7 = vadd.f32 %v7268_v36, %v15942_v60 }
 0x868   : > { %v16011_v13 = vpop.f32.mrf.mxu0  ;;  %v16013_v17 = vpop.f32.mrf.mxu1  ;;  %v7716_v29 = vmax.f32 %v7269_v7, 0.0 }
 0x86a   : > { %7590 = vmatmul.bf16.gmra.mxu2 %v15505_v24 }
 0x86d   : > { %v7270_v46 = vpop.f32.mrf.mxu3  ;;  %v16016_v61 = vpop.f32.mrf.mxu2 }
 0x86e   : > { %v7271_v49 = vadd.f32 %v7270_v46, %v15951_v16 }
 0x870   : > { %v7720_v3 = vmax.f32 %v7271_v49, 0.0  ;;  %v7302_v32 = vpop.f32.mrf.mxu0  ;;  %v7351_v0 = vpop.f32.mrf.mxu1 }
 0x871   : > { %v7303_v50 = vadd.f32 %v7302_v32, %v15976_v38  ;;  %v13586_v32 = vld [vmem:[#allocation9 + $0xec] sm:$0xf0] }
 0x872   : > { %v16020_v23 = vpack.c.bf16 %v7720_v3, %v7716_v29  ;;  %7468 = vmatmul.bf16.gmra.mxu3 %v15772_v28  ;;  %v13650_v29 = vld [vmem:[#allocation9 + $0x2ec] sm:$0xf0] }
 0x873   : > { %v16023_v60 = vadd.f32 %v7351_v0, %v7303_v50  ;;  %7497 = vmatmul.bf16.gmra.mxu0 %v17204_v8  ;;  %7546 = vmatmul.bf16.gmra.mxu1 %v15402_v21  ;;  %v12844_v50 = vld [vmem:[#allocation9 + $0x3e0] sm:$0xf] }
 0x874   : > { %17226 = vst [vmem:[#allocation27_spill] sm:$0xff] %v16020_v23  ;;  %v12684_v23 = vld [vmem:[#allocation9 + $0x2a0] sm:$0xf] }
 0x875   : > { %v7273_v24 = vpop.f32.mrf.mxu3  ;;  %v16027_v45 = vpop.f32.mrf.mxu2 }
 0x876   : > { %v7274_v16 = vadd.f32 %v7273_v24, %v15956_v62 }
 0x878   : > { %v16030_v30 = vpop.f32.mrf.mxu0  ;;  %v16032_v41 = vpop.f32.mrf.mxu1  ;;  %v7724_v36 = vmax.f32 %v7274_v16, 0.0 }
 0x87a   : > { %7595 = vmatmul.bf16.gmra.mxu2 %v15519_v27  ;;  %v12716_v27 = vld [vmem:[#allocation9 + $0x2e0] sm:$0xf] }
 0x87b   : > { %v12717_v3 = vor.u32 %v13650_v29, %v12716_v27 }
 0x87d   : > { %v7275_v37 = vpop.f32.mrf.mxu3  ;;  %v16035_v55 = vpop.f32.mrf.mxu2  ;;  %8647 = vmatpush.bf16.msrb.mxu2 %v12717_v3 }
 0x87e   : > { %v7276_v12 = vadd.f32 %v7275_v37, %v15965_v59  ;;  %v12460_v59 = vld [vmem:[#allocation9 + $0xe0] sm:$0xf]  ;;  %v13682_v37 = vld [vmem:[#allocation9 + $0x3ec] sm:$0xf0] }
 0x87f   : > { %v12461_v16 = vor.u32 %v13586_v32, %v12460_v59 }
 0x880   : > { %v7728_v8 = vmax.f32 %v7276_v12, 0.0  ;;  %v7307_v7 = vpop.f32.mrf.mxu0  ;;  %v7356_v46 = vpop.f32.mrf.mxu1 }
 0x881   : > { %v7308_v21 = vadd.f32 %v7307_v7, %v15976_v38  ;;  %8549 = vmatpush.bf16.msrb.mxu0 %v12461_v16  ;;  %v13618_v7 = vld [vmem:[#allocation9 + $0x1ec] sm:$0xf0] }
 0x882   : > { %v16039_v49 = vpack.c.bf16 %v7728_v8, %v7724_v36  ;;  %7473 = vmatmul.bf16.gmra.mxu3 %v15792_v54  ;;  %v12845_v36 = vor.u32 %v13682_v37, %v12844_v50  ;;  %v13646_v37 = vld [vmem:[#allocation9 + $0x2cc] sm:$0xf0] }
 0x883   : > { %v16042_v62 = vadd.f32 %v7356_v46, %v7308_v21  ;;  %7502 = vmatmul.bf16.gmra.mxu0 %v17205_v18  ;;  %7551 = vmatmul.bf16.gmra.mxu1 %v15416_v48  ;;  %v12588_v18 = vld [vmem:[#allocation9 + $0x1e0] sm:$0xf] }
 0x884   : > { %17227 = vst [vmem:[#allocation28_spill] sm:$0xff] %v16039_v49  ;;  %8696 = vmatpush.bf16.msrb.mxu3 %v12845_v36  ;;  %v12589_v21 = vor.u32 %v13618_v7, %v12588_v18  ;;  %v12828_v18 = vld [vmem:[#allocation9 + $0x3c0] sm:$0xf] }
 0x885   : > { %v7278_v0 = vpop.f32.mrf.mxu3  ;;  %v16046_v24 = vpop.f32.mrf.mxu2 }
 0x886   : > { %v7279_v12 = vadd.f32 %v7278_v0, %v15978_v22  ;;  %8598 = vmatpush.bf16.msrb.mxu1 %v12589_v21 }
 0x888   : > { %v16049_v8 = vpop.f32.mrf.mxu0  ;;  %v16051_v48 = vpop.f32.mrf.mxu1  ;;  %v7732_v22 = vmax.f32 %v7279_v12, 0.0  ;;  %v13582_v12 = vld [vmem:[#allocation9 + $0xcc] sm:$0xf0] }
 0x88a   : > { %7600 = vmatmul.bf16.gmra.mxu2 %v15529_v57  ;;  %v12700_v57 = vld [vmem:[#allocation9 + $0x2c0] sm:$0xf] }
 0x88b   : > { %v12701_v36 = vor.u32 %v13646_v37, %v12700_v57  ;;  %v12556_v57 = vld [vmem:[#allocation9 + $0x1a0] sm:$0xf] }
 0x88d   : > { %v7280_v46 = vpop.f32.mrf.mxu3  ;;  %v16054_v27 = vpop.f32.mrf.mxu2  ;;  %8648 = vmatpush.bf16.msrb.mxu2 %v12701_v36 }
 0x88e   : > { %v7281_v29 = vadd.f32 %v7280_v46, %v15989_v31  ;;  %v12444_v31 = vld [vmem:[#allocation9 + $0xc0] sm:$0xf] }
 0x88f   : > { %v12445_v46 = vor.u32 %v13582_v12, %v12444_v31  ;;  %v13610_v31 = vld [vmem:[#allocation9 + $0x1ac] sm:$0xf0] }
 0x890   : > { %v7736_v3 = vmax.f32 %v7281_v29, 0.0  ;;  %v7312_v59 = vpop.f32.mrf.mxu0  ;;  %v7361_v50 = vpop.f32.mrf.mxu1  ;;  %v13678_v29 = vld [vmem:[#allocation9 + $0x3cc] sm:$0xf0] }
 0x891   : > { %v7313_v32 = vadd.f32 %v7312_v59, %v15976_v38  ;;  %8550 = vmatpush.bf16.msrb.mxu0 %v12445_v46  ;;  %v12412_v46 = vld [vmem:[#allocation9 + $0x80] sm:$0xf] }
 0x892   : > { %v16058_v0 = vpack.c.bf16 %v7736_v3, %v7732_v22  ;;  %7634 = vmatmul.bf16.vlgmr.msra.gmra.mxu3 %v15620_v25  ;;  %v12829_v25 = vor.u32 %v13678_v29, %v12828_v18  ;;  %v12572_v22 = vld [vmem:[#allocation9 + $0x1c0] sm:$0xf]  ;;  %v13614_v3 = vld [vmem:[#allocation9 + $0x1cc] sm:$0xf0]  ;;  %v12557_v18 = vor.u32 %v13610_v31, %v12556_v57 }
 0x893   : > { %v16061_v16 = vadd.f32 %v7361_v50, %v7313_v32  ;;  %7507 = vmatmul.bf16.gmra.mxu0 %v17206_v9  ;;  %7556 = vmatmul.bf16.gmra.mxu1 %v15436_v40  ;;  %v12573_v59 = vor.u32 %v13614_v3, %v12572_v22  ;;  %v12428_v32 = vld [vmem:[#allocation9 + $0xa0] sm:$0xf]  ;;  %v13578_v50 = vld [vmem:[#allocation9 + $0xac] sm:$0xf0] }
 0x894   : > { %17228 = vst [vmem:[#allocation29_spill] sm:$0xff] %v16058_v0  ;;  %8697 = vmatpush.bf16.msrb.mxu3 %v12829_v25  ;;  %v12429_v37 = vor.u32 %v13578_v50, %v12428_v32  ;;  %v13574_v29 = vld [vmem:[#allocation9 + $0x8c] sm:$0xf0]  ;;  %v12540_v25 = vld [vmem:[#allocation9 + $0x180] sm:$0xf] }
 0x895   : > { %v16065_v7 = vpop.f32.mrf.mxu2  ;;  %v16067_v21 = vpop.f32.mrf.mxu3  ;;  %8599 = vmatpush.bf16.msrb.mxu1 %v12573_v59  ;;  %v12413_v3 = vor.u32 %v13574_v29, %v12412_v46  ;;  %v13606_v0 = vld [vmem:[#allocation9 + $0x18c] sm:$0xf0]  ;;  %v12396_v57 = vld [vmem:[#allocation9 + $0x60] sm:$0xf] }
 0x896   : > { %8551 = vmatpush.bf16.msrb.mxu0 %v12429_v37  ;;  %v12541_v49 = vor.u32 %v13606_v0, %v12540_v25  ;;  %v13642_v32 = vld [vmem:[#allocation9 + $0x2ac] sm:$0xf0]  ;;  %v12524_v31 = vld [vmem:[#allocation9 + $0x160] sm:$0xf] }
 0x897   : > { %v12685_v50 = vor.u32 %v13642_v32, %v12684_v23  ;;  %v13570_v37 = vld [vmem:[#allocation9 + $0x6c] sm:$0xf0] }
 0x898   : > { %v16069_v9 = vpop.f32.mrf.mxu0  ;;  %v16071_v40 = vpop.f32.mrf.mxu1  ;;  %v13674_v46 = vld [vmem:[#allocation9 + $0x3ac] sm:$0xf0]  ;;  %v12397_v0 = vor.u32 %v13570_v37, %v12396_v57 }
 0x899   : > { %8600 = vmatpush.bf16.msrb.mxu1 %v12557_v18  ;;  %8649 = vmatpush.bf16.msrb.mxu2 %v12685_v50  ;;  %v12812_v18 = vld [vmem:[#allocation9 + $0x3a0] sm:$0xf]  ;;  %v13602_v29 = vld [vmem:[#allocation9 + $0x16c] sm:$0xf0] }
 0x89a   : > { %7605 = vmatmul.bf16.gmra.mxu2 %v15539_v47  ;;  %8552 = vmatpush.bf16.msrb.mxu0 %v12413_v3  ;;  %v12813_v23 = vor.u32 %v13674_v46, %v12812_v18  ;;  %v12668_v3 = vld [vmem:[#allocation9 + $0x280] sm:$0xf]  ;;  %v13598_v57 = vld [vmem:[#allocation9 + $0x14c] sm:$0xf0] }
 0x89b   : > { %v13634_v18 = vld [vmem:[#allocation9 + $0x26c] sm:$0xf0]  ;;  %v12364_v46 = vld [vmem:[#allocation9 + $0x20] sm:$0xf] }
 0x89c   : > { %8698 = vmatpush.bf16.msrb.mxu3 %v12813_v23 }
 0x89d   : > { %v16074_v12 = vpop.f32.mrf.mxu2  ;;  %v16076_v36 = vpop.f32.mrf.mxu3  ;;  %8601 = vmatpush.bf16.msrb.mxu1 %v12541_v49  ;;  %v12380_v49 = vld [vmem:[#allocation9 + $0x40] sm:$0xf] }
 0x89e   : > { %8553 = vmatpush.bf16.msrb.mxu0 %v12397_v0  ;;  %v13562_v0 = vld [vmem:[#allocation9 + $0x2c] sm:$0xf0] }
 0x89f   : > { %v12365_v23 = vor.u32 %v13562_v0, %v12364_v46 }
 0x8a0   : > { %v7317_v22 = vpop.f32.mrf.mxu0  ;;  %v7366_v59 = vpop.f32.mrf.mxu1 }
 0x8a1   : > { %v7318_v47 = vadd.f32 %v7317_v22, %v15976_v38  ;;  %v12525_v22 = vor.u32 %v13602_v29, %v12524_v31  ;;  %v12653_v31 = vor.u32 %v13634_v18, %v12652_v10  ;;  %v12492_v29 = vld [vmem:[#allocation9 + $0x120] sm:$0xf]  ;;  %v13590_v18 = vld [vmem:[#allocation9 + $0x10c] sm:$0xf0] }
 0x8a2   : > { %7639 = vmatmul.bf16.gmra.mxu3 %v15646_v26  ;;  %v12476_v10 = vld [vmem:[#allocation9 + $0x100] sm:$0xf] }
 0x8a3   : > { %v16080_v5 = vadd.f32 %v7366_v59, %v7318_v47  ;;  %7512 = vmatmul.bf16.gmra.mxu0 %v17207_v53  ;;  %7561 = vmatmul.bf16.gmra.mxu1 %v15450_v20  ;;  %v13638_v47 = vld [vmem:[#allocation9 + $0x28c] sm:$0xf0]  ;;  %v12508_v20 = vld [vmem:[#allocation9 + $0x140] sm:$0xf]  ;;  %v12477_v0 = vor.u32 %v13590_v18, %v12476_v10 }
 0x8a4   : > { %v12669_v53 = vor.u32 %v13638_v47, %v12668_v3  ;;  %8602 = vmatpush.bf16.msrb.mxu1 %v12525_v22  ;;  %v13566_v59 = vld [vmem:[#allocation9 + $0x4c] sm:$0xf0] }
 0x8a5   : > { %17229 = vst [vmem:[#allocation30_spill] sm:$0xff] %v16080_v5  ;;  %v16084_v25 = vpop.f32.mrf.mxu2  ;;  %v16086_v26 = vpop.f32.mrf.mxu3  ;;  %v12381_v50 = vor.u32 %v13566_v59, %v12380_v49  ;;  %v12509_v5 = vor.u32 %v13598_v57, %v12508_v20  ;;  %v13594_v22 = vld [vmem:[#allocation9 + $0x12c] sm:$0xf0]  ;;  %v12636_v49 = vld [vmem:[#allocation9 + $0x240] sm:$0xf] }
 0x8a6   : > { %8650 = vmatpush.bf16.msrb.mxu2 %v12669_v53  ;;  %v12493_v53 = vor.u32 %v13594_v22, %v12492_v29  ;;  %v13630_v59 = vld [vmem:[#allocation9 + $0x24c] sm:$0xf0]  ;;  %v12796_v22 = vld [vmem:[#allocation9 + $0x380] sm:$0xf] }
 0x8a7   : > { %8554 = vmatpush.bf16.msrb.mxu0 %v12381_v50  ;;  %v12637_v20 = vor.u32 %v13630_v59, %v12636_v49  ;;  %v13558_v50 = vld [vmem:[#allocation9 + $0xc] sm:$0xf0] }
 0x8a8   : > { %v16088_v32 = vpop.f32.mrf.mxu0  ;;  %v16090_v37 = vpop.f32.mrf.mxu1  ;;  %8603 = vmatpush.bf16.msrb.mxu1 %v12509_v5 }
 0x8a9   : > { %17230 = vst [vmem:[#allocation31_spill] sm:$0xff] %v16090_v37  ;;  %v13626_v37 = vld [vmem:[#allocation9 + $0x22c] sm:$0xf0] }
 0x8aa   : > { %7610 = vmatmul.bf16.gmra.mxu2 %v15556_v1  ;;  %v12348_v1 = vld [vmem:[#allocation9] sm:$0xf] }
 0x8ab   : > { %8651 = vmatpush.bf16.msrb.mxu2 %v12653_v31  ;;  %8555 = vmatpush.bf16.msrb.mxu0 %v12365_v23  ;;  %v12349_v57 = vor.u32 %v13558_v50, %v12348_v1  ;;  %v12604_v1 = vld [vmem:[#allocation9 + $0x200] sm:$0xf]  ;;  %v13622_v50 = vld [vmem:[#allocation9 + $0x20c] sm:$0xf0] }
 0x8ac   : > { %8604 = vmatpush.bf16.msrb.mxu1 %v12493_v53  ;;  %v13670_v53 = vld [vmem:[#allocation9 + $0x38c] sm:$0xf0] }
 0x8ad   : > { %v16093_v3 = vpop.f32.mrf.mxu2  ;;  %v16095_v47 = vpop.f32.mrf.mxu3 }
 0x8ae   : > { %17231 = vst [vmem:[#allocation32_spill] sm:$0xff] %v16093_v3  ;;  %v12620_v3 = vld [vmem:[#allocation9 + $0x220] sm:$0xf] }
 0x8af   : > { %8652 = vmatpush.bf16.msrb.mxu2 %v12637_v20  ;;  %8556 = vmatpush.bf16.msrb.mxu0 %v12349_v57  ;;  %v12621_v29 = vor.u32 %v13626_v37, %v12620_v3  ;;  %v12797_v20 = vor.u32 %v13670_v53, %v12796_v22  ;;  %v7295_v22 = vadd.f32 %v15992_v4, %v15976_v38 }
 0x8b0   : > { %v7322_v5 = vpop.f32.mrf.mxu0  ;;  %v7371_v46 = vpop.f32.mrf.mxu1  ;;  %8605 = vmatpush.bf16.msrb.mxu1 %v12477_v0 }
 0x8b1   : > { %v7323_v31 = vadd.f32 %v7322_v5, %v15976_v38  ;;  %8699 = vmatpush.bf16.msrb.mxu3 %v12797_v20 }
 0x8b2   : > { %7644 = vmatmul.bf16.gmra.mxu3 %v15672_v39  ;;  %v12605_v39 = vor.u32 %v13622_v50, %v12604_v1  ;;  %v7391_v50 = vadd.f32 %v15997_v43, %v15985_v15 }
 0x8b3   : > { %v16099_v23 = vadd.f32 %v7371_v46, %v7323_v31  ;;  %7517 = vmatmul.bf16.gmra.mxu0 %v17208_v11  ;;  %7566 = vmatmul.bf16.gmra.mxu1 %v15463_v33  ;;  %v12780_v31 = vld [vmem:[#allocation9 + $0x360] sm:$0xf]  ;;  %v13666_v46 = vld [vmem:[#allocation9 + $0x36c] sm:$0xf0] }
 0x8b4   : > { %8653 = vmatpush.bf16.msrb.mxu2 %v12621_v29  ;;  %v12781_v29 = vor.u32 %v13666_v46, %v12780_v31  ;;  %v12764_v31 = vld [vmem:[#allocation9 + $0x340] sm:$0xf] }
 0x8b5   : > { %v16103_v49 = vpop.f32.mrf.mxu2  ;;  %v16105_v59 = vpop.f32.mrf.mxu3 }
 0x8b6   : > { %8700 = vmatpush.bf16.msrb.mxu3 %v12781_v29  ;;  %v7300_v29 = vadd.f32 %v16011_v13, %v15976_v38 }
 0x8b8   : > { %v16107_v37 = vpop.f32.mrf.mxu0  ;;  %8654 = vmatpush.bf16.msrb.mxu2 %v12605_v39  ;;  %v16109_v3 = vpop.f32.mrf.mxu1 }
 0x8ba   : > { %7615 = vmatmul.bf16.gmra.mxu2 %v15574_v14 }
 0x8bd   : > { %v16112_v33 = vpop.f32.mrf.mxu2  ;;  %v16114_v11 = vpop.f32.mrf.mxu3 }
 0x8c0   : > { %v7327_v10 = vpop.f32.mrf.mxu0  ;;  %v7376_v57 = vpop.f32.mrf.mxu1 }
 0x8c1   : > { %v7328_v5 = vadd.f32 %v7327_v10, %v15976_v38 }
 0x8c2   : > { %7649 = vmatmul.bf16.gmra.mxu3 %v15698_v42 }
 0x8c3   : > { %v16118_v18 = vadd.f32 %v7376_v57, %v7328_v5  ;;  %7522 = vmatmul.bf16.gmra.mxu0 %v17209_v51  ;;  %7571 = vmatmul.bf16.gmra.mxu1 %v15477_v52  ;;  %v7344_v51 = vadd.f32 %v15994_v44, %v7295_v22  ;;  %v7440_v5 = vadd.f32 %v16067_v21, %v7391_v50  ;;  %v17233_v57 = vld [vmem:[#allocation21_spill] sm:$0xff] }
 0x8c5   : > { %v16122_v0 = vpop.f32.mrf.mxu2  ;;  %v16124_v14 = vpop.f32.mrf.mxu3  ;;  %v7393_v1 = vadd.f32 %v16008_v35, %v7344_v51  ;;  %v13662_v35 = vld [vmem:[#allocation9 + $0x34c] sm:$0xf0]  ;;  %v7349_v51 = vadd.f32 %v16013_v17, %v7300_v29  ;;  %v17235_v17 = vld [vmem:[#allocation16_spill] sm:$0xff] }
 0x8c6   : > { %v12765_v43 = vor.u32 %v13662_v35, %v12764_v31 }
 0x8c7   : > { %v7442_v39 = vadd.f32 %v16076_v36, %v7393_v1  ;;  %v7677_v36 = vmax.f32 %v7440_v5, 0.0  ;;  %v7396_v5 = vadd.f32 %v16016_v61, %v16004_v34 }
 0x8c8   : > { %v16128_v53 = vpop.f32.mrf.mxu0  ;;  %v16130_v42 = vpop.f32.mrf.mxu1  ;;  %8701 = vmatpush.bf16.msrb.mxu3 %v12765_v43 }
 0x8c9   : > { %v7681_v44 = vmax.f32 %v7442_v39, 0.0  ;;  %v7398_v39 = vadd.f32 %v16027_v45, %v7349_v51  ;;  %v7445_v35 = vadd.f32 %v16086_v26, %v7396_v5  ;;  %v13658_v45 = vld [vmem:[#allocation9 + $0x32c] sm:$0xf0]  ;;  %v7305_v51 = vadd.f32 %v16030_v30, %v15976_v38 }
 0x8ca   : > { %7620 = vmatmul.bf16.gmra.mxu2 %v15595_v6  ;;  %v17232_v6 = vld [vmem:[#allocation14_spill] sm:$0xff] }
 0x8cb   : > { %v16156_v21 = vpack.c.bf16 %v7681_v44, %v7677_v36  ;;  %v7447_v13 = vadd.f32 %v16095_v47, %v7398_v39  ;;  %v12748_v36 = vld [vmem:[#allocation9 + $0x320] sm:$0xf]  ;;  %v7685_v47 = vmax.f32 %v7445_v35, 0.0  ;;  %v7354_v5 = vadd.f32 %v16032_v41, %v7305_v51  ;;  %v17237_v41 = vld [vmem:[#allocation15_spill] sm:$0xff] }
 0x8cc   : > { %v12749_v61 = vor.u32 %v13658_v45, %v12748_v36  ;;  %v7401_v36 = vadd.f32 %v16035_v55, %v16023_v60  ;;  %v12732_v51 = vld [vmem:[#allocation9 + $0x300] sm:$0xf] }
 0x8cd   : > { %v16134_v52 = vpop.f32.mrf.mxu2  ;;  %v16136_v20 = vpop.f32.mrf.mxu3  ;;  %17234 = vst [vmem:[#allocation14_spill] sm:$0xff] %v16156_v21  ;;  %v7689_v43 = vmax.f32 %v7447_v13, 0.0  ;;  %v7403_v35 = vadd.f32 %v16046_v24, %v7354_v5  ;;  %v13654_v24 = vld [vmem:[#allocation9 + $0x30c] sm:$0xf0] }
 0x8ce   : > { %8702 = vmatpush.bf16.msrb.mxu3 %v12749_v61  ;;  %v7450_v61 = vadd.f32 %v16105_v59, %v7401_v36  ;;  %v12733_v55 = vor.u32 %v13654_v24, %v12732_v51 }
 0x8cf   : > { %v16186_v26 = vpack.c.bf16 %v7689_v43, %v7685_v47  ;;  %v7452_v30 = vadd.f32 %v16114_v11, %v7403_v35  ;;  %v7310_v35 = vadd.f32 %v16049_v8, %v15976_v38  ;;  %v7406_v8 = vadd.f32 %v16054_v27, %v16042_v62 }
 0x8d0   : > { %v16142_v4 = vpop.f32.mrf.mxu0  ;;  %v16144_v10 = vpop.f32.mrf.mxu1  ;;  %v7693_v11 = vmax.f32 %v7450_v61, 0.0 }
 0x8d1   : > { %17236 = vst [vmem:[#allocation33_spill] sm:$0xff] %v16186_v26  ;;  %v7697_v47 = vmax.f32 %v7452_v30, 0.0  ;;  %v7359_v30 = vadd.f32 %v16051_v48, %v7310_v35  ;;  %v12718_v35 = vld [vmem:[#allocation9 + $0x2f0] sm:$0xf0] }
 0x8d2   : > { %7654 = vmatmul.bf16.gmra.mxu3 %v15732_v19 }
 0x8d3   : > { %8557 = vmatmul.bf16.vlgmr.msrb.gmra.mxu0 %v17232_v6  ;;  %8606 = vmatmul.bf16.vlgmr.msrb.gmra.mxu1 %v17233_v57  ;;  %v16216_v59 = vpack.c.bf16 %v7697_v47, %v7693_v11  ;;  %v17239_v11 = vld [vmem:[#allocation17_spill] sm:$0xff] }
 0x8d4   : > { %8703 = vmatpush.bf16.msrb.mxu3 %v12733_v55  ;;  %v7455_v55 = vadd.f32 %v16124_v14, %v7406_v8 }
 0x8d5   : > { %v16150_v46 = vpop.f32.mrf.mxu2  ;;  %v16152_v15 = vpop.f32.mrf.mxu3  ;;  %17238 = vst [vmem:[#allocation34_spill] sm:$0xff] %v16216_v59 }
 0x8d6   : > { %v7701_v14 = vmax.f32 %v7455_v55, 0.0 }
 0x8d8   : > { %v16158_v19 = vpop.f32.mrf.mxu0  ;;  %v16160_v22 = vpop.f32.mrf.mxu1 }
 0x8da   : > { %8655 = vmatmul.bf16.vlgmr.msrb.gmra.mxu2 %v16156_v21 }
 0x8dd   : > { %v16164_v1 = vpop.f32.mrf.mxu3  ;;  %v16166_v50 = vpop.f32.mrf.mxu2 }
 0x8e0   : > { %v16172_v44 = vpop.f32.mrf.mxu0  ;;  %v16174_v31 = vpop.f32.mrf.mxu1 }
 0x8e2   : > { %7659 = vmatmul.bf16.gmra.mxu3 %v15752_v2 }
 0x8e3   : > { %8562 = vmatmul.bf16.gmra.mxu0 %v17235_v17  ;;  %8611 = vmatmul.bf16.gmra.mxu1 %v15946_v63  ;;  %v12846_v17 = vld [vmem:[#allocation9 + $0x3f0] sm:$0xf0] }
 0x8e5   : > { %v16180_v29 = vpop.f32.mrf.mxu3  ;;  %v16182_v34 = vpop.f32.mrf.mxu2 }
 0x8e8   : > { %v16188_v2 = vpop.f32.mrf.mxu0  ;;  %v16190_v39 = vpop.f32.mrf.mxu1 }
 0x8ea   : > { %8660 = vmatmul.bf16.gmra.mxu2 %v16186_v26 }
 0x8ed   : > { %v16194_v13 = vpop.f32.mrf.mxu3  ;;  %v16196_v63 = vpop.f32.mrf.mxu2 }
 0x8f0   : > { %v16202_v43 = vpop.f32.mrf.mxu0  ;;  %v16204_v45 = vpop.f32.mrf.mxu1 }
 0x8f2   : > { %7664 = vmatmul.bf16.gmra.mxu3 %v15772_v28 }
 0x8f3   : > { %8567 = vmatmul.bf16.gmra.mxu0 %v17237_v41  ;;  %8616 = vmatmul.bf16.gmra.mxu1 %v15960_v58  ;;  %v7408_v58 = vadd.f32 %v16065_v7, %v7359_v30  ;;  %v13648_v7 = vld [vmem:[#allocation9 + $0x2e4] sm:$0xf] }
 0x8f4   : > { %v12721_v30 = vor.u32 %v13648_v7, %v12718_v35  ;;  %v13616_v7 = vld [vmem:[#allocation9 + $0x1e4] sm:$0xf]  ;;  %v12590_v35 = vld [vmem:[#allocation9 + $0x1f0] sm:$0xf0] }
 0x8f5   : > { %v16210_v5 = vpop.f32.mrf.mxu3  ;;  %v16212_v60 = vpop.f32.mrf.mxu2  ;;  %v7457_v61 = vadd.f32 %v16136_v20, %v7408_v58  ;;  %v13584_v58 = vld [vmem:[#allocation9 + $0xe4] sm:$0xf]  ;;  %v12462_v20 = vld [vmem:[#allocation9 + $0xf0] sm:$0xf0]  ;;  %v12593_v21 = vor.u32 %v13616_v7, %v12590_v35  ;;  %v17245_v7 = vld [vmem:[#allocation26_spill] sm:$0xff] }
 0x8f6   : > { %v12465_v26 = vor.u32 %v13584_v58, %v12462_v20  ;;  %8843 = vmatpush.bf16.msra.mxu2 %v12721_v30  ;;  %v17241_v30 = vld [vmem:[#allocation24_spill] sm:$0xff]  ;;  %v12446_v35 = vld [vmem:[#allocation9 + $0xd0] sm:$0xf0] }
 0x8f7   : > { %v7705_v48 = vmax.f32 %v7457_v61, 0.0  ;;  %v7315_v61 = vadd.f32 %v16069_v9, %v15976_v38  ;;  %8794 = vmatpush.bf16.msra.mxu1 %v12593_v21  ;;  %v16263_v58 = vperm.slane %v17241_v30, 3 }
 0x8f8   : > { %v16218_v28 = vpop.f32.mrf.mxu0  ;;  %v16220_v36 = vpop.f32.mrf.mxu1  ;;  %8745 = vmatpush.bf16.msra.mxu0 %v12465_v26 }
 0x8f9   : > { %v16246_v8 = vpack.c.bf16 %v7705_v48, %v7701_v14  ;;  %v7364_v55 = vadd.f32 %v16071_v40, %v7315_v61  ;;  %v7411_v48 = vadd.f32 %v16074_v12, %v16061_v16  ;;  %v12702_v61 = vld [vmem:[#allocation9 + $0x2d0] sm:$0xf0]  ;;  %v13580_v12 = vld [vmem:[#allocation9 + $0xc4] sm:$0xf] }
 0x8fa   : > { %8665 = vmatmul.bf16.gmra.mxu2 %v16216_v59  ;;  %v13680_v59 = vld [vmem:[#allocation9 + $0x3e4] sm:$0xf] }
 0x8fb   : > { %17240 = vst [vmem:[#allocation35_spill] sm:$0xff] %v16246_v8  ;;  %v7460_v40 = vadd.f32 %v16152_v15, %v7411_v48  ;;  %v7320_v15 = vadd.f32 %v16088_v32, %v15976_v38  ;;  %v7491_v48 = vadd.f32 %v16158_v19, %v16263_v58  ;;  %v17246_v32 = vld [vmem:[#allocation31_spill] sm:$0xff] }
 0x8fd   : > { %v16225_v41 = vpop.f32.mrf.mxu3  ;;  %v16227_v51 = vpop.f32.mrf.mxu2 }
 0x900   : > { %v16232_v47 = vpop.f32.mrf.mxu0  ;;  %v16234_v24 = vpop.f32.mrf.mxu1 }
 0x902   : > { %7669 = vmatmul.bf16.gmra.mxu3 %v15792_v54  ;;  %v12849_v54 = vor.u32 %v13680_v59, %v12846_v17  ;;  %v7413_v17 = vadd.f32 %v16084_v25, %v7364_v55  ;;  %v17244_v25 = vld [vmem:[#allocation18_spill] sm:$0xff]  ;;  %v13676_v55 = vld [vmem:[#allocation9 + $0x3c4] sm:$0xf] }
 0x903   : > { %8572 = vmatmul.bf16.gmra.mxu0 %v17239_v11  ;;  %8621 = vmatmul.bf16.gmra.mxu1 %v15982_v56 }
 0x904   : > { %8892 = vmatpush.bf16.msra.mxu3 %v12849_v54  ;;  %v7462_v26 = vadd.f32 %v16164_v1, %v7413_v17  ;;  %v13644_v54 = vld [vmem:[#allocation9 + $0x2c4] sm:$0xf]  ;;  %v7489_v1 = vadd.f32 %v16142_v4, %v16263_v58 }
 0x905   : > { %v16240_v62 = vpop.f32.mrf.mxu3  ;;  %v16242_v27 = vpop.f32.mrf.mxu2  ;;  %v12705_v16 = vor.u32 %v13644_v54, %v12702_v61  ;;  %v12574_v54 = vld [vmem:[#allocation9 + $0x1d0] sm:$0xf0] }
 0x906   : > { %v7713_v21 = vmax.f32 %v7462_v26, 0.0  ;;  %v7709_v26 = vmax.f32 %v7460_v40, 0.0  ;;  %v7538_v61 = vadd.f32 %v16144_v10, %v7489_v1  ;;  %v7369_v40 = vadd.f32 %v17246_v32, %v7320_v15  ;;  %v13608_v10 = vld [vmem:[#allocation9 + $0x1a4] sm:$0xf]  ;;  %v17248_v32 = vld [vmem:[#allocation32_spill] sm:$0xff] }
 0x907   : > { %8844 = vmatpush.bf16.msra.mxu2 %v12705_v16 }
 0x908   : > { %v16248_v56 = vpop.f32.mrf.mxu0  ;;  %v16250_v11 = vpop.f32.mrf.mxu1  ;;  %v7587_v19 = vadd.f32 %v16166_v50, %v7538_v61  ;;  %v13604_v61 = vld [vmem:[#allocation9 + $0x184] sm:$0xf] }
 0x90a   : > { %8670 = vmatmul.bf16.gmra.mxu2 %v16246_v8  ;;  %v12449_v8 = vor.u32 %v13580_v12, %v12446_v35 }
 0x90c   : > { %8746 = vmatpush.bf16.msra.mxu0 %v12449_v8  ;;  %v13576_v8 = vld [vmem:[#allocation9 + $0xa4] sm:$0xf] }
 0x90d   : > { %v16255_v59 = vpop.f32.mrf.mxu3  ;;  %v16257_v9 = vpop.f32.mrf.mxu2 }
 0x910   : > { %v16265_v20 = vpop.f32.mrf.mxu0  ;;  %v16267_v14 = vpop.f32.mrf.mxu1 }
 0x911   : > { %17242 = vst [vmem:[#allocation24_spill] sm:$0xff] %v16265_v20  ;;  %v7540_v20 = vadd.f32 %v16160_v22, %v7491_v48  ;;  %v13572_v48 = vld [vmem:[#allocation9 + $0x84] sm:$0xf] }
 0x912   : > { %17243 = vst [vmem:[#allocation36_spill] sm:$0xff] %v16267_v14  ;;  %v12830_v14 = vld [vmem:[#allocation9 + $0x3d0] sm:$0xf0] }
 0x913   : > { %8577 = vmatmul.bf16.gmra.mxu0 %v17244_v25  ;;  %8626 = vmatmul.bf16.gmra.mxu1 %v17245_v7  ;;  %v12833_v4 = vor.u32 %v13676_v55, %v12830_v14  ;;  %v13612_v7 = vld [vmem:[#allocation9 + $0x1c4] sm:$0xf]  ;;  %v16281_v25 = vpack.c.bf16 %v7713_v21, %v7709_v26  ;;  %v12430_v14 = vld [vmem:[#allocation9 + $0xb0] sm:$0xf0]  ;;  %v7418_v21 = vadd.f32 %v16103_v49, %v7369_v40 }
 0x914   : > { %v12577_v12 = vor.u32 %v13612_v7, %v12574_v54  ;;  %v7589_v1 = vadd.f32 %v16182_v34, %v7540_v20  ;;  %v12433_v7 = vor.u32 %v13576_v8, %v12430_v14  ;;  %v12558_v55 = vld [vmem:[#allocation9 + $0x1b0] sm:$0xf0] }
 0x915   : > { %v16274_v17 = vpop.f32.mrf.mxu2  ;;  %v7635_v30 = vpop.f32.mrf.mxu3  ;;  %8893 = vmatpush.bf16.msra.mxu3 %v12833_v4  ;;  %v12561_v4 = vor.u32 %v13608_v10, %v12558_v55  ;;  %v7467_v22 = vadd.f32 %v16194_v13, %v7418_v21  ;;  %v12414_v54 = vld [vmem:[#allocation9 + $0x90] sm:$0xf0]  ;;  %v13640_v10 = vld [vmem:[#allocation9 + $0x2a4] sm:$0xf] }
 0x916   : > { %8795 = vmatpush.bf16.msra.mxu1 %v12577_v12  ;;  %v7636_v16 = vadd.f32 %v7635_v30, %v7587_v19  ;;  %8747 = vmatpush.bf16.msra.mxu0 %v12433_v7  ;;  %v17247_v12 = vld [vmem:[#allocation30_spill] sm:$0xff]  ;;  %v12417_v30 = vor.u32 %v13572_v48, %v12414_v54  ;;  %v12542_v19 = vld [vmem:[#allocation9 + $0x190] sm:$0xf0]  ;;  %v7494_v48 = vadd.f32 %v16172_v44, %v16263_v58 }
 0x917   : > { %v7416_v49 = vadd.f32 %v17248_v32, %v17247_v12  ;;  %v12545_v14 = vor.u32 %v13604_v61, %v12542_v19  ;;  %v12686_v13 = vld [vmem:[#allocation9 + $0x2b0] sm:$0xf0]  ;;  %v13672_v61 = vld [vmem:[#allocation9 + $0x3a4] sm:$0xf]  ;;  %v7496_v44 = vadd.f32 %v16188_v2, %v16263_v58 }
 0x918   : > { %v16283_v57 = vpop.f32.mrf.mxu0  ;;  %v16285_v35 = vpop.f32.mrf.mxu1  ;;  %v7678_v40 = vmax.f32 %v7636_v16, 0.0  ;;  %v12689_v55 = vor.u32 %v13640_v10, %v12686_v13  ;;  %v13568_v16 = vld [vmem:[#allocation9 + $0x64] sm:$0xf]  ;;  %v17251_v54 = vld [vmem:[#allocation27_spill] sm:$0xff] }
 0x919   : > { %v7465_v21 = vadd.f32 %v16180_v29, %v7416_v49  ;;  %v12814_v29 = vld [vmem:[#allocation9 + $0x3b0] sm:$0xf0]  ;;  %v13564_v13 = vld [vmem:[#allocation9 + $0x44] sm:$0xf] }
 0x91a   : > { %8675 = vmatmul.bf16.gmra.mxu2 %v16281_v25  ;;  %8796 = vmatpush.bf16.msra.mxu1 %v12561_v4  ;;  %v12398_v4 = vld [vmem:[#allocation9 + $0x70] sm:$0xf0] }
 0x91b   : > { %8748 = vmatpush.bf16.msra.mxu0 %v12417_v30  ;;  %v12526_v12 = vld [vmem:[#allocation9 + $0x170] sm:$0xf0]  ;;  %8845 = vmatpush.bf16.msra.mxu2 %v12689_v55  ;;  %v13636_v30 = vld [vmem:[#allocation9 + $0x284] sm:$0xf]  ;;  %v7543_v55 = vadd.f32 %v16174_v31, %v7494_v48 }
 0x91c   : > { %v12670_v19 = vld [vmem:[#allocation9 + $0x290] sm:$0xf0]  ;;  %v13560_v31 = vld [vmem:[#allocation9 + $0x24] sm:$0xf] }
 0x91d   : > { %v16293_v26 = vpop.f32.mrf.mxu2  ;;  %v7637_v15 = vpop.f32.mrf.mxu3  ;;  %v12673_v10 = vor.u32 %v13636_v30, %v12670_v19  ;;  %v7592_v30 = vadd.f32 %v16196_v63, %v7543_v55  ;;  %v13592_v48 = vld [vmem:[#allocation9 + $0x124] sm:$0xf]  ;;  %v12638_v55 = vld [vmem:[#allocation9 + $0x250] sm:$0xf0] }
 0x91e   : > { %v7638_v50 = vadd.f32 %v7637_v15, %v7589_v1  ;;  %v7721_v1 = vmax.f32 %v7467_v22, 0.0  ;;  %v17250_v15 = vld [vmem:[#allocation19_spill] sm:$0xff]  ;;  %8797 = vmatpush.bf16.msra.mxu1 %v12545_v14  ;;  %v12401_v22 = vor.u32 %v13568_v16, %v12398_v4  ;;  %v7717_v14 = vmax.f32 %v7465_v21, 0.0  ;;  %v13596_v16 = vld [vmem:[#allocation9 + $0x144] sm:$0xf] }
 0x91f   : > { %v7325_v4 = vadd.f32 %v16107_v37, %v15976_v38  ;;  %8846 = vmatpush.bf16.msra.mxu2 %v12673_v10 }
 0x920   : > { %v7682_v34 = vmax.f32 %v7638_v50, 0.0  ;;  %v16298_v20 = vpop.f32.mrf.mxu0  ;;  %v16300_v8 = vpop.f32.mrf.mxu1  ;;  %v13600_v50 = vld [vmem:[#allocation9 + $0x164] sm:$0xf]  ;;  %8749 = vmatpush.bf16.msra.mxu0 %v12401_v22 }
 0x921   : > { %v13632_v22 = vld [vmem:[#allocation9 + $0x264] sm:$0xf] }
 0x922   : > { %v16303_v7 = vpack.c.bf16 %v7682_v34, %v7678_v40  ;;  %v12817_v40 = vor.u32 %v13672_v61, %v12814_v29  ;;  %v12529_v34 = vor.u32 %v13600_v50, %v12526_v12  ;;  %v16317_v61 = vpack.c.bf16 %v7721_v1, %v7717_v14  ;;  %v12510_v29 = vld [vmem:[#allocation9 + $0x150] sm:$0xf0] }
 0x923   : > { %8582 = vmatmul.bf16.gmra.mxu0 %v17250_v15  ;;  %8631 = vmatmul.bf16.gmra.mxu1 %v17251_v54  ;;  %v12513_v2 = vor.u32 %v13596_v16, %v12510_v29  ;;  %v12366_v1 = vld [vmem:[#allocation9 + $0x30] sm:$0xf0] }
 0x924   : > { %17249 = vst [vmem:[#allocation31_spill] sm:$0xff] %v16303_v7  ;;  %8704 = vmatmul.bf16.vlgmr.msrb.gmra.mxu3 %v16303_v7  ;;  %8798 = vmatpush.bf16.msra.mxu1 %v12529_v34  ;;  %v12382_v7 = vld [vmem:[#allocation9 + $0x50] sm:$0xf0]  ;;  %v7545_v34 = vadd.f32 %v16190_v39, %v7496_v44  ;;  %v12369_v10 = vor.u32 %v13560_v31, %v12366_v1  ;;  %v13628_v44 = vld [vmem:[#allocation9 + $0x244] sm:$0xf] }
 0x925   : > { %v16310_v32 = vpop.f32.mrf.mxu2  ;;  %v7640_v49 = vpop.f32.mrf.mxu3  ;;  %8894 = vmatpush.bf16.msra.mxu3 %v12817_v40  ;;  %v12385_v21 = vor.u32 %v13564_v13, %v12382_v7  ;;  %v12654_v40 = vld [vmem:[#allocation9 + $0x270] sm:$0xf0]  ;;  %v7374_v7 = vadd.f32 %v16109_v3, %v7325_v4  ;;  %v7421_v3 = vadd.f32 %v16112_v33, %v16099_v23  ;;  %v13588_v4 = vld [vmem:[#allocation9 + $0x104] sm:$0xf] }
 0x926   : > { %v12657_v37 = vor.u32 %v13632_v22, %v12654_v40  ;;  %v7594_v19 = vadd.f32 %v16212_v60, %v7545_v34  ;;  %v7641_v14 = vadd.f32 %v7640_v49, %v7592_v30  ;;  %v12494_v13 = vld [vmem:[#allocation9 + $0x130] sm:$0xf0]  ;;  %v13556_v60 = vld [vmem:[#allocation9 + $0x4] sm:$0xf] }
 0x927   : > { %8750 = vmatpush.bf16.msra.mxu0 %v12385_v21  ;;  %v12497_v63 = vor.u32 %v13592_v48, %v12494_v13  ;;  %v7423_v21 = vadd.f32 %v16122_v0, %v7374_v7  ;;  %v12350_v49 = vld [vmem:[#allocation9 + $0x10] sm:$0xf0]  ;;  %v13624_v48 = vld [vmem:[#allocation9 + $0x224] sm:$0xf]  ;;  %v7470_v23 = vadd.f32 %v16210_v5, %v7421_v3  ;;  %v17253_v13 = vld [vmem:[#allocation28_spill] sm:$0xff]  ;;  %v7501_v3 = vadd.f32 %v16218_v28, %v16263_v58 }
 0x928   : > { %v16319_v50 = vpop.f32.mrf.mxu0  ;;  %v16321_v12 = vpop.f32.mrf.mxu1  ;;  %8799 = vmatpush.bf16.msra.mxu1 %v12513_v2  ;;  %8847 = vmatpush.bf16.msra.mxu2 %v12657_v37  ;;  %v12641_v2 = vor.u32 %v13628_v44, %v12638_v55  ;;  %v7686_v40 = vmax.f32 %v7641_v14, 0.0  ;;  %v12353_v37 = vor.u32 %v13556_v60, %v12350_v49  ;;  %v12478_v31 = vld [vmem:[#allocation9 + $0x110] sm:$0xf0] }
 0x929   : > { %v7472_v22 = vadd.f32 %v16225_v41, %v7423_v21  ;;  %v12481_v0 = vor.u32 %v13588_v4, %v12478_v31  ;;  %v12622_v7 = vld [vmem:[#allocation9 + $0x230] sm:$0xf0]  ;;  %v7499_v41 = vadd.f32 %v16202_v43, %v16263_v58  ;;  %v13620_v21 = vld [vmem:[#allocation9 + $0x204] sm:$0xf]  ;;  %v7330_v43 = vadd.f32 %v16128_v53, %v15976_v38 }
 0x92a   : > { %8680 = vmatmul.bf16.gmra.mxu2 %v16317_v61 }
 0x92b   : > { %8751 = vmatpush.bf16.msra.mxu0 %v12369_v10  ;;  %v17252_v10 = vld [vmem:[#allocation13_spill] sm:$0xff]  ;;  %v7729_v14 = vmax.f32 %v7472_v22, 0.0  ;;  %v7548_v49 = vadd.f32 %v16204_v45, %v7499_v41  ;;  %v7379_v28 = vadd.f32 %v16130_v42, %v7330_v43 }
 0x92c   : > { %8800 = vmatpush.bf16.msra.mxu1 %v12497_v63  ;;  %8848 = vmatpush.bf16.msra.mxu2 %v12641_v2  ;;  %v12798_v63 = vld [vmem:[#allocation9 + $0x390] sm:$0xf0]  ;;  %v7725_v2 = vmax.f32 %v7470_v23, 0.0 }
 0x92d   : > { %v16328_v16 = vpop.f32.mrf.mxu2  ;;  %v7642_v39 = vpop.f32.mrf.mxu3 }
 0x92e   : > { %v7643_v29 = vadd.f32 %v7642_v39, %v7594_v19  ;;  %v12625_v19 = vor.u32 %v13624_v48, %v12622_v7  ;;  %v13668_v39 = vld [vmem:[#allocation9 + $0x384] sm:$0xf]  ;;  %v16353_v4 = vpack.c.bf16 %v7729_v14, %v7725_v2  ;;  %v7426_v7 = vadd.f32 %v16134_v52, %v16118_v18  ;;  %v17254_v14 = vld [vmem:[#allocation20_spill] sm:$0xff]  ;;  %v12782_v52 = vld [vmem:[#allocation9 + $0x370] sm:$0xf0] }
 0x92f   : > { %8752 = vmatpush.bf16.msra.mxu0 %v12353_v37  ;;  %v12801_v55 = vor.u32 %v13668_v39, %v12798_v63  ;;  %v7597_v37 = vadd.f32 %v16227_v51, %v7548_v49  ;;  %v17255_v63 = vld [vmem:[#allocation29_spill] sm:$0xff] }
 0x930   : > { %v7690_v34 = vmax.f32 %v7643_v29, 0.0  ;;  %v16334_v30 = vpop.f32.mrf.mxu0  ;;  %v16336_v1 = vpop.f32.mrf.mxu1  ;;  %8801 = vmatpush.bf16.msra.mxu1 %v12481_v0  ;;  %8849 = vmatpush.bf16.msra.mxu2 %v12625_v19  ;;  %v12606_v29 = vld [vmem:[#allocation9 + $0x210] sm:$0xf0]  ;;  %v7428_v0 = vadd.f32 %v16150_v46, %v7379_v28  ;;  %v7475_v42 = vadd.f32 %v16240_v62, %v7426_v7  ;;  %v7504_v46 = vadd.f32 %v16232_v47, %v16263_v58  ;;  %v13664_v18 = vld [vmem:[#allocation9 + $0x364] sm:$0xf] }
 0x931   : > { %v12609_v60 = vor.u32 %v13620_v21, %v12606_v29  ;;  %8895 = vmatpush.bf16.msra.mxu3 %v12801_v55  ;;  %v12785_v55 = vor.u32 %v13664_v18, %v12782_v52  ;;  %v7506_v62 = vadd.f32 %v16248_v56, %v16263_v58  ;;  %v16399_v49 = vld [vmem:[%s17111_s12] sm:$0xf]  ;;  %v7511_v52 = vadd.f32 %v16283_v57, %v16263_v58 }
 0x932   : > { %v16339_v33 = vpack.c.bf16 %v7690_v34, %v7686_v40  ;;  %v7550_v34 = vadd.f32 %v16220_v36, %v7501_v3  ;;  %v7477_v36 = vadd.f32 %v16255_v59, %v7428_v0  ;;  %v7733_v21 = vmax.f32 %v7475_v42, 0.0  ;;  %v12766_v42 = vld [vmem:[#allocation9 + $0x350] sm:$0xf0] }
 0x933   : > { %8587 = vmatmul.bf16.gmra.mxu0 %v17252_v10  ;;  %8636 = vmatmul.bf16.gmra.mxu1 %v17253_v13  ;;  %v7553_v29 = vadd.f32 %v16234_v24, %v7504_v46  ;;  %v16405_v28 = vperm.slane %v16399_v49, 0 }
 0x934   : > { %8709 = vmatmul.bf16.gmra.mxu3 %v16339_v33  ;;  %8850 = vmatpush.bf16.msra.mxu2 %v12609_v60  ;;  %v7599_v31 = vadd.f32 %v16242_v27, %v7550_v34  ;;  %v7737_v39 = vmax.f32 %v7477_v36, 0.0  ;;  %v7555_v60 = vadd.f32 %v16250_v11, %v7506_v62 }
 0x935   : > { %v16346_v44 = vpop.f32.mrf.mxu2  ;;  %v7645_v5 = vpop.f32.mrf.mxu3  ;;  %8896 = vmatpush.bf16.msra.mxu3 %v12785_v55  ;;  %v7602_v43 = vadd.f32 %v16257_v9, %v7553_v29 }
 0x936   : > { %v7646_v38 = vadd.f32 %v7645_v5, %v7597_v37  ;;  %v16387_v2 = vpack.c.bf16 %v7737_v39, %v7733_v21  ;;  %v7604_v56 = vadd.f32 %v16274_v17, %v7555_v60  ;;  %v17256_v17 = vld [vmem:[#allocation24_spill] sm:$0xff]  ;;  %v7560_v60 = vadd.f32 %v16285_v35, %v7511_v52 }
 0x937   : > { %v7509_v36 = vadd.f32 %v17256_v17, %v16263_v58 }
 0x938   : > { %v16355_v22 = vpop.f32.mrf.mxu0  ;;  %v16357_v40 = vpop.f32.mrf.mxu1  ;;  %v7694_v23 = vmax.f32 %v7646_v38, 0.0 }
 0x93a   : > { %8685 = vmatmul.bf16.gmra.mxu2 %v16353_v4 }
 0x93d   : > { %v16364_v53 = vpop.f32.mrf.mxu2  ;;  %v7647_v45 = vpop.f32.mrf.mxu3 }
 0x93e   : > { %v7648_v48 = vadd.f32 %v7647_v45, %v7599_v31 }
 0x940   : > { %v7698_v51 = vmax.f32 %v7648_v48, 0.0  ;;  %v16370_v19 = vpop.f32.mrf.mxu0  ;;  %v16372_v41 = vpop.f32.mrf.mxu1 }
 0x942   : > { %v16375_v27 = vpack.c.bf16 %v7698_v51, %v7694_v23  ;;  %v17257_v23 = vld [vmem:[#allocation21_spill] sm:$0xff] }
 0x943   : > { %8592 = vmatmul.bf16.gmra.mxu0 %v17254_v14  ;;  %8641 = vmatmul.bf16.gmra.mxu1 %v17255_v63  ;;  %v13660_v51 = vld [vmem:[#allocation9 + $0x344] sm:$0xf] }
 0x944   : > { %8714 = vmatmul.bf16.gmra.mxu3 %v16375_v27  ;;  %v12769_v18 = vor.u32 %v13660_v51, %v12766_v42  ;;  %v17260_v42 = vld [vmem:[#allocation16_spill] sm:$0xff] }
 0x945   : > { %v16382_v59 = vpop.f32.mrf.mxu2  ;;  %v7650_v5 = vpop.f32.mrf.mxu3 }
 0x946   : > { %v7651_v24 = vadd.f32 %v7650_v5, %v7602_v43  ;;  %8897 = vmatpush.bf16.msra.mxu3 %v12769_v18  ;;  %v17258_v5 = vld [vmem:[#allocation36_spill] sm:$0xff]  ;;  %v12750_v18 = vld [vmem:[#allocation9 + $0x330] sm:$0xf0] }
 0x947   : > { %v7558_v55 = vadd.f32 %v17258_v5, %v7509_v36 }
 0x948   : > { %v16389_v47 = vpop.f32.mrf.mxu0  ;;  %v16391_v3 = vpop.f32.mrf.mxu1  ;;  %v7702_v11 = vmax.f32 %v7651_v24, 0.0 }
 0x949   : > { %v7607_v43 = vadd.f32 %v16293_v26, %v7558_v55 }
 0x94a   : > { %8690 = vmatmul.bf16.gmra.mxu2 %v16387_v2 }
 0x94d   : > { %v16402_v34 = vpop.f32.mrf.mxu2  ;;  %v7652_v37 = vpop.f32.mrf.mxu3 }
 0x94e   : > { %v7653_v31 = vadd.f32 %v7652_v37, %v7604_v56  ;;  %v17259_v56 = vld [vmem:[#allocation14_spill] sm:$0xff]  ;;  %v7609_v37 = vadd.f32 %v16310_v32, %v7560_v60  ;;  %v7514_v32 = vadd.f32 %v16298_v20, %v16263_v58 }
 0x950   : > { %v7706_v38 = vmax.f32 %v7653_v31, 0.0  ;;  %v8558_v9 = vpop.f32.mrf.mxu0  ;;  %v8607_v0 = vpop.f32.mrf.mxu1 }
 0x951   : > { %v8559_v45 = vadd.f32 %v8558_v9, %v16405_v28 }
 0x952   : > { %v16408_v48 = vpack.c.bf16 %v7706_v38, %v7702_v11 }
 0x953   : > { %v8608_v7 = vadd.f32 %v8607_v0, %v8559_v45  ;;  %8753 = vmatmul.bf16.vlgmr.msra.gmra.mxu0 %v17232_v6  ;;  %8802 = vmatmul.bf16.vlgmr.msra.gmra.mxu1 %v17257_v23 }
 0x954   : > { %8719 = vmatmul.bf16.gmra.mxu3 %v16408_v48 }
 0x955   : > { %v16415_v46 = vpop.f32.mrf.mxu2  ;;  %v7655_v39 = vpop.f32.mrf.mxu3 }
 0x956   : > { %v7656_v31 = vadd.f32 %v7655_v39, %v7607_v43  ;;  %v17261_v39 = vld [vmem:[#allocation22_spill] sm:$0xff] }
 0x958   : > { %v8560_v21 = vpop.f32.mrf.mxu0  ;;  %v8609_v29 = vpop.f32.mrf.mxu1  ;;  %v7710_v45 = vmax.f32 %v7656_v31, 0.0 }
 0x959   : > { %v8561_v62 = vadd.f32 %v8560_v21, %v16405_v28  ;;  %v7516_v21 = vadd.f32 %v16319_v50, %v16263_v58 }
 0x95a   : > { %8851 = vmatmul.bf16.vlgmr.msra.gmra.mxu2 %v17259_v56 }
 0x95b   : > { %v8610_v24 = vadd.f32 %v8609_v29, %v8561_v62  ;;  %v7563_v29 = vadd.f32 %v16300_v8, %v7514_v32 }
 0x95d   : > { %v7657_v11 = vpop.f32.mrf.mxu3  ;;  %v8656_v38 = vpop.f32.mrf.mxu2  ;;  %v7612_v31 = vadd.f32 %v16328_v16, %v7563_v29 }
 0x95e   : > { %v7658_v57 = vadd.f32 %v7657_v11, %v7609_v37  ;;  %v16425_v9 = vadd.f32 %v8656_v38, %v8608_v7  ;;  %v13656_v7 = vld [vmem:[#allocation9 + $0x324] sm:$0xf]  ;;  %v7565_v37 = vadd.f32 %v16321_v12, %v7516_v21 }
 0x95f   : > { %v12753_v55 = vor.u32 %v13656_v7, %v12750_v18  ;;  %v17262_v11 = vld [vmem:[#allocation33_spill] sm:$0xff]  ;;  %v17263_v18 = vld [vmem:[#allocation15_spill] sm:$0xff] }
 0x960   : > { %v7714_v0 = vmax.f32 %v7658_v57, 0.0  ;;  %v8563_v17 = vpop.f32.mrf.mxu0  ;;  %v8612_v51 = vpop.f32.mrf.mxu1  ;;  %v7614_v57 = vadd.f32 %v16346_v44, %v7565_v37  ;;  %v7519_v44 = vadd.f32 %v16334_v30, %v16263_v58 }
 0x961   : > { %v8564_v36 = vadd.f32 %v8563_v17, %v16405_v28  ;;  %8898 = vmatpush.bf16.msra.mxu3 %v12753_v55 }
 0x962   : > { %v16428_v35 = vpack.c.bf16 %v7714_v0, %v7710_v45 }
 0x963   : > { %v8613_v26 = vadd.f32 %v8612_v51, %v8564_v36  ;;  %8758 = vmatmul.bf16.gmra.mxu0 %v17260_v42  ;;  %8807 = vmatmul.bf16.gmra.mxu1 %v17261_v39 }
 0x964   : > { %8724 = vmatmul.bf16.gmra.mxu3 %v16428_v35 }
 0x965   : > { %v7660_v52 = vpop.f32.mrf.mxu3  ;;  %v8658_v5 = vpop.f32.mrf.mxu2 }
 0x966   : > { %v16437_v62 = vadd.f32 %v8658_v5, %v8610_v24  ;;  %v7661_v45 = vadd.f32 %v7660_v52, %v7612_v31  ;;  %v17264_v52 = vld [vmem:[#allocation23_spill] sm:$0xff] }
 0x967   : > { %v12734_v5 = vld [vmem:[#allocation9 + $0x310] sm:$0xf0] }
 0x968   : > { %v8565_v60 = vpop.f32.mrf.mxu0  ;;  %v8614_v43 = vpop.f32.mrf.mxu1  ;;  %v7718_v8 = vmax.f32 %v7661_v45, 0.0 }
 0x969   : > { %v8566_v20 = vadd.f32 %v8565_v60, %v16405_v28  ;;  %v7521_v60 = vadd.f32 %v16355_v22, %v16263_v58 }
 0x96a   : > { %8856 = vmatmul.bf16.gmra.mxu2 %v17262_v11 }
 0x96b   : > { %v8615_v38 = vadd.f32 %v8614_v43, %v8566_v20  ;;  %v7568_v43 = vadd.f32 %v16336_v1, %v7519_v44 }
 0x96d   : > { %v7662_v50 = vpop.f32.mrf.mxu3  ;;  %v8661_v24 = vpop.f32.mrf.mxu2  ;;  %v7617_v45 = vadd.f32 %v16364_v53, %v7568_v43  ;;  %v13587_v43 = vld [vmem:[#allocation9 + $0xf4] sm:$0xf0] }
 0x96e   : > { %v7663_v0 = vadd.f32 %v7662_v50, %v7614_v57  ;;  %v16445_v17 = vadd.f32 %v8661_v24, %v8613_v26  ;;  %v13652_v26 = vld [vmem:[#allocation9 + $0x304] sm:$0xf]  ;;  %v7570_v57 = vadd.f32 %v16357_v40, %v7521_v60  ;;  %v17265_v50 = vld [vmem:[#allocation34_spill] sm:$0xff] }
 0x96f   : > { %v12737_v29 = vor.u32 %v13652_v26, %v12734_v5  ;;  %v17266_v5 = vld [vmem:[#allocation17_spill] sm:$0xff]  ;;  %v12468_v60 = vld [vmem:[#allocation9 + $0xe8] sm:$0xf] }
 0x970   : > { %v7722_v36 = vmax.f32 %v7663_v0, 0.0  ;;  %v8568_v51 = vpop.f32.mrf.mxu0  ;;  %v8617_v7 = vpop.f32.mrf.mxu1  ;;  %v7619_v0 = vadd.f32 %v16382_v59, %v7570_v57  ;;  %v7524_v59 = vadd.f32 %v16370_v19, %v16263_v58  ;;  %v12469_v57 = vor.u32 %v13587_v43, %v12468_v60  ;;  %v12596_v19 = vld [vmem:[#allocation9 + $0x1e8] sm:$0xf] }
 0x971   : > { %v8569_v32 = vadd.f32 %v8568_v51, %v16405_v28  ;;  %8899 = vmatpush.bf16.msra.mxu3 %v12737_v29  ;;  %v13651_v29 = vld [vmem:[#allocation9 + $0x2f4] sm:$0xf0] }
 0x972   : > { %v16448_v12 = vpack.c.bf16 %v7722_v36, %v7718_v8  ;;  %8941 = vmatpush.bf16.msrb.mxu0 %v12469_v57 }
 0x973   : > { %v8618_v16 = vadd.f32 %v8617_v7, %v8569_v32  ;;  %8763 = vmatmul.bf16.gmra.mxu0 %v17263_v18  ;;  %8812 = vmatmul.bf16.gmra.mxu1 %v17264_v52 }
 0x974   : > { %8729 = vmatmul.bf16.gmra.mxu3 %v16448_v12 }
 0x975   : > { %v7665_v55 = vpop.f32.mrf.mxu3  ;;  %v8663_v21 = vpop.f32.mrf.mxu2 }
 0x976   : > { %v16457_v20 = vadd.f32 %v8663_v21, %v8615_v38  ;;  %v7666_v8 = vadd.f32 %v7665_v55, %v7617_v45  ;;  %v12724_v21 = vld [vmem:[#allocation9 + $0x2e8] sm:$0xf]  ;;  %v13683_v45 = vld [vmem:[#allocation9 + $0x3f4] sm:$0xf0] }
 0x977   : > { %v12725_v55 = vor.u32 %v13651_v29, %v12724_v21 }
 0x978   : > { %v8570_v37 = vpop.f32.mrf.mxu0  ;;  %v8619_v31 = vpop.f32.mrf.mxu1  ;;  %v7726_v1 = vmax.f32 %v7666_v8, 0.0 }
 0x979   : > { %v8571_v30 = vadd.f32 %v8570_v37, %v16405_v28  ;;  %v12852_v37 = vld [vmem:[#allocation9 + $0x3e8] sm:$0xf]  ;;  %9039 = vmatpush.bf16.msrb.mxu2 %v12725_v55 }
 0x97a   : > { %8861 = vmatmul.bf16.gmra.mxu2 %v17265_v50 }
 0x97b   : > { %v8620_v24 = vadd.f32 %v8619_v31, %v8571_v30 }
 0x97d   : > { %v7667_v22 = vpop.f32.mrf.mxu3  ;;  %v8666_v38 = vpop.f32.mrf.mxu2 }
 0x97e   : > { %v7668_v36 = vadd.f32 %v7667_v22, %v7619_v0  ;;  %v16465_v51 = vadd.f32 %v8666_v38, %v8618_v16  ;;  %v17267_v16 = vld [vmem:[#allocation25_spill] sm:$0xff]  ;;  %v7526_v0 = vadd.f32 %v16389_v47, %v16263_v58  ;;  %v12853_v22 = vor.u32 %v13683_v45, %v12852_v37  ;;  %v13619_v38 = vld [vmem:[#allocation9 + $0x1f4] sm:$0xf0]  ;;  %v17268_v47 = vld [vmem:[#allocation35_spill] sm:$0xff] }
 0x980   : > { %v7730_v32 = vmax.f32 %v7668_v36, 0.0  ;;  %v8573_v7 = vpop.f32.mrf.mxu0  ;;  %v8622_v26 = vpop.f32.mrf.mxu1  ;;  %v12597_v36 = vor.u32 %v13619_v38, %v12596_v19  ;;  %9088 = vmatpush.bf16.msrb.mxu3 %v12853_v22  ;;  %v13647_v22 = vld [vmem:[#allocation9 + $0x2d4] sm:$0xf0]  ;;  %v12452_v19 = vld [vmem:[#allocation9 + $0xc8] sm:$0xf] }
 0x981   : > { %v8574_v44 = vadd.f32 %v8573_v7, %v16405_v28 }
 0x982   : > { %v16468_v40 = vpack.c.bf16 %v7730_v32, %v7726_v1  ;;  %v7573_v1 = vadd.f32 %v16372_v41, %v7524_v59  ;;  %8990 = vmatpush.bf16.msrb.mxu1 %v12597_v36  ;;  %v13583_v36 = vld [vmem:[#allocation9 + $0xd4] sm:$0xf0] }
 0x983   : > { %v8623_v53 = vadd.f32 %v8622_v26, %v8574_v44  ;;  %8768 = vmatmul.bf16.gmra.mxu0 %v17266_v5  ;;  %8817 = vmatmul.bf16.gmra.mxu1 %v17267_v16  ;;  %v7575_v26 = vadd.f32 %v16391_v3, %v7526_v0  ;;  %v17269_v0 = vld [vmem:[#allocation18_spill] sm:$0xff] }
 0x984   : > { %8734 = vmatmul.bf16.gmra.mxu3 %v16468_v40  ;;  %v7622_v58 = vadd.f32 %v16402_v34, %v7573_v1  ;;  %v12836_v1 = vld [vmem:[#allocation9 + $0x3c8] sm:$0xf] }
 0x985   : > { %v7670_v30 = vpop.f32.mrf.mxu3  ;;  %v8668_v31 = vpop.f32.mrf.mxu2  ;;  %v7624_v21 = vadd.f32 %v16415_v46, %v7575_v26  ;;  %v17270_v46 = vld [vmem:[#allocation26_spill] sm:$0xff] }
 0x986   : > { %v16477_v8 = vadd.f32 %v8668_v31, %v8620_v24  ;;  %v7671_v29 = vadd.f32 %v7670_v30, %v7622_v58  ;;  %v12708_v30 = vld [vmem:[#allocation9 + $0x2c8] sm:$0xf] }
 0x987   : > { %v12709_v38 = vor.u32 %v13647_v22, %v12708_v30  ;;  %v12580_v58 = vld [vmem:[#allocation9 + $0x1c8] sm:$0xf] }
 0x988   : > { %v8575_v32 = vpop.f32.mrf.mxu0  ;;  %v8624_v44 = vpop.f32.mrf.mxu1  ;;  %v7734_v59 = vmax.f32 %v7671_v29, 0.0 }
 0x989   : > { %v8576_v7 = vadd.f32 %v8575_v32, %v16405_v28  ;;  %v13679_v32 = vld [vmem:[#allocation9 + $0x3d4] sm:$0xf0]  ;;  %9040 = vmatpush.bf16.msrb.mxu2 %v12709_v38 }
 0x98a   : > { %8866 = vmatmul.bf16.gmra.mxu2 %v17268_v47  ;;  %v12837_v26 = vor.u32 %v13679_v32, %v12836_v1  ;;  %v13575_v38 = vld [vmem:[#allocation9 + $0x94] sm:$0xf0] }
 0x98b   : > { %v8625_v24 = vadd.f32 %v8624_v44, %v8576_v7  ;;  %v12453_v44 = vor.u32 %v13583_v36, %v12452_v19  ;;  %v12548_v36 = vld [vmem:[#allocation9 + $0x188] sm:$0xf] }
 0x98c   : > { %9089 = vmatpush.bf16.msrb.mxu3 %v12837_v26 }
 0x98d   : > { %v7672_v55 = vpop.f32.mrf.mxu3  ;;  %v8671_v60 = vpop.f32.mrf.mxu2  ;;  %8942 = vmatpush.bf16.msrb.mxu0 %v12453_v44  ;;  %v13607_v44 = vld [vmem:[#allocation9 + $0x194] sm:$0xf0] }
 0x98e   : > { %v7673_v43 = vadd.f32 %v7672_v55, %v7624_v21  ;;  %v16485_v41 = vadd.f32 %v8671_v60, %v8623_v53  ;;  %v13615_v21 = vld [vmem:[#allocation9 + $0x1d4] sm:$0xf0] }
 0x98f   : > { %v12581_v29 = vor.u32 %v13615_v21, %v12580_v58  ;;  %v12549_v21 = vor.u32 %v13607_v44, %v12548_v36 }
 0x990   : > { %v7738_v37 = vmax.f32 %v7673_v43, 0.0  ;;  %v8578_v31 = vpop.f32.mrf.mxu0  ;;  %v8627_v45 = vpop.f32.mrf.mxu1 }
 0x991   : > { %v8579_v57 = vadd.f32 %v8578_v31, %v16405_v28  ;;  %8991 = vmatpush.bf16.msrb.mxu1 %v12581_v29  ;;  %v13579_v31 = vld [vmem:[#allocation9 + $0xb4] sm:$0xf0]  ;;  %v12692_v29 = vld [vmem:[#allocation9 + $0x2a8] sm:$0xf] }
 0x992   : > { %v16488_v3 = vpack.c.bf16 %v7738_v37, %v7734_v59  ;;  %v12436_v37 = vld [vmem:[#allocation9 + $0xa8] sm:$0xf] }
 0x993   : > { %v8628_v34 = vadd.f32 %v8627_v45, %v8579_v57  ;;  %8773 = vmatmul.bf16.gmra.mxu0 %v17269_v0  ;;  %8822 = vmatmul.bf16.gmra.mxu1 %v17270_v46  ;;  %v12437_v57 = vor.u32 %v13579_v31, %v12436_v37  ;;  %v13611_v45 = vld [vmem:[#allocation9 + $0x1b4] sm:$0xf0]  ;;  %v12532_v31 = vld [vmem:[#allocation9 + $0x168] sm:$0xf] }
 0x994   : > { %8739 = vmatmul.bf16.gmra.mxu3 %v16488_v3  ;;  %v13571_v37 = vld [vmem:[#allocation9 + $0x74] sm:$0xf0] }
 0x995   : > { %v8673_v53 = vpop.f32.mrf.mxu2  ;;  %8943 = vmatpush.bf16.msrb.mxu0 %v12437_v57  ;;  %v12820_v57 = vld [vmem:[#allocation9 + $0x3a8] sm:$0xf] }
 0x996   : > { %v16493_v7 = vadd.f32 %v8673_v53, %v8625_v24  ;;  %v12564_v24 = vld [vmem:[#allocation9 + $0x1a8] sm:$0xf] }
 0x997   : > { %v12565_v22 = vor.u32 %v13611_v45, %v12564_v24  ;;  %v12420_v53 = vld [vmem:[#allocation9 + $0x88] sm:$0xf]  ;;  %v17271_v24 = vld [vmem:[#allocation31_spill] sm:$0xff]  ;;  %v13675_v45 = vld [vmem:[#allocation9 + $0x3b4] sm:$0xf0] }
 0x998   : > { %v8580_v55 = vpop.f32.mrf.mxu0  ;;  %v8629_v43 = vpop.f32.mrf.mxu1  ;;  %v12421_v32 = vor.u32 %v13575_v38, %v12420_v53  ;;  %v12821_v38 = vor.u32 %v13675_v45, %v12820_v57  ;;  %v13635_v45 = vld [vmem:[#allocation9 + $0x274] sm:$0xf0] }
 0x999   : > { %v8581_v60 = vadd.f32 %v8580_v55, %v16405_v28  ;;  %8992 = vmatpush.bf16.msrb.mxu1 %v12565_v22  ;;  %v13643_v55 = vld [vmem:[#allocation9 + $0x2b4] sm:$0xf0] }
 0x99a   : > { %8871 = vmatmul.bf16.gmra.mxu2 %v16281_v25  ;;  %8944 = vmatpush.bf16.msrb.mxu0 %v12421_v32  ;;  %v13603_v22 = vld [vmem:[#allocation9 + $0x174] sm:$0xf0] }
 0x99b   : > { %v8630_v59 = vadd.f32 %v8629_v43, %v8581_v60  ;;  %v12693_v60 = vor.u32 %v13643_v55, %v12692_v29  ;;  %v12533_v36 = vor.u32 %v13603_v22, %v12532_v31  ;;  %v13639_v32 = vld [vmem:[#allocation9 + $0x294] sm:$0xf0]  ;;  %9090 = vmatpush.bf16.msrb.mxu3 %v12821_v38  ;;  %v12516_v55 = vld [vmem:[#allocation9 + $0x148] sm:$0xf] }
 0x99c   : > { %v13567_v29 = vld [vmem:[#allocation9 + $0x54] sm:$0xf0] }
 0x99d   : > { %v8676_v30 = vpop.f32.mrf.mxu2  ;;  %8993 = vmatpush.bf16.msrb.mxu1 %v12549_v21  ;;  %9041 = vmatpush.bf16.msrb.mxu2 %v12693_v60  ;;  %v12388_v21 = vld [vmem:[#allocation9 + $0x48] sm:$0xf]  ;;  %v13563_v38 = vld [vmem:[#allocation9 + $0x34] sm:$0xf0] }
 0x99e   : > { %v16497_v19 = vadd.f32 %v8676_v30, %v8628_v34  ;;  %v12404_v34 = vld [vmem:[#allocation9 + $0x68] sm:$0xf] }
 0x99f   : > { %v12405_v30 = vor.u32 %v13571_v37, %v12404_v34  ;;  %v12389_v37 = vor.u32 %v13567_v29, %v12388_v21  ;;  %v12644_v21 = vld [vmem:[#allocation9 + $0x248] sm:$0xf]  ;;  %v13631_v29 = vld [vmem:[#allocation9 + $0x254] sm:$0xf0] }
 0x9a0   : > { %v8583_v1 = vpop.f32.mrf.mxu0  ;;  %v8632_v58 = vpop.f32.mrf.mxu1 }
 0x9a1   : > { %v8584_v26 = vadd.f32 %v8583_v1, %v16405_v28  ;;  %v12676_v1 = vld [vmem:[#allocation9 + $0x288] sm:$0xf]  ;;  %8945 = vmatpush.bf16.msrb.mxu0 %v12405_v30  ;;  %8994 = vmatpush.bf16.msrb.mxu1 %v12533_v36 }
 0x9a2   : > { %v12500_v36 = vld [vmem:[#allocation9 + $0x128] sm:$0xf] }
 0x9a3   : > { %v8633_v43 = vadd.f32 %v8632_v58, %v8584_v26  ;;  %8778 = vmatmul.bf16.gmra.mxu0 %v17250_v15  ;;  %8827 = vmatmul.bf16.gmra.mxu1 %v17251_v54  ;;  %v12677_v26 = vor.u32 %v13639_v32, %v12676_v1  ;;  %v13599_v54 = vld [vmem:[#allocation9 + $0x154] sm:$0xf0] }
 0x9a4   : > { %8900 = vmatmul.bf16.vlgmr.msra.gmra.mxu3 %v17271_v24  ;;  %v12517_v57 = vor.u32 %v13599_v54, %v12516_v55  ;;  %v13595_v1 = vld [vmem:[#allocation9 + $0x134] sm:$0xf0]  ;;  %v12645_v54 = vor.u32 %v13631_v29, %v12644_v21 }
 0x9a5   : > { %v8678_v53 = vpop.f32.mrf.mxu2  ;;  %9042 = vmatpush.bf16.msrb.mxu2 %v12677_v26  ;;  %8946 = vmatpush.bf16.msrb.mxu0 %v12389_v37  ;;  %v13559_v37 = vld [vmem:[#allocation9 + $0x14] sm:$0xf0] }
 0x9a6   : > { %v16503_v44 = vadd.f32 %v8678_v53, %v8630_v59  ;;  %v12660_v59 = vld [vmem:[#allocation9 + $0x268] sm:$0xf]  ;;  %8995 = vmatpush.bf16.msrb.mxu1 %v12517_v57  ;;  %v13671_v29 = vld [vmem:[#allocation9 + $0x394] sm:$0xf0] }
 0x9a7   : > { %v8705_v58 = vpop.f32.mrf.mxu3  ;;  %v12661_v30 = vor.u32 %v13635_v45, %v12660_v59  ;;  %v12372_v53 = vld [vmem:[#allocation9 + $0x28] sm:$0xf]  ;;  %v13591_v45 = vld [vmem:[#allocation9 + $0x114] sm:$0xf0] }
 0x9a8   : > { %v8706_v24 = vadd.f32 %v8705_v58, %v16425_v9  ;;  %v8585_v34 = vpop.f32.mrf.mxu0  ;;  %v8634_v31 = vpop.f32.mrf.mxu1  ;;  %v12373_v9 = vor.u32 %v13563_v38, %v12372_v53  ;;  %v12501_v58 = vor.u32 %v13595_v1, %v12500_v36  ;;  %v12628_v36 = vld [vmem:[#allocation9 + $0x228] sm:$0xf] }
 0x9a9   : > { %v8586_v60 = vadd.f32 %v8585_v34, %v16405_v28  ;;  %9043 = vmatpush.bf16.msrb.mxu2 %v12661_v30  ;;  %v12356_v34 = vld [vmem:[#allocation9 + $0x8] sm:$0xf] }
 0x9aa   : > { %8876 = vmatmul.bf16.gmra.mxu2 %v16317_v61  ;;  %8947 = vmatpush.bf16.msrb.mxu0 %v12373_v9  ;;  %v12357_v59 = vor.u32 %v13559_v37, %v12356_v34  ;;  %v9333_v1 = vmax.f32 %v8706_v24, 0.0  ;;  %v12612_v34 = vld [vmem:[#allocation9 + $0x208] sm:$0xf]  ;;  %v13623_v24 = vld [vmem:[#allocation9 + $0x214] sm:$0xf0] }
 0x9ab   : > { %v8635_v22 = vadd.f32 %v8634_v31, %v8586_v60  ;;  %8996 = vmatpush.bf16.msrb.mxu1 %v12501_v58  ;;  %v12484_v60 = vld [vmem:[#allocation9 + $0x108] sm:$0xf] }
 0x9ac   : > { %v12485_v38 = vor.u32 %v13591_v45, %v12484_v60  ;;  %v12613_v60 = vor.u32 %v13623_v24, %v12612_v34 }
 0x9ad   : > { %v8681_v32 = vpop.f32.mrf.mxu2  ;;  %9044 = vmatpush.bf16.msrb.mxu2 %v12645_v54 }
 0x9ae   : > { %v16508_v26 = vadd.f32 %v8681_v32, %v8633_v43  ;;  %v13627_v43 = vld [vmem:[#allocation9 + $0x234] sm:$0xf0]  ;;  %8948 = vmatpush.bf16.msrb.mxu0 %v12357_v59 }
 0x9af   : > { %v8707_v55 = vpop.f32.mrf.mxu3  ;;  %v12629_v32 = vor.u32 %v13627_v43, %v12628_v36  ;;  %8997 = vmatpush.bf16.msrb.mxu1 %v12485_v38 }
 0x9b0   : > { %v8708_v31 = vadd.f32 %v8707_v55, %v16437_v62  ;;  %v8588_v57 = vpop.f32.mrf.mxu0  ;;  %v8637_v30 = vpop.f32.mrf.mxu1  ;;  %v12804_v62 = vld [vmem:[#allocation9 + $0x388] sm:$0xf] }
 0x9b1   : > { %v8589_v53 = vadd.f32 %v8588_v57, %v16405_v28  ;;  %9045 = vmatpush.bf16.msrb.mxu2 %v12629_v32  ;;  %v12805_v55 = vor.u32 %v13671_v29, %v12804_v62 }
 0x9b2   : > { %v9337_v9 = vmax.f32 %v8708_v31, 0.0 }
 0x9b3   : > { %v8638_v58 = vadd.f32 %v8637_v30, %v8589_v53  ;;  %8783 = vmatmul.bf16.gmra.mxu0 %v17252_v10  ;;  %8832 = vmatmul.bf16.gmra.mxu1 %v17253_v13 }
 0x9b4   : > { %v16513_v21 = vpack.c.bf16 %v9337_v9, %v9333_v1  ;;  %8905 = vmatmul.bf16.gmra.mxu3 %v16339_v33 }
 0x9b5   : > { %v8683_v54 = vpop.f32.mrf.mxu2  ;;  %9091 = vmatpush.bf16.msrb.mxu3 %v12805_v55  ;;  %9046 = vmatpush.bf16.msrb.mxu2 %v12613_v60  ;;  %v13667_v55 = vld [vmem:[#allocation9 + $0x374] sm:$0xf0] }
 0x9b6   : > { %17272 = vst [vmem:[#allocation30_spill] sm:$0xff] %v16513_v21  ;;  %v16517_v37 = vadd.f32 %v8683_v54, %v8635_v22  ;;  %v12788_v54 = vld [vmem:[#allocation9 + $0x368] sm:$0xf]  ;;  %v13565_v21 = vld [vmem:[#allocation9 + $0x4c] sm:$0xf] }
 0x9b7   : > { %v8710_v31 = vpop.f32.mrf.mxu3  ;;  %v12789_v24 = vor.u32 %v13667_v55, %v12788_v54  ;;  %v13663_v54 = vld [vmem:[#allocation9 + $0x354] sm:$0xf0] }
 0x9b8   : > { %v8711_v57 = vadd.f32 %v8710_v31, %v16445_v17  ;;  %v8590_v59 = vpop.f32.mrf.mxu0  ;;  %v8639_v53 = vpop.f32.mrf.mxu1 }
 0x9b9   : > { %v8591_v45 = vadd.f32 %v8590_v59, %v16405_v28  ;;  %9092 = vmatpush.bf16.msrb.mxu3 %v12789_v24 }
 0x9ba   : > { %8881 = vmatmul.bf16.gmra.mxu2 %v16353_v4  ;;  %v9341_v62 = vmax.f32 %v8711_v57, 0.0 }
 0x9bb   : > { %v8640_v30 = vadd.f32 %v8639_v53, %v8591_v45 }
 0x9bd   : > { %v8686_v38 = vpop.f32.mrf.mxu2 }
 0x9be   : > { %v16522_v36 = vadd.f32 %v8686_v38, %v8638_v58 }
 0x9bf   : > { %v8712_v43 = vpop.f32.mrf.mxu3 }
 0x9c0   : > { %v8713_v22 = vadd.f32 %v8712_v43, %v16457_v20  ;;  %v8593_v1 = vpop.f32.mrf.mxu0  ;;  %v8642_v32 = vpop.f32.mrf.mxu1  ;;  %v16537_v43 = vperm.slane %v16399_v49, 1  ;;  %v12772_v49 = vld [vmem:[#allocation9 + $0x348] sm:$0xf] }
 0x9c1   : > { %v8594_v9 = vadd.f32 %v8593_v1, %v16405_v28 }
 0x9c2   : > { %v9345_v17 = vmax.f32 %v8713_v22, 0.0 }
 0x9c3   : > { %v8643_v29 = vadd.f32 %v8642_v32, %v8594_v9  ;;  %8788 = vmatmul.bf16.gmra.mxu0 %v17254_v14  ;;  %8837 = vmatmul.bf16.gmra.mxu1 %v17255_v63 }
 0x9c4   : > { %8910 = vmatmul.bf16.gmra.mxu3 %v16375_v27  ;;  %v16529_v58 = vpack.c.bf16 %v9345_v17, %v9341_v62 }
 0x9c5   : > { %v8688_v34 = vpop.f32.mrf.mxu2 }
 0x9c6   : > { %17273 = vst [vmem:[#allocation32_spill] sm:$0xff] %v16529_v58  ;;  %v16531_v20 = vadd.f32 %v8688_v34, %v8640_v30  ;;  %v12773_v34 = vor.u32 %v13663_v54, %v12772_v49  ;;  %v12756_v49 = vld [vmem:[#allocation9 + $0x328] sm:$0xf]  ;;  %v13659_v54 = vld [vmem:[#allocation9 + $0x334] sm:$0xf0] }
 0x9c7   : > { %v8715_v60 = vpop.f32.mrf.mxu3 }
 0x9c8   : > { %v8716_v31 = vadd.f32 %v8715_v60, %v16465_v51  ;;  %v8595_v57 = vpop.f32.mrf.mxu0  ;;  %v8644_v45 = vpop.f32.mrf.mxu1  ;;  %9093 = vmatpush.bf16.msrb.mxu3 %v12773_v34  ;;  %v12757_v34 = vor.u32 %v13659_v54, %v12756_v49  ;;  %v12740_v54 = vld [vmem:[#allocation9 + $0x308] sm:$0xf] }
 0x9c9   : > { %v8596_v59 = vadd.f32 %v8595_v57, %v16405_v28 }
 0x9ca   : > { %8886 = vmatmul.bf16.gmra.mxu2 %v16387_v2  ;;  %v9349_v62 = vmax.f32 %v8716_v31, 0.0 }
 0x9cb   : > { %v8645_v53 = vadd.f32 %v8644_v45, %v8596_v59 }
 0x9cc   : > { %9094 = vmatpush.bf16.msrb.mxu3 %v12757_v34 }
 0x9cd   : > { %v8691_v38 = vpop.f32.mrf.mxu2 }
 0x9ce   : > { %v16539_v22 = vadd.f32 %v8691_v38, %v8643_v29 }
 0x9cf   : > { %v8717_v1 = vpop.f32.mrf.mxu3 }
 0x9d0   : > { %v8718_v30 = vadd.f32 %v8717_v1, %v16477_v8  ;;  %v8754_v9 = vpop.f32.mrf.mxu0  ;;  %v8803_v51 = vpop.f32.mrf.mxu1 }
 0x9d1   : > { %v8755_v32 = vadd.f32 %v8754_v9, %v16537_v43 }
 0x9d2   : > { %v9353_v17 = vmax.f32 %v8718_v30, 0.0 }
 0x9d3   : > { %v8804_v28 = vadd.f32 %v8803_v51, %v8755_v32  ;;  %8949 = vmatmul.bf16.vlgmr.msrb.gmra.mxu0 %v17232_v6  ;;  %8998 = vmatmul.bf16.vlgmr.msrb.gmra.mxu1 %v17257_v23 }
 0x9d4   : > { %8915 = vmatmul.bf16.gmra.mxu3 %v16408_v48  ;;  %v16546_v29 = vpack.c.bf16 %v9353_v17, %v9349_v62 }
 0x9d5   : > { %v8693_v55 = vpop.f32.mrf.mxu2 }
 0x9d6   : > { %17274 = vst [vmem:[#allocation19_spill] sm:$0xff] %v16546_v29  ;;  %v16548_v8 = vadd.f32 %v8693_v55, %v8645_v53 }
 0x9d7   : > { %v8720_v24 = vpop.f32.mrf.mxu3 }
 0x9d8   : > { %v8721_v60 = vadd.f32 %v8720_v24, %v16485_v41  ;;  %v8756_v31 = vpop.f32.mrf.mxu0  ;;  %v8805_v59 = vpop.f32.mrf.mxu1 }
 0x9d9   : > { %v8757_v57 = vadd.f32 %v8756_v31, %v16537_v43 }
 0x9da   : > { %9047 = vmatmul.bf16.vlgmr.msrb.gmra.mxu2 %v17259_v56  ;;  %v9357_v62 = vmax.f32 %v8721_v60, 0.0 }
 0x9db   : > { %v8806_v45 = vadd.f32 %v8805_v59, %v8757_v57 }
 0x9dd   : > { %v8852_v38 = vpop.f32.mrf.mxu2 }
 0x9de   : > { %v16553_v1 = vadd.f32 %v8852_v38, %v8804_v28 }
 0x9df   : > { %v8722_v30 = vpop.f32.mrf.mxu3 }
 0x9e0   : > { %v8723_v9 = vadd.f32 %v8722_v30, %v16493_v7  ;;  %v8759_v32 = vpop.f32.mrf.mxu0  ;;  %v8808_v51 = vpop.f32.mrf.mxu1 }
 0x9e1   : > { %v8760_v53 = vadd.f32 %v8759_v32, %v16537_v43 }
 0x9e2   : > { %v9361_v17 = vmax.f32 %v8723_v9, 0.0 }
 0x9e3   : > { %v8809_v41 = vadd.f32 %v8808_v51, %v8760_v53  ;;  %8954 = vmatmul.bf16.gmra.mxu0 %v17260_v42  ;;  %9003 = vmatmul.bf16.gmra.mxu1 %v17261_v39 }
 0x9e4   : > { %8920 = vmatmul.bf16.gmra.mxu3 %v16428_v35  ;;  %v16560_v28 = vpack.c.bf16 %v9361_v17, %v9357_v62 }
 0x9e5   : > { %v8854_v55 = vpop.f32.mrf.mxu2 }
 0x9e6   : > { %17275 = vst [vmem:[#allocation13_spill] sm:$0xff] %v16560_v28  ;;  %v16562_v7 = vadd.f32 %v8854_v55, %v8806_v45  ;;  %v13655_v55 = vld [vmem:[#allocation9 + $0x314] sm:$0xf0] }
 0x9e7   : > { %v8725_v24 = vpop.f32.mrf.mxu3 }
 0x9e8   : > { %v8726_v60 = vadd.f32 %v8725_v24, %v16497_v19  ;;  %v8761_v31 = vpop.f32.mrf.mxu0  ;;  %v8810_v59 = vpop.f32.mrf.mxu1  ;;  %v12741_v24 = vor.u32 %v13655_v55, %v12740_v54 }
 0x9e9   : > { %v8762_v57 = vadd.f32 %v8761_v31, %v16537_v43 }
 0x9ea   : > { %9052 = vmatmul.bf16.gmra.mxu2 %v17262_v11  ;;  %v9365_v17 = vmax.f32 %v8726_v60, 0.0  ;;  %9095 = vmatpush.bf16.msrb.mxu3 %v12741_v24  ;;  %v12726_v24 = vld [vmem:[#allocation9 + $0x2f8] sm:$0xf0] }
 0x9eb   : > { %v8811_v38 = vadd.f32 %v8810_v59, %v8762_v57 }
 0x9ed   : > { %v8857_v30 = vpop.f32.mrf.mxu2 }
 0x9ee   : > { %v16567_v9 = vadd.f32 %v8857_v30, %v8809_v41 }
 0x9ef   : > { %v8727_v32 = vpop.f32.mrf.mxu3 }
 0x9f0   : > { %v8728_v53 = vadd.f32 %v8727_v32, %v16503_v44  ;;  %v8764_v51 = vpop.f32.mrf.mxu0  ;;  %v8813_v62 = vpop.f32.mrf.mxu1 }
 0x9f1   : > { %v8765_v45 = vadd.f32 %v8764_v51, %v16537_v43 }
 0x9f2   : > { %v9369_v49 = vmax.f32 %v8728_v53, 0.0 }
 0x9f3   : > { %v8814_v19 = vadd.f32 %v8813_v62, %v8765_v45  ;;  %8959 = vmatmul.bf16.gmra.mxu0 %v17263_v18  ;;  %9008 = vmatmul.bf16.gmra.mxu1 %v17264_v52 }
 0x9f4   : > { %8925 = vmatmul.bf16.gmra.mxu3 %v16448_v12  ;;  %v16574_v41 = vpack.c.bf16 %v9369_v49, %v9365_v17 }
 0x9f5   : > { %v8859_v34 = vpop.f32.mrf.mxu2 }
 0x9f6   : > { %17276 = vst [vmem:[#allocation28_spill] sm:$0xff] %v16574_v41  ;;  %v16576_v44 = vadd.f32 %v8859_v34, %v8811_v38  ;;  %v13649_v34 = vld [vmem:[#allocation9 + $0x2ec] sm:$0xf] }
 0x9f7   : > { %v8730_v31 = vpop.f32.mrf.mxu3 }
 0x9f8   : > { %v8731_v60 = vadd.f32 %v8730_v31, %v16508_v26  ;;  %v8766_v57 = vpop.f32.mrf.mxu0  ;;  %v8815_v30 = vpop.f32.mrf.mxu1  ;;  %v13585_v31 = vld [vmem:[#allocation9 + $0xec] sm:$0xf] }
 0x9f9   : > { %v8767_v59 = vadd.f32 %v8766_v57, %v16537_v43  ;;  %v12470_v57 = vld [vmem:[#allocation9 + $0xf8] sm:$0xf0] }
 0x9fa   : > { %9057 = vmatmul.bf16.gmra.mxu2 %v17265_v50  ;;  %v9373_v54 = vmax.f32 %v8731_v60, 0.0 }
 0x9fb   : > { %v8816_v32 = vadd.f32 %v8815_v30, %v8767_v59  ;;  %v13681_v59 = vld [vmem:[#allocation9 + $0x3ec] sm:$0xf] }
 0x9fd   : > { %v8862_v53 = vpop.f32.mrf.mxu2 }
 0x9fe   : > { %v16581_v51 = vadd.f32 %v8862_v53, %v8814_v19  ;;  %v12729_v19 = vor.u32 %v13649_v34, %v12726_v24  ;;  %v12473_v53 = vor.u32 %v13585_v31, %v12470_v57 }
 0x9ff   : > { %v8732_v45 = vpop.f32.mrf.mxu3 }
 0xa00   : > { %v8733_v62 = vadd.f32 %v8732_v45, %v16517_v37  ;;  %v8769_v17 = vpop.f32.mrf.mxu0  ;;  %v8818_v49 = vpop.f32.mrf.mxu1  ;;  %v12854_v45 = vld [vmem:[#allocation9 + $0x3f8] sm:$0xf0]  ;;  %9235 = vmatpush.bf16.msra.mxu2 %v12729_v19  ;;  %9137 = vmatpush.bf16.msra.mxu0 %v12473_v53 }
 0xa01   : > { %v8770_v38 = vadd.f32 %v8769_v17, %v16537_v43  ;;  %v13617_v17 = vld [vmem:[#allocation9 + $0x1ec] sm:$0xf] }
 0xa02   : > { %v9377_v55 = vmax.f32 %v8733_v62, 0.0  ;;  %v12857_v62 = vor.u32 %v13681_v59, %v12854_v45 }
 0xa03   : > { %v8819_v26 = vadd.f32 %v8818_v49, %v8770_v38  ;;  %8964 = vmatmul.bf16.gmra.mxu0 %v17266_v5  ;;  %9013 = vmatmul.bf16.gmra.mxu1 %v17267_v16  ;;  %v12598_v38 = vld [vmem:[#allocation9 + $0x1f8] sm:$0xf0] }
 0xa04   : > { %8930 = vmatmul.bf16.gmra.mxu3 %v16468_v40  ;;  %v16588_v37 = vpack.c.bf16 %v9377_v55, %v9373_v54  ;;  %v12601_v41 = vor.u32 %v13617_v17, %v12598_v38  ;;  %v12710_v17 = vld [vmem:[#allocation9 + $0x2d8] sm:$0xf0] }
 0xa05   : > { %v8864_v30 = vpop.f32.mrf.mxu2  ;;  %9284 = vmatpush.bf16.msra.mxu3 %v12857_v62 }
 0xa06   : > { %17277 = vst [vmem:[#allocation20_spill] sm:$0xff] %v16588_v37  ;;  %v16590_v60 = vadd.f32 %v8864_v30, %v8816_v32  ;;  %9186 = vmatpush.bf16.msra.mxu1 %v12601_v41  ;;  %v13645_v41 = vld [vmem:[#allocation9 + $0x2cc] sm:$0xf] }
 0xa07   : > { %v8735_v49 = vpop.f32.mrf.mxu3 }
 0xa08   : > { %v8736_v28 = vadd.f32 %v8735_v49, %v16522_v36  ;;  %v8771_v34 = vpop.f32.mrf.mxu0  ;;  %v8820_v54 = vpop.f32.mrf.mxu1 }
 0xa09   : > { %v8772_v24 = vadd.f32 %v8771_v34, %v16537_v43  ;;  %v12454_v34 = vld [vmem:[#allocation9 + $0xd8] sm:$0xf0] }
 0xa0a   : > { %9062 = vmatmul.bf16.gmra.mxu2 %v17268_v47  ;;  %v9381_v36 = vmax.f32 %v8736_v28, 0.0 }
 0xa0b   : > { %v8821_v55 = vadd.f32 %v8820_v54, %v8772_v24  ;;  %v13677_v24 = vld [vmem:[#allocation9 + $0x3cc] sm:$0xf]  ;;  %v12838_v54 = vld [vmem:[#allocation9 + $0x3d8] sm:$0xf0] }
 0xa0d   : > { %v8867_v32 = vpop.f32.mrf.mxu2 }
 0xa0e   : > { %v16595_v31 = vadd.f32 %v8867_v32, %v8819_v26  ;;  %v13581_v26 = vld [vmem:[#allocation9 + $0xcc] sm:$0xf] }
 0xa0f   : > { %v8737_v19 = vpop.f32.mrf.mxu3  ;;  %v12457_v28 = vor.u32 %v13581_v26, %v12454_v34  ;;  %v13609_v26 = vld [vmem:[#allocation9 + $0x1ac] sm:$0xf]  ;;  %v12566_v34 = vld [vmem:[#allocation9 + $0x1b8] sm:$0xf0] }
 0xa10   : > { %v8738_v57 = vadd.f32 %v8737_v19, %v16531_v20  ;;  %v8774_v59 = vpop.f32.mrf.mxu0  ;;  %v8823_v53 = vpop.f32.mrf.mxu1  ;;  %v12713_v20 = vor.u32 %v13645_v41, %v12710_v17  ;;  %v12841_v19 = vor.u32 %v13677_v24, %v12838_v54  ;;  %v13577_v41 = vld [vmem:[#allocation9 + $0xac] sm:$0xf]  ;;  %v12438_v17 = vld [vmem:[#allocation9 + $0xb8] sm:$0xf0] }
 0xa11   : > { %v8775_v30 = vadd.f32 %v8774_v59, %v16537_v43  ;;  %v12582_v59 = vld [vmem:[#allocation9 + $0x1d8] sm:$0xf0]  ;;  %9138 = vmatpush.bf16.msra.mxu0 %v12457_v28  ;;  %v13573_v28 = vld [vmem:[#allocation9 + $0x8c] sm:$0xf] }
 0xa12   : > { %v9385_v45 = vmax.f32 %v8738_v57, 0.0  ;;  %v13613_v57 = vld [vmem:[#allocation9 + $0x1cc] sm:$0xf]  ;;  %9236 = vmatpush.bf16.msra.mxu2 %v12713_v20  ;;  %9285 = vmatpush.bf16.msra.mxu3 %v12841_v19  ;;  %v12569_v20 = vor.u32 %v13609_v26, %v12566_v34  ;;  %v12422_v19 = vld [vmem:[#allocation9 + $0x98] sm:$0xf0] }
 0xa13   : > { %v8824_v62 = vadd.f32 %v8823_v53, %v8775_v30  ;;  %8969 = vmatmul.bf16.gmra.mxu0 %v17269_v0  ;;  %9018 = vmatmul.bf16.gmra.mxu1 %v17270_v46  ;;  %v12585_v53 = vor.u32 %v13613_v57, %v12582_v59 }
 0xa14   : > { %8935 = vmatmul.bf16.gmra.mxu3 %v16488_v3  ;;  %v16602_v38 = vpack.c.bf16 %v9385_v45, %v9381_v36 }
 0xa15   : > { %v8869_v49 = vpop.f32.mrf.mxu2  ;;  %9187 = vmatpush.bf16.msra.mxu1 %v12585_v53  ;;  %v12550_v53 = vld [vmem:[#allocation9 + $0x198] sm:$0xf0] }
 0xa16   : > { %17278 = vst [vmem:[#allocation29_spill] sm:$0xff] %v16602_v38  ;;  %v16604_v32 = vadd.f32 %v8869_v49, %v8821_v55  ;;  %v12441_v49 = vor.u32 %v13577_v41, %v12438_v17  ;;  %v13641_v17 = vld [vmem:[#allocation9 + $0x2ac] sm:$0xf]  ;;  %v12694_v38 = vld [vmem:[#allocation9 + $0x2b8] sm:$0xf0] }
 0xa17   : > { %v8740_v30 = vpop.f32.mrf.mxu3 }
 0xa18   : > { %v8741_v37 = vadd.f32 %v8740_v30, %v16539_v22  ;;  %v8776_v29 = vpop.f32.mrf.mxu0  ;;  %v8825_v45 = vpop.f32.mrf.mxu1  ;;  %9139 = vmatpush.bf16.msra.mxu0 %v12441_v49  ;;  %v12425_v30 = vor.u32 %v13573_v28, %v12422_v19  ;;  %v12697_v49 = vor.u32 %v13641_v17, %v12694_v38  ;;  %v17280_v28 = vld [vmem:[#allocation31_spill] sm:$0xff]  ;;  %v13673_v19 = vld [vmem:[#allocation9 + $0x3ac] sm:$0xf] }
 0xa19   : > { %v8777_v36 = vadd.f32 %v8776_v29, %v16537_v43  ;;  %9188 = vmatpush.bf16.msra.mxu1 %v12569_v20  ;;  %v13605_v29 = vld [vmem:[#allocation9 + $0x18c] sm:$0xf]  ;;  %v12406_v20 = vld [vmem:[#allocation9 + $0x78] sm:$0xf0] }
 0xa1a   : > { %9067 = vmatmul.bf16.gmra.mxu2 %v16281_v25  ;;  %v12553_v41 = vor.u32 %v13605_v29, %v12550_v53  ;;  %v9389_v26 = vmax.f32 %v8741_v37, 0.0  ;;  %v12534_v53 = vld [vmem:[#allocation9 + $0x178] sm:$0xf0] }
 0xa1b   : > { %v8826_v55 = vadd.f32 %v8825_v45, %v8777_v36  ;;  %9237 = vmatpush.bf16.msra.mxu2 %v12697_v49 }
 0xa1c   : > { %9140 = vmatpush.bf16.msra.mxu0 %v12425_v30  ;;  %v13637_v30 = vld [vmem:[#allocation9 + $0x28c] sm:$0xf] }
 0xa1d   : > { %v8872_v24 = vpop.f32.mrf.mxu2  ;;  %9189 = vmatpush.bf16.msra.mxu1 %v12553_v41 }
 0xa1e   : > { %v16609_v54 = vadd.f32 %v8872_v24, %v8824_v62  ;;  %v13569_v24 = vld [vmem:[#allocation9 + $0x6c] sm:$0xf] }
 0xa1f   : > { %v8742_v22 = vpop.f32.mrf.mxu3  ;;  %v12409_v29 = vor.u32 %v13569_v24, %v12406_v20  ;;  %v12518_v20 = vld [vmem:[#allocation9 + $0x158] sm:$0xf0] }
 0xa20   : > { %v8743_v57 = vadd.f32 %v8742_v22, %v16548_v8  ;;  %v8779_v59 = vpop.f32.mrf.mxu0  ;;  %v8828_v45 = vpop.f32.mrf.mxu1  ;;  %v13601_v8 = vld [vmem:[#allocation9 + $0x16c] sm:$0xf]  ;;  %v17279_v22 = vld [vmem:[#allocation27_spill] sm:$0xff] }
 0xa21   : > { %v8780_v36 = vadd.f32 %v8779_v59, %v16537_v43  ;;  %v12822_v59 = vld [vmem:[#allocation9 + $0x3b8] sm:$0xf0]  ;;  %9141 = vmatpush.bf16.msra.mxu0 %v12409_v29 }
 0xa22   : > { %v9393_v62 = vmax.f32 %v8743_v57, 0.0  ;;  %v12825_v38 = vor.u32 %v13673_v19, %v12822_v59  ;;  %v12537_v57 = vor.u32 %v13601_v8, %v12534_v53  ;;  %v12662_v59 = vld [vmem:[#allocation9 + $0x278] sm:$0xf0] }
 0xa23   : > { %v8829_v34 = vadd.f32 %v8828_v45, %v8780_v36  ;;  %8974 = vmatmul.bf16.gmra.mxu0 %v17250_v15  ;;  %9023 = vmatmul.bf16.gmra.mxu1 %v17279_v22  ;;  %v12678_v36 = vld [vmem:[#allocation9 + $0x298] sm:$0xf0]  ;;  %v13597_v22 = vld [vmem:[#allocation9 + $0x14c] sm:$0xf] }
 0xa24   : > { %9096 = vmatmul.bf16.vlgmr.msrb.gmra.mxu3 %v17280_v28  ;;  %v16616_v58 = vpack.c.bf16 %v9393_v62, %v9389_v26  ;;  %v12681_v41 = vor.u32 %v13637_v30, %v12678_v36  ;;  %9190 = vmatpush.bf16.msra.mxu1 %v12537_v57  ;;  %v12390_v28 = vld [vmem:[#allocation9 + $0x58] sm:$0xf0]  ;;  %v12521_v19 = vor.u32 %v13597_v22, %v12518_v20  ;;  %v13593_v57 = vld [vmem:[#allocation9 + $0x12c] sm:$0xf] }
 0xa25   : > { %v8874_v37 = vpop.f32.mrf.mxu2  ;;  %9286 = vmatpush.bf16.msra.mxu3 %v12825_v38  ;;  %v12393_v62 = vor.u32 %v13565_v21, %v12390_v28  ;;  %v12374_v38 = vld [vmem:[#allocation9 + $0x38] sm:$0xf0]  ;;  %v13629_v36 = vld [vmem:[#allocation9 + $0x24c] sm:$0xf] }
 0xa26   : > { %17281 = vst [vmem:[#allocation24_spill] sm:$0xff] %v16616_v58  ;;  %v16618_v45 = vadd.f32 %v8874_v37, %v8826_v55  ;;  %9238 = vmatpush.bf16.msra.mxu2 %v12681_v41  ;;  %v13633_v55 = vld [vmem:[#allocation9 + $0x26c] sm:$0xf]  ;;  %v12502_v30 = vld [vmem:[#allocation9 + $0x138] sm:$0xf0] }
 0xa27   : > { %v8901_v17 = vpop.f32.mrf.mxu3  ;;  %9142 = vmatpush.bf16.msra.mxu0 %v12393_v62  ;;  %v12665_v29 = vor.u32 %v13633_v55, %v12662_v59  ;;  %v13561_v37 = vld [vmem:[#allocation9 + $0x2c] sm:$0xf]  ;;  %v12505_v28 = vor.u32 %v13593_v57, %v12502_v30  ;;  %v12358_v20 = vld [vmem:[#allocation9 + $0x18] sm:$0xf0] }
 0xa28   : > { %v8902_v24 = vadd.f32 %v8901_v17, %v16553_v1  ;;  %v8781_v26 = vpop.f32.mrf.mxu0  ;;  %v8830_v8 = vpop.f32.mrf.mxu1  ;;  %9191 = vmatpush.bf16.msra.mxu1 %v12521_v19  ;;  %v12377_v1 = vor.u32 %v13561_v37, %v12374_v38  ;;  %v12646_v17 = vld [vmem:[#allocation9 + $0x258] sm:$0xf0]  ;;  %v13557_v62 = vld [vmem:[#allocation9 + $0xc] sm:$0xf] }
 0xa29   : > { %v8782_v49 = vadd.f32 %v8781_v26, %v16537_v43  ;;  %v12649_v22 = vor.u32 %v13629_v36, %v12646_v17  ;;  %v12361_v55 = vor.u32 %v13557_v62, %v12358_v20  ;;  %v12486_v59 = vld [vmem:[#allocation9 + $0x118] sm:$0xf0]  ;;  %v13625_v57 = vld [vmem:[#allocation9 + $0x22c] sm:$0xf] }
 0xa2a   : > { %9072 = vmatmul.bf16.gmra.mxu2 %v16317_v61  ;;  %v9334_v30 = vmax.f32 %v8902_v24, 0.0  ;;  %v12806_v17 = vld [vmem:[#allocation9 + $0x398] sm:$0xf0]  ;;  %v13621_v62 = vld [vmem:[#allocation9 + $0x20c] sm:$0xf] }
 0xa2b   : > { %v8831_v53 = vadd.f32 %v8830_v8, %v8782_v49  ;;  %9239 = vmatpush.bf16.msra.mxu2 %v12665_v29  ;;  %9143 = vmatpush.bf16.msra.mxu0 %v12377_v1  ;;  %v13589_v49 = vld [vmem:[#allocation9 + $0x10c] sm:$0xf]  ;;  %v12614_v24 = vld [vmem:[#allocation9 + $0x218] sm:$0xf0] }
 0xa2c   : > { %9192 = vmatpush.bf16.msra.mxu1 %v12505_v28  ;;  %v12489_v38 = vor.u32 %v13589_v49, %v12486_v59  ;;  %v12617_v49 = vor.u32 %v13621_v62, %v12614_v24  ;;  %v17286_v58 = vld [vmem:[#allocation30_spill] sm:$0xff] }
 0xa2d   : > { %v8877_v21 = vpop.f32.mrf.mxu2 }
 0xa2e   : > { %v16623_v41 = vadd.f32 %v8877_v21, %v8829_v34  ;;  %v12630_v34 = vld [vmem:[#allocation9 + $0x238] sm:$0xf0] }
 0xa2f   : > { %v8903_v26 = vpop.f32.mrf.mxu3  ;;  %9240 = vmatpush.bf16.msra.mxu2 %v12649_v22  ;;  %9144 = vmatpush.bf16.msra.mxu0 %v12361_v55  ;;  %v12633_v21 = vor.u32 %v13625_v57, %v12630_v34 }
 0xa30   : > { %v8904_v8 = vadd.f32 %v8903_v26, %v16562_v7  ;;  %v8784_v19 = vpop.f32.mrf.mxu0  ;;  %v8833_v29 = vpop.f32.mrf.mxu1  ;;  %9193 = vmatpush.bf16.msra.mxu1 %v12489_v38  ;;  %v13669_v7 = vld [vmem:[#allocation9 + $0x38c] sm:$0xf] }
 0xa31   : > { %v8785_v37 = vadd.f32 %v8784_v19, %v16537_v43  ;;  %v12809_v26 = vor.u32 %v13669_v7, %v12806_v17 }
 0xa32   : > { %v9338_v1 = vmax.f32 %v8904_v8, 0.0 }
 0xa33   : > { %v8834_v28 = vadd.f32 %v8833_v29, %v8785_v37  ;;  %8979 = vmatmul.bf16.gmra.mxu0 %v17252_v10  ;;  %9028 = vmatmul.bf16.gmra.mxu1 %v17253_v13 }
 0xa34   : > { %v16628_v36 = vpack.c.bf16 %v9338_v1, %v9334_v30  ;;  %9101 = vmatmul.bf16.gmra.mxu3 %v16339_v33  ;;  %9241 = vmatpush.bf16.msra.mxu2 %v12633_v21 }
 0xa35   : > { %v8879_v22 = vpop.f32.mrf.mxu2  ;;  %9287 = vmatpush.bf16.msra.mxu3 %v12809_v26  ;;  %v12790_v26 = vld [vmem:[#allocation9 + $0x378] sm:$0xf0] }
 0xa36   : > { %v16632_v20 = vadd.f32 %v8879_v22, %v8831_v53  ;;  %v13665_v22 = vld [vmem:[#allocation9 + $0x36c] sm:$0xf] }
 0xa37   : > { %v8906_v8 = vpop.f32.mrf.mxu3  ;;  %v12793_v24 = vor.u32 %v13665_v22, %v12790_v26  ;;  %v13661_v26 = vld [vmem:[#allocation9 + $0x34c] sm:$0xf] }
 0xa38   : > { %v8907_v19 = vadd.f32 %v8906_v8, %v16567_v9  ;;  %v8786_v55 = vpop.f32.mrf.mxu0  ;;  %v8835_v37 = vpop.f32.mrf.mxu1  ;;  %9242 = vmatpush.bf16.msra.mxu2 %v12617_v49 }
 0xa39   : > { %v8787_v59 = vadd.f32 %v8786_v55, %v16537_v43  ;;  %9288 = vmatpush.bf16.msra.mxu3 %v12793_v24 }
 0xa3a   : > { %9077 = vmatmul.bf16.gmra.mxu2 %v16353_v4  ;;  %v9342_v7 = vmax.f32 %v8907_v19, 0.0 }
 0xa3b   : > { %v8836_v29 = vadd.f32 %v8835_v37, %v8787_v59 }
 0xa3d   : > { %v8882_v38 = vpop.f32.mrf.mxu2 }
 0xa3e   : > { %v16637_v57 = vadd.f32 %v8882_v38, %v8834_v28 }
 0xa3f   : > { %v8908_v34 = vpop.f32.mrf.mxu3 }
 0xa40   : > { %v8909_v53 = vadd.f32 %v8908_v34, %v16576_v44  ;;  %v8789_v30 = vpop.f32.mrf.mxu0  ;;  %v8838_v21 = vpop.f32.mrf.mxu1  ;;  %v16654_v34 = vld [vmem:[%s17111_s12] sm:$0xf] }
 0xa41   : > { %v8790_v1 = vadd.f32 %v8789_v30, %v16537_v43 }
 0xa42   : > { %v9346_v9 = vmax.f32 %v8909_v53, 0.0 }
 0xa43   : > { %v8839_v17 = vadd.f32 %v8838_v21, %v8790_v1  ;;  %8984 = vmatmul.bf16.gmra.mxu0 %v17254_v14  ;;  %9033 = vmatmul.bf16.gmra.mxu1 %v17255_v63 }
 0xa44   : > { %9106 = vmatmul.bf16.gmra.mxu3 %v16375_v27  ;;  %v16644_v28 = vpack.c.bf16 %v9346_v9, %v9342_v7 }
 0xa45   : > { %v8884_v62 = vpop.f32.mrf.mxu2 }
 0xa46   : > { %v16646_v44 = vadd.f32 %v8884_v62, %v8836_v29  ;;  %v16657_v29 = vperm.slane %v16654_v34, 2 }
 0xa47   : > { %v8911_v49 = vpop.f32.mrf.mxu3 }
 0xa48   : > { %v8912_v8 = vadd.f32 %v8911_v49, %v16581_v51  ;;  %v8791_v19 = vpop.f32.mrf.mxu0  ;;  %v8840_v59 = vpop.f32.mrf.mxu1 }
 0xa49   : > { %v8792_v55 = vadd.f32 %v8791_v19, %v16537_v43 }
 0xa4a   : > { %9082 = vmatmul.bf16.gmra.mxu2 %v16387_v2  ;;  %v9350_v7 = vmax.f32 %v8912_v8, 0.0 }
 0xa4b   : > { %v8841_v37 = vadd.f32 %v8840_v59, %v8792_v55 }
 0xa4d   : > { %v8887_v38 = vpop.f32.mrf.mxu2 }
 0xa4e   : > { %v16659_v53 = vadd.f32 %v8887_v38, %v8839_v17  ;;  %v12774_v17 = vld [vmem:[#allocation9 + $0x358] sm:$0xf0] }
 0xa4f   : > { %v8913_v30 = vpop.f32.mrf.mxu3 }
 0xa50   : > { %v8914_v51 = vadd.f32 %v8913_v30, %v16590_v60  ;;  %v8950_v1 = vpop.f32.mrf.mxu0  ;;  %v8999_v21 = vpop.f32.mrf.mxu1  ;;  %v12777_v60 = vor.u32 %v13661_v26, %v12774_v17 }
 0xa51   : > { %v8951_v43 = vadd.f32 %v8950_v1, %v16657_v29 }
 0xa52   : > { %v9354_v9 = vmax.f32 %v8914_v51, 0.0  ;;  %9289 = vmatpush.bf16.msra.mxu3 %v12777_v60 }
 0xa53   : > { %v16663_v22 = vadd.f32 %v8999_v21, %v8951_v43  ;;  %9145 = vmatmul.bf16.vlgmr.msra.gmra.mxu0 %v17232_v6  ;;  %9194 = vmatmul.bf16.vlgmr.msra.gmra.mxu1 %v17257_v23 }
 0xa54   : > { %9111 = vmatmul.bf16.gmra.mxu3 %v16408_v48  ;;  %v16668_v62 = vpack.c.bf16 %v9354_v9, %v9350_v7 }
 0xa55   : > { %v8889_v24 = vpop.f32.mrf.mxu2 }
 0xa56   : > { %v16670_v49 = vadd.f32 %v8889_v24, %v8841_v37 }
 0xa57   : > { %v8916_v19 = vpop.f32.mrf.mxu3 }
 0xa58   : > { %v8917_v8 = vadd.f32 %v8916_v19, %v16595_v31  ;;  %v16673_v55 = vpop.f32.mrf.mxu0  ;;  %v16675_v59 = vpop.f32.mrf.mxu1  ;;  %v12758_v31 = vld [vmem:[#allocation9 + $0x338] sm:$0xf0] }
 0xa5a   : > { %9243 = vmatmul.bf16.vlgmr.msra.gmra.mxu2 %v17259_v56  ;;  %v9358_v1 = vmax.f32 %v8917_v8, 0.0  ;;  %v13657_v56 = vld [vmem:[#allocation9 + $0x32c] sm:$0xf] }
 0xa5d   : > { %v16678_v6 = vpop.f32.mrf.mxu2 }
 0xa5f   : > { %v8918_v23 = vpop.f32.mrf.mxu3 }
 0xa60   : > { %v8919_v38 = vadd.f32 %v8918_v23, %v16604_v32  ;;  %v8955_v30 = vpop.f32.mrf.mxu0  ;;  %v9004_v37 = vpop.f32.mrf.mxu1  ;;  %v12761_v32 = vor.u32 %v13657_v56, %v12758_v31 }
 0xa61   : > { %v8956_v51 = vadd.f32 %v8955_v30, %v16657_v29 }
 0xa62   : > { %v9362_v43 = vmax.f32 %v8919_v38, 0.0  ;;  %9290 = vmatpush.bf16.msra.mxu3 %v12761_v32 }
 0xa63   : > { %v16682_v21 = vadd.f32 %v9004_v37, %v8956_v51  ;;  %9150 = vmatmul.bf16.gmra.mxu0 %v17260_v42  ;;  %9199 = vmatmul.bf16.gmra.mxu1 %v17261_v39 }
 0xa64   : > { %9116 = vmatmul.bf16.gmra.mxu3 %v16428_v35  ;;  %v16687_v7 = vpack.c.bf16 %v9362_v43, %v9358_v1 }
 0xa65   : > { %v16689_v9 = vpop.f32.mrf.mxu2 }
 0xa67   : > { %v8921_v26 = vpop.f32.mrf.mxu3 }
 0xa68   : > { %v8922_v17 = vadd.f32 %v8921_v26, %v16609_v54  ;;  %v16692_v24 = vpop.f32.mrf.mxu0  ;;  %v16694_v60 = vpop.f32.mrf.mxu1  ;;  %v12742_v54 = vld [vmem:[#allocation9 + $0x318] sm:$0xf0] }
 0xa6a   : > { %9248 = vmatmul.bf16.gmra.mxu2 %v17262_v11  ;;  %v9366_v30 = vmax.f32 %v8922_v17, 0.0  ;;  %v13653_v11 = vld [vmem:[#allocation9 + $0x30c] sm:$0xf] }
 0xa6d   : > { %v16697_v42 = vpop.f32.mrf.mxu2 }
 0xa6f   : > { %v8923_v39 = vpop.f32.mrf.mxu3 }
 0xa70   : > { %v8924_v19 = vadd.f32 %v8923_v39, %v16618_v45  ;;  %v8960_v8 = vpop.f32.mrf.mxu0  ;;  %v9009_v38 = vpop.f32.mrf.mxu1  ;;  %v12745_v45 = vor.u32 %v13653_v11, %v12742_v54 }
 0xa71   : > { %v8961_v23 = vadd.f32 %v8960_v8, %v16657_v29 }
 0xa72   : > { %v9370_v51 = vmax.f32 %v8924_v19, 0.0  ;;  %9291 = vmatpush.bf16.msra.mxu3 %v12745_v45 }
 0xa73   : > { %v16701_v37 = vadd.f32 %v9009_v38, %v8961_v23  ;;  %9155 = vmatmul.bf16.gmra.mxu0 %v17263_v18  ;;  %9204 = vmatmul.bf16.gmra.mxu1 %v17264_v52 }
 0xa74   : > { %9121 = vmatmul.bf16.gmra.mxu3 %v16448_v12  ;;  %v16706_v1 = vpack.c.bf16 %v9370_v51, %v9366_v30 }
 0xa75   : > { %v16708_v43 = vpop.f32.mrf.mxu2 }
 0xa77   : > { %v8926_v56 = vpop.f32.mrf.mxu3 }
 0xa78   : > { %v8927_v31 = vadd.f32 %v8926_v56, %v16623_v41  ;;  %v16711_v32 = vpop.f32.mrf.mxu0  ;;  %v16713_v26 = vpop.f32.mrf.mxu1 }
 0xa7a   : > { %9253 = vmatmul.bf16.gmra.mxu2 %v17265_v50  ;;  %v9374_v23 = vmax.f32 %v8927_v31, 0.0 }
 0xa7d   : > { %v16716_v18 = vpop.f32.mrf.mxu2 }
 0xa7f   : > { %v8928_v52 = vpop.f32.mrf.mxu3 }
 0xa80   : > { %v8929_v17 = vadd.f32 %v8928_v52, %v16632_v20  ;;  %v8965_v39 = vpop.f32.mrf.mxu0  ;;  %v9014_v8 = vpop.f32.mrf.mxu1 }
 0xa81   : > { %v8966_v19 = vadd.f32 %v8965_v39, %v16657_v29 }
 0xa82   : > { %v9378_v38 = vmax.f32 %v8929_v17, 0.0 }
 0xa83   : > { %v16720_v30 = vadd.f32 %v9014_v8, %v8966_v19  ;;  %9160 = vmatmul.bf16.gmra.mxu0 %v17266_v5  ;;  %9209 = vmatmul.bf16.gmra.mxu1 %v17267_v16  ;;  %v13699_v19 = vld [vmem:[%s17112_s13 + $0x78] sm:$0xff] }
 0xa84   : > { %9126 = vmatmul.bf16.gmra.mxu3 %v16468_v40  ;;  %v16725_v50 = vpack.c.bf16 %v9378_v38, %v9374_v23  ;;  %9738 = vmatpush.bf16.msrb.mxu1 %v13699_v19 }
 0xa85   : > { %v16730_v11 = vpop.f32.mrf.mxu2 }
 0xa87   : > { %v8931_v41 = vpop.f32.mrf.mxu3 }
 0xa88   : > { %v8932_v51 = vadd.f32 %v8931_v41, %v16637_v57  ;;  %v16728_v20 = vpop.f32.mrf.mxu0  ;;  %v16732_v54 = vpop.f32.mrf.mxu1  ;;  %v13690_v41 = vld [vmem:[%s17112_s13 + $0x30] sm:$0xff] }
 0xa8a   : > { %9258 = vmatmul.bf16.gmra.mxu2 %v17268_v47  ;;  %v9382_v52 = vmax.f32 %v8932_v51, 0.0  ;;  %v13707_v47 = vld [vmem:[%s17112_s13 + $0xb8] sm:$0xff]  ;;  %v13698_v51 = vld [vmem:[%s17112_s13 + $0x70] sm:$0xff] }
 0xa8b   : > { %9787 = vmatpush.bf16.msrb.mxu2 %v13707_v47  ;;  %9739 = vmatpush.bf16.msrb.mxu1 %v13698_v51  ;;  %v13696_v47 = vld [vmem:[%s17112_s13 + $0x60] sm:$0xff]  ;;  %v17282_v51 = vld [vmem:[#allocation27_spill] sm:$0xff] }
 0xa8d   : > { %v16737_v39 = vpop.f32.mrf.mxu2 }
 0xa8f   : > { %v8933_v45 = vpop.f32.mrf.mxu3 }
 0xa90   : > { %v8934_v5 = vadd.f32 %v8933_v45, %v16646_v44  ;;  %v8970_v56 = vpop.f32.mrf.mxu0  ;;  %v9019_v16 = vpop.f32.mrf.mxu1  ;;  %v13691_v44 = vld [vmem:[%s17112_s13 + $0x38] sm:$0xff] }
 0xa91   : > { %v8971_v31 = vadd.f32 %v8970_v56, %v16657_v29  ;;  %9689 = vmatpush.bf16.msrb.mxu0 %v13691_v44 }
 0xa92   : > { %v9386_v17 = vmax.f32 %v8934_v5, 0.0  ;;  %v13697_v5 = vld [vmem:[%s17112_s13 + $0x68] sm:$0xff] }
 0xa93   : > { %v16739_v57 = vadd.f32 %v9019_v16, %v8971_v31  ;;  %9165 = vmatmul.bf16.gmra.mxu0 %v17269_v0  ;;  %9214 = vmatmul.bf16.gmra.mxu1 %v17270_v46  ;;  %v13715_v0 = vld [vmem:[%s17112_s13 + $0xf8] sm:$0xff]  ;;  %v13706_v31 = vld [vmem:[%s17112_s13 + $0xb0] sm:$0xff] }
 0xa94   : > { %9131 = vmatmul.bf16.gmra.mxu3 %v16488_v3  ;;  %v16753_v8 = vpack.c.bf16 %v9386_v17, %v9382_v52  ;;  %9740 = vmatpush.bf16.msrb.mxu1 %v13697_v5  ;;  %v13688_v17 = vld [vmem:[%s17112_s13 + $0x20] sm:$0xff]  ;;  %v13687_v5 = vld [vmem:[%s17112_s13 + $0x18] sm:$0xff] }
 0xa95   : > { %9836 = vmatpush.bf16.msrb.mxu3 %v13715_v0  ;;  %9690 = vmatpush.bf16.msrb.mxu0 %v13690_v41  ;;  %v16776_v56 = vpop.f32.mrf.mxu2 }
 0xa96   : > { %9788 = vmatpush.bf16.msrb.mxu2 %v13706_v31 }
 0xa97   : > { %v8936_v46 = vpop.f32.mrf.mxu3 }
 0xa98   : > { %v8937_v23 = vadd.f32 %v8936_v46, %v16659_v53  ;;  %v16759_v38 = vpop.f32.mrf.mxu0  ;;  %v16767_v45 = vpop.f32.mrf.mxu1  ;;  %v13689_v53 = vld [vmem:[%s17112_s13 + $0x28] sm:$0xff]  ;;  %9741 = vmatpush.bf16.msrb.mxu1 %v13696_v47  ;;  %v13686_v47 = vld [vmem:[%s17112_s13 + $0x10] sm:$0xff] }
 0xa99   : > { %9691 = vmatpush.bf16.msrb.mxu0 %v13689_v53  ;;  %v17283_v53 = vld [vmem:[#allocation31_spill] sm:$0xff] }
 0xa9a   : > { %9263 = vmatmul.bf16.gmra.mxu2 %v16281_v25  ;;  %v9390_v0 = vmax.f32 %v8937_v23, 0.0  ;;  %v13695_v23 = vld [vmem:[%s17112_s13 + $0x58] sm:$0xff] }
 0xa9c   : > { %9742 = vmatpush.bf16.msrb.mxu1 %v13695_v23  ;;  %v13692_v23 = vld [vmem:[%s17112_s13 + $0x40] sm:$0xff] }
 0xa9d   : > { %9692 = vmatpush.bf16.msrb.mxu0 %v13688_v17 }
 0xa9f   : > { %v8938_v16 = vpop.f32.mrf.mxu3 }
 0xaa0   : > { %v8939_v25 = vadd.f32 %v8938_v16, %v16670_v49  ;;  %v8975_v52 = vpop.f32.mrf.mxu0  ;;  %v9024_v19 = vpop.f32.mrf.mxu1  ;;  %v13705_v49 = vld [vmem:[%s17112_s13 + $0xa8] sm:$0xff]  ;;  %v13704_v16 = vld [vmem:[%s17112_s13 + $0xa0] sm:$0xff] }
 0xaa1   : > { %v8976_v44 = vadd.f32 %v8975_v52, %v16657_v29  ;;  %9789 = vmatpush.bf16.msrb.mxu2 %v13705_v49  ;;  %9693 = vmatpush.bf16.msrb.mxu0 %v13687_v5  ;;  %v13693_v49 = vld [vmem:[%s17112_s13 + $0x48] sm:$0xff]  ;;  %v13684_v5 = vld [vmem:[%s17112_s13] sm:$0xff] }
 0xaa2   : > { %v9394_v46 = vmax.f32 %v8939_v25, 0.0  ;;  %v16811_v25 = vpop.f32.mrf.mxu2 }
 0xaa3   : > { %v16792_v41 = vadd.f32 %v9024_v19, %v8976_v44  ;;  %9170 = vmatmul.bf16.gmra.mxu0 %v17250_v15  ;;  %9219 = vmatmul.bf16.gmra.mxu1 %v17282_v51  ;;  %v13714_v15 = vld [vmem:[%s17112_s13 + $0xf0] sm:$0xff] }
 0xaa4   : > { %9292 = vmatmul.bf16.vlgmr.msra.gmra.mxu3 %v17283_v53  ;;  %v16803_v31 = vpack.c.bf16 %v9394_v46, %v9390_v0  ;;  %v13694_v44 = vld [vmem:[%s17112_s13 + $0x50] sm:$0xff]  ;;  %v13703_v0 = vld [vmem:[%s17112_s13 + $0x98] sm:$0xff]  ;;  %v13685_v46 = vld [vmem:[%s17112_s13 + $0x8] sm:$0xff] }
 0xaa5   : > { %9837 = vmatpush.bf16.msrb.mxu3 %v13714_v15  ;;  %9790 = vmatpush.bf16.msrb.mxu2 %v13704_v16 }
 0xaa6   : > { %17284 = vst [vmem:[#allocation21_spill] sm:$0xff] %v16803_v31  ;;  %9694 = vmatpush.bf16.msrb.mxu0 %v13686_v47  ;;  %9743 = vmatpush.bf16.msrb.mxu1 %v13694_v44  ;;  %v13701_v44 = vld [vmem:[%s17112_s13 + $0x88] sm:$0xff] }
 0xaa7   : > { %v16813_v52 = vpop.f32.mrf.mxu3 }
 0xaa8   : > { %v16815_v17 = vpop.f32.mrf.mxu0  ;;  %v16823_v19 = vpop.f32.mrf.mxu1 }
 0xaa9   : > { %9791 = vmatpush.bf16.msrb.mxu2 %v13703_v0 }
 0xaaa   : > { %9268 = vmatmul.bf16.gmra.mxu2 %v16317_v61  ;;  %9695 = vmatpush.bf16.msrb.mxu0 %v13685_v46  ;;  %v13702_v61 = vld [vmem:[%s17112_s13 + $0x90] sm:$0xff]  ;;  %v16844_v15 = vpop.f32.mrf.mxu2  ;;  %v13713_v46 = vld [vmem:[%s17112_s13 + $0xe8] sm:$0xff] }
 0xaab   : > { %9744 = vmatpush.bf16.msrb.mxu1 %v13693_v49  ;;  %v13700_v49 = vld [vmem:[%s17112_s13 + $0x80] sm:$0xff]  ;;  %9838 = vmatpush.bf16.msrb.mxu3 %v13713_v46 }
 0xaad   : > { %9792 = vmatpush.bf16.msrb.mxu2 %v13702_v61 }
 0xaae   : > { %9696 = vmatpush.bf16.msrb.mxu0 %v13684_v5 }
 0xaaf   : > { %v9099_v51 = vpop.f32.mrf.mxu3  ;;  %9745 = vmatpush.bf16.msrb.mxu1 %v13692_v23 }
 0xab0   : > { %v8980_v53 = vpop.f32.mrf.mxu0  ;;  %v9029_v47 = vpop.f32.mrf.mxu1 }
 0xab1   : > { %v8981_v16 = vadd.f32 %v8980_v53, %v16657_v29  ;;  %9793 = vmatpush.bf16.msrb.mxu2 %v13701_v44 }
 0xab3   : > { %v16850_v0 = vadd.f32 %v9029_v47, %v8981_v16  ;;  %9175 = vmatmul.bf16.gmra.mxu0 %v17252_v10  ;;  %9224 = vmatmul.bf16.gmra.mxu1 %v17253_v13  ;;  %v16866_v10 = vpop.f32.mrf.mxu2 }
 0xab4   : > { %9297 = vmatmul.bf16.gmra.mxu3 %v16339_v33 }
 0xab5   : > { %9794 = vmatpush.bf16.msrb.mxu2 %v13700_v49  ;;  %v8953_v49 = vadd.f32 %v16673_v55, %v16657_v29  ;;  %v13711_v55 = vld [vmem:[%s17112_s13 + $0xd8] sm:$0xff] }
 0xab7   : > { %v9102_v61 = vpop.f32.mrf.mxu3 }
 0xab8   : > { %v16861_v53 = vpop.f32.mrf.mxu0  ;;  %v16863_v5 = vpop.f32.mrf.mxu1 }
 0xaba   : > { %9273 = vmatmul.bf16.gmra.mxu2 %v16353_v4  ;;  %v13712_v4 = vld [vmem:[%s17112_s13 + $0xe0] sm:$0xff] }
 0xabb   : > { %v16874_v44 = vpop.f32.mrf.mxu2  ;;  %9839 = vmatpush.bf16.msrb.mxu3 %v13712_v4 }
 0xabf   : > { %v9104_v33 = vpop.f32.mrf.mxu3  ;;  %9840 = vmatpush.bf16.msrb.mxu3 %v13711_v55 }
 0xac0   : > { %v8985_v13 = vpop.f32.mrf.mxu0  ;;  %v9034_v16 = vpop.f32.mrf.mxu1 }
 0xac1   : > { %v8986_v23 = vadd.f32 %v8985_v13, %v16657_v29  ;;  %v9002_v13 = vadd.f32 %v16675_v59, %v8953_v49  ;;  %v17287_v49 = vld [vmem:[#allocation32_spill] sm:$0xff] }
 0xac3   : > { %v16869_v47 = vadd.f32 %v9034_v16, %v8986_v23  ;;  %9180 = vmatmul.bf16.gmra.mxu0 %v17254_v14  ;;  %9229 = vmatmul.bf16.gmra.mxu1 %v17255_v63  ;;  %v9051_v14 = vadd.f32 %v16689_v9, %v9002_v13  ;;  %v16884_v63 = vpop.f32.mrf.mxu2  ;;  %v9049_v23 = vadd.f32 %v16678_v6, %v16663_v22 }
 0xac4   : > { %9302 = vmatmul.bf16.gmra.mxu3 %v16375_v27  ;;  %v8958_v9 = vadd.f32 %v16692_v24, %v16657_v29 }
 0xac5   : > { %17285 = vst [vmem:[#allocation36_spill] sm:$0xff] %v16869_v47  ;;  %v9100_v16 = vadd.f32 %v9099_v51, %v9051_v14  ;;  %v9098_v31 = vadd.f32 %v16813_v52, %v9049_v23  ;;  %v9059_v23 = vadd.f32 %v16716_v18, %v16701_v37  ;;  %v8968_v18 = vadd.f32 %v16728_v20, %v16657_v29 }
 0xac7   : > { %v9107_v46 = vpop.f32.mrf.mxu3  ;;  %v9339_v47 = vmax.f32 %v9100_v16, 0.0 }
 0xac8   : > { %v9108_v55 = vadd.f32 %v9107_v46, %v9059_v23 }
 0xaca   : > { %9278 = vmatmul.bf16.gmra.mxu2 %v16387_v2  ;;  %v9335_v2 = vmax.f32 %v9098_v31, 0.0 }
 0xacb   : > { %v16897_v6 = vpop.f32.mrf.mxu2 }
 0xacc   : > { %v9399_v22 = vpack.c.bf16 %v9339_v47, %v9335_v2 }
 0xacf   : > { %v9109_v27 = vpop.f32.mrf.mxu3 }
 0xad3   : > { %9697 = vmatmul.bf16.vlgmr.msrb.gmra.mxu0 %v17286_v58  ;;  %9746 = vmatmul.bf16.vlgmr.msrb.gmra.mxu1 %v16628_v36  ;;  %v9007_v58 = vadd.f32 %v16694_v60, %v8958_v9  ;;  %v9054_v36 = vadd.f32 %v16697_v42, %v16682_v21  ;;  %v16903_v4 = vpop.f32.mrf.mxu2  ;;  %v13710_v60 = vld [vmem:[%s17112_s13 + $0xd0] sm:$0xff]  ;;  %v8963_v21 = vadd.f32 %v16711_v32, %v16657_v29 }
 0xad4   : > { %9307 = vmatmul.bf16.gmra.mxu3 %v16408_v48  ;;  %v17288_v32 = vld [vmem:[#allocation19_spill] sm:$0xff] }
 0xad5   : > { %v9056_v48 = vadd.f32 %v16708_v43, %v9007_v58  ;;  %v9103_v51 = vadd.f32 %v9102_v61, %v9054_v36  ;;  %v16911_v43 = vpop.f32.mrf.mxu0  ;;  %9841 = vmatpush.bf16.msrb.mxu3 %v13710_v60  ;;  %v9012_v61 = vadd.f32 %v16713_v26, %v8963_v21  ;;  %v9351_v26 = vmax.f32 %v9108_v55, 0.0 }
 0xad6   : > { %v9064_v36 = vadd.f32 %v16737_v39, %v16720_v30  ;;  %v8973_v39 = vadd.f32 %v16759_v38, %v16657_v29  ;;  %v17290_v38 = vld [vmem:[#allocation28_spill] sm:$0xff] }
 0xad7   : > { %v9112_v59 = vpop.f32.mrf.mxu3  ;;  %v9105_v31 = vadd.f32 %v9104_v33, %v9056_v48  ;;  %v9343_v47 = vmax.f32 %v9103_v51, 0.0  ;;  %v16916_v33 = vpop.f32.mrf.mxu1 }
 0xad9   : > { %v9347_v24 = vmax.f32 %v9105_v31, 0.0 }
 0xada   : > { %9795 = vmatmul.bf16.vlgmr.msrb.gmra.mxu2 %v9399_v22 }
 0xadb   : > { %v9403_v42 = vpack.c.bf16 %v9347_v24, %v9343_v47  ;;  %v9113_v24 = vadd.f32 %v9112_v59, %v9064_v36  ;;  %v17289_v47 = vld [vmem:[#allocation13_spill] sm:$0xff]  ;;  %v17291_v36 = vld [vmem:[#allocation20_spill] sm:$0xff] }
 0xadd   : > { %v16923_v2 = vpop.f32.mrf.mxu0 }
 0xadf   : > { %v9114_v52 = vpop.f32.mrf.mxu3  ;;  %v16928_v22 = vpop.f32.mrf.mxu1 }
 0xae3   : > { %9702 = vmatmul.bf16.gmra.mxu0 %v17287_v49  ;;  %9751 = vmatmul.bf16.gmra.mxu1 %v16644_v28  ;;  %v9061_v28 = vadd.f32 %v16730_v11, %v9012_v61  ;;  %v13709_v11 = vld [vmem:[%s17112_s13 + $0xc8] sm:$0xff] }
 0xae4   : > { %9312 = vmatmul.bf16.gmra.mxu3 %v16428_v35  ;;  %v16918_v35 = vpop.f32.mrf.mxu2 }
 0xae5   : > { %v9110_v16 = vadd.f32 %v9109_v27, %v9061_v28  ;;  %9842 = vmatpush.bf16.msrb.mxu3 %v13709_v11  ;;  %v9148_v27 = vpop.f32.mrf.mxu0  ;;  %v9069_v28 = vadd.f32 %v16811_v25, %v16739_v57 }
 0xae7   : > { %v9117_v13 = vpop.f32.mrf.mxu3  ;;  %v9355_v9 = vmax.f32 %v9110_v16, 0.0  ;;  %v9197_v31 = vpop.f32.mrf.mxu1 }
 0xae8   : > { %v9118_v16 = vadd.f32 %v9117_v13, %v9069_v28 }
 0xae9   : > { %v9407_v46 = vpack.c.bf16 %v9355_v9, %v9351_v26  ;;  %v8978_v26 = vadd.f32 %v16815_v17, %v16657_v29 }
 0xaea   : > { %9800 = vmatmul.bf16.gmra.mxu2 %v9403_v42 }
 0xaeb   : > { %v9027_v13 = vadd.f32 %v16823_v19, %v8978_v26 }
 0xaec   : > { %v16933_v58 = vpop.f32.mrf.mxu2 }
 0xaed   : > { %v16946_v60 = vpop.f32.mrf.mxu0 }
 0xaef   : > { %v9119_v14 = vpop.f32.mrf.mxu3  ;;  %v16953_v59 = vpop.f32.mrf.mxu1 }
 0xaf3   : > { %9707 = vmatmul.bf16.gmra.mxu0 %v17288_v32  ;;  %9756 = vmatmul.bf16.gmra.mxu1 %v16668_v62 }
 0xaf4   : > { %9317 = vmatmul.bf16.gmra.mxu3 %v16448_v12  ;;  %v9017_v12 = vadd.f32 %v16732_v54, %v8968_v18  ;;  %v16941_v49 = vpop.f32.mrf.mxu2  ;;  %v9359_v54 = vmax.f32 %v9113_v24, 0.0  ;;  %v9074_v18 = vadd.f32 %v16866_v10, %v16792_v41  ;;  %v8983_v41 = vadd.f32 %v16861_v53, %v16657_v29 }
 0xaf5   : > { %v16959_v42 = vpop.f32.mrf.mxu0 }
 0xaf6   : > { %v9066_v62 = vadd.f32 %v16776_v56, %v9017_v12  ;;  %v13708_v56 = vld [vmem:[%s17112_s13 + $0xc0] sm:$0xff]  ;;  %v16985_v12 = vperm.slane %v16654_v34, 3 }
 0xaf7   : > { %v9122_v37 = vpop.f32.mrf.mxu3  ;;  %9843 = vmatpush.bf16.msrb.mxu3 %v13708_v56  ;;  %v16964_v55 = vpop.f32.mrf.mxu1 }
 0xaf8   : > { %v9115_v51 = vadd.f32 %v9114_v52, %v9066_v62  ;;  %v9123_v17 = vadd.f32 %v9122_v37, %v9074_v18  ;;  %v9149_v10 = vadd.f32 %v9148_v27, %v16985_v12 }
 0xafa   : > { %9805 = vmatmul.bf16.gmra.mxu2 %v9407_v46  ;;  %v9363_v20 = vmax.f32 %v9115_v51, 0.0  ;;  %v9375_v51 = vmax.f32 %v9123_v17, 0.0 }
 0xafc   : > { %v9411_v52 = vpack.c.bf16 %v9363_v20, %v9359_v54  ;;  %v16955_v21 = vpop.f32.mrf.mxu2  ;;  %v9198_v20 = vadd.f32 %v9197_v31, %v9149_v10 }
 0xafd   : > { %v16974_v25 = vpop.f32.mrf.mxu0 }
 0xafe   : > { %v9247_v53 = vadd.f32 %v16941_v49, %v9198_v20  ;;  %v9152_v49 = vadd.f32 %v16946_v60, %v16985_v12 }
 0xaff   : > { %v9124_v48 = vpop.f32.mrf.mxu3  ;;  %v16978_v11 = vpop.f32.mrf.mxu1 }
 0xb03   : > { %9712 = vmatmul.bf16.gmra.mxu0 %v17289_v47  ;;  %9761 = vmatmul.bf16.gmra.mxu1 %v16687_v7 }
 0xb04   : > { %9322 = vmatmul.bf16.gmra.mxu3 %v16468_v40  ;;  %v9022_v40 = vadd.f32 %v16767_v45, %v8973_v39  ;;  %v16968_v45 = vpop.f32.mrf.mxu2 }
 0xb05   : > { %v16987_v62 = vpop.f32.mrf.mxu0 }
 0xb06   : > { %v9071_v7 = vadd.f32 %v16844_v15, %v9022_v40  ;;  %v9367_v15 = vmax.f32 %v9118_v16, 0.0  ;;  %v9159_v10 = vadd.f32 %v16987_v62, %v16985_v12 }
 0xb07   : > { %v9127_v30 = vpop.f32.mrf.mxu3  ;;  %v16996_v34 = vpop.f32.mrf.mxu1 }
 0xb08   : > { %v9120_v23 = vadd.f32 %v9119_v14, %v9071_v7  ;;  %v9076_v14 = vadd.f32 %v16874_v44, %v9027_v13  ;;  %v9147_v44 = vadd.f32 %v16923_v2, %v16985_v12 }
 0xb0a   : > { %9810 = vmatmul.bf16.gmra.mxu2 %v9411_v52  ;;  %v9371_v32 = vmax.f32 %v9120_v23, 0.0  ;;  %v9125_v46 = vadd.f32 %v9124_v48, %v9076_v14  ;;  %v9196_v47 = vadd.f32 %v16928_v22, %v9147_v44  ;;  %v9079_v52 = vadd.f32 %v16884_v63, %v16850_v0  ;;  %v17294_v44 = vld [vmem:[#allocation24_spill] sm:$0xff] }
 0xb0c   : > { %v9415_v57 = vpack.c.bf16 %v9371_v32, %v9367_v15  ;;  %v9379_v19 = vmax.f32 %v9125_v46, 0.0  ;;  %v9245_v2 = vadd.f32 %v16933_v58, %v9196_v47  ;;  %v9128_v28 = vadd.f32 %v9127_v30, %v9079_v52  ;;  %v17292_v58 = vld [vmem:[#allocation29_spill] sm:$0xff]  ;;  %v17293_v46 = vld [vmem:[#allocation36_spill] sm:$0xff] }
 0xb0d   : > { %v17003_v54 = vpop.f32.mrf.mxu0  ;;  %v8988_v30 = vadd.f32 %v16911_v43, %v16657_v29  ;;  %v9201_v15 = vadd.f32 %v16953_v59, %v9152_v49 }
 0xb0e   : > { %v9419_v37 = vpack.c.bf16 %v9379_v19, %v9375_v51  ;;  %v17295_v51 = vld [vmem:[#allocation21_spill] sm:$0xff] }
 0xb0f   : > { %v9129_v61 = vpop.f32.mrf.mxu3  ;;  %v17009_v22 = vpop.f32.mrf.mxu1  ;;  %v9037_v26 = vadd.f32 %v16916_v33, %v8988_v30  ;;  %v9250_v60 = vadd.f32 %v16955_v21, %v9201_v15 }
 0xb11   : > { %v9086_v14 = vadd.f32 %v16918_v35, %v9037_v26 }
 0xb13   : > { %9717 = vmatmul.bf16.gmra.mxu0 %v17290_v38  ;;  %9766 = vmatmul.bf16.gmra.mxu1 %v16706_v1  ;;  %v9383_v38 = vmax.f32 %v9128_v28, 0.0 }
 0xb14   : > { %9327 = vmatmul.bf16.gmra.mxu3 %v16488_v3  ;;  %v16980_v3 = vpop.f32.mrf.mxu2 }
 0xb15   : > { %v9163_v0 = vpop.f32.mrf.mxu0 }
 0xb17   : > { %v16970_v9 = vpop.f32.mrf.mxu3 }
 0xb1a   : > { %9815 = vmatmul.bf16.gmra.mxu2 %v9415_v57  ;;  %v9212_v57 = vpop.f32.mrf.mxu1 }
 0xb1c   : > { %v16998_v48 = vpop.f32.mrf.mxu2 }
 0xb1f   : > { %v9134_v1 = vpop.f32.mrf.mxu3 }
 0xb20   : > { %v9135_v17 = vadd.f32 %v9134_v1, %v9086_v14 }
 0xb22   : > { %v9395_v21 = vmax.f32 %v9135_v17, 0.0 }
 0xb23   : > { %9722 = vmatmul.bf16.gmra.mxu0 %v17291_v36  ;;  %9771 = vmatmul.bf16.gmra.mxu1 %v16725_v50  ;;  %v9032_v50 = vadd.f32 %v16863_v5, %v8983_v41  ;;  %v9166_v36 = vpop.f32.mrf.mxu0 }
 0xb24   : > { %v17011_v23 = vpop.f32.mrf.mxu2  ;;  %v9167_v26 = vadd.f32 %v9166_v36, %v16985_v12 }
 0xb25   : > { %v9081_v56 = vadd.f32 %v16897_v6, %v9032_v50  ;;  %v9208_v50 = vadd.f32 %v16996_v34, %v9159_v10  ;;  %v9164_v34 = vadd.f32 %v9163_v0, %v16985_v12 }
 0xb27   : > { %v9293_v24 = vpop.f32.mrf.mxu3  ;;  %v9130_v40 = vadd.f32 %v9129_v61, %v9081_v56  ;;  %v9154_v61 = vadd.f32 %v16959_v42, %v16985_v12  ;;  %v9084_v42 = vadd.f32 %v16903_v4, %v17293_v46 }
 0xb28   : > { %v9294_v27 = vadd.f32 %v9293_v24, %v9245_v2  ;;  %v9215_v24 = vpop.f32.mrf.mxu1  ;;  %v9257_v2 = vadd.f32 %v16998_v48, %v9208_v50 }
 0xb29   : > { %v9387_v16 = vmax.f32 %v9130_v40, 0.0  ;;  %v9133_v33 = vadd.f32 %v16970_v9, %v9084_v42 }
 0xb2a   : > { %9820 = vmatmul.bf16.gmra.mxu2 %v9419_v37  ;;  %v9336_v5 = vmax.f32 %v9294_v27, 0.0 }
 0xb2b   : > { %v9423_v32 = vpack.c.bf16 %v9387_v16, %v9383_v38  ;;  %v9391_v41 = vmax.f32 %v9133_v33, 0.0  ;;  %v9168_v47 = vpop.f32.mrf.mxu0 }
 0xb2c   : > { %v9261_v13 = vpop.f32.mrf.mxu2 }
 0xb2d   : > { %v9427_v9 = vpack.c.bf16 %v9395_v21, %v9391_v41 }
 0xb2f   : > { %v9295_v39 = vpop.f32.mrf.mxu3 }
 0xb30   : > { %v9296_v7 = vadd.f32 %v9295_v39, %v9247_v53  ;;  %v9217_v53 = vpop.f32.mrf.mxu1 }
 0xb32   : > { %v9340_v31 = vmax.f32 %v9296_v7, 0.0 }
 0xb33   : > { %9727 = vmatmul.bf16.gmra.mxu0 %v17292_v58  ;;  %9776 = vmatmul.bf16.gmra.mxu1 %v16753_v8  ;;  %v9203_v8 = vadd.f32 %v16964_v55, %v9154_v61  ;;  %v9171_v62 = vpop.f32.mrf.mxu0 }
 0xb34   : > { %v9400_v6 = vpack.c.bf16 %v9340_v31, %v9336_v5  ;;  %v9264_v4 = vpop.f32.mrf.mxu2  ;;  %v9213_v31 = vadd.f32 %v9212_v57, %v9164_v34  ;;  %v9172_v36 = vadd.f32 %v9171_v62, %v16985_v12 }
 0xb35   : > { %v9252_v18 = vadd.f32 %v16968_v45, %v9203_v8  ;;  %v9157_v45 = vadd.f32 %v16974_v25, %v16985_v12 }
 0xb36   : > { %9844 = vmatmul.bf16.vlgmr.msrb.gmra.mxu3 %v9400_v6  ;;  %v9262_v16 = vadd.f32 %v9261_v13, %v9213_v31 }
 0xb37   : > { %v9298_v63 = vpop.f32.mrf.mxu3  ;;  %v9206_v37 = vadd.f32 %v16978_v11, %v9157_v45  ;;  %v9162_v11 = vadd.f32 %v17003_v54, %v16985_v12 }
 0xb38   : > { %v9299_v29 = vadd.f32 %v9298_v63, %v9250_v60  ;;  %v9220_v5 = vpop.f32.mrf.mxu1  ;;  %v9216_v60 = vadd.f32 %v9215_v24, %v9167_v26 }
 0xb39   : > { %v9255_v20 = vadd.f32 %v16980_v3, %v9206_v37  ;;  %v9211_v3 = vadd.f32 %v17009_v22, %v9162_v11  ;;  %v9169_v22 = vadd.f32 %v9168_v47, %v16985_v12 }
 0xb3a   : > { %9825 = vmatmul.bf16.gmra.mxu2 %v9423_v32  ;;  %v9344_v19 = vmax.f32 %v9299_v29, 0.0 }
 0xb3b   : > { %v9260_v58 = vadd.f32 %v17011_v23, %v9211_v3  ;;  %v9173_v49 = vpop.f32.mrf.mxu0  ;;  %v9218_v57 = vadd.f32 %v9217_v53, %v9169_v22  ;;  %v9265_v23 = vadd.f32 %v9264_v4, %v9216_v60 }
 0xb3c   : > { %v9266_v39 = vpop.f32.mrf.mxu2 }
 0xb3d   : > { %v9267_v13 = vadd.f32 %v9266_v39, %v9218_v57 }
 0xb3f   : > { %v9300_v43 = vpop.f32.mrf.mxu3 }
 0xb40   : > { %v9301_v59 = vadd.f32 %v9300_v43, %v9252_v18  ;;  %v9222_v32 = vpop.f32.mrf.mxu1 }
 0xb42   : > { %v9348_v55 = vmax.f32 %v9301_v59, 0.0 }
 0xb43   : > { %9732 = vmatmul.bf16.gmra.mxu0 %v17294_v44  ;;  %9781 = vmatmul.bf16.gmra.mxu1 %v17295_v51  ;;  %v9176_v8 = vpop.f32.mrf.mxu0  ;;  %v9221_v51 = vadd.f32 %v9220_v5, %v9172_v36 }
 0xb44   : > { %v9404_v35 = vpack.c.bf16 %v9348_v55, %v9344_v19  ;;  %v9269_v48 = vpop.f32.mrf.mxu2  ;;  %v9174_v55 = vadd.f32 %v9173_v49, %v16985_v12 }
 0xb45   : > { %v9270_v45 = vadd.f32 %v9269_v48, %v9221_v51 }
 0xb46   : > { %9849 = vmatmul.bf16.gmra.mxu3 %v9404_v35  ;;  %v9223_v35 = vadd.f32 %v9222_v32, %v9174_v55 }
 0xb47   : > { %v9303_v1 = vpop.f32.mrf.mxu3 }
 0xb48   : > { %v9304_v25 = vadd.f32 %v9303_v1, %v9255_v20  ;;  %v9225_v14 = vpop.f32.mrf.mxu1 }
 0xb4a   : > { %9830 = vmatmul.bf16.gmra.mxu2 %v9427_v9  ;;  %v9352_v52 = vmax.f32 %v9304_v25, 0.0 }
 0xb4b   : > { %v9178_v59 = vpop.f32.mrf.mxu0 }
 0xb4c   : > { %v9271_v15 = vpop.f32.mrf.mxu2  ;;  %v9179_v53 = vadd.f32 %v9178_v59, %v16985_v12 }
 0xb4d   : > { %v9272_v41 = vadd.f32 %v9271_v15, %v9223_v35 }
 0xb4f   : > { %v9305_v56 = vpop.f32.mrf.mxu3 }
 0xb50   : > { %v9306_v27 = vadd.f32 %v9305_v56, %v9257_v2  ;;  %v9227_v44 = vpop.f32.mrf.mxu1  ;;  %v9177_v2 = vadd.f32 %v9176_v8, %v16985_v12 }
 0xb51   : > { %v9228_v39 = vadd.f32 %v9227_v44, %v9179_v53 }
 0xb52   : > { %v9356_v40 = vmax.f32 %v9306_v27, 0.0  ;;  %v9226_v27 = vadd.f32 %v9225_v14, %v9177_v2 }
 0xb53   : > { %v9181_v24 = vpop.f32.mrf.mxu0 }
 0xb54   : > { %v9408_v7 = vpack.c.bf16 %v9356_v40, %v9352_v52  ;;  %v9274_v29 = vpop.f32.mrf.mxu2 }
 0xb55   : > { %v9275_v52 = vadd.f32 %v9274_v29, %v9226_v27 }
 0xb56   : > { %9854 = vmatmul.bf16.gmra.mxu3 %v9408_v7 }
 0xb57   : > { %v9308_v28 = vpop.f32.mrf.mxu3 }
 0xb58   : > { %v9309_v6 = vadd.f32 %v9308_v28, %v9260_v58  ;;  %v9230_v9 = vpop.f32.mrf.mxu1  ;;  %v9182_v58 = vadd.f32 %v9181_v24, %v16985_v12 }
 0xb5a   : > { %v9360_v30 = vmax.f32 %v9309_v6, 0.0 }
 0xb5b   : > { %v9183_v25 = vpop.f32.mrf.mxu0 }
 0xb5c   : > { %v9276_v21 = vpop.f32.mrf.mxu2 }
 0xb5d   : > { %v9277_v62 = vadd.f32 %v9276_v21, %v9228_v39 }
 0xb5f   : > { %v9310_v38 = vpop.f32.mrf.mxu3 }
 0xb60   : > { %v9311_v63 = vadd.f32 %v9310_v38, %v9262_v16  ;;  %v9232_v40 = vpop.f32.mrf.mxu1  ;;  %v9184_v38 = vadd.f32 %v9183_v25, %v16985_v12  ;;  %v17056_v12 = vld [vmem:[%s17296_s9] ss:$0 sm:$0xff] }
 0xb62   : > { %v9364_v61 = vmax.f32 %v9311_v63, 0.0  ;;  %v9231_v63 = vadd.f32 %v9230_v9, %v9182_v58 }
 0xb63   : > { %v9698_v3 = vpop.f32.mrf.mxu0 }
 0xb64   : > { %v9412_v54 = vpack.c.bf16 %v9364_v61, %v9360_v30  ;;  %v9279_v50 = vpop.f32.mrf.mxu2  ;;  %v9233_v61 = vadd.f32 %v9232_v40, %v9184_v38 }
 0xb65   : > { %v9280_v32 = vadd.f32 %v9279_v50, %v9231_v63 }
 0xb66   : > { %9859 = vmatmul.bf16.gmra.mxu3 %v9412_v54 }
 0xb67   : > { %v9313_v0 = vpop.f32.mrf.mxu3 }
 0xb68   : > { %v9314_v18 = vadd.f32 %v9313_v0, %v9265_v23  ;;  %v9747_v16 = vpop.f32.mrf.mxu1 }
 0xb6a   : > { %v9368_v42 = vmax.f32 %v9314_v18, 0.0 }
 0xb6b   : > { %v9700_v30 = vpop.f32.mrf.mxu0 }
 0xb6c   : > { %v9281_v7 = vpop.f32.mrf.mxu2 }
 0xb6d   : > { %v9282_v54 = vadd.f32 %v9281_v7, %v9233_v61 }
 0xb6f   : > { %v9315_v43 = vpop.f32.mrf.mxu3 }
 0xb70   : > { %v9316_v46 = vadd.f32 %v9315_v43, %v9267_v13  ;;  %v9749_v0 = vpop.f32.mrf.mxu1  ;;  %v9699_v43 = vadd.f32 %v17056_v12, %v9698_v3 }
 0xb72   : > { %v9372_v17 = vmax.f32 %v9316_v46, 0.0 }
 0xb73   : > { %v9703_v13 = vpop.f32.mrf.mxu0 }
 0xb74   : > { %v9416_v33 = vpack.c.bf16 %v9372_v17, %v9368_v42  ;;  %v9796_v6 = vpop.f32.mrf.mxu2  ;;  %v9748_v17 = vadd.f32 %v9747_v16, %v9699_v43 }
 0xb76   : > { %9864 = vmatmul.bf16.gmra.mxu3 %v9416_v33  ;;  %v9797_v59 = vadd.f32 %v9796_v6, %v9748_v17 }
 0xb77   : > { %v9318_v19 = vpop.f32.mrf.mxu3 }
 0xb78   : > { %v9319_v4 = vadd.f32 %v9318_v19, %v9270_v45  ;;  %v9752_v14 = vpop.f32.mrf.mxu1  ;;  %v9701_v19 = vadd.f32 %v17056_v12, %v9700_v30 }
 0xb7a   : > { %v9376_v37 = vmax.f32 %v9319_v4, 0.0  ;;  %v9750_v21 = vadd.f32 %v9749_v0, %v9701_v19 }
 0xb7b   : > { %v9705_v29 = vpop.f32.mrf.mxu0 }
 0xb7c   : > { %v9798_v8 = vpop.f32.mrf.mxu2 }
 0xb7d   : > { %v9799_v24 = vadd.f32 %v9798_v8, %v9750_v21 }
 0xb7f   : > { %v9320_v1 = vpop.f32.mrf.mxu3 }
 0xb80   : > { %v9321_v10 = vadd.f32 %v9320_v1, %v9272_v41  ;;  %v9754_v46 = vpop.f32.mrf.mxu1  ;;  %v9704_v1 = vadd.f32 %v17056_v12, %v9703_v13 }
 0xb82   : > { %v9380_v47 = vmax.f32 %v9321_v10, 0.0 }
 0xb83   : > { %v9708_v33 = vpop.f32.mrf.mxu0 }
 0xb84   : > { %v9420_v20 = vpack.c.bf16 %v9380_v47, %v9376_v37  ;;  %v9801_v18 = vpop.f32.mrf.mxu2  ;;  %v9753_v47 = vadd.f32 %v9752_v14, %v9704_v1  ;;  %v9709_v16 = vadd.f32 %v17056_v12, %v9708_v33 }
 0xb86   : > { %9869 = vmatmul.bf16.gmra.mxu3 %v9420_v20  ;;  %v9802_v2 = vadd.f32 %v9801_v18, %v9753_v47 }
 0xb87   : > { %v9323_v56 = vpop.f32.mrf.mxu3 }
 0xb88   : > { %v9324_v11 = vadd.f32 %v9323_v56, %v9275_v52  ;;  %v9757_v51 = vpop.f32.mrf.mxu1  ;;  %v9706_v52 = vadd.f32 %v17056_v12, %v9705_v29 }
 0xb89   : > { %v9758_v30 = vadd.f32 %v9757_v51, %v9709_v16 }
 0xb8a   : > { %v9384_v5 = vmax.f32 %v9324_v11, 0.0  ;;  %v9755_v11 = vadd.f32 %v9754_v46, %v9706_v52 }
 0xb8b   : > { %v9710_v9 = vpop.f32.mrf.mxu0 }
 0xb8c   : > { %v9803_v42 = vpop.f32.mrf.mxu2 }
 0xb8d   : > { %v9804_v3 = vadd.f32 %v9803_v42, %v9755_v11 }
 0xb8f   : > { %v9325_v28 = vpop.f32.mrf.mxu3 }
 0xb90   : > { %v9326_v34 = vadd.f32 %v9325_v28, %v9277_v62  ;;  %v9759_v25 = vpop.f32.mrf.mxu1 }
 0xb92   : > { %v9388_v48 = vmax.f32 %v9326_v34, 0.0 }
 0xb93   : > { %v9713_v62 = vpop.f32.mrf.mxu0 }
 0xb94   : > { %v9424_v31 = vpack.c.bf16 %v9388_v48, %v9384_v5  ;;  %v9806_v45 = vpop.f32.mrf.mxu2  ;;  %v9714_v19 = vadd.f32 %v17056_v12, %v9713_v62 }
 0xb96   : > { %9874 = vmatmul.bf16.gmra.mxu3 %v9424_v31 }
 0xb97   : > { %v9328_v49 = vpop.f32.mrf.mxu3 }
 0xb98   : > { %v9329_v15 = vadd.f32 %v9328_v49, %v9280_v32  ;;  %v9762_v6 = vpop.f32.mrf.mxu1 }
 0xb99   : > { %v9763_v21 = vadd.f32 %v9762_v6, %v9714_v19 }
 0xb9a   : > { %v9392_v60 = vmax.f32 %v9329_v15, 0.0  ;;  %v9807_v15 = vadd.f32 %v9806_v45, %v9758_v30 }
 0xb9b   : > { %v9715_v32 = vpop.f32.mrf.mxu0 }
 0xb9c   : > { %v9808_v53 = vpop.f32.mrf.mxu2 }
 0xb9f   : > { %v9330_v26 = vpop.f32.mrf.mxu3 }
 0xba0   : > { %v9331_v22 = vadd.f32 %v9330_v26, %v9282_v54 }
 0xba2   : > { %v9396_v57 = vmax.f32 %v9331_v22, 0.0 }
 0xba4   : > { %v9428_v23 = vpack.c.bf16 %v9396_v57, %v9392_v60  ;;  %v9811_v38 = vpop.f32.mrf.mxu2  ;;  %v9711_v60 = vadd.f32 %v17056_v12, %v9710_v9 }
 0xba6   : > { %9879 = vmatmul.bf16.gmra.mxu3 %v9428_v23  ;;  %v9764_v23 = vpop.f32.mrf.mxu1  ;;  %v9760_v18 = vadd.f32 %v9759_v25, %v9711_v60 }
 0xba8   : > { %v9809_v46 = vadd.f32 %v9808_v53, %v9760_v18 }
 0xbac   : > { %v9813_v14 = vpop.f32.mrf.mxu2 }
 0xbae   : > { %v9767_v51 = vpop.f32.mrf.mxu1 }
 0xbb4   : > { %v9816_v45 = vpop.f32.mrf.mxu2 }
 0xbb9   : > { %v9845_v36 = vpop.f32.mrf.mxu3 }
 0xbba   : > { %v9846_v55 = vadd.f32 %v9845_v36, %v9797_v59  ;;  %v9718_v59 = vpop.f32.mrf.mxu0 }
 0xbbb   : > { %v9719_v11 = vadd.f32 %v17056_v12, %v9718_v59 }
 0xbbc   : > { %v12986_v44 = vclamps-f32 %v9846_v55, 30.0 }
 0xbbe   : > { %v9917_v35 = vsub.f32 0.0, %v12986_v44 }
 0xbc0   : > { %v9933_v41 = vmul.f32 1.442695, %v9917_v35 }
 0xbc1   : > { %v9847_v4 = vpop.f32.mrf.mxu3 }
 0xbc2   : > { %13778 = vpow2.f32 %v9933_v41  ;;  %v9848_v10 = vadd.f32 %v9847_v4, %v9799_v24  ;;  %v9812_v41 = vadd.f32 %v9811_v38, %v9763_v21 }
 0xbc4   : > { %v12987_v37 = vclamps-f32 %v9848_v10, 30.0 }
 0xbc6   : > { %v9918_v50 = vsub.f32 0.0, %v12987_v37  ;;  %v9716_v37 = vadd.f32 %v17056_v12, %v9715_v32 }
 0xbc8   : > { %v13779_v20 = vpop.eup %13778  ;;  %v9935_v56 = vmul.f32 1.442695, %v9918_v50  ;;  %v9720_v50 = vpop.f32.mrf.mxu0 }
 0xbc9   : > { %v9965_v27 = vadd.f32 1.0, %v13779_v20  ;;  %v9850_v39 = vpop.f32.mrf.mxu3 }
 0xbca   : > { %13780 = vpow2.f32 %v9935_v56  ;;  %v9851_v40 = vadd.f32 %v9850_v39, %v9802_v2  ;;  %v9765_v2 = vadd.f32 %v9764_v23, %v9716_v37 }
 0xbcb   : > { %13782 = vrcp.f32 %v9965_v27  ;;  %v9769_v27 = vpop.f32.mrf.mxu1 }
 0xbcc   : > { %v12988_v7 = vclamps-f32 %v9851_v40, 30.0  ;;  %v9814_v53 = vadd.f32 %v9813_v14, %v9765_v2  ;;  %v9818_v40 = vpop.f32.mrf.mxu2 }
 0xbce   : > { %v9919_v28 = vsub.f32 0.0, %v12988_v7 }
 0xbd0   : > { %v13781_v34 = vpop.eup %13780  ;;  %v9937_v5 = vmul.f32 1.442695, %v9919_v28 }
 0xbd1   : > { %v13783_v48 = vpop.eup %13782  ;;  %v9966_v31 = vadd.f32 1.0, %v13781_v34  ;;  %v9852_v58 = vpop.f32.mrf.mxu3 }
 0xbd2   : > { %9997 = vst [vmem:[%s17066_s30] sm:$0xff] %v13783_v48  ;;  %13784 = vpow2.f32 %v9937_v5  ;;  %v9853_v49 = vadd.f32 %v9852_v58, %v9804_v3  ;;  %v9723_v3 = vpop.f32.mrf.mxu0  ;;  %v9768_v5 = vadd.f32 %v9767_v51, %v9719_v11 }
 0xbd3   : > { %13786 = vrcp.f32 %v9966_v31  ;;  %v9772_v30 = vpop.f32.mrf.mxu1  ;;  %v9724_v14 = vadd.f32 %v17056_v12, %v9723_v3 }
 0xbd4   : > { %v12989_v63 = vclamps-f32 %v9853_v49, 30.0  ;;  %v9817_v58 = vadd.f32 %v9816_v45, %v9768_v5  ;;  %v9821_v32 = vpop.f32.mrf.mxu2 }
 0xbd6   : > { %v9920_v61 = vsub.f32 0.0, %v12989_v63  ;;  %v9721_v63 = vadd.f32 %v17056_v12, %v9720_v50 }
 0xbd8   : > { %v13785_v54 = vpop.eup %13784  ;;  %v9939_v26 = vmul.f32 1.442695, %v9920_v61 }
 0xbd9   : > { %v13787_v0 = vpop.eup %13786  ;;  %v9967_v22 = vadd.f32 1.0, %v13785_v54  ;;  %v9855_v8 = vpop.f32.mrf.mxu3 }
 0xbda   : > { %9998 = vst [vmem:[%s17066_s30 + $0x8] sm:$0xff] %v13787_v0  ;;  %13788 = vpow2.f32 %v9939_v26  ;;  %v9856_v57 = vadd.f32 %v9855_v8, %v9807_v15  ;;  %v9770_v15 = vadd.f32 %v9769_v27, %v9721_v63  ;;  %v9725_v0 = vpop.f32.mrf.mxu0 }
 0xbdb   : > { %13790 = vrcp.f32 %v9967_v22  ;;  %v9726_v51 = vadd.f32 %v17056_v12, %v9725_v0 }
 0xbdc   : > { %v12990_v13 = vclamps-f32 %v9856_v57, 30.0  ;;  %v9819_v8 = vadd.f32 %v9818_v40, %v9770_v15 }
 0xbde   : > { %v9921_v29 = vsub.f32 0.0, %v12990_v13 }
 0xbe0   : > { %v13789_v43 = vpop.eup %13788  ;;  %v9941_v42 = vmul.f32 1.442695, %v9921_v29  ;;  %v9774_v29 = vpop.f32.mrf.mxu1 }
 0xbe1   : > { %v13791_v17 = vpop.eup %13790  ;;  %v9968_v33 = vadd.f32 1.0, %v13789_v43  ;;  %v9857_v36 = vpop.f32.mrf.mxu3 }
 0xbe2   : > { %9999 = vst [vmem:[%s17066_s30 + $0x10] sm:$0xff] %v13791_v17  ;;  %13792 = vpow2.f32 %v9941_v42  ;;  %v9858_v55 = vadd.f32 %v9857_v36, %v9809_v46  ;;  %v9823_v46 = vpop.f32.mrf.mxu2  ;;  %v9773_v42 = vadd.f32 %v9772_v30, %v9724_v14 }
 0xbe3   : > { %13794 = vrcp.f32 %v9968_v33 }
 0xbe4   : > { %v12991_v44 = vclamps-f32 %v9858_v55, 30.0  ;;  %v9822_v33 = vadd.f32 %v9821_v32, %v9773_v42  ;;  %v9728_v55 = vpop.f32.mrf.mxu0 }
 0xbe5   : > { %v9729_v2 = vadd.f32 %v17056_v12, %v9728_v55 }
 0xbe6   : > { %v9922_v35 = vsub.f32 0.0, %v12991_v44 }
 0xbe8   : > { %v13793_v24 = vpop.eup %13792  ;;  %v9943_v4 = vmul.f32 1.442695, %v9922_v35 }
 0xbe9   : > { %v13795_v1 = vpop.eup %13794  ;;  %v9969_v10 = vadd.f32 1.0, %v13793_v24  ;;  %v9860_v9 = vpop.f32.mrf.mxu3  ;;  %v9775_v24 = vadd.f32 %v9774_v29, %v9726_v51 }
 0xbea   : > { %10000 = vst [vmem:[%s17066_s30 + $0x18] sm:$0xff] %v13795_v1  ;;  %13796 = vpow2.f32 %v9943_v4  ;;  %v9861_v47 = vadd.f32 %v9860_v9, %v9812_v41  ;;  %v9777_v41 = vpop.f32.mrf.mxu1  ;;  %v9826_v1 = vpop.f32.mrf.mxu2 }
 0xbeb   : > { %13798 = vrcp.f32 %v9969_v10  ;;  %v9824_v9 = vadd.f32 %v9823_v46, %v9775_v24  ;;  %v9778_v27 = vadd.f32 %v9777_v41, %v9729_v2 }
 0xbec   : > { %v12992_v20 = vclamps-f32 %v9861_v47, 30.0 }
 0xbee   : > { %v9923_v25 = vsub.f32 0.0, %v12992_v20 }
 0xbf0   : > { %v13797_v56 = vpop.eup %13796  ;;  %v9945_v39 = vmul.f32 1.442695, %v9923_v25 }
 0xbf1   : > { %v13799_v52 = vpop.eup %13798  ;;  %v9970_v7 = vadd.f32 1.0, %v13797_v56  ;;  %v9862_v62 = vpop.f32.mrf.mxu3 }
 0xbf2   : > { %10001 = vst [vmem:[%s17066_s30 + $0x20] sm:$0xff] %v13799_v52  ;;  %13800 = vpow2.f32 %v9945_v39  ;;  %v9863_v28 = vadd.f32 %v9862_v62, %v9814_v53  ;;  %v9730_v56 = vpop.f32.mrf.mxu0  ;;  %v9779_v40 = vpop.f32.mrf.mxu1 }
 0xbf3   : > { %13802 = vrcp.f32 %v9970_v7  ;;  %v9827_v7 = vadd.f32 %v9826_v1, %v9778_v27  ;;  %v9731_v5 = vadd.f32 %v17056_v12, %v9730_v56 }
 0xbf4   : > { %v12993_v34 = vclamps-f32 %v9863_v28, 30.0  ;;  %v9828_v28 = vpop.f32.mrf.mxu2 }
 0xbf6   : > { %v9924_v48 = vsub.f32 0.0, %v12993_v34 }
 0xbf8   : > { %v13801_v31 = vpop.eup %13800  ;;  %v9947_v16 = vmul.f32 1.442695, %v9924_v48 }
 0xbf9   : > { %v13803_v6 = vpop.eup %13802  ;;  %v9971_v49 = vadd.f32 1.0, %v13801_v31  ;;  %v9865_v38 = vpop.f32.mrf.mxu3 }
 0xbfa   : > { %10002 = vst [vmem:[%s17066_s30 + $0x28] sm:$0xff] %v13803_v6  ;;  %13804 = vpow2.f32 %v9947_v16  ;;  %v9866_v61 = vadd.f32 %v9865_v38, %v9817_v58  ;;  %v9733_v58 = vpop.f32.mrf.mxu0  ;;  %v9780_v16 = vadd.f32 %v9779_v40, %v9731_v5 }
 0xbfb   : > { %13806 = vrcp.f32 %v9971_v49 }
 0xbfc   : > { %v12994_v54 = vclamps-f32 %v9866_v61, 30.0  ;;  %v9829_v38 = vadd.f32 %v9828_v28, %v9780_v16  ;;  %v9831_v0 = vpop.f32.mrf.mxu2 }
 0xbfe   : > { %v9925_v26 = vsub.f32 0.0, %v12994_v54  ;;  %v9734_v54 = vadd.f32 %v17056_v12, %v9733_v58 }
 0xc00   : > { %v13805_v22 = vpop.eup %13804  ;;  %v9949_v60 = vmul.f32 1.442695, %v9925_v26  ;;  %v9782_v26 = vpop.f32.mrf.mxu1 }
 0xc01   : > { %v13807_v57 = vpop.eup %13806  ;;  %v9972_v23 = vadd.f32 1.0, %v13805_v22  ;;  %v9867_v13 = vpop.f32.mrf.mxu3 }
 0xc02   : > { %10003 = vst [vmem:[%s17066_s30 + $0x30] sm:$0xff] %v13807_v57  ;;  %13808 = vpow2.f32 %v9949_v60  ;;  %v9868_v18 = vadd.f32 %v9867_v13, %v9819_v8  ;;  %v9783_v8 = vadd.f32 %v9782_v26, %v9734_v54  ;;  %v9735_v57 = vpop.f32.mrf.mxu0 }
 0xc03   : > { %13810 = vrcp.f32 %v9972_v23  ;;  %v9736_v46 = vadd.f32 %v17056_v12, %v9735_v57 }
 0xc04   : > { %v12995_v43 = vclamps-f32 %v9868_v18, 30.0  ;;  %v9832_v13 = vadd.f32 %v9831_v0, %v9783_v8 }
 0xc06   : > { %v9926_v17 = vsub.f32 0.0, %v12995_v43 }
 0xc08   : > { %v13809_v59 = vpop.eup %13808  ;;  %v9951_v36 = vmul.f32 1.442695, %v9926_v17 }
 0xc09   : > { %v13811_v19 = vpop.eup %13810  ;;  %v9973_v44 = vadd.f32 1.0, %v13809_v59  ;;  %v9870_v21 = vpop.f32.mrf.mxu3 }
 0xc0a   : > { %10004 = vst [vmem:[%s17066_s30 + $0x38] sm:$0xff] %v13811_v19  ;;  %13812 = vpow2.f32 %v9951_v36  ;;  %v9871_v35 = vadd.f32 %v9870_v21, %v9822_v33  ;;  %v9784_v59 = vpop.f32.mrf.mxu1  ;;  %v9833_v33 = vpop.f32.mrf.mxu2 }
 0xc0b   : > { %13814 = vrcp.f32 %v9973_v44  ;;  %v9785_v36 = vadd.f32 %v9784_v59, %v9736_v46 }
 0xc0c   : > { %v12996_v45 = vclamps-f32 %v9871_v35, 30.0 }
 0xc0d   : > { %v9834_v44 = vadd.f32 %v9833_v33, %v9785_v36 }
 0xc0e   : > { %v9927_v4 = vsub.f32 0.0, %v12996_v45 }
 0xc10   : > { %v13813_v10 = vpop.eup %13812  ;;  %v9953_v37 = vmul.f32 1.442695, %v9927_v4 }
 0xc11   : > { %v13815_v47 = vpop.eup %13814  ;;  %v9974_v50 = vadd.f32 1.0, %v13813_v10  ;;  %v9872_v20 = vpop.f32.mrf.mxu3 }
 0xc12   : > { %10005 = vst [vmem:[%s17066_s30 + $0x40] sm:$0xff] %v13815_v47  ;;  %13816 = vpow2.f32 %v9953_v37  ;;  %v9873_v25 = vadd.f32 %v9872_v20, %v9824_v9 }
 0xc13   : > { %13818 = vrcp.f32 %v9974_v50 }
 0xc14   : > { %v12997_v53 = vclamps-f32 %v9873_v25, 30.0 }
 0xc16   : > { %v9928_v39 = vsub.f32 0.0, %v12997_v53 }
 0xc18   : > { %v13817_v52 = vpop.eup %13816  ;;  %v9955_v62 = vmul.f32 1.442695, %v9928_v39 }
 0xc19   : > { %v13819_v11 = vpop.eup %13818  ;;  %v9975_v34 = vadd.f32 1.0, %v13817_v52  ;;  %v9875_v3 = vpop.f32.mrf.mxu3 }
 0xc1a   : > { %10006 = vst [vmem:[%s17066_s30 + $0x48] sm:$0xff] %v13819_v11  ;;  %13820 = vpow2.f32 %v9955_v62  ;;  %v9876_v48 = vadd.f32 %v9875_v3, %v9827_v7 }
 0xc1b   : > { %13822 = vrcp.f32 %v9975_v34 }
 0xc1c   : > { %v12998_v31 = vclamps-f32 %v9876_v48, 30.0 }
 0xc1e   : > { %v9929_v6 = vsub.f32 0.0, %v12998_v31 }
 0xc20   : > { %v13821_v49 = vpop.eup %13820  ;;  %v9957_v63 = vmul.f32 1.442695, %v9929_v6 }
 0xc21   : > { %v13823_v30 = vpop.eup %13822  ;;  %v9976_v61 = vadd.f32 1.0, %v13821_v49  ;;  %v9877_v32 = vpop.f32.mrf.mxu3 }
 0xc22   : > { %10007 = vst [vmem:[%s17066_s30 + $0x50] sm:$0xff] %v13823_v30  ;;  %13824 = vpow2.f32 %v9957_v63  ;;  %v9878_v15 = vadd.f32 %v9877_v32, %v9829_v38 }
 0xc23   : > { %13826 = vrcp.f32 %v9976_v61 }
 0xc24   : > { %v12999_v22 = vclamps-f32 %v9878_v15, 30.0 }
 0xc26   : > { %v9930_v60 = vsub.f32 0.0, %v12999_v22 }
 0xc28   : > { %v13825_v23 = vpop.eup %13824  ;;  %v9959_v14 = vmul.f32 1.442695, %v9930_v60 }
 0xc29   : > { %v13827_v18 = vpop.eup %13826  ;;  %v9977_v29 = vadd.f32 1.0, %v13825_v23  ;;  %v9880_v43 = vpop.f32.mrf.mxu3 }
 0xc2a   : > { %10008 = vst [vmem:[%s17066_s30 + $0x58] sm:$0xff] %v13827_v18  ;;  %13828 = vpow2.f32 %v9959_v14  ;;  %v9881_v42 = vadd.f32 %v9880_v43, %v9832_v13 }
 0xc2b   : > { %13830 = vrcp.f32 %v9977_v29 }
 0xc2c   : > { %v13000_v17 = vclamps-f32 %v9881_v42, 30.0 }
 0xc2e   : > { %v9931_v19 = vsub.f32 0.0, %v13000_v17 }
 0xc30   : > { %v13829_v55 = vpop.eup %13828  ;;  %v9961_v21 = vmul.f32 1.442695, %v9931_v19 }
 0xc31   : > { %v13831_v51 = vpop.eup %13830  ;;  %v9978_v35 = vadd.f32 1.0, %v13829_v55  ;;  %v9882_v45 = vpop.f32.mrf.mxu3 }
 0xc32   : > { %10009 = vst [vmem:[%s17066_s30 + $0x60] sm:$0xff] %v13831_v51  ;;  %13832 = vpow2.f32 %v9961_v21  ;;  %v9883_v12 = vadd.f32 %v9882_v45, %v9834_v44 }
 0xc33   : > { %13834 = vrcp.f32 %v9978_v35 }
 0xc34   : > { %v13001_v24 = vclamps-f32 %v9883_v12, 30.0 }
 0xc36   : > { %v9932_v41 = vsub.f32 0.0, %v13001_v24 }
 0xc38   : > { %v13833_v4 = vpop.eup %13832  ;;  %v9963_v1 = vmul.f32 1.442695, %v9932_v41 }
 0xc39   : > { %v13835_v10 = vpop.eup %13834  ;;  %v9979_v9 = vadd.f32 1.0, %v13833_v4 }
 0xc3a   : > { %10010 = vst [vmem:[%s17066_s30 + $0x68] sm:$0xff] %v13835_v10  ;;  %13836 = vpow2.f32 %v9963_v1 }
 0xc3b   : > { %13838 = vrcp.f32 %v9979_v9 }
 0xc40   : > { %v13837_v37 = vpop.eup %13836 }
 0xc41   : > { %v13839_v47 = vpop.eup %13838  ;;  %v9980_v50 = vadd.f32 1.0, %v13837_v37 }
 0xc42   : > { %10011 = vst [vmem:[%s17066_s30 + $0x70] sm:$0xff] %v13839_v47 }
 0xc43   : > { %13840 = vrcp.f32 %v9980_v50 }
 0xc49   : > { %v13841_v20 = vpop.eup %13840 }
 0xc4a   : > { %10012 = vst [vmem:[%s17066_s30 + $0x78] sm:$0xff] %v13841_v20 }
 0xc4b PF: > { %s28_s18 = sadd.s32 1, %s14015_s18  }
 0xc4c   : > { %p25_p7 = scmp.ge.s32.totalorder %s28_s18, 5  }
 0xc4e   :  { %27 = sbr.rel (!%p25_p7) target bundleno = 9 (0x9), region = 131 }
 0xc53   :  { %10035 = vsyncpa [#allocation3], 1 }
 0xc54   :  { %10037 = vsyncpa [#allocation3 + $0x1], 1 }
 0xc55   :  { %10038 = vsyncpa [#allocation5], 1 }
 0xc56   :  { %10039 = vsyncpa [#allocation8], 1 }

</bundles_post_ra>
